<compile_context>
chip_gen: v5e
topology: v5e:2x2
jax: 0.10.0
libtpu: 0.0.40
codegen_flags: <defaults>
</compile_context>

<pallas_src>
import functools
import math

import jax
import jax.numpy as jnp
from jax.experimental import pallas as pl
from jax.experimental.pallas import tpu as pltpu


def _round_up(v, m):
    return (v + m - 1) // m * m


# ---------------------------------------------------------------------------
# Fused kernel: 8 x (matmul + bias [+ sigmoid]) in one pass, activations kept
# in VMEM between layers.  Weights are bf16, accumulation is f32.
# ---------------------------------------------------------------------------
def _ae_fused_kernel(x_ref, b_ref, *refs):
    w_refs = refs[:8]          # 8 padded bf16 weights (Din_p, Dout_p)
    s_refs = refs[8:16]        # 8 pre-activation outputs (Bp, Dout_p) f32
    act_refs = refs[16:]       # sigmoid outputs for layers 0,1,2,4,5,6 + recon(7)

    act_slot = {0: 0, 1: 1, 2: 2, 4: 3, 5: 4, 6: 5, 7: 6}

    h = x_ref[...]             # (Bp, Din_p) f32
    for i in range(8):
        w = w_refs[i][...]     # (Din_p, Dout_p) bf16, zero padded
        dout_p = w.shape[1]
        pre = jnp.dot(h.astype(jnp.bfloat16), w,
                      preferred_element_type=jnp.float32)
        pre = pre + b_ref[pl.ds(i, 1), pl.ds(0, dout_p)]   # (1, Dout_p) broadcast
        s_refs[i][...] = pre
        if i == 3:             # layer_hidden3: no sigmoid before next layer
            h = pre
        else:
            h = jax.nn.sigmoid(pre)
            act_refs[act_slot[i]][...] = h   # layer 7's entry is the recon


# ---------------------------------------------------------------------------
# Parameter init (deterministic, PyTorch-style uniform(-1/sqrt(in), 1/sqrt(in)))
# ---------------------------------------------------------------------------
def init_params(key, dim_in):
    dims = [dim_in, 1000, 500, 250, 30, 250, 500, 1000, dim_in]
    params = []
    for i in range(len(dims) - 1):
        fan_in, fan_out = dims[i], dims[i + 1]
        key, kw, kb = jax.random.split(key, 3)
        bound = 1.0 / math.sqrt(fan_in)
        w = jax.random.uniform(kw, (fan_in, fan_out), jnp.float32, -bound, bound)
        b = jax.random.uniform(kb, (fan_out,), jnp.float32, -bound, bound)
        params.append((w, b))
    return params


def pack_params(params):
    """Zero-pad weights to 128-multiples, cast to bf16, pack biases into one
    (8, max_width) f32 buffer.  Returns (ws, b_pack, true_out_dims)."""
    out_dims = tuple(int(w.shape[1]) for w, _ in params)
    dins_p = [_round_up(int(w.shape[0]), 128) for w, _ in params]
    douts_p = [_round_up(d, 128) for d in out_dims]
    bmax = max(douts_p)

    ws = []
    for (w, _), din_p, dout_p in zip(params, dins_p, douts_p):
        wp = jnp.zeros((din_p, dout_p), jnp.float32)
        wp = wp.at[: w.shape[0], : w.shape[1]].set(w)
        ws.append(wp.astype(jnp.bfloat16))

    b_pack = jnp.zeros((len(params), bmax), jnp.float32)
    for i, (_, b) in enumerate(params):
        b_pack = b_pack.at[i, : b.shape[0]].set(b)
    return tuple(ws), b_pack, out_dims


# ---------------------------------------------------------------------------
# Forward pass matching MNIST_AE.forward
# ---------------------------------------------------------------------------
def mnist_ae_forward(x, ws, b_pack, *, out_dims):
    input_shape = x.shape
    dim_in = x.shape[-3] * x.shape[-2] * x.shape[-1]
    xf = x.reshape(-1, dim_in)
    B = xf.shape[0]

    Bp = _round_up(B, 8)                    # full f32 sublane group
    Din_p = ws[0].shape[0]
    x_pad = jnp.zeros((Bp, Din_p), jnp.float32).at[:B, :dim_in].set(xf)

    douts_p = [int(w.shape[1]) for w in ws]
    act_layers = (0, 1, 2, 4, 5, 6, 7)      # layers whose sigmoid the kernel emits

    out_shape = tuple(
        [jax.ShapeDtypeStruct((Bp, dp), jnp.float32) for dp in douts_p]
        + [jax.ShapeDtypeStruct((Bp, douts_p[i]), jnp.float32) for i in act_layers]
    )

    def whole(shape):
        return pl.BlockSpec(shape, lambda i: (0, 0))

    in_specs = [whole(x_pad.shape), whole(b_pack.shape)] + [whole(w.shape) for w in ws]
    out_specs = tuple(whole(o.shape) for o in out_shape)

    outs = pl.pallas_call(
        _ae_fused_kernel,
        grid=(1,),
        out_shape=out_shape,
        in_specs=in_specs,
        out_specs=out_specs,
        compiler_params=pltpu.CompilerParams(
            dimension_semantics=("arbitrary",),
            vmem_limit_bytes=48 * 1024 * 1024,
        ),
    )(x_pad, b_pack, *ws)

    s_pad, act_pad = outs[:8], outs[8:]
    s = [s_pad[i][:B, : out_dims[i]] for i in range(8)]

    a = [xf]
    ai = 0
    for i in range(7):                      # layer_output's sigmoid not in `a`
        if i == 3:
            a.append(s[3])                  # layer_hidden3: raw pre-activation
        else:
            a.append(act_pad[ai][:B, : out_dims[i]])
            ai += 1

    recon = act_pad[6][:B, : out_dims[7]].reshape(input_shape)
    return recon, s, a


# ---------------------------------------------------------------------------
# Pure-JAX reference using the SAME padded bf16 weights (correctness check)
# ---------------------------------------------------------------------------
def _reference_forward(xf, ws, b_pack, out_dims):
    dims_in = [xf.shape[1]] + list(out_dims[:-1])
    h = xf
    s = []
    for i in range(8):
        w = ws[i][: dims_in[i], : out_dims[i]]
        b = b_pack[i, : out_dims[i]]
        pre = jnp.dot(h.astype(jnp.bfloat16), w,
                      preferred_element_type=jnp.float32) + b
        s.append(pre)
        h = pre if i == 3 else jax.nn.sigmoid(pre)
    return h, s


if __name__ == "__main__":
    # Module-consistent small shapes: NCHW input (batch=2, C=1, H=W=16) -> dim_in=256.
    key = jax.random.PRNGKey(0)
    key, kx = jax.random.split(key)
    x = jax.random.uniform(kx, (2, 1, 16, 16), jnp.float32)
    dim_in = 1 * 16 * 16

    params = init_params(key, dim_in)
    ws, b_pack, out_dims = pack_params(params)     # packed once, reused per call

    fwd = jax.jit(functools.partial(mnist_ae_forward, out_dims=out_dims))
    recon, s, a = fwd(x, ws, b_pack)
    jax.block_until_ready((recon, s, a))

    # Shape sanity checks.
    assert recon.shape == x.shape
    assert len(s) == 8 and len(a) == 8
    assert s[0].shape == (2, 1000) and s[3].shape == (2, 30) and s[7].shape == (2, 256)
    assert a[0].shape == (2, 256) and a[1].shape == (2, 1000) and a[4].shape == (2, 30)

    # Numerical check vs plain-JAX reference (same bf16 weights).
    xf = x.reshape(-1, dim_in)
    ref_recon, ref_s = _reference_forward(xf, ws, b_pack, out_dims)
    assert jnp.allclose(recon.reshape(-1, dim_in), ref_recon, atol=2e-3, rtol=2e-3)
    assert jnp.allclose(s[3], ref_s[3], atol=2e-3, rtol=2e-3)
    assert jnp.allclose(s[7], ref_s[7], atol=5e-3, rtol=5e-3)

    print("KERNEL_OK")
</pallas_src>

<mosaic_0001>
module attributes {stable_mosaic.version = 11 : i64} {
  func.func @_ae_fused_kernel(%arg0: i32, %arg1: memref<8x256xf32, #tpu.memory_space<vmem>>, %arg2: memref<8x1024xf32, #tpu.memory_space<vmem>>, %arg3: memref<256x1024xbf16, #tpu.memory_space<vmem>>, %arg4: memref<1024x512xbf16, #tpu.memory_space<vmem>>, %arg5: memref<512x256xbf16, #tpu.memory_space<vmem>>, %arg6: memref<256x128xbf16, #tpu.memory_space<vmem>>, %arg7: memref<128x256xbf16, #tpu.memory_space<vmem>>, %arg8: memref<256x512xbf16, #tpu.memory_space<vmem>>, %arg9: memref<512x1024xbf16, #tpu.memory_space<vmem>>, %arg10: memref<1024x256xbf16, #tpu.memory_space<vmem>>, %arg11: memref<8x1024xf32, #tpu.memory_space<vmem>>, %arg12: memref<8x512xf32, #tpu.memory_space<vmem>>, %arg13: memref<8x256xf32, #tpu.memory_space<vmem>>, %arg14: memref<8x128xf32, #tpu.memory_space<vmem>>, %arg15: memref<8x256xf32, #tpu.memory_space<vmem>>, %arg16: memref<8x512xf32, #tpu.memory_space<vmem>>, %arg17: memref<8x1024xf32, #tpu.memory_space<vmem>>, %arg18: memref<8x256xf32, #tpu.memory_space<vmem>>, %arg19: memref<8x1024xf32, #tpu.memory_space<vmem>>, %arg20: memref<8x512xf32, #tpu.memory_space<vmem>>, %arg21: memref<8x256xf32, #tpu.memory_space<vmem>>, %arg22: memref<8x256xf32, #tpu.memory_space<vmem>>, %arg23: memref<8x512xf32, #tpu.memory_space<vmem>>, %arg24: memref<8x1024xf32, #tpu.memory_space<vmem>>, %arg25: memref<8x256xf32, #tpu.memory_space<vmem>>) attributes {dimension_semantics = [#tpu.dimension_semantics<arbitrary>], iteration_bounds = array<i64: 1>, scalar_prefetch = 0 : i64, scratch_operands = 0 : i64, tpu.core_type = #tpu.core_type<tc>, window_params = [{pipeline_mode = #tpu.pipeline_mode<synchronous>, transform_indices = @transform_0, window_bounds = array<i64: 8, 256>}, {pipeline_mode = #tpu.pipeline_mode<synchronous>, transform_indices = @transform_1, window_bounds = array<i64: 8, 1024>}, {pipeline_mode = #tpu.pipeline_mode<synchronous>, transform_indices = @transform_2, window_bounds = array<i64: 256, 1024>}, {pipeline_mode = #tpu.pipeline_mode<synchronous>, transform_indices = @transform_3, window_bounds = array<i64: 1024, 512>}, {pipeline_mode = #tpu.pipeline_mode<synchronous>, transform_indices = @transform_4, window_bounds = array<i64: 512, 256>}, {pipeline_mode = #tpu.pipeline_mode<synchronous>, transform_indices = @transform_5, window_bounds = array<i64: 256, 128>}, {pipeline_mode = #tpu.pipeline_mode<synchronous>, transform_indices = @transform_6, window_bounds = array<i64: 128, 256>}, {pipeline_mode = #tpu.pipeline_mode<synchronous>, transform_indices = @transform_7, window_bounds = array<i64: 256, 512>}, {pipeline_mode = #tpu.pipeline_mode<synchronous>, transform_indices = @transform_8, window_bounds = array<i64: 512, 1024>}, {pipeline_mode = #tpu.pipeline_mode<synchronous>, transform_indices = @transform_9, window_bounds = array<i64: 1024, 256>}, {pipeline_mode = #tpu.pipeline_mode<synchronous>, transform_indices = @transform_10, window_bounds = array<i64: 8, 1024>}, {pipeline_mode = #tpu.pipeline_mode<synchronous>, transform_indices = @transform_11, window_bounds = array<i64: 8, 512>}, {pipeline_mode = #tpu.pipeline_mode<synchronous>, transform_indices = @transform_12, window_bounds = array<i64: 8, 256>}, {pipeline_mode = #tpu.pipeline_mode<synchronous>, transform_indices = @transform_13, window_bounds = array<i64: 8, 128>}, {pipeline_mode = #tpu.pipeline_mode<synchronous>, transform_indices = @transform_14, window_bounds = array<i64: 8, 256>}, {pipeline_mode = #tpu.pipeline_mode<synchronous>, transform_indices = @transform_15, window_bounds = array<i64: 8, 512>}, {pipeline_mode = #tpu.pipeline_mode<synchronous>, transform_indices = @transform_16, window_bounds = array<i64: 8, 1024>}, {pipeline_mode = #tpu.pipeline_mode<synchronous>, transform_indices = @transform_17, window_bounds = array<i64: 8, 256>}, {pipeline_mode = #tpu.pipeline_mode<synchronous>, transform_indices = @transform_18, window_bounds = array<i64: 8, 1024>}, {pipeline_mode = #tpu.pipeline_mode<synchronous>, transform_indices = @transform_19, window_bounds = array<i64: 8, 512>}, {pipeline_mode = #tpu.pipeline_mode<synchronous>, transform_indices = @transform_20, window_bounds = array<i64: 8, 256>}, {pipeline_mode = #tpu.pipeline_mode<synchronous>, transform_indices = @transform_21, window_bounds = array<i64: 8, 256>}, {pipeline_mode = #tpu.pipeline_mode<synchronous>, transform_indices = @transform_22, window_bounds = array<i64: 8, 512>}, {pipeline_mode = #tpu.pipeline_mode<synchronous>, transform_indices = @transform_23, window_bounds = array<i64: 8, 1024>}, {pipeline_mode = #tpu.pipeline_mode<synchronous>, transform_indices = @transform_24, window_bounds = array<i64: 8, 256>}]} {
    %c0 = arith.constant 0 : index
    %c0_0 = arith.constant 0 : index
    %0 = vector.load %arg1[%c0, %c0_0] : memref<8x256xf32, #tpu.memory_space<vmem>>, vector<8x256xf32>
    %c0_1 = arith.constant 0 : index
    %c0_2 = arith.constant 0 : index
    %1 = vector.load %arg3[%c0_1, %c0_2] : memref<256x1024xbf16, #tpu.memory_space<vmem>>, vector<256x1024xbf16>
    %2 = arith.truncf %0 : vector<8x256xf32> to vector<8x256xbf16>
    %cst = arith.constant dense<0.000000e+00> : vector<8x1024xf32>
    %3 = tpu.matmul %2, %1, %cst {dimension_numbers = #tpu.dot_dimension_numbers<[1], [0], [0], [1], [0, 0, 1, 1], [], []>} : vector<8x256xbf16>, vector<256x1024xbf16>, vector<8x1024xf32> -> vector<8x1024xf32>
    %c0_3 = arith.constant 0 : index
    %c0_4 = arith.constant 0 : index
    %4 = vector.load %arg2[%c0_3, %c0_4] : memref<8x1024xf32, #tpu.memory_space<vmem>>, vector<1x1024xf32>
    %5 = vector.broadcast %4 : vector<1x1024xf32> to vector<8x1024xf32>
    %6 = arith.addf %3, %5 : vector<8x1024xf32>
    %c0_5 = arith.constant 0 : index
    %c0_6 = arith.constant 0 : index
    %7 = vector.load %arg11[%c0_5, %c0_6] : memref<8x1024xf32, #tpu.memory_space<vmem>>, vector<8x1024xf32>
    tpu.vector_store %arg11[%c0_5, %c0_6], %6 {strides = array<i32>} : memref<8x1024xf32, #tpu.memory_space<vmem>>, vector<8x1024xf32>,
    %8 = arith.negf %6 : vector<8x1024xf32>
    %9 = math.exp %8 : vector<8x1024xf32>
    %cst_7 = arith.constant 1.000000e+00 : f32
    %10 = vector.broadcast %cst_7 : f32 to vector<8x1024xf32>
    %11 = arith.addf %10, %9 : vector<8x1024xf32>
    %12 = arith.divf %10, %11 : vector<8x1024xf32>
    %c0_8 = arith.constant 0 : index
    %c0_9 = arith.constant 0 : index
    %13 = vector.load %arg19[%c0_8, %c0_9] : memref<8x1024xf32, #tpu.memory_space<vmem>>, vector<8x1024xf32>
    tpu.vector_store %arg19[%c0_8, %c0_9], %12 {strides = array<i32>} : memref<8x1024xf32, #tpu.memory_space<vmem>>, vector<8x1024xf32>,
    %c0_10 = arith.constant 0 : index
    %c0_11 = arith.constant 0 : index
    %14 = vector.load %arg4[%c0_10, %c0_11] : memref<1024x512xbf16, #tpu.memory_space<vmem>>, vector<1024x512xbf16>
    %15 = arith.truncf %12 : vector<8x1024xf32> to vector<8x1024xbf16>
    %cst_12 = arith.constant dense<0.000000e+00> : vector<8x512xf32>
    %16 = tpu.matmul %15, %14, %cst_12 {dimension_numbers = #tpu.dot_dimension_numbers<[1], [0], [0], [1], [0, 0, 1, 1], [], []>} : vector<8x1024xbf16>, vector<1024x512xbf16>, vector<8x512xf32> -> vector<8x512xf32>
    %c1 = arith.constant 1 : index
    %c0_13 = arith.constant 0 : index
    %17 = vector.load %arg2[%c1, %c0_13] : memref<8x1024xf32, #tpu.memory_space<vmem>>, vector<1x512xf32>
    %18 = vector.broadcast %17 : vector<1x512xf32> to vector<8x512xf32>
    %19 = arith.addf %16, %18 : vector<8x512xf32>
    %c0_14 = arith.constant 0 : index
    %c0_15 = arith.constant 0 : index
    %20 = vector.load %arg12[%c0_14, %c0_15] : memref<8x512xf32, #tpu.memory_space<vmem>>, vector<8x512xf32>
    tpu.vector_store %arg12[%c0_14, %c0_15], %19 {strides = array<i32>} : memref<8x512xf32, #tpu.memory_space<vmem>>, vector<8x512xf32>,
    %21 = arith.negf %19 : vector<8x512xf32>
    %22 = math.exp %21 : vector<8x512xf32>
    %cst_16 = arith.constant 1.000000e+00 : f32
    %23 = vector.broadcast %cst_16 : f32 to vector<8x512xf32>
    %24 = arith.addf %23, %22 : vector<8x512xf32>
    %25 = arith.divf %23, %24 : vector<8x512xf32>
    %c0_17 = arith.constant 0 : index
    %c0_18 = arith.constant 0 : index
    %26 = vector.load %arg20[%c0_17, %c0_18] : memref<8x512xf32, #tpu.memory_space<vmem>>, vector<8x512xf32>
    tpu.vector_store %arg20[%c0_17, %c0_18], %25 {strides = array<i32>} : memref<8x512xf32, #tpu.memory_space<vmem>>, vector<8x512xf32>,
    %c0_19 = arith.constant 0 : index
    %c0_20 = arith.constant 0 : index
    %27 = vector.load %arg5[%c0_19, %c0_20] : memref<512x256xbf16, #tpu.memory_space<vmem>>, vector<512x256xbf16>
    %28 = arith.truncf %25 : vector<8x512xf32> to vector<8x512xbf16>
    %cst_21 = arith.constant dense<0.000000e+00> : vector<8x256xf32>
    %29 = tpu.matmul %28, %27, %cst_21 {dimension_numbers = #tpu.dot_dimension_numbers<[1], [0], [0], [1], [0, 0, 1, 1], [], []>} : vector<8x512xbf16>, vector<512x256xbf16>, vector<8x256xf32> -> vector<8x256xf32>
    %c2 = arith.constant 2 : index
    %c0_22 = arith.constant 0 : index
    %30 = vector.load %arg2[%c2, %c0_22] : memref<8x1024xf32, #tpu.memory_space<vmem>>, vector<1x256xf32>
    %31 = vector.broadcast %30 : vector<1x256xf32> to vector<8x256xf32>
    %32 = arith.addf %29, %31 : vector<8x256xf32>
    %c0_23 = arith.constant 0 : index
    %c0_24 = arith.constant 0 : index
    %33 = vector.load %arg13[%c0_23, %c0_24] : memref<8x256xf32, #tpu.memory_space<vmem>>, vector<8x256xf32>
    tpu.vector_store %arg13[%c0_23, %c0_24], %32 {strides = array<i32>} : memref<8x256xf32, #tpu.memory_space<vmem>>, vector<8x256xf32>,
    %34 = arith.negf %32 : vector<8x256xf32>
    %35 = math.exp %34 : vector<8x256xf32>
    %cst_25 = arith.constant 1.000000e+00 : f32
    %36 = vector.broadcast %cst_25 : f32 to vector<8x256xf32>
    %37 = arith.addf %36, %35 : vector<8x256xf32>
    %38 = arith.divf %36, %37 : vector<8x256xf32>
    %c0_26 = arith.constant 0 : index
    %c0_27 = arith.constant 0 : index
    %39 = vector.load %arg21[%c0_26, %c0_27] : memref<8x256xf32, #tpu.memory_space<vmem>>, vector<8x256xf32>
    tpu.vector_store %arg21[%c0_26, %c0_27], %38 {strides = array<i32>} : memref<8x256xf32, #tpu.memory_space<vmem>>, vector<8x256xf32>,
    %c0_28 = arith.constant 0 : index
    %c0_29 = arith.constant 0 : index
    %40 = vector.load %arg6[%c0_28, %c0_29] : memref<256x128xbf16, #tpu.memory_space<vmem>>, vector<256x128xbf16>
    %41 = arith.truncf %38 : vector<8x256xf32> to vector<8x256xbf16>
    %cst_30 = arith.constant dense<0.000000e+00> : vector<8x128xf32>
    %42 = tpu.matmul %41, %40, %cst_30 {dimension_numbers = #tpu.dot_dimension_numbers<[1], [0], [0], [1], [0, 0, 1, 1], [], []>} : vector<8x256xbf16>, vector<256x128xbf16>, vector<8x128xf32> -> vector<8x128xf32>
    %c3 = arith.constant 3 : index
    %c0_31 = arith.constant 0 : index
    %43 = vector.load %arg2[%c3, %c0_31] : memref<8x1024xf32, #tpu.memory_space<vmem>>, vector<1x128xf32>
    %44 = vector.broadcast %43 : vector<1x128xf32> to vector<8x128xf32>
    %45 = arith.addf %42, %44 : vector<8x128xf32>
    %c0_32 = arith.constant 0 : index
    %c0_33 = arith.constant 0 : index
    %46 = vector.load %arg14[%c0_32, %c0_33] : memref<8x128xf32, #tpu.memory_space<vmem>>, vector<8x128xf32>
    tpu.vector_store %arg14[%c0_32, %c0_33], %45 {strides = array<i32>} : memref<8x128xf32, #tpu.memory_space<vmem>>, vector<8x128xf32>,
    %c0_34 = arith.constant 0 : index
    %c0_35 = arith.constant 0 : index
    %47 = vector.load %arg7[%c0_34, %c0_35] : memref<128x256xbf16, #tpu.memory_space<vmem>>, vector<128x256xbf16>
    %48 = arith.truncf %45 : vector<8x128xf32> to vector<8x128xbf16>
    %cst_36 = arith.constant dense<0.000000e+00> : vector<8x256xf32>
    %49 = tpu.matmul %48, %47, %cst_36 {dimension_numbers = #tpu.dot_dimension_numbers<[1], [0], [0], [1], [0, 0, 1, 1], [], []>} : vector<8x128xbf16>, vector<128x256xbf16>, vector<8x256xf32> -> vector<8x256xf32>
    %c4 = arith.constant 4 : index
    %c0_37 = arith.constant 0 : index
    %50 = vector.load %arg2[%c4, %c0_37] : memref<8x1024xf32, #tpu.memory_space<vmem>>, vector<1x256xf32>
    %51 = vector.broadcast %50 : vector<1x256xf32> to vector<8x256xf32>
    %52 = arith.addf %49, %51 : vector<8x256xf32>
    %c0_38 = arith.constant 0 : index
    %c0_39 = arith.constant 0 : index
    %53 = vector.load %arg15[%c0_38, %c0_39] : memref<8x256xf32, #tpu.memory_space<vmem>>, vector<8x256xf32>
    tpu.vector_store %arg15[%c0_38, %c0_39], %52 {strides = array<i32>} : memref<8x256xf32, #tpu.memory_space<vmem>>, vector<8x256xf32>,
    %54 = arith.negf %52 : vector<8x256xf32>
    %55 = math.exp %54 : vector<8x256xf32>
    %cst_40 = arith.constant 1.000000e+00 : f32
    %56 = vector.broadcast %cst_40 : f32 to vector<8x256xf32>
    %57 = arith.addf %56, %55 : vector<8x256xf32>
    %58 = arith.divf %56, %57 : vector<8x256xf32>
    %c0_41 = arith.constant 0 : index
    %c0_42 = arith.constant 0 : index
    %59 = vector.load %arg22[%c0_41, %c0_42] : memref<8x256xf32, #tpu.memory_space<vmem>>, vector<8x256xf32>
    tpu.vector_store %arg22[%c0_41, %c0_42], %58 {strides = array<i32>} : memref<8x256xf32, #tpu.memory_space<vmem>>, vector<8x256xf32>,
    %c0_43 = arith.constant 0 : index
    %c0_44 = arith.constant 0 : index
    %60 = vector.load %arg8[%c0_43, %c0_44] : memref<256x512xbf16, #tpu.memory_space<vmem>>, vector<256x512xbf16>
    %61 = arith.truncf %58 : vector<8x256xf32> to vector<8x256xbf16>
    %cst_45 = arith.constant dense<0.000000e+00> : vector<8x512xf32>
    %62 = tpu.matmul %61, %60, %cst_45 {dimension_numbers = #tpu.dot_dimension_numbers<[1], [0], [0], [1], [0, 0, 1, 1], [], []>} : vector<8x256xbf16>, vector<256x512xbf16>, vector<8x512xf32> -> vector<8x512xf32>
    %c5 = arith.constant 5 : index
    %c0_46 = arith.constant 0 : index
    %63 = vector.load %arg2[%c5, %c0_46] : memref<8x1024xf32, #tpu.memory_space<vmem>>, vector<1x512xf32>
    %64 = vector.broadcast %63 : vector<1x512xf32> to vector<8x512xf32>
    %65 = arith.addf %62, %64 : vector<8x512xf32>
    %c0_47 = arith.constant 0 : index
    %c0_48 = arith.constant 0 : index
    %66 = vector.load %arg16[%c0_47, %c0_48] : memref<8x512xf32, #tpu.memory_space<vmem>>, vector<8x512xf32>
    tpu.vector_store %arg16[%c0_47, %c0_48], %65 {strides = array<i32>} : memref<8x512xf32, #tpu.memory_space<vmem>>, vector<8x512xf32>,
    %67 = arith.negf %65 : vector<8x512xf32>
    %68 = math.exp %67 : vector<8x512xf32>
    %cst_49 = arith.constant 1.000000e+00 : f32
    %69 = vector.broadcast %cst_49 : f32 to vector<8x512xf32>
    %70 = arith.addf %69, %68 : vector<8x512xf32>
    %71 = arith.divf %69, %70 : vector<8x512xf32>
    %c0_50 = arith.constant 0 : index
    %c0_51 = arith.constant 0 : index
    %72 = vector.load %arg23[%c0_50, %c0_51] : memref<8x512xf32, #tpu.memory_space<vmem>>, vector<8x512xf32>
    tpu.vector_store %arg23[%c0_50, %c0_51], %71 {strides = array<i32>} : memref<8x512xf32, #tpu.memory_space<vmem>>, vector<8x512xf32>,
    %c0_52 = arith.constant 0 : index
    %c0_53 = arith.constant 0 : index
    %73 = vector.load %arg9[%c0_52, %c0_53] : memref<512x1024xbf16, #tpu.memory_space<vmem>>, vector<512x1024xbf16>
    %74 = arith.truncf %71 : vector<8x512xf32> to vector<8x512xbf16>
    %cst_54 = arith.constant dense<0.000000e+00> : vector<8x1024xf32>
    %75 = tpu.matmul %74, %73, %cst_54 {dimension_numbers = #tpu.dot_dimension_numbers<[1], [0], [0], [1], [0, 0, 1, 1], [], []>} : vector<8x512xbf16>, vector<512x1024xbf16>, vector<8x1024xf32> -> vector<8x1024xf32>
    %c6 = arith.constant 6 : index
    %c0_55 = arith.constant 0 : index
    %76 = vector.load %arg2[%c6, %c0_55] : memref<8x1024xf32, #tpu.memory_space<vmem>>, vector<1x1024xf32>
    %77 = vector.broadcast %76 : vector<1x1024xf32> to vector<8x1024xf32>
    %78 = arith.addf %75, %77 : vector<8x1024xf32>
    %c0_56 = arith.constant 0 : index
    %c0_57 = arith.constant 0 : index
    %79 = vector.load %arg17[%c0_56, %c0_57] : memref<8x1024xf32, #tpu.memory_space<vmem>>, vector<8x1024xf32>
    tpu.vector_store %arg17[%c0_56, %c0_57], %78 {strides = array<i32>} : memref<8x1024xf32, #tpu.memory_space<vmem>>, vector<8x1024xf32>,
    %80 = arith.negf %78 : vector<8x1024xf32>
    %81 = math.exp %80 : vector<8x1024xf32>
    %cst_58 = arith.constant 1.000000e+00 : f32
    %82 = vector.broadcast %cst_58 : f32 to vector<8x1024xf32>
    %83 = arith.addf %82, %81 : vector<8x1024xf32>
    %84 = arith.divf %82, %83 : vector<8x1024xf32>
    %c0_59 = arith.constant 0 : index
    %c0_60 = arith.constant 0 : index
    %85 = vector.load %arg24[%c0_59, %c0_60] : memref<8x1024xf32, #tpu.memory_space<vmem>>, vector<8x1024xf32>
    tpu.vector_store %arg24[%c0_59, %c0_60], %84 {strides = array<i32>} : memref<8x1024xf32, #tpu.memory_space<vmem>>, vector<8x1024xf32>,
    %c0_61 = arith.constant 0 : index
    %c0_62 = arith.constant 0 : index
    %86 = vector.load %arg10[%c0_61, %c0_62] : memref<1024x256xbf16, #tpu.memory_space<vmem>>, vector<1024x256xbf16>
    %87 = arith.truncf %84 : vector<8x1024xf32> to vector<8x1024xbf16>
    %cst_63 = arith.constant dense<0.000000e+00> : vector<8x256xf32>
    %88 = tpu.matmul %87, %86, %cst_63 {dimension_numbers = #tpu.dot_dimension_numbers<[1], [0], [0], [1], [0, 0, 1, 1], [], []>} : vector<8x1024xbf16>, vector<1024x256xbf16>, vector<8x256xf32> -> vector<8x256xf32>
    %c7 = arith.constant 7 : index
    %c0_64 = arith.constant 0 : index
    %89 = vector.load %arg2[%c7, %c0_64] : memref<8x1024xf32, #tpu.memory_space<vmem>>, vector<1x256xf32>
    %90 = vector.broadcast %89 : vector<1x256xf32> to vector<8x256xf32>
    %91 = arith.addf %88, %90 : vector<8x256xf32>
    %c0_65 = arith.constant 0 : index
    %c0_66 = arith.constant 0 : index
    %92 = vector.load %arg18[%c0_65, %c0_66] : memref<8x256xf32, #tpu.memory_space<vmem>>, vector<8x256xf32>
    tpu.vector_store %arg18[%c0_65, %c0_66], %91 {strides = array<i32>} : memref<8x256xf32, #tpu.memory_space<vmem>>, vector<8x256xf32>,
    %93 = arith.negf %91 : vector<8x256xf32>
    %94 = math.exp %93 : vector<8x256xf32>
    %cst_67 = arith.constant 1.000000e+00 : f32
    %95 = vector.broadcast %cst_67 : f32 to vector<8x256xf32>
    %96 = arith.addf %95, %94 : vector<8x256xf32>
    %97 = arith.divf %95, %96 : vector<8x256xf32>
    %c0_68 = arith.constant 0 : index
    %c0_69 = arith.constant 0 : index
    %98 = vector.load %arg25[%c0_68, %c0_69] : memref<8x256xf32, #tpu.memory_space<vmem>>, vector<8x256xf32>
    tpu.vector_store %arg25[%c0_68, %c0_69], %97 {strides = array<i32>} : memref<8x256xf32, #tpu.memory_space<vmem>>, vector<8x256xf32>,
    return
  }
  func.func @transform_0(%arg0: i32) -> (i32, i32) {
    %c0_i32 = arith.constant 0 : i32
    %c0_i32_0 = arith.constant 0 : i32
    %c0_i32_1 = arith.constant 0 : i32
    return %c0_i32, %c0_i32_0 : i32, i32
  }
  func.func @transform_1(%arg0: i32) -> (i32, i32) {
    %c0_i32 = arith.constant 0 : i32
    %c0_i32_0 = arith.constant 0 : i32
    %c0_i32_1 = arith.constant 0 : i32
    return %c0_i32, %c0_i32_0 : i32, i32
  }
  func.func @transform_2(%arg0: i32) -> (i32, i32) {
    %c0_i32 = arith.constant 0 : i32
    %c0_i32_0 = arith.constant 0 : i32
    %c0_i32_1 = arith.constant 0 : i32
    return %c0_i32, %c0_i32_0 : i32, i32
  }
  func.func @transform_3(%arg0: i32) -> (i32, i32) {
    %c0_i32 = arith.constant 0 : i32
    %c0_i32_0 = arith.constant 0 : i32
    %c0_i32_1 = arith.constant 0 : i32
    return %c0_i32, %c0_i32_0 : i32, i32
  }
  func.func @transform_4(%arg0: i32) -> (i32, i32) {
    %c0_i32 = arith.constant 0 : i32
    %c0_i32_0 = arith.constant 0 : i32
    %c0_i32_1 = arith.constant 0 : i32
    return %c0_i32, %c0_i32_0 : i32, i32
  }
  func.func @transform_5(%arg0: i32) -> (i32, i32) {
    %c0_i32 = arith.constant 0 : i32
    %c0_i32_0 = arith.constant 0 : i32
    %c0_i32_1 = arith.constant 0 : i32
    return %c0_i32, %c0_i32_0 : i32, i32
  }
  func.func @transform_6(%arg0: i32) -> (i32, i32) {
    %c0_i32 = arith.constant 0 : i32
    %c0_i32_0 = arith.constant 0 : i32
    %c0_i32_1 = arith.constant 0 : i32
    return %c0_i32, %c0_i32_0 : i32, i32
  }
  func.func @transform_7(%arg0: i32) -> (i32, i32) {
    %c0_i32 = arith.constant 0 : i32
    %c0_i32_0 = arith.constant 0 : i32
    %c0_i32_1 = arith.constant 0 : i32
    return %c0_i32, %c0_i32_0 : i32, i32
  }
  func.func @transform_8(%arg0: i32) -> (i32, i32) {
    %c0_i32 = arith.constant 0 : i32
    %c0_i32_0 = arith.constant 0 : i32
    %c0_i32_1 = arith.constant 0 : i32
    return %c0_i32, %c0_i32_0 : i32, i32
  }
  func.func @transform_9(%arg0: i32) -> (i32, i32) {
    %c0_i32 = arith.constant 0 : i32
    %c0_i32_0 = arith.constant 0 : i32
    %c0_i32_1 = arith.constant 0 : i32
    return %c0_i32, %c0_i32_0 : i32, i32
  }
  func.func @transform_10(%arg0: i32) -> (i32, i32) {
    %c0_i32 = arith.constant 0 : i32
    %c0_i32_0 = arith.constant 0 : i32
    %c0_i32_1 = arith.constant 0 : i32
    return %c0_i32, %c0_i32_0 : i32, i32
  }
  func.func @transform_11(%arg0: i32) -> (i32, i32) {
    %c0_i32 = arith.constant 0 : i32
    %c0_i32_0 = arith.constant 0 : i32
    %c0_i32_1 = arith.constant 0 : i32
    return %c0_i32, %c0_i32_0 : i32, i32
  }
  func.func @transform_12(%arg0: i32) -> (i32, i32) {
    %c0_i32 = arith.constant 0 : i32
    %c0_i32_0 = arith.constant 0 : i32
    %c0_i32_1 = arith.constant 0 : i32
    return %c0_i32, %c0_i32_0 : i32, i32
  }
  func.func @transform_13(%arg0: i32) -> (i32, i32) {
    %c0_i32 = arith.constant 0 : i32
    %c0_i32_0 = arith.constant 0 : i32
    %c0_i32_1 = arith.constant 0 : i32
    return %c0_i32, %c0_i32_0 : i32, i32
  }
  func.func @transform_14(%arg0: i32) -> (i32, i32) {
    %c0_i32 = arith.constant 0 : i32
    %c0_i32_0 = arith.constant 0 : i32
    %c0_i32_1 = arith.constant 0 : i32
    return %c0_i32, %c0_i32_0 : i32, i32
  }
  func.func @transform_15(%arg0: i32) -> (i32, i32) {
    %c0_i32 = arith.constant 0 : i32
    %c0_i32_0 = arith.constant 0 : i32
    %c0_i32_1 = arith.constant 0 : i32
    return %c0_i32, %c0_i32_0 : i32, i32
  }
  func.func @transform_16(%arg0: i32) -> (i32, i32) {
    %c0_i32 = arith.constant 0 : i32
    %c0_i32_0 = arith.constant 0 : i32
    %c0_i32_1 = arith.constant 0 : i32
    return %c0_i32, %c0_i32_0 : i32, i32
  }
  func.func @transform_17(%arg0: i32) -> (i32, i32) {
    %c0_i32 = arith.constant 0 : i32
    %c0_i32_0 = arith.constant 0 : i32
    %c0_i32_1 = arith.constant 0 : i32
    return %c0_i32, %c0_i32_0 : i32, i32
  }
  func.func @transform_18(%arg0: i32) -> (i32, i32) {
    %c0_i32 = arith.constant 0 : i32
    %c0_i32_0 = arith.constant 0 : i32
    %c0_i32_1 = arith.constant 0 : i32
    return %c0_i32, %c0_i32_0 : i32, i32
  }
  func.func @transform_19(%arg0: i32) -> (i32, i32) {
    %c0_i32 = arith.constant 0 : i32
    %c0_i32_0 = arith.constant 0 : i32
    %c0_i32_1 = arith.constant 0 : i32
    return %c0_i32, %c0_i32_0 : i32, i32
  }
  func.func @transform_20(%arg0: i32) -> (i32, i32) {
    %c0_i32 = arith.constant 0 : i32
    %c0_i32_0 = arith.constant 0 : i32
    %c0_i32_1 = arith.constant 0 : i32
    return %c0_i32, %c0_i32_0 : i32, i32
  }
  func.func @transform_21(%arg0: i32) -> (i32, i32) {
    %c0_i32 = arith.constant 0 : i32
    %c0_i32_0 = arith.constant 0 : i32
    %c0_i32_1 = arith.constant 0 : i32
    return %c0_i32, %c0_i32_0 : i32, i32
  }
  func.func @transform_22(%arg0: i32) -> (i32, i32) {
    %c0_i32 = arith.constant 0 : i32
    %c0_i32_0 = arith.constant 0 : i32
    %c0_i32_1 = arith.constant 0 : i32
    return %c0_i32, %c0_i32_0 : i32, i32
  }
  func.func @transform_23(%arg0: i32) -> (i32, i32) {
    %c0_i32 = arith.constant 0 : i32
    %c0_i32_0 = arith.constant 0 : i32
    %c0_i32_1 = arith.constant 0 : i32
    return %c0_i32, %c0_i32_0 : i32, i32
  }
  func.func @transform_24(%arg0: i32) -> (i32, i32) {
    %c0_i32 = arith.constant 0 : i32
    %c0_i32_0 = arith.constant 0 : i32
    %c0_i32_1 = arith.constant 0 : i32
    return %c0_i32, %c0_i32_0 : i32, i32
  }
}

</mosaic_0001>

<bundles_post_ra>
// kernel: mnist_ae_forward.1
= control target key start
LH: loop header
LB: loop body
LE: loop exit
PB: predicated region body
PF: predicated region fallthrough
CT: control target
= control target key end

     0   :  { %s14029_s0 = inlined_call_operand.vmem [shape: f32[8,256], index: 0, kind: input, shape index: {}]   ;;  %s14030_s1 = inlined_call_operand.vmem [shape: f32[8,1024], index: 1, kind: input, shape index: {}]   ;;  %s14031_s2 = inlined_call_operand.hbm [shape: bf16[256,1024], index: 2, kind: input, shape index: {}]   ;;  %s14032_s3 = inlined_call_operand.hbm [shape: bf16[1024,512], index: 3, kind: input, shape index: {}]   ;;  %s14033_s4 = inlined_call_operand.hbm [shape: bf16[512,256], index: 4, kind: input, shape index: {}]   ;;  %s14034_s5 = inlined_call_operand.hbm [shape: bf16[256,128], index: 5, kind: input, shape index: {}]   ;;  %s14035_s6 = inlined_call_operand.hbm [shape: bf16[128,256], index: 6, kind: input, shape index: {}]   ;;  %s14036_s7 = inlined_call_operand.hbm [shape: bf16[256,512], index: 7, kind: input, shape index: {}]   ;;  %s14037_s8 = inlined_call_operand.hbm [shape: bf16[512,1024], index: 8, kind: input, shape index: {}]   ;;  %s14038_s9 = inlined_call_operand.hbm [shape: bf16[1024,256], index: 9, kind: input, shape index: {}]   ;;  %s14039_s10 = inlined_call_operand.vmem [shape: f32[8,1024], index: 10, kind: output, shape index: {0}]   ;;  %s14040_s11 = inlined_call_operand.vmem [shape: f32[8,512], index: 11, kind: output, shape index: {1}]   ;;  %s14041_s12 = inlined_call_operand.vmem [shape: f32[8,256], index: 12, kind: output, shape index: {2}]   ;;  %s14042_s13 = inlined_call_operand.vmem [shape: f32[8,128], index: 13, kind: output, shape index: {3}]   ;;  %s14043_s14 = inlined_call_operand.vmem [shape: f32[8,256], index: 14, kind: output, shape index: {4}]   ;;  %s14044_s15 = inlined_call_operand.vmem [shape: f32[8,512], index: 15, kind: output, shape index: {5}]   ;;  %s14045_s16 = inlined_call_operand.vmem [shape: f32[8,1024], index: 16, kind: output, shape index: {6}]   ;;  %s14046_s17 = inlined_call_operand.vmem [shape: f32[8,256], index: 17, kind: output, shape index: {7}]   ;;  %s14047_s18 = inlined_call_operand.vmem [shape: f32[8,1024], index: 18, kind: output, shape index: {8}]   ;;  %s14048_s19 = inlined_call_operand.vmem [shape: f32[8,512], index: 19, kind: output, shape index: {9}]   ;;  %s14049_s20 = inlined_call_operand.vmem [shape: f32[8,256], index: 20, kind: output, shape index: {10}]   ;;  %s14050_s21 = inlined_call_operand.vmem [shape: f32[8,256], index: 21, kind: output, shape index: {11}]   ;;  %s14051_s22 = inlined_call_operand.vmem [shape: f32[8,512], index: 22, kind: output, shape index: {12}]   ;;  %s14052_s23 = inlined_call_operand.vmem [shape: f32[8,1024], index: 23, kind: output, shape index: {13}]   ;;  %s14053_s24 = inlined_call_operand.vmem [shape: f32[8,256], index: 24, kind: output, shape index: {14}]  }
   0x1   :  { %14061 = sst [smem:[#allocation20_spill]] %s14029_s0 }
   0x2   :  { %14062 = sst [smem:[#allocation21_spill]] %s14030_s1 }
   0x3   :  { %14063 = sst [smem:[#allocation22_spill]] %s14031_s2 }
   0x4   :  { %14064 = sst [smem:[#allocation23_spill]] %s14032_s3 }
   0x5   :  { %14065 = sst [smem:[#allocation24_spill]] %s14033_s4 }
   0x6   :  { %14066 = sst [smem:[#allocation25_spill]] %s14034_s5 }
   0x7   :  { %14067 = sst [smem:[#allocation26_spill]] %s14035_s6 }
   0x8   :  { %14068 = sst [smem:[#allocation27_spill]] %s14036_s7 }
   0x9   :  { %14069 = sst [smem:[#allocation28_spill]] %s14037_s8 }
   0xa   :  { %14070 = sst [smem:[#allocation29_spill]] %s14045_s16 }
   0xb   :  { %14071 = sst [smem:[#allocation30_spill]] %s14046_s17 }
   0xc   :  { %14072 = sst [smem:[#allocation31_spill]] %s14051_s22 }
   0xd   :  { %14073 = sst [smem:[#allocation32_spill]] %s14052_s23 }
   0xe   :  { %14074 = sst [smem:[#allocation33_spill]] %s14053_s24 }
   0xf   :  { %30 = vsyncpa [#allocation3], 0 }
  0x10   :  { %31 = vsyncpa [#allocation5], 0 }
  0x11   :  { %32 = vsyncpa [#allocation8], 0 }
  0x12   :  { %33 = vsyncpa [#allocation11], 0  ;;  %s14075_s27 = sld [smem:[#allocation23_spill]] }
  0x18   :  { %s56_s28 = sshll.u32 %s14075_s27, 4  ;;  %s57_s28 = int_to_ptr.hbm [resolvable:$true] %s56_s28 }
  0x19   :  { %34 = vsyncpa [#allocation14], 0  ;;  %s13113_s6 = smov [#allocation4]   ;;  %s14076_s7 = sld [smem:[#allocation25_spill]] }
  0x1a   :  { %s58_s2 = sshll.u32 %s13113_s6, 4  ;;  %s13114_s3 = smov 256   ;;  %s59_s2 = int_to_ptr.vmem [resolvable:$true] %s58_s2 }
  0x1b   :  { %s13115_s25 = smov 16   ;;  %s13116_s8 = smov [#allocation7]  }
  0x1c   :  { %64 = dma.hbm_to_vmem [thread:$0]  %s57_s28, 32768, %s59_s2, [#allocation5], %s13114_s3, %s13114_s3, %s13115_s25  }
  0x1d   :  { %s84_s4 = sshll.u32 %s13116_s8, 4  ;;  %s13117_s1 = smov 64   ;;  %s85_s4 = int_to_ptr.vmem [resolvable:$true] %s84_s4 }
  0x1e   :  { %s13118_s24 = smov 4   ;;  %s14077_s27 = sld [smem:[#allocation27_spill]] }
  0x1f   :  { %s82_s30 = sshll.u32 %s14076_s7, 4  ;;  %s13119_s6 = smov [#allocation10]   ;;  %s83_s30 = int_to_ptr.hbm [resolvable:$true] %s82_s30 }
  0x20   :  { %90 = dma.hbm_to_vmem [thread:$0]  %s83_s30, 2048, %s85_s4, [#allocation8], %s13117_s1, %s13117_s1, %s13118_s24  }
  0x21   :  { %s110_s23 = sshll.u32 %s13119_s6, 4  ;;  %s14078_s7 = sld [smem:[#allocation22_spill]]  ;;  %s111_s23 = int_to_ptr.vmem [resolvable:$true] %s110_s23 }
  0x22   :  { %s13120_s28 = smov [#allocation2]   ;;  %s13121_s8 = smov 512  }
  0x23   :  { %s45_s2 = sshll.u32 %s13120_s28, 4  ;;  %s13122_s22 = smov 32   ;;  %s46_s2 = int_to_ptr.vmem [resolvable:$true] %s45_s2 }
  0x24   :  { %s108_s17 = sshll.u32 %s14077_s27, 4  ;;  %s14079_s4 = sld [smem:[#allocation24_spill]]  ;;  %s109_s17 = int_to_ptr.hbm [resolvable:$true] %s108_s17 }
  0x25   :  { %116 = dma.hbm_to_vmem [thread:$0]  %s109_s17, 8192, %s111_s23, [#allocation11], %s13114_s3, %s13114_s3, %s13115_s25  }
  0x26   :  { %s13123_s5 = smov [#allocation6]   ;;  %s14080_s29 = sld [smem:[#allocation26_spill]] }
  0x27   :  { %s43_s16 = sshll.u32 %s14078_s7, 4  ;;  %s71_s26 = sshll.u32 %s13123_s5, 4  ;;  %s44_s16 = int_to_ptr.hbm [resolvable:$true] %s43_s16  ;;  %s72_s26 = int_to_ptr.vmem [resolvable:$true] %s71_s26 }
  0x28   :  { %51 = dma.hbm_to_vmem [thread:$0]  %s44_s16, 16384, %s46_s2, [#allocation3], %s13121_s8, %s13121_s8, %s13122_s22  }
  0x29   :  { %s13124_s17 = smov 128   ;;  %s13125_s23 = smov 8  }
  0x2a   :  { %s69_s1 = sshll.u32 %s14079_s4, 4  ;;  %s13126_s3 = smov [#allocation9]   ;;  %s70_s1 = int_to_ptr.hbm [resolvable:$true] %s69_s1 }
  0x2b   :  { %77 = dma.hbm_to_vmem [thread:$0]  %s70_s1, 8192, %s72_s26, [#allocation5], %s13124_s17, %s13124_s17, %s13125_s23  }
  0x2c   :  { %s95_s0 = sshll.u32 %s14080_s29, 4  ;;  %s97_s25 = sshll.u32 %s13126_s3, 4  ;;  %s96_s0 = int_to_ptr.hbm [resolvable:$true] %s95_s0  ;;  %s98_s25 = int_to_ptr.vmem [resolvable:$true] %s97_s25 }
  0x2d   :  { %s14081_s28 = sld [smem:[#allocation28_spill]]  ;;  %s134_s4 = sshll.u32 %s14038_s9, 4  ;;  %s135_s4 = int_to_ptr.hbm [resolvable:$true] %s134_s4 }
  0x2e   :  { %103 = dma.hbm_to_vmem [thread:$0]  %s96_s0, 2048, %s98_s25, [#allocation8], %s13124_s17, %s13124_s17, %s13125_s23  }
  0x2f   :  { %s13127_s5 = smov [#allocation12]   ;;  %s13128_s1 = smov [#allocation13]  }
  0x30   :  { %s123_s27 = sshll.u32 %s13127_s5, 4  ;;  %s136_s26 = sshll.u32 %s13128_s1, 4  ;;  %s124_s27 = int_to_ptr.vmem [resolvable:$true] %s123_s27  ;;  %s137_s26 = int_to_ptr.vmem [resolvable:$true] %s136_s26 }
  0x31   :  { %142 = dma.hbm_to_vmem [thread:$0]  %s135_s4, 16384, %s137_s26, [#allocation14], %s13124_s17, %s13124_s17, %s13125_s23  }
  0x33   :  { %s121_s2 = sshll.u32 %s14081_s28, 4  ;;  %s122_s2 = int_to_ptr.hbm [resolvable:$true] %s121_s2 }
  0x34   :  { %129 = dma.hbm_to_vmem [thread:$0]  %s122_s2, 32768, %s124_s27, [#allocation11], %s13121_s8, %s13121_s8, %s13122_s22  }
  0x35   :  { %13103 = dma.done.wait [#allocation3], 16384  }
  0x36   :  { %13104 = vsyncadd [#allocation3], 4294950912 }
  0x37   :  { %13105 = dma.done.wait [#allocation5], 40960  }
  0x38   :  { %13106 = vsyncadd [#allocation5], 4294926336 }
  0x39   :  { %13107 = dma.done.wait [#allocation8], 4096  }
  0x3a   :  { %13108 = vsyncadd [#allocation8], 4294963200 }
  0x3b   :  { %13109 = dma.done.wait [#allocation11], 40960  }
  0x3c   :  { %13110 = vsyncadd [#allocation11], 4294926336 }
  0x3d   :  { %13111 = dma.done.wait [#allocation14], 16384  }
  0x3e   :  { %13112 = vsyncadd [#allocation14], 4294950912  ;;  %v8323_v0 = vld [vmem:[#allocation2 + $0x1c0] sm:$0xf]  ;;  %v11902_v5 = vld [vmem:[#allocation2 + $0x1c4] sm:$0xf] }
  0x3f   :  { %v11906_v1 = vld [vmem:[#allocation2 + $0x1dc] sm:$0xf0]  ;;  %v8325_v6 = vld [vmem:[#allocation2 + $0x1e0] sm:$0xf0]  ;;  %s14082_s8 = sld [smem:[#allocation20_spill]] }
  0x40   :  { %v8579_v2 = vld [vmem:[#allocation2 + $0x3c0] sm:$0xf]  ;;  %v8324_v3 = vor.u32 %v11906_v1, %v8323_v0  ;;  %v8328_v8 = vor.u32 %v11902_v5, %v8325_v6  ;;  %v11966_v9 = vld [vmem:[#allocation2 + $0x3c4] sm:$0xf]  ;;  %s14083_s23 = sld [smem:[#allocation21_spill]] }
  0x41   :  { %v11970_v4 = vld [vmem:[#allocation2 + $0x3dc] sm:$0xf0]  ;;  %v8581_v10 = vld [vmem:[#allocation2 + $0x3e0] sm:$0xf0]  ;;  %s14107_s28 = sld [smem:[#allocation29_spill]] }
  0x42   :  { %v8580_v7 = vor.u32 %v11970_v4, %v8579_v2  ;;  %v8291_v11 = vld [vmem:[#allocation2 + $0x180] sm:$0xf]  ;;  %967 = vmatpush.bf16.msra.mxu0 %v8324_v3  ;;  %v8584_v12 = vor.u32 %v11966_v9, %v8581_v10  ;;  %993 = vmatpush.bf16.msra.mxu2 %v8328_v8  ;;  %v11894_v18 = vld [vmem:[#allocation2 + $0x184] sm:$0xf] }
  0x43   :  { %v11898_v13 = vld [vmem:[#allocation2 + $0x19c] sm:$0xf0]  ;;  %v8293_v19 = vld [vmem:[#allocation2 + $0x1a0] sm:$0xf0] }
  0x44   :  { %v8547_v14 = vld [vmem:[#allocation2 + $0x380] sm:$0xf]  ;;  %980 = vmatpush.bf16.msra.mxu1 %v8580_v7  ;;  %v8292_v16 = vor.u32 %v11898_v13, %v8291_v11  ;;  %v11958_v20 = vld [vmem:[#allocation2 + $0x384] sm:$0xf]  ;;  %1006 = vmatpush.bf16.msra.mxu3 %v8584_v12  ;;  %v8296_v21 = vor.u32 %v11894_v18, %v8293_v19 }
  0x45   :  { %v11962_v15 = vld [vmem:[#allocation2 + $0x39c] sm:$0xf0]  ;;  %v8549_v22 = vld [vmem:[#allocation2 + $0x3a0] sm:$0xf0] }
  0x46   :  { %v8548_v17 = vor.u32 %v11962_v15, %v8547_v14  ;;  %v8259_v23 = vld [vmem:[#allocation2 + $0x140] sm:$0xf]  ;;  %v8552_v25 = vor.u32 %v11958_v20, %v8549_v22  ;;  %v11886_v28 = vld [vmem:[#allocation2 + $0x144] sm:$0xf]  ;;  %968 = vmatpush.bf16.msra.mxu0 %v8292_v16  ;;  %994 = vmatpush.bf16.msra.mxu2 %v8296_v21 }
  0x47   :  { %v11890_v24 = vld [vmem:[#allocation2 + $0x15c] sm:$0xf0]  ;;  %v8261_v30 = vld [vmem:[#allocation2 + $0x160] sm:$0xf0] }
  0x48   :  { %v8515_v26 = vld [vmem:[#allocation2 + $0x340] sm:$0xf]  ;;  %v8260_v29 = vor.u32 %v11890_v24, %v8259_v23  ;;  %v11950_v31 = vld [vmem:[#allocation2 + $0x344] sm:$0xf]  ;;  %981 = vmatpush.bf16.msra.mxu1 %v8548_v17  ;;  %v8264_v34 = vor.u32 %v11886_v28, %v8261_v30  ;;  %1007 = vmatpush.bf16.msra.mxu3 %v8552_v25  ;;  %v8331_v28 = vld [vmem:[#allocation2 + $0x1c8] sm:$0xf] }
  0x49   :  { %v11954_v27 = vld [vmem:[#allocation2 + $0x35c] sm:$0xf0]  ;;  %v8517_v32 = vld [vmem:[#allocation2 + $0x360] sm:$0xf0]  ;;  %v8587_v30 = vld [vmem:[#allocation2 + $0x3c8] sm:$0xf] }
  0x4a   :  { %v8516_v33 = vor.u32 %v11954_v27, %v8515_v26  ;;  %v8227_v35 = vld [vmem:[#allocation2 + $0x100] sm:$0xf]  ;;  %v8520_v38 = vor.u32 %v11950_v31, %v8517_v32  ;;  %v11878_v40 = vld [vmem:[#allocation2 + $0x104] sm:$0xf]  ;;  %969 = vmatpush.bf16.msra.mxu0 %v8260_v29  ;;  %995 = vmatpush.bf16.msra.mxu2 %v8264_v34  ;;  %v11907_v29 = vld [vmem:[#allocation2 + $0x1e4] sm:$0xf0] }
  0x4b   :  { %v11882_v36 = vld [vmem:[#allocation2 + $0x11c] sm:$0xf0]  ;;  %v8229_v41 = vld [vmem:[#allocation2 + $0x120] sm:$0xf0]  ;;  %v11971_v32 = vld [vmem:[#allocation2 + $0x3e4] sm:$0xf0] }
  0x4c   :  { %v8483_v37 = vld [vmem:[#allocation2 + $0x300] sm:$0xf]  ;;  %v11942_v42 = vld [vmem:[#allocation2 + $0x304] sm:$0xf]  ;;  %v8228_v44 = vor.u32 %v11882_v36, %v8227_v35  ;;  %982 = vmatpush.bf16.msra.mxu1 %v8516_v33  ;;  %v8232_v46 = vor.u32 %v11878_v40, %v8229_v41  ;;  %1008 = vmatpush.bf16.msra.mxu3 %v8520_v38  ;;  %v11903_v33 = vld [vmem:[#allocation2 + $0x1cc] sm:$0xf]  ;;  %v8332_v41 = vor.u32 %v11907_v29, %v8331_v28 }
  0x4d   :  { %v11946_v39 = vld [vmem:[#allocation2 + $0x31c] sm:$0xf0]  ;;  %v8485_v43 = vld [vmem:[#allocation2 + $0x320] sm:$0xf0]  ;;  %v8333_v34 = vld [vmem:[#allocation2 + $0x1e8] sm:$0xf0] }
  0x4e   :  { %v8484_v45 = vor.u32 %v11946_v39, %v8483_v37  ;;  %v8195_v47 = vld [vmem:[#allocation2 + $0xc0] sm:$0xf]  ;;  %v8488_v50 = vor.u32 %v11942_v42, %v8485_v43  ;;  %v11870_v52 = vld [vmem:[#allocation2 + $0xc4] sm:$0xf]  ;;  %970 = vmatpush.bf16.msra.mxu0 %v8228_v44  ;;  %996 = vmatpush.bf16.msra.mxu2 %v8232_v46  ;;  %v11967_v37 = vld [vmem:[#allocation2 + $0x3cc] sm:$0xf]  ;;  %v8588_v43 = vor.u32 %v11971_v32, %v8587_v30 }
  0x4f   :  { %v11874_v48 = vld [vmem:[#allocation2 + $0xdc] sm:$0xf0]  ;;  %v8197_v53 = vld [vmem:[#allocation2 + $0xe0] sm:$0xf0]  ;;  %v8589_v38 = vld [vmem:[#allocation2 + $0x3e8] sm:$0xf0]  ;;  %v8336_v44 = vor.u32 %v11903_v33, %v8333_v34 }
  0x50   :  { %v8451_v49 = vld [vmem:[#allocation2 + $0x2c0] sm:$0xf]  ;;  %v11934_v54 = vld [vmem:[#allocation2 + $0x2c4] sm:$0xf]  ;;  %v8196_v56 = vor.u32 %v11874_v48, %v8195_v47  ;;  %983 = vmatpush.bf16.msra.mxu1 %v8484_v45  ;;  %v8200_v58 = vor.u32 %v11870_v52, %v8197_v53  ;;  %1009 = vmatpush.bf16.msra.mxu3 %v8488_v50  ;;  %v176_v42 = vld [vmem:[%s14082_s8 + $0x8] sm:$0xff]  ;;  %v8592_v48 = vor.u32 %v11967_v37, %v8589_v38 }
  0x51   :  { %v11938_v51 = vld [vmem:[#allocation2 + $0x2dc] sm:$0xf0]  ;;  %v8453_v55 = vld [vmem:[#allocation2 + $0x2e0] sm:$0xf0]  ;;  %v8299_v45 = vld [vmem:[#allocation2 + $0x188] sm:$0xf] }
  0x52   :  { %v8452_v57 = vor.u32 %v11938_v51, %v8451_v49  ;;  %v8163_v59 = vld [vmem:[#allocation2 + $0x80] sm:$0xf]  ;;  %v8456_v62 = vor.u32 %v11934_v54, %v8453_v55  ;;  %v11862_v0 = vld [vmem:[#allocation2 + $0x84] sm:$0xf]  ;;  %971 = vmatpush.bf16.msra.mxu0 %v8196_v56  ;;  %997 = vmatpush.bf16.msra.mxu2 %v8200_v58  ;;  %v11899_v46 = vld [vmem:[#allocation2 + $0x1a4] sm:$0xf0]  ;;  %v13286_v55 = vpack.c.bf16 %v176_v42, %v176_v42 }
  0x53   :  { %v11866_v60 = vld [vmem:[#allocation2 + $0x9c] sm:$0xf0]  ;;  %v8165_v1 = vld [vmem:[#allocation2 + $0xa0] sm:$0xf0]  ;;  %v8555_v47 = vld [vmem:[#allocation2 + $0x388] sm:$0xf]  ;;  %v8300_v56 = vor.u32 %v11899_v46, %v8299_v45 }
  0x54   :  { %v8419_v61 = vld [vmem:[#allocation2 + $0x280] sm:$0xf]  ;;  %v11926_v2 = vld [vmem:[#allocation2 + $0x284] sm:$0xf]  ;;  %v8164_v4 = vor.u32 %v11866_v60, %v8163_v59  ;;  %984 = vmatpush.bf16.msra.mxu1 %v8452_v57  ;;  %v8168_v6 = vor.u32 %v11862_v0, %v8165_v1  ;;  %1010 = vmatpush.bf16.msra.mxu3 %v8456_v62  ;;  %v11963_v49 = vld [vmem:[#allocation2 + $0x3a4] sm:$0xf0] }
  0x55   :  { %v11930_v63 = vld [vmem:[#allocation2 + $0x29c] sm:$0xf0]  ;;  %v8421_v3 = vld [vmem:[#allocation2 + $0x2a0] sm:$0xf0]  ;;  %v11895_v50 = vld [vmem:[#allocation2 + $0x18c] sm:$0xf]  ;;  %v8556_v57 = vor.u32 %v11963_v49, %v8555_v47 }
  0x56   :  { %v8420_v5 = vor.u32 %v11930_v63, %v8419_v61  ;;  %v8131_v7 = vld [vmem:[#allocation2 + $0x40] sm:$0xf]  ;;  %v8424_v10 = vor.u32 %v11926_v2, %v8421_v3  ;;  %v11854_v12 = vld [vmem:[#allocation2 + $0x44] sm:$0xf]  ;;  %972 = vmatpush.bf16.msra.mxu0 %v8164_v4  ;;  %998 = vmatpush.bf16.msra.mxu2 %v8168_v6  ;;  %v8301_v51 = vld [vmem:[#allocation2 + $0x1a8] sm:$0xf0] }
  0x57   :  { %v11858_v8 = vld [vmem:[#allocation2 + $0x5c] sm:$0xf0]  ;;  %v8133_v13 = vld [vmem:[#allocation2 + $0x60] sm:$0xf0]  ;;  %v11959_v53 = vld [vmem:[#allocation2 + $0x38c] sm:$0xf]  ;;  %v8304_v58 = vor.u32 %v11895_v50, %v8301_v51 }
  0x58   :  { %v8387_v9 = vld [vmem:[#allocation2 + $0x240] sm:$0xf]  ;;  %v11918_v14 = vld [vmem:[#allocation2 + $0x244] sm:$0xf]  ;;  %v8132_v16 = vor.u32 %v11858_v8, %v8131_v7  ;;  %985 = vmatpush.bf16.msra.mxu1 %v8420_v5  ;;  %v8136_v20 = vor.u32 %v11854_v12, %v8133_v13  ;;  %1011 = vmatpush.bf16.msra.mxu3 %v8424_v10  ;;  %v8557_v54 = vld [vmem:[#allocation2 + $0x3a8] sm:$0xf0] }
  0x59   :  { %v11922_v11 = vld [vmem:[#allocation2 + $0x25c] sm:$0xf0]  ;;  %v8389_v15 = vld [vmem:[#allocation2 + $0x260] sm:$0xf0]  ;;  %v8267_v59 = vld [vmem:[#allocation2 + $0x148] sm:$0xf]  ;;  %v8560_v62 = vor.u32 %v11959_v53, %v8557_v54 }
  0x5a   :  { %v8099_v17 = vld [vmem:[#allocation2] sm:$0xf]  ;;  %v8388_v19 = vor.u32 %v11922_v11, %v8387_v9  ;;  %v11846_v23 = vld [vmem:[#allocation2 + $0x4] sm:$0xf]  ;;  %v8392_v24 = vor.u32 %v11918_v14, %v8389_v15  ;;  %973 = vmatpush.bf16.msra.mxu0 %v8132_v16  ;;  %999 = vmatpush.bf16.msra.mxu2 %v8136_v20  ;;  %v11891_v60 = vld [vmem:[#allocation2 + $0x164] sm:$0xf0] }
  0x5b   :  { %v11850_v18 = vld [vmem:[#allocation2 + $0x1c] sm:$0xf0]  ;;  %v8101_v25 = vld [vmem:[#allocation2 + $0x20] sm:$0xf0]  ;;  %v8523_v61 = vld [vmem:[#allocation2 + $0x348] sm:$0xf]  ;;  %v8268_v4 = vor.u32 %v11891_v60, %v8267_v59 }
  0x5c   :  { %v8355_v21 = vld [vmem:[#allocation2 + $0x200] sm:$0xf]  ;;  %v11910_v26 = vld [vmem:[#allocation2 + $0x204] sm:$0xf]  ;;  %v8100_v31 = vor.u32 %v11850_v18, %v8099_v17  ;;  %986 = vmatpush.bf16.msra.mxu1 %v8388_v19  ;;  %v8104_v36 = vor.u32 %v11846_v23, %v8101_v25  ;;  %1012 = vmatpush.bf16.msra.mxu3 %v8392_v24  ;;  %v11955_v63 = vld [vmem:[#allocation2 + $0x364] sm:$0xf0] }
  0x5d   :  { %v11914_v22 = vld [vmem:[#allocation2 + $0x21c] sm:$0xf0]  ;;  %v8357_v27 = vld [vmem:[#allocation2 + $0x220] sm:$0xf0]  ;;  %v11887_v0 = vld [vmem:[#allocation2 + $0x14c] sm:$0xf]  ;;  %v8524_v5 = vor.u32 %v11955_v63, %v8523_v61 }
  0x5e   :  { %v8356_v35 = vor.u32 %v11914_v22, %v8355_v21  ;;  %v175_v39 = vld [vmem:[%s14082_s8] sm:$0xff]  ;;  %v8360_v40 = vor.u32 %v11910_v26, %v8357_v27  ;;  %974 = vmatpush.bf16.msra.mxu0 %v8100_v31  ;;  %1000 = vmatpush.bf16.msra.mxu2 %v8104_v36  ;;  %v8269_v1 = vld [vmem:[#allocation2 + $0x168] sm:$0xf0]  ;;  %v8235_v7 = vld [vmem:[#allocation2 + $0x108] sm:$0xf] }
  0x5f   :  { %v13284_v52 = vpack.c.bf16 %v175_v39, %v175_v39  ;;  %v11951_v2 = vld [vmem:[#allocation2 + $0x34c] sm:$0xf]  ;;  %v8272_v6 = vor.u32 %v11887_v0, %v8269_v1  ;;  %v11883_v8 = vld [vmem:[#allocation2 + $0x124] sm:$0xf0] }
  0x60   :  { %987 = vmatpush.bf16.msra.mxu1 %v8356_v35  ;;  %1013 = vmatpush.bf16.msra.mxu3 %v8360_v40  ;;  %v8525_v3 = vld [vmem:[#allocation2 + $0x368] sm:$0xf0]  ;;  %v8491_v9 = vld [vmem:[#allocation2 + $0x308] sm:$0xf]  ;;  %v8236_v16 = vor.u32 %v11883_v8, %v8235_v7  ;;  %v11904_v7 = vld [vmem:[#allocation2 + $0x1d4] sm:$0xf] }
  0x61   :  { %1001 = vmatmul.bf16.vlgmr.msra.gmra.mxu2 %v13284_v52  ;;  %975 = vmatmul.bf16.vlgmr.msra.gmra.mxu0 %v13284_v52  ;;  %v8528_v10 = vor.u32 %v11951_v2, %v8525_v3  ;;  %v11947_v11 = vld [vmem:[#allocation2 + $0x324] sm:$0xf0]  ;;  %v11879_v12 = vld [vmem:[#allocation2 + $0x10c] sm:$0xf]  ;;  %v8339_v2 = vld [vmem:[#allocation2 + $0x1d0] sm:$0xf] }
  0x62   :  { %1019 = vmatpush.bf16.msrb.mxu0 %v8332_v41  ;;  %1045 = vmatpush.bf16.msrb.mxu2 %v8336_v44  ;;  %v8237_v13 = vld [vmem:[#allocation2 + $0x128] sm:$0xf0]  ;;  %v8492_v17 = vor.u32 %v11947_v11, %v8491_v9  ;;  %v8203_v19 = vld [vmem:[#allocation2 + $0xc8] sm:$0xf]  ;;  %v11908_v3 = vld [vmem:[#allocation2 + $0x1ec] sm:$0xf0] }
  0x63   :  { %1014 = vmatmul.bf16.vlgmr.msra.gmra.mxu3 %v13286_v55  ;;  %988 = vmatmul.bf16.vlgmr.msra.gmra.mxu1 %v13286_v55  ;;  %v11943_v14 = vld [vmem:[#allocation2 + $0x30c] sm:$0xf]  ;;  %v8240_v18 = vor.u32 %v11879_v12, %v8237_v13  ;;  %v11875_v20 = vld [vmem:[#allocation2 + $0xe4] sm:$0xf0]  ;;  %v8341_v8 = vld [vmem:[#allocation2 + $0x1f0] sm:$0xf0] }
  0x64   :  { %1032 = vmatpush.bf16.msrb.mxu1 %v8588_v43  ;;  %1058 = vmatpush.bf16.msrb.mxu3 %v8592_v48  ;;  %v8493_v15 = vld [vmem:[#allocation2 + $0x328] sm:$0xf0]  ;;  %v8459_v21 = vld [vmem:[#allocation2 + $0x2c8] sm:$0xf]  ;;  %v8204_v28 = vor.u32 %v11875_v20, %v8203_v19  ;;  %v11968_v11 = vld [vmem:[#allocation2 + $0x3d4] sm:$0xf] }
  0x65   :  { %v8496_v22 = vor.u32 %v11943_v14, %v8493_v15  ;;  %v11939_v23 = vld [vmem:[#allocation2 + $0x2e4] sm:$0xf0]  ;;  %v11871_v24 = vld [vmem:[#allocation2 + $0xcc] sm:$0xf]  ;;  %v8597_v12 = vld [vmem:[#allocation2 + $0x3f0] sm:$0xf0]  ;;  %v8340_v14 = vor.u32 %v11908_v3, %v8339_v2 }
  0x66   :  { %1020 = vmatpush.bf16.msrb.mxu0 %v8300_v56  ;;  %1046 = vmatpush.bf16.msrb.mxu2 %v8304_v58  ;;  %v8205_v25 = vld [vmem:[#allocation2 + $0xe8] sm:$0xf0]  ;;  %v8460_v29 = vor.u32 %v11939_v23, %v8459_v21  ;;  %v8171_v31 = vld [vmem:[#allocation2 + $0x88] sm:$0xf]  ;;  %v8563_v19 = vld [vmem:[#allocation2 + $0x390] sm:$0xf]  ;;  %v8600_v20 = vor.u32 %v11968_v11, %v8597_v12 }
  0x67   :  { %v11935_v26 = vld [vmem:[#allocation2 + $0x2cc] sm:$0xf]  ;;  %v8208_v30 = vor.u32 %v11871_v24, %v8205_v25  ;;  %v11867_v32 = vld [vmem:[#allocation2 + $0xa4] sm:$0xf0]  ;;  %v11964_v21 = vld [vmem:[#allocation2 + $0x3ac] sm:$0xf0] }
  0x68   :  { %1033 = vmatpush.bf16.msrb.mxu1 %v8556_v57  ;;  %1059 = vmatpush.bf16.msrb.mxu3 %v8560_v62  ;;  %v8461_v27 = vld [vmem:[#allocation2 + $0x2e8] sm:$0xf0]  ;;  %v8427_v33 = vld [vmem:[#allocation2 + $0x288] sm:$0xf]  ;;  %v8172_v40 = vor.u32 %v11867_v32, %v8171_v31  ;;  %v8309_v23 = vld [vmem:[#allocation2 + $0x1b0] sm:$0xf0] }
  0x69   :  { %v8464_v34 = vor.u32 %v11935_v26, %v8461_v27  ;;  %v11931_v35 = vld [vmem:[#allocation2 + $0x2a4] sm:$0xf0]  ;;  %v11863_v36 = vld [vmem:[#allocation2 + $0x8c] sm:$0xf]  ;;  %v11960_v24 = vld [vmem:[#allocation2 + $0x394] sm:$0xf]  ;;  %v8564_v27 = vor.u32 %v11964_v21, %v8563_v19 }
  0x6a   :  { %1021 = vmatpush.bf16.msrb.mxu0 %v8268_v4  ;;  %1047 = vmatpush.bf16.msrb.mxu2 %v8272_v6  ;;  %v8173_v37 = vld [vmem:[#allocation2 + $0xa8] sm:$0xf0]  ;;  %v8428_v41 = vor.u32 %v11931_v35, %v8427_v33  ;;  %v8139_v43 = vld [vmem:[#allocation2 + $0x48] sm:$0xf]  ;;  %v8595_v4 = vld [vmem:[#allocation2 + $0x3d0] sm:$0xf] }
  0x6b   :  { %v11927_v38 = vld [vmem:[#allocation2 + $0x28c] sm:$0xf]  ;;  %v8176_v42 = vor.u32 %v11863_v36, %v8173_v37  ;;  %v11859_v44 = vld [vmem:[#allocation2 + $0x64] sm:$0xf0]  ;;  %v11972_v6 = vld [vmem:[#allocation2 + $0x3ec] sm:$0xf0] }
  0x6c   :  { %1034 = vmatpush.bf16.msrb.mxu1 %v8524_v5  ;;  %1060 = vmatpush.bf16.msrb.mxu3 %v8528_v10  ;;  %v8429_v39 = vld [vmem:[#allocation2 + $0x2a8] sm:$0xf0]  ;;  %v8395_v45 = vld [vmem:[#allocation2 + $0x248] sm:$0xf]  ;;  %v8140_v53 = vor.u32 %v11859_v44, %v8139_v43  ;;  %v8596_v15 = vor.u32 %v11972_v6, %v8595_v4  ;;  %v8565_v25 = vld [vmem:[#allocation2 + $0x3b0] sm:$0xf0] }
  0x6d   :  { %v8432_v46 = vor.u32 %v11927_v38, %v8429_v39  ;;  %v11923_v47 = vld [vmem:[#allocation2 + $0x264] sm:$0xf0]  ;;  %v11855_v48 = vld [vmem:[#allocation2 + $0x4c] sm:$0xf]  ;;  %v8531_v31 = vld [vmem:[#allocation2 + $0x350] sm:$0xf]  ;;  %v8568_v32 = vor.u32 %v11960_v24, %v8565_v25 }
  0x6e   :  { %1022 = vmatpush.bf16.msrb.mxu0 %v8236_v16  ;;  %1048 = vmatpush.bf16.msrb.mxu2 %v8240_v18  ;;  %v8141_v49 = vld [vmem:[#allocation2 + $0x68] sm:$0xf0]  ;;  %v8107_v54 = vld [vmem:[#allocation2 + $0x8] sm:$0xf]  ;;  %v8396_v57 = vor.u32 %v11923_v47, %v8395_v45  ;;  %v8344_v16 = vor.u32 %v11904_v7, %v8341_v8  ;;  %v11900_v18 = vld [vmem:[#allocation2 + $0x1ac] sm:$0xf0] }
  0x6f   :  { %v11919_v50 = vld [vmem:[#allocation2 + $0x24c] sm:$0xf]  ;;  %v11851_v56 = vld [vmem:[#allocation2 + $0x24] sm:$0xf0]  ;;  %v8144_v58 = vor.u32 %v11855_v48, %v8141_v49  ;;  %v11956_v33 = vld [vmem:[#allocation2 + $0x36c] sm:$0xf0] }
  0x70   :  { %1035 = vmatpush.bf16.msrb.mxu1 %v8492_v17  ;;  %1061 = vmatpush.bf16.msrb.mxu3 %v8496_v22  ;;  %v8397_v51 = vld [vmem:[#allocation2 + $0x268] sm:$0xf0]  ;;  %v8363_v59 = vld [vmem:[#allocation2 + $0x208] sm:$0xf]  ;;  %v8108_v5 = vor.u32 %v11851_v56, %v8107_v54  ;;  %v8307_v17 = vld [vmem:[#allocation2 + $0x190] sm:$0xf]  ;;  %v8532_v39 = vor.u32 %v11956_v33, %v8531_v31 }
  0x71   :  { %v11915_v60 = vld [vmem:[#allocation2 + $0x224] sm:$0xf0]  ;;  %v11847_v61 = vld [vmem:[#allocation2 + $0xc] sm:$0xf]  ;;  %v8400_v62 = vor.u32 %v11919_v50, %v8397_v51  ;;  %v11896_v22 = vld [vmem:[#allocation2 + $0x194] sm:$0xf]  ;;  %v8308_v26 = vor.u32 %v11900_v18, %v8307_v17 }
  0x72   :  { %1023 = vmatpush.bf16.msrb.mxu0 %v8204_v28  ;;  %1049 = vmatpush.bf16.msrb.mxu2 %v8208_v30  ;;  %v8109_v63 = vld [vmem:[#allocation2 + $0x28] sm:$0xf0]  ;;  %v8364_v9 = vor.u32 %v11915_v60, %v8363_v59  ;;  %v8312_v28 = vor.u32 %v11896_v22, %v8309_v23  ;;  %v11892_v30 = vld [vmem:[#allocation2 + $0x16c] sm:$0xf0]  ;;  %v8277_v35 = vld [vmem:[#allocation2 + $0x170] sm:$0xf0] }
  0x73   :  { %v11911_v0 = vld [vmem:[#allocation2 + $0x20c] sm:$0xf]  ;;  %v8112_v10 = vor.u32 %v11847_v61, %v8109_v63  ;;  %v11952_v36 = vld [vmem:[#allocation2 + $0x354] sm:$0xf]  ;;  %v8499_v43 = vld [vmem:[#allocation2 + $0x310] sm:$0xf] }
  0x74   :  { %1036 = vmatpush.bf16.msrb.mxu1 %v8460_v29  ;;  %1062 = vmatpush.bf16.msrb.mxu3 %v8464_v34  ;;  %v8365_v1 = vld [vmem:[#allocation2 + $0x228] sm:$0xf0]  ;;  %v8275_v29 = vld [vmem:[#allocation2 + $0x150] sm:$0xf]  ;;  %v11888_v34 = vld [vmem:[#allocation2 + $0x154] sm:$0xf] }
  0x75   :  { %v8368_v13 = vor.u32 %v11911_v0, %v8365_v1  ;;  %v8533_v37 = vld [vmem:[#allocation2 + $0x370] sm:$0xf0]  ;;  %v8276_v38 = vor.u32 %v11892_v30, %v8275_v29  ;;  %v11948_v45 = vld [vmem:[#allocation2 + $0x32c] sm:$0xf0] }
  0x76   :  { %1024 = vmatpush.bf16.msrb.mxu0 %v8172_v40  ;;  %1050 = vmatpush.bf16.msrb.mxu2 %v8176_v42  ;;  %v8280_v40 = vor.u32 %v11888_v34, %v8277_v35  ;;  %v11884_v42 = vld [vmem:[#allocation2 + $0x12c] sm:$0xf0]  ;;  %v8536_v44 = vor.u32 %v11952_v36, %v8533_v37  ;;  %v8245_v47 = vld [vmem:[#allocation2 + $0x130] sm:$0xf0]  ;;  %v8500_v51 = vor.u32 %v11948_v45, %v8499_v43  ;;  %v8347_v36 = vld [vmem:[#allocation2 + $0x1d8] sm:$0xf] }
  0x77   :  { %v11944_v48 = vld [vmem:[#allocation2 + $0x314] sm:$0xf]  ;;  %v8211_v54 = vld [vmem:[#allocation2 + $0xd0] sm:$0xf]  ;;  %v11909_v37 = vld [vmem:[#allocation2 + $0x1f4] sm:$0xf0] }
  0x78   :  { %1037 = vmatpush.bf16.msrb.mxu1 %v8428_v41  ;;  %1063 = vmatpush.bf16.msrb.mxu3 %v8432_v46  ;;  %v8243_v41 = vld [vmem:[#allocation2 + $0x110] sm:$0xf]  ;;  %v11880_v46 = vld [vmem:[#allocation2 + $0x114] sm:$0xf]  ;;  %v11969_v45 = vld [vmem:[#allocation2 + $0x3dc] sm:$0xf] }
  0x79   :  { %v8501_v49 = vld [vmem:[#allocation2 + $0x330] sm:$0xf0]  ;;  %v8244_v50 = vor.u32 %v11884_v42, %v8243_v41  ;;  %v11876_v56 = vld [vmem:[#allocation2 + $0xec] sm:$0xf0]  ;;  %v11905_v41 = vld [vmem:[#allocation2 + $0x1dc] sm:$0xf] }
  0x7a   :  { %1025 = vmatpush.bf16.msrb.mxu0 %v8140_v53  ;;  %1051 = vmatpush.bf16.msrb.mxu2 %v8144_v58  ;;  %v8248_v53 = vor.u32 %v11880_v46, %v8245_v47  ;;  %v8504_v58 = vor.u32 %v11944_v48, %v8501_v49  ;;  %v11940_v59 = vld [vmem:[#allocation2 + $0x2ec] sm:$0xf0]  ;;  %v11872_v60 = vld [vmem:[#allocation2 + $0xd4] sm:$0xf]  ;;  %v8212_v0 = vor.u32 %v11876_v56, %v8211_v54  ;;  %v8349_v42 = vld [vmem:[#allocation2 + $0x1f8] sm:$0xf0] }
  0x7b   :  { %v8213_v61 = vld [vmem:[#allocation2 + $0xf0] sm:$0xf0]  ;;  %v8179_v3 = vld [vmem:[#allocation2 + $0x90] sm:$0xf]  ;;  %v8605_v46 = vld [vmem:[#allocation2 + $0x3f8] sm:$0xf0]  ;;  %v8348_v48 = vor.u32 %v11909_v37, %v8347_v36 }
  0x7c   :  { %1038 = vmatpush.bf16.msrb.mxu1 %v8396_v57  ;;  %1064 = vmatpush.bf16.msrb.mxu3 %v8400_v62  ;;  %v8467_v57 = vld [vmem:[#allocation2 + $0x2d0] sm:$0xf]  ;;  %v11936_v62 = vld [vmem:[#allocation2 + $0x2d4] sm:$0xf]  ;;  %v8216_v2 = vor.u32 %v11872_v60, %v8213_v61  ;;  %v8571_v54 = vld [vmem:[#allocation2 + $0x398] sm:$0xf]  ;;  %v8608_v56 = vor.u32 %v11969_v45, %v8605_v46 }
  0x7d   :  { %v8469_v63 = vld [vmem:[#allocation2 + $0x2f0] sm:$0xf0]  ;;  %v8468_v1 = vor.u32 %v11940_v59, %v8467_v57  ;;  %v11868_v4 = vld [vmem:[#allocation2 + $0xac] sm:$0xf0]  ;;  %v11965_v57 = vld [vmem:[#allocation2 + $0x3b4] sm:$0xf0] }
  0x7e   :  { %1026 = vmatpush.bf16.msrb.mxu0 %v8108_v5  ;;  %1052 = vmatpush.bf16.msrb.mxu2 %v8112_v10  ;;  %v8435_v5 = vld [vmem:[#allocation2 + $0x290] sm:$0xf]  ;;  %v8472_v6 = vor.u32 %v11936_v62, %v8469_v63  ;;  %v11864_v8 = vld [vmem:[#allocation2 + $0x94] sm:$0xf]  ;;  %v8180_v12 = vor.u32 %v11868_v4, %v8179_v3  ;;  %v8317_v59 = vld [vmem:[#allocation2 + $0x1b8] sm:$0xf0]  ;;  %v8572_v63 = vor.u32 %v11965_v57, %v8571_v54 }
  0x7f   :  { %v11932_v7 = vld [vmem:[#allocation2 + $0x2ac] sm:$0xf0]  ;;  %v11928_v10 = vld [vmem:[#allocation2 + $0x294] sm:$0xf]  ;;  %v11961_v60 = vld [vmem:[#allocation2 + $0x39c] sm:$0xf] }
  0x80   :  { %1039 = vmatpush.bf16.msrb.mxu1 %v8364_v9  ;;  %1065 = vmatpush.bf16.msrb.mxu3 %v8368_v13  ;;  %v8181_v9 = vld [vmem:[#allocation2 + $0xb0] sm:$0xf0]  ;;  %v8436_v13 = vor.u32 %v11932_v7, %v8435_v5  ;;  %v8403_v17 = vld [vmem:[#allocation2 + $0x250] sm:$0xf]  ;;  %v8573_v61 = vld [vmem:[#allocation2 + $0x3b8] sm:$0xf0] }
  0x81   :  { %1027 = vmatmul.bf16.vlgmr.msrb.gmra.mxu0 %v13284_v52  ;;  %1053 = vmatmul.bf16.vlgmr.msrb.gmra.mxu2 %v13284_v52  ;;  %v8437_v11 = vld [vmem:[#allocation2 + $0x2b0] sm:$0xf0]  ;;  %v11924_v19 = vld [vmem:[#allocation2 + $0x26c] sm:$0xf0]  ;;  %v8539_v3 = vld [vmem:[#allocation2 + $0x358] sm:$0xf]  ;;  %v8576_v4 = vor.u32 %v11961_v60, %v8573_v61 }
  0x82   :  { %1071 = vmatpush.bf16.msra.mxu0 %v8340_v14  ;;  %1097 = vmatpush.bf16.msra.mxu2 %v8344_v16  ;;  %v8184_v14 = vor.u32 %v11864_v8, %v8181_v9  ;;  %v11860_v16 = vld [vmem:[#allocation2 + $0x6c] sm:$0xf0]  ;;  %v8440_v18 = vor.u32 %v11928_v10, %v8437_v11  ;;  %v8149_v21 = vld [vmem:[#allocation2 + $0x70] sm:$0xf0]  ;;  %v11957_v5 = vld [vmem:[#allocation2 + $0x374] sm:$0xf0] }
  0x83   :  { %1040 = vmatmul.bf16.vlgmr.msrb.gmra.mxu1 %v13286_v55  ;;  %1066 = vmatmul.bf16.vlgmr.msrb.gmra.mxu3 %v13286_v55  ;;  %v11920_v22 = vld [vmem:[#allocation2 + $0x254] sm:$0xf]  ;;  %v8115_v25 = vld [vmem:[#allocation2 + $0x10] sm:$0xf]  ;;  %v8285_v7 = vld [vmem:[#allocation2 + $0x178] sm:$0xf0]  ;;  %v8540_v11 = vor.u32 %v11957_v5, %v8539_v3 }
  0x84   :  { %1084 = vmatpush.bf16.msra.mxu1 %v8596_v15  ;;  %1110 = vmatpush.bf16.msra.mxu3 %v8600_v20  ;;  %v8147_v15 = vld [vmem:[#allocation2 + $0x50] sm:$0xf]  ;;  %v11856_v20 = vld [vmem:[#allocation2 + $0x54] sm:$0xf]  ;;  %v11953_v8 = vld [vmem:[#allocation2 + $0x35c] sm:$0xf] }
  0x85   :  { %v8405_v23 = vld [vmem:[#allocation2 + $0x270] sm:$0xf0]  ;;  %v8148_v24 = vor.u32 %v11860_v16, %v8147_v15  ;;  %v8371_v29 = vld [vmem:[#allocation2 + $0x210] sm:$0xf]  ;;  %v8541_v9 = vld [vmem:[#allocation2 + $0x378] sm:$0xf0] }
  0x86   :  { %1072 = vmatpush.bf16.msra.mxu0 %v8308_v26  ;;  %1098 = vmatpush.bf16.msra.mxu2 %v8312_v28  ;;  %v11852_v26 = vld [vmem:[#allocation2 + $0x2c] sm:$0xf0]  ;;  %v8152_v28 = vor.u32 %v11856_v20, %v8149_v21  ;;  %v11848_v31 = vld [vmem:[#allocation2 + $0x14] sm:$0xf]  ;;  %v8507_v15 = vld [vmem:[#allocation2 + $0x318] sm:$0xf]  ;;  %v8544_v16 = vor.u32 %v11953_v8, %v8541_v9 }
  0x87   :  { %v11916_v30 = vld [vmem:[#allocation2 + $0x22c] sm:$0xf0]  ;;  %v8117_v33 = vld [vmem:[#allocation2 + $0x30] sm:$0xf0]  ;;  %v11945_v20 = vld [vmem:[#allocation2 + $0x31c] sm:$0xf] }
  0x88   :  { %1085 = vmatpush.bf16.msra.mxu1 %v8564_v27  ;;  %1111 = vmatpush.bf16.msra.mxu3 %v8568_v32  ;;  %v8404_v27 = vor.u32 %v11924_v19, %v8403_v17  ;;  %v8408_v32 = vor.u32 %v11920_v22, %v8405_v23  ;;  %v11912_v34 = vld [vmem:[#allocation2 + $0x214] sm:$0xf]  ;;  %v8372_v43 = vor.u32 %v11916_v30, %v8371_v29  ;;  %v11949_v17 = vld [vmem:[#allocation2 + $0x334] sm:$0xf0]  ;;  %v8253_v19 = vld [vmem:[#allocation2 + $0x138] sm:$0xf0] }
  0x89   :  { %v8373_v35 = vld [vmem:[#allocation2 + $0x230] sm:$0xf0]  ;;  %v8509_v21 = vld [vmem:[#allocation2 + $0x338] sm:$0xf0]  ;;  %v8508_v23 = vor.u32 %v11949_v17, %v8507_v15  ;;  %v11941_v29 = vld [vmem:[#allocation2 + $0x2f4] sm:$0xf0] }
  0x8a   :  { %1073 = vmatpush.bf16.msra.mxu0 %v8276_v38  ;;  %1099 = vmatpush.bf16.msra.mxu2 %v8280_v40  ;;  %v8603_v38 = vld [vmem:[#allocation2 + $0x3d8] sm:$0xf]  ;;  %v8376_v47 = vor.u32 %v11912_v34, %v8373_v35  ;;  %v11873_v30 = vld [vmem:[#allocation2 + $0xdc] sm:$0xf]  ;;  %v8732_v8 = vld [vmem:[#allocation4 + $0xe0] sm:$0xf] }
  0x8b   :  { %v11973_v40 = vld [vmem:[#allocation2 + $0x3f4] sm:$0xf0]  ;;  %v8445_v45 = vld [vmem:[#allocation2 + $0x2b8] sm:$0xf0]  ;;  %v12004_v9 = vld [vmem:[#allocation4 + $0xec] sm:$0xf0] }
  0x8c   :  { %1086 = vmatpush.bf16.msra.mxu1 %v8532_v39  ;;  %1112 = vmatpush.bf16.msra.mxu3 %v8536_v44  ;;  %v8116_v39 = vor.u32 %v11852_v26, %v8115_v25  ;;  %v8120_v44 = vor.u32 %v11848_v31, %v8117_v33  ;;  %v8604_v49 = vor.u32 %v11973_v40, %v8603_v38  ;;  %v8219_v25 = vld [vmem:[#allocation2 + $0xd8] sm:$0xf]  ;;  %v8221_v31 = vld [vmem:[#allocation2 + $0xf8] sm:$0xf0]  ;;  %v8716_v15 = vld [vmem:[#allocation4 + $0xc0] sm:$0xf] }
  0x8d   :  { %v11877_v26 = vld [vmem:[#allocation2 + $0xf4] sm:$0xf0]  ;;  %v8477_v33 = vld [vmem:[#allocation2 + $0x2f8] sm:$0xf0]  ;;  %v8224_v36 = vor.u32 %v11873_v30, %v8221_v31 }
  0x8e   :  { %1074 = vmatpush.bf16.msra.mxu0 %v8244_v50  ;;  %1100 = vmatpush.bf16.msra.mxu2 %v8248_v53  ;;  %v8352_v50 = vor.u32 %v11905_v41, %v8349_v42  ;;  %v11901_v53 = vld [vmem:[#allocation2 + $0x1b4] sm:$0xf0]  ;;  %v8220_v34 = vor.u32 %v11877_v26, %v8219_v25  ;;  %v11865_v42 = vld [vmem:[#allocation2 + $0x9c] sm:$0xf]  ;;  %v12032_v25 = vld [vmem:[#allocation4 + $0x1cc] sm:$0xf0] }
  0x8f   :  { %v8187_v37 = vld [vmem:[#allocation2 + $0x98] sm:$0xf]  ;;  %v8157_v57 = vld [vmem:[#allocation2 + $0x78] sm:$0xf0] }
  0x90   :  { %1087 = vmatpush.bf16.msra.mxu1 %v8500_v51  ;;  %1113 = vmatpush.bf16.msra.mxu3 %v8504_v58  ;;  %v8315_v51 = vld [vmem:[#allocation2 + $0x198] sm:$0xf]  ;;  %v11897_v58 = vld [vmem:[#allocation2 + $0x19c] sm:$0xf] }
  0x91   :  { %v8316_v62 = vor.u32 %v11901_v53, %v8315_v51  ;;  %v11869_v38 = vld [vmem:[#allocation2 + $0xb4] sm:$0xf0]  ;;  %v8125_v5 = vld [vmem:[#allocation2 + $0x38] sm:$0xf0] }
  0x92   :  { %1075 = vmatpush.bf16.msra.mxu0 %v8212_v0  ;;  %1101 = vmatpush.bf16.msra.mxu2 %v8216_v2  ;;  %v8320_v0 = vor.u32 %v11897_v58, %v8317_v59  ;;  %v11893_v2 = vld [vmem:[#allocation2 + $0x174] sm:$0xf0]  ;;  %v8188_v46 = vor.u32 %v11869_v38, %v8187_v37  ;;  %v11921_v58 = vld [vmem:[#allocation2 + $0x25c] sm:$0xf]  ;;  %v12024_v37 = vld [vmem:[#allocation4 + $0x18c] sm:$0xf0] }
  0x93   :  { %v11933_v41 = vld [vmem:[#allocation2 + $0x2b4] sm:$0xf0]  ;;  %v8413_v59 = vld [vmem:[#allocation2 + $0x278] sm:$0xf0] }
  0x94   :  { %1088 = vmatpush.bf16.msra.mxu1 %v8468_v1  ;;  %1114 = vmatpush.bf16.msra.mxu3 %v8472_v6  ;;  %v8283_v1 = vld [vmem:[#allocation2 + $0x158] sm:$0xf]  ;;  %v11889_v6 = vld [vmem:[#allocation2 + $0x15c] sm:$0xf]  ;;  %v8416_v3 = vor.u32 %v11921_v58, %v8413_v59  ;;  %v8988_v58 = vld [vmem:[#allocation4 + $0x2e0] sm:$0xf] }
  0x95   :  { %v8284_v10 = vor.u32 %v11893_v2, %v8283_v1  ;;  %v8411_v51 = vld [vmem:[#allocation2 + $0x258] sm:$0xf]  ;;  %v12068_v59 = vld [vmem:[#allocation4 + $0x2ec] sm:$0xf0] }
  0x96   :  { %1076 = vmatpush.bf16.msra.mxu0 %v8180_v12  ;;  %1102 = vmatpush.bf16.msra.mxu2 %v8184_v14  ;;  %v8288_v12 = vor.u32 %v11889_v6, %v8285_v7  ;;  %v11885_v14 = vld [vmem:[#allocation2 + $0x134] sm:$0xf0]  ;;  %v11913_v6 = vld [vmem:[#allocation2 + $0x21c] sm:$0xf] }
  0x97   :  { %v11925_v54 = vld [vmem:[#allocation2 + $0x274] sm:$0xf0]  ;;  %v8381_v7 = vld [vmem:[#allocation2 + $0x238] sm:$0xf0] }
  0x98   :  { %1089 = vmatpush.bf16.msra.mxu1 %v8436_v13  ;;  %1115 = vmatpush.bf16.msra.mxu3 %v8440_v18  ;;  %v8251_v13 = vld [vmem:[#allocation2 + $0x118] sm:$0xf]  ;;  %v11881_v18 = vld [vmem:[#allocation2 + $0x11c] sm:$0xf] }
  0x99   :  { %v8252_v22 = vor.u32 %v11885_v14, %v8251_v13  ;;  %v8123_v61 = vld [vmem:[#allocation2 + $0x18] sm:$0xf]  ;;  %v8384_v13 = vor.u32 %v11913_v6, %v8381_v7  ;;  %v8733_v14 = vor.u32 %v12004_v9, %v8732_v8  ;;  %v12012_v6 = vld [vmem:[#allocation4 + $0x12c] sm:$0xf0] }
  0x9a   :  { %1077 = vmatpush.bf16.msra.mxu0 %v8148_v24  ;;  %1103 = vmatpush.bf16.msra.mxu2 %v8152_v28  ;;  %v8256_v24 = vor.u32 %v11881_v18, %v8253_v19  ;;  %v8512_v28 = vor.u32 %v11945_v20, %v8509_v21  ;;  %v8379_v1 = vld [vmem:[#allocation2 + $0x218] sm:$0xf]  ;;  %v8860_v18 = vld [vmem:[#allocation4 + $0x1e0] sm:$0xf]  ;;  %v12036_v19 = vld [vmem:[#allocation4 + $0x1ec] sm:$0xf0] }
  0x9b   :  { %v11917_v2 = vld [vmem:[#allocation2 + $0x234] sm:$0xf0]  ;;  %v8861_v20 = vor.u32 %v12036_v19, %v8860_v18  ;;  %v8700_v21 = vld [vmem:[#allocation4 + $0xa0] sm:$0xf] }
  0x9c   :  { %1090 = vmatpush.bf16.msra.mxu1 %v8404_v27  ;;  %1116 = vmatpush.bf16.msra.mxu3 %v8408_v32  ;;  %v8475_v27 = vld [vmem:[#allocation2 + $0x2d8] sm:$0xf]  ;;  %v11937_v32 = vld [vmem:[#allocation2 + $0x2dc] sm:$0xf] }
  0x9d   :  { %v8476_v35 = vor.u32 %v11941_v29, %v8475_v27  ;;  %v8480_v40 = vor.u32 %v11937_v32, %v8477_v33  ;;  %v8684_v27 = vld [vmem:[#allocation4 + $0x80] sm:$0xf]  ;;  %v12028_v29 = vld [vmem:[#allocation4 + $0x1ac] sm:$0xf0] }
  0x9e   :  { %1078 = vmatpush.bf16.msra.mxu0 %v8116_v39  ;;  %1104 = vmatpush.bf16.msra.mxu2 %v8120_v44  ;;  %v8443_v39 = vld [vmem:[#allocation2 + $0x298] sm:$0xf]  ;;  %v11929_v44 = vld [vmem:[#allocation2 + $0x29c] sm:$0xf]  ;;  %v8668_v33 = vld [vmem:[#allocation4 + $0x60] sm:$0xf] }
  0x9f   :  { %v8448_v53 = vor.u32 %v11929_v44, %v8445_v45  ;;  %v307_v30 = vld [vmem:[%s14083_s23] ss:$8 sm:$0xf] }
  0xa0   :  { %1091 = vmatpush.bf16.msra.mxu1 %v8372_v43  ;;  %1117 = vmatpush.bf16.msra.mxu3 %v8376_v47  ;;  %v8189_v43 = vld [vmem:[#allocation2 + $0xb8] sm:$0xf0]  ;;  %v8444_v47 = vor.u32 %v11933_v41, %v8443_v39  ;;  %v308_v31 = vld [vmem:[%s14083_s23] ss:$8 sm:$0xf0] }
  0xa1   :  { %1079 = vmatmul.bf16.vlgmr.msra.gmra.mxu0 %v13284_v52  ;;  %1105 = vmatmul.bf16.vlgmr.msra.gmra.mxu2 %v13284_v52  ;;  %v13310_v38 = vor.u32 %v308_v31, %v307_v30  ;;  %v11984_v41 = vld [vmem:[#allocation4 + $0x4c] sm:$0xf0] }
  0xa2   :  { %1123 = vmatpush.bf16.msrb.mxu0 %v8348_v48  ;;  %1149 = vmatpush.bf16.msrb.mxu2 %v8352_v50  ;;  %v8192_v48 = vor.u32 %v11865_v42, %v8189_v43  ;;  %v11861_v50 = vld [vmem:[#allocation2 + $0x74] sm:$0xf0]  ;;  %v8796_v43 = vld [vmem:[#allocation4 + $0x160] sm:$0xf]  ;;  %v12020_v44 = vld [vmem:[#allocation4 + $0x16c] sm:$0xf0] }
  0xa3   :  { %1092 = vmatmul.bf16.vlgmr.msra.gmra.mxu1 %v13286_v55  ;;  %1118 = vmatmul.bf16.vlgmr.msra.gmra.mxu3 %v13286_v55  ;;  %v311_v45 = vperm.slane %v13310_v38, 0  ;;  %v12164_v30 = vld [vmem:[#allocation4 + $0x5ec] sm:$0xf0] }
  0xa4   :  { %1136 = vmatpush.bf16.msrb.mxu1 %v8604_v49  ;;  %1162 = vmatpush.bf16.msrb.mxu3 %v8608_v56  ;;  %v8155_v49 = vld [vmem:[#allocation2 + $0x58] sm:$0xf]  ;;  %v11857_v56 = vld [vmem:[#allocation2 + $0x5c] sm:$0xf] }
  0xa5   :  { %v8156_v60 = vor.u32 %v11861_v50, %v8155_v49 }
  0xa6   :  { %1124 = vmatpush.bf16.msrb.mxu0 %v8316_v62  ;;  %1150 = vmatpush.bf16.msrb.mxu2 %v8320_v0  ;;  %v8412_v62 = vor.u32 %v11925_v54, %v8411_v51  ;;  %v11853_v0 = vld [vmem:[#allocation2 + $0x34] sm:$0xf0]  ;;  %v8780_v51 = vld [vmem:[#allocation4 + $0x140] sm:$0xf] }
  0xa8   :  { %1137 = vmatpush.bf16.msrb.mxu1 %v8572_v63  ;;  %1163 = vmatpush.bf16.msrb.mxu3 %v8576_v4  ;;  %v8160_v63 = vor.u32 %v11857_v56, %v8157_v57  ;;  %v11849_v4 = vld [vmem:[#allocation2 + $0x1c] sm:$0xf] }
  0xaa   :  { %1125 = vmatpush.bf16.msrb.mxu0 %v8284_v10  ;;  %1151 = vmatpush.bf16.msrb.mxu2 %v8288_v12  ;;  %v8124_v10 = vor.u32 %v11853_v0, %v8123_v61  ;;  %v8128_v12 = vor.u32 %v11849_v4, %v8125_v5  ;;  %v8989_v61 = vor.u32 %v12068_v59, %v8988_v58  ;;  %v8764_v5 = vld [vmem:[#allocation4 + $0x120] sm:$0xf]  ;;  %v12052_v58 = vld [vmem:[#allocation4 + $0x26c] sm:$0xf0] }
  0xab   :  { %v8765_v9 = vor.u32 %v12012_v6, %v8764_v5  ;;  %v9340_v59 = vld [vmem:[#allocation4 + $0x5a0] sm:$0xf]  ;;  %v12116_v5 = vld [vmem:[#allocation4 + $0x46c] sm:$0xf0] }
  0xac   :  { %1138 = vmatpush.bf16.msrb.mxu1 %v8540_v11  ;;  %1164 = vmatpush.bf16.msrb.mxu3 %v8544_v16  ;;  %v8380_v11 = vor.u32 %v11917_v2, %v8379_v1  ;;  %v12000_v16 = vld [vmem:[#allocation4 + $0xcc] sm:$0xf0]  ;;  %v9244_v2 = vld [vmem:[#allocation4 + $0x4e0] sm:$0xf] }
  0xad   :  { %v8717_v17 = vor.u32 %v12000_v16, %v8716_v15  ;;  %v9116_v15 = vld [vmem:[#allocation4 + $0x3e0] sm:$0xf]  ;;  %v12100_v16 = vld [vmem:[#allocation4 + $0x3ec] sm:$0xf0] }
  0xae   :  { %1126 = vmatpush.bf16.msrb.mxu0 %v8252_v22  ;;  %1152 = vmatpush.bf16.msrb.mxu2 %v8256_v24  ;;  %v11996_v22 = vld [vmem:[#allocation4 + $0xac] sm:$0xf0]  ;;  %v8844_v24 = vld [vmem:[#allocation4 + $0x1c0] sm:$0xf] }
  0xaf   :  { %v8845_v26 = vor.u32 %v12032_v25, %v8844_v24 }
  0xb0   :  { %1139 = vmatpush.bf16.msrb.mxu1 %v8508_v23  ;;  %1165 = vmatpush.bf16.msrb.mxu3 %v8512_v28  ;;  %v8701_v23 = vor.u32 %v11996_v22, %v8700_v21  ;;  %v11992_v28 = vld [vmem:[#allocation4 + $0x8c] sm:$0xf0]  ;;  %v8748_v22 = vld [vmem:[#allocation4 + $0x100] sm:$0xf] }
  0xb1   :  { %v12128_v21 = vld [vmem:[#allocation4 + $0x4cc] sm:$0xf0] }
  0xb2   :  { %1127 = vmatpush.bf16.msrb.mxu0 %v8220_v34  ;;  %1153 = vmatpush.bf16.msrb.mxu2 %v8224_v36  ;;  %v11988_v34 = vld [vmem:[#allocation4 + $0x6c] sm:$0xf0]  ;;  %v8812_v36 = vld [vmem:[#allocation4 + $0x180] sm:$0xf] }
  0xb3   :  { %v8813_v39 = vor.u32 %v12024_v37, %v8812_v36  ;;  %v12124_v36 = vld [vmem:[#allocation4 + $0x4ac] sm:$0xf0] }
  0xb4   :  { %1140 = vmatpush.bf16.msrb.mxu1 %v8476_v35  ;;  %1166 = vmatpush.bf16.msrb.mxu3 %v8480_v40  ;;  %v8669_v35 = vor.u32 %v11988_v34, %v8668_v33  ;;  %v8652_v40 = vld [vmem:[#allocation4 + $0x40] sm:$0xf]  ;;  %v12096_v33 = vld [vmem:[#allocation4 + $0x3cc] sm:$0xf0] }
  0xb5   :  { %v8653_v42 = vor.u32 %v11984_v41, %v8652_v40  ;;  %v9212_v34 = vld [vmem:[#allocation4 + $0x4a0] sm:$0xf] }
  0xb6   :  { %1128 = vmatpush.bf16.msrb.mxu0 %v8188_v46  ;;  %1154 = vmatpush.bf16.msrb.mxu2 %v8192_v48  ;;  %v8797_v46 = vor.u32 %v12020_v44, %v8796_v43  ;;  %v11980_v48 = vld [vmem:[#allocation4 + $0x2c] sm:$0xf0]  ;;  %v9213_v40 = vor.u32 %v12124_v36, %v9212_v34  ;;  %v8940_v41 = vld [vmem:[#allocation4 + $0x280] sm:$0xf] }
  0xb7   :  { %v9356_v43 = vld [vmem:[#allocation4 + $0x5c0] sm:$0xf] }
  0xb8   :  { %1141 = vmatpush.bf16.msrb.mxu1 %v8444_v47  ;;  %1167 = vmatpush.bf16.msrb.mxu3 %v8448_v53  ;;  %v8636_v47 = vld [vmem:[#allocation4 + $0x20] sm:$0xf]  ;;  %v12016_v53 = vld [vmem:[#allocation4 + $0x14c] sm:$0xf0] }
  0xb9   :  { %v8637_v49 = vor.u32 %v11980_v48, %v8636_v47  ;;  %v8781_v57 = vor.u32 %v12016_v53, %v8780_v51  ;;  %v12160_v47 = vld [vmem:[#allocation4 + $0x5cc] sm:$0xf0]  ;;  %v9196_v51 = vld [vmem:[#allocation4 + $0x480] sm:$0xf] }
  0xba   :  { %1129 = vmatpush.bf16.msrb.mxu0 %v8156_v60  ;;  %1155 = vmatpush.bf16.msrb.mxu2 %v8160_v63  ;;  %v312_v60 = vperm.slane %v13310_v38, 1  ;;  %v11976_v63 = vld [vmem:[#allocation4 + $0xc] sm:$0xf0]  ;;  %v9357_v48 = vor.u32 %v12160_v47, %v9356_v43  ;;  %v9036_v34 = vld [vmem:[#allocation4 + $0x340] sm:$0xf] }
  0xbb   :  { %v12120_v53 = vld [vmem:[#allocation4 + $0x48c] sm:$0xf0]  ;;  %v9148_v36 = vld [vmem:[#allocation4 + $0x420] sm:$0xf] }
  0xbc   :  { %1142 = vmatpush.bf16.msrb.mxu1 %v8412_v62  ;;  %1168 = vmatpush.bf16.msrb.mxu3 %v8416_v3  ;;  %v8620_v62 = vld [vmem:[#allocation4] sm:$0xf]  ;;  %v12132_v3 = vld [vmem:[#allocation4 + $0x4ec] sm:$0xf0] }
  0xbd   :  { %v8621_v1 = vor.u32 %v11976_v63, %v8620_v62  ;;  %v9245_v4 = vor.u32 %v12132_v3, %v9244_v2  ;;  %v12156_v62 = vld [vmem:[#allocation4 + $0x5ac] sm:$0xf0] }
  0xbe   :  { %1130 = vmatpush.bf16.msrb.mxu0 %v8124_v10  ;;  %1156 = vmatpush.bf16.msrb.mxu2 %v8128_v12  ;;  %v8972_v10 = vld [vmem:[#allocation4 + $0x2c0] sm:$0xf]  ;;  %v12088_v2 = vld [vmem:[#allocation4 + $0x38c] sm:$0xf0] }
  0xc0   :  { %1143 = vmatpush.bf16.msrb.mxu1 %v8380_v11  ;;  %1169 = vmatpush.bf16.msrb.mxu3 %v8384_v13  ;;  %v12064_v13 = vld [vmem:[#allocation4 + $0x2cc] sm:$0xf0] }
  0xc1   :  { %1131 = vmatmul.bf16.vlgmr.msrb.gmra.mxu0 %v13284_v52  ;;  %1157 = vmatmul.bf16.vlgmr.msrb.gmra.mxu2 %v13284_v52  ;;  %v8685_v52 = vor.u32 %v11992_v28, %v8684_v27  ;;  %v8956_v27 = vld [vmem:[#allocation4 + $0x2a0] sm:$0xf]  ;;  %v12060_v28 = vld [vmem:[#allocation4 + $0x2ac] sm:$0xf0] }
  0xc2   :  { %2898 = vmatpush.bf16.msra.mxu0 %v8733_v14  ;;  %2924 = vmatpush.bf16.msra.mxu2 %v8989_v61  ;;  %v8973_v14 = vor.u32 %v12064_v13, %v8972_v10  ;;  %v12048_v10 = vld [vmem:[#allocation4 + $0x24c] sm:$0xf0] }
  0xc3   :  { %1144 = vmatmul.bf16.vlgmr.msrb.gmra.mxu1 %v13286_v55  ;;  %1170 = vmatmul.bf16.vlgmr.msrb.gmra.mxu3 %v13286_v55  ;;  %v8828_v55 = vld [vmem:[#allocation4 + $0x1a0] sm:$0xf] }
  0xc4   :  { %2911 = vmatpush.bf16.msra.mxu1 %v8861_v20  ;;  %v8829_v32 = vor.u32 %v12028_v29, %v8828_v55  ;;  %v9117_v20 = vor.u32 %v12100_v16, %v9116_v15  ;;  %v8957_v29 = vor.u32 %v12060_v28, %v8956_v27  ;;  %v314_v15 = vperm.slane %v13310_v38, 3  ;;  %v9052_v16 = vld [vmem:[#allocation4 + $0x360] sm:$0xf]  ;;  %v12044_v27 = vld [vmem:[#allocation4 + $0x22c] sm:$0xf0] }
  0xc6   :  { %2899 = vmatpush.bf16.msra.mxu0 %v8717_v17  ;;  %v9228_v17 = vld [vmem:[#allocation4 + $0x4c0] sm:$0xf]  ;;  %2925 = vmatpush.bf16.msra.mxu2 %v8973_v14  ;;  %v313_v14 = vperm.slane %v13310_v38, 2 }
  0xc7   :  { %v9229_v25 = vor.u32 %v12128_v21, %v9228_v17  ;;  %2937 = vmatpush.bf16.msra.mxu3 %v9117_v20  ;;  %v12084_v17 = vld [vmem:[#allocation4 + $0x36c] sm:$0xf0] }
  0xc8   :  { %2912 = vmatpush.bf16.msra.mxu1 %v8845_v26  ;;  %v9053_v21 = vor.u32 %v12084_v17, %v9052_v16  ;;  %v11986_v16 = vld [vmem:[#allocation4 + $0x64] sm:$0xf] }
  0xca   :  { %2900 = vmatpush.bf16.msra.mxu0 %v8701_v23  ;;  %v12008_v23 = vld [vmem:[#allocation4 + $0x10c] sm:$0xf0]  ;;  %2926 = vmatpush.bf16.msra.mxu2 %v8957_v29  ;;  %v9308_v29 = vld [vmem:[#allocation4 + $0x560] sm:$0xf] }
  0xcb   :  { %v8749_v26 = vor.u32 %v12008_v23, %v8748_v22  ;;  %v9164_v22 = vld [vmem:[#allocation4 + $0x440] sm:$0xf]  ;;  %v12112_v23 = vld [vmem:[#allocation4 + $0x44c] sm:$0xf0] }
  0xcc   :  { %2913 = vmatpush.bf16.msra.mxu1 %v8829_v32  ;;  %v9100_v32 = vld [vmem:[#allocation4 + $0x3c0] sm:$0xf] }
  0xce   :  { %2901 = vmatpush.bf16.msra.mxu0 %v8685_v52  ;;  %v9372_v52 = vld [vmem:[#allocation4 + $0x5e0] sm:$0xf] }
  0xcf   :  { %v9373_v31 = vor.u32 %v12164_v30, %v9372_v52  ;;  %v12148_v30 = vld [vmem:[#allocation4 + $0x56c] sm:$0xf0] }
  0xd0   :  { %2914 = vmatpush.bf16.msra.mxu1 %v8813_v39 }
  0xd2   :  { %2902 = vmatpush.bf16.msra.mxu0 %v8669_v35  ;;  %v9101_v35 = vor.u32 %v12096_v33, %v9100_v32  ;;  %v9309_v33 = vor.u32 %v12148_v30, %v9308_v29 }
  0xd4   :  { %2915 = vmatpush.bf16.msra.mxu1 %v8797_v46  ;;  %2938 = vmatpush.bf16.msra.mxu3 %v9101_v35  ;;  %v12080_v35 = vld [vmem:[#allocation4 + $0x34c] sm:$0xf0] }
  0xd6   :  { %2903 = vmatpush.bf16.msra.mxu0 %v8653_v42  ;;  %v12056_v42 = vld [vmem:[#allocation4 + $0x28c] sm:$0xf0] }
  0xd7   :  { %v8941_v46 = vor.u32 %v12056_v42, %v8940_v41  ;;  %v9037_v41 = vor.u32 %v12080_v35, %v9036_v34  ;;  %v12108_v42 = vld [vmem:[#allocation4 + $0x42c] sm:$0xf0] }
  0xd8   :  { %2916 = vmatpush.bf16.msra.mxu1 %v8781_v57  ;;  %v8924_v57 = vld [vmem:[#allocation4 + $0x260] sm:$0xf]  ;;  %v9149_v47 = vor.u32 %v12108_v42, %v9148_v36  ;;  %v12136_v34 = vld [vmem:[#allocation4 + $0x50c] sm:$0xf0]  ;;  %v12034_v42 = vld [vmem:[#allocation4 + $0x1e4] sm:$0xf] }
  0xd9   :  { %2927 = vmatpush.bf16.msra.mxu2 %v8941_v46  ;;  %v8925_v61 = vor.u32 %v12052_v58, %v8924_v57  ;;  %v9292_v57 = vld [vmem:[#allocation4 + $0x540] sm:$0xf]  ;;  %v12144_v58 = vld [vmem:[#allocation4 + $0x54c] sm:$0xf0] }
  0xda   :  { %2904 = vmatpush.bf16.msra.mxu0 %v8637_v49  ;;  %v9084_v49 = vld [vmem:[#allocation4 + $0x3a0] sm:$0xf] }
  0xdc   :  { %2917 = vmatpush.bf16.msra.mxu1 %v8765_v9 }
  0xdd   :  { %2928 = vmatpush.bf16.msra.mxu2 %v8925_v61  ;;  %v9020_v61 = vld [vmem:[#allocation4 + $0x320] sm:$0xf] }
  0xde   :  { %v976_v50 = vpop.f32.mrf.mxu0  ;;  %2905 = vmatpush.bf16.msra.mxu0 %v8621_v1  ;;  %v9068_v1 = vld [vmem:[#allocation4 + $0x380] sm:$0xf] }
  0xdf   :  { %v977_v54 = vadd.f32 %v976_v50, %v311_v45  ;;  %v12092_v50 = vld [vmem:[#allocation4 + $0x3ac] sm:$0xf0]  ;;  %v9069_v3 = vor.u32 %v12088_v2, %v9068_v1 }
  0xe0   :  { %v989_v56 = vpop.f32.mrf.mxu1  ;;  %2918 = vmatpush.bf16.msra.mxu1 %v8749_v26  ;;  %v8892_v26 = vld [vmem:[#allocation4 + $0x220] sm:$0xf] }
  0xe1   :  { %v990_v0 = vadd.f32 %v989_v56, %v977_v54  ;;  %v9085_v54 = vor.u32 %v12092_v50, %v9084_v49  ;;  %v9197_v56 = vor.u32 %v12120_v53, %v9196_v51  ;;  %v12040_v49 = vld [vmem:[#allocation4 + $0x20c] sm:$0xf0] }
  0xe2   :  { %2950 = vmatpush.bf16.msrb.mxu0 %v9245_v4  ;;  %v9180_v4 = vld [vmem:[#allocation4 + $0x460] sm:$0xf] }
  0xe3   :  { %1175 = vst [vmem:[%s14039_s10] sm:$0xff] %v990_v0  ;;  %v8609_v7 = vmul.f32 -1.442695, %v990_v0  ;;  %2939 = vmatpush.bf16.msra.mxu3 %v9085_v54  ;;  %v9341_v0 = vor.u32 %v12156_v62, %v9340_v59  ;;  %v9181_v9 = vor.u32 %v12116_v5, %v9180_v4  ;;  %v12076_v62 = vld [vmem:[#allocation4 + $0x32c] sm:$0xf0]  ;;  %v9500_v5 = vld [vmem:[#allocation4 + $0x6e0] sm:$0xf] }
  0xe4   :  { %v1002_v8 = vpop.f32.mrf.mxu2  ;;  %2963 = vmatpush.bf16.msrb.mxu1 %v9373_v31  ;;  %v12104_v4 = vld [vmem:[#allocation4 + $0x40c] sm:$0xf0] }
  0xe5   :  { %v1003_v11 = vadd.f32 %v1002_v8, %v312_v60  ;;  %12790 = vpow2.f32 %v8609_v7  ;;  %v8908_v7 = vld [vmem:[#allocation4 + $0x240] sm:$0xf] }
  0xe6   :  { %v1015_v12 = vpop.f32.mrf.mxu3  ;;  %v978_v19 = vpop.f32.mrf.mxu0  ;;  %2951 = vmatpush.bf16.msrb.mxu0 %v9229_v25  ;;  %v9165_v25 = vor.u32 %v12112_v23, %v9164_v22 }
  0xe7   :  { %v1016_v18 = vadd.f32 %v1015_v12, %v1003_v11  ;;  %v9324_v11 = vld [vmem:[#allocation4 + $0x580] sm:$0xf]  ;;  %v12152_v12 = vld [vmem:[#allocation4 + $0x58c] sm:$0xf0]  ;;  %2940 = vmatpush.bf16.msra.mxu3 %v9069_v3  ;;  %v8909_v19 = vor.u32 %v12048_v10, %v8908_v7  ;;  %v9021_v3 = vor.u32 %v12076_v62, %v9020_v61  ;;  %v12002_v10 = vld [vmem:[#allocation4 + $0xe4] sm:$0xf] }
  0xe8   :  { %v991_v24 = vpop.f32.mrf.mxu1  ;;  %2964 = vmatpush.bf16.msrb.mxu1 %v9357_v48  ;;  %v9325_v20 = vor.u32 %v12152_v12, %v9324_v11  ;;  %v8876_v48 = vld [vmem:[#allocation4 + $0x200] sm:$0xf]  ;;  %v8734_v11 = vld [vmem:[#allocation4 + $0xf0] sm:$0xf0] }
  0xe9   :  { %1176 = vst [vmem:[%s14039_s10 + $0x8] sm:$0xff] %v1016_v18  ;;  %v8610_v55 = vmul.f32 -1.442695, %v1016_v18  ;;  %2929 = vmatpush.bf16.msra.mxu2 %v8909_v19  ;;  %v9276_v12 = vld [vmem:[#allocation4 + $0x520] sm:$0xf]  ;;  %v8737_v17 = vor.u32 %v12002_v10, %v8734_v11 }
  0xea   :  { %2952 = vmatpush.bf16.msrb.mxu0 %v9213_v40  ;;  %v8830_v11 = vld [vmem:[#allocation4 + $0x1b0] sm:$0xf0] }
  0xeb   :  { %12792 = vpow2.f32 %v8610_v55  ;;  %v12791_v37 = vpop.eup %12790  ;;  %v8893_v55 = vor.u32 %v12044_v27, %v8892_v26  ;;  %2941 = vmatpush.bf16.msra.mxu3 %v9053_v21  ;;  %v12072_v21 = vld [vmem:[#allocation4 + $0x30c] sm:$0xf0]  ;;  %v11998_v27 = vld [vmem:[#allocation4 + $0xc4] sm:$0xf] }
  0xec   :  { %v1004_v39 = vpop.f32.mrf.mxu2  ;;  %v13320_v44 = vadd.f32 1.0, %v12791_v37  ;;  %2965 = vmatpush.bf16.msrb.mxu1 %v9341_v0  ;;  %v9132_v0 = vld [vmem:[#allocation4 + $0x400] sm:$0xf]  ;;  %v12192_v26 = vld [vmem:[#allocation4 + $0x6cc] sm:$0xf0] }
  0xed   :  { %2930 = vmatpush.bf16.msra.mxu2 %v8893_v55  ;;  %v12228_v39 = vld [vmem:[#allocation4 + $0x7ec] sm:$0xf0] }
  0xee   :  { %v1017_v45 = vpop.f32.mrf.mxu3  ;;  %12794 = vrcp.f32 %v13320_v44  ;;  %2953 = vmatpush.bf16.msrb.mxu0 %v9197_v56  ;;  %v1224_v6 = vand.u32 2147483647, %v13320_v44  ;;  %v1226_v18 = vand.u32 2147483648, %v13320_v44  ;;  %vm1220_vm0 = vweird.f32 %v13320_v44 }
  0xef   :  { %v8877_v56 = vor.u32 %v12040_v49, %v8876_v48  ;;  %2942 = vmatpush.bf16.msra.mxu3 %v9037_v41  ;;  %v11994_v48 = vld [vmem:[#allocation4 + $0xa4] sm:$0xf] }
  0xf0   :  { %vm13336_vm2 = vcmp.eq.f32.partialorder %v1224_v6, 8.507059e+37  ;;  %2966 = vmatpush.bf16.msrb.mxu1 %v9325_v20  ;;  %v1227_v40 = vor.u32 1.1754944e-38, %v1226_v18  ;;  %v12196_v6 = vld [vmem:[#allocation4 + $0x6ec] sm:$0xf0]  ;;  %v9004_v20 = vld [vmem:[#allocation4 + $0x300] sm:$0xf] }
  0xf1   :  { %v12793_v60 = vpop.eup %12792  ;;  %2931 = vmatpush.bf16.msra.mxu2 %v8877_v56  ;;  %v12140_v18 = vld [vmem:[#allocation4 + $0x52c] sm:$0xf0] }
  0xf2   :  { %v13323_v63 = vadd.f32 1.0, %v12793_v60  ;;  %2954 = vmatpush.bf16.msrb.mxu0 %v9181_v9  ;;  %v9293_v60 = vor.u32 %v12144_v58, %v9292_v57  ;;  %v9501_v9 = vor.u32 %v12196_v6, %v9500_v5  ;;  %v9277_v19 = vor.u32 %v12140_v18, %v9276_v12  ;;  %v12224_v56 = vld [vmem:[#allocation4 + $0x7cc] sm:$0xf0]  ;;  %v12030_v57 = vld [vmem:[#allocation4 + $0x1c4] sm:$0xf] }
  0xf3   :  { %2943 = vmatpush.bf16.msra.mxu3 %v9021_v3  ;;  %v8686_v3 = vld [vmem:[#allocation4 + $0x90] sm:$0xf0]  ;;  %v9596_v6 = vld [vmem:[#allocation4 + $0x7a0] sm:$0xf] }
  0xf4   :  { %12796 = vrcp.f32 %v13323_v63  ;;  %v13327_v8 = vpop.eup %12794  ;;  %v1241_v52 = vand.u32 2147483648, %v13323_v63  ;;  %vm1235_vm3 = vweird.f32 %v13323_v63  ;;  %v1239_v46 = vand.u32 2147483647, %v13323_v63  ;;  %2967 = vmatpush.bf16.msrb.mxu1 %v9309_v33  ;;  %v9260_v33 = vld [vmem:[#allocation4 + $0x500] sm:$0xf] }
  0xf5   :  { %v1216_v13 = vmul.f32 %v13327_v8, %v13320_v44  ;;  %vm1221_vm1 = vweird.f32 %v13327_v8  ;;  %2976 = vmatpush.bf16.msrb.mxu2 %v9501_v9  ;;  %v12026_v9 = vld [vmem:[#allocation4 + $0x1a4] sm:$0xf] }
  0xf6   :  { %vm13351_vm4 = vmor %vm1220_vm0, %vm1221_vm1  ;;  %2955 = vmatpush.bf16.msrb.mxu0 %v9165_v25  ;;  %v1242_v54 = vor.u32 1.1754944e-38, %v1241_v52  ;;  %vm13379_vm7 = vcmp.eq.f32.partialorder %v1239_v46, 8.507059e+37  ;;  %v9484_v25 = vld [vmem:[#allocation4 + $0x6c0] sm:$0xf]  ;;  %v8833_v12 = vor.u32 %v12026_v9, %v8830_v11 }
  0xf7   :  { %v1217_v24 = vsub.f32 1.0, %v1216_v13  ;;  %v9485_v30 = vor.u32 %v12192_v26, %v9484_v25  ;;  %v9468_v46 = vld [vmem:[#allocation4 + $0x6a0] sm:$0xf]  ;;  %v12022_v26 = vld [vmem:[#allocation4 + $0x184] sm:$0xf] }
  0xf8   :  { %2968 = vmatpush.bf16.msrb.mxu1 %v9293_v60  ;;  %v8846_v60 = vld [vmem:[#allocation4 + $0x1d0] sm:$0xf0]  ;;  %v9388_v9 = vld [vmem:[#allocation4 + $0x600] sm:$0xf] }
  0xf9   :  { %v1218_v32 = vmul.f32 %v13327_v8, %v1217_v24  ;;  %v9005_v24 = vor.u32 %v12072_v21, %v9004_v20  ;;  %2977 = vmatpush.bf16.msrb.mxu2 %v9485_v30  ;;  %v8849_v62 = vor.u32 %v12030_v57, %v8846_v60  ;;  %v9548_v60 = vld [vmem:[#allocation4 + $0x740] sm:$0xf] }
  0xfa   :  { %v13341_v31 = vpop.eup %12796  ;;  %2956 = vmatpush.bf16.msrb.mxu0 %v9149_v47  ;;  %v12188_v47 = vld [vmem:[#allocation4 + $0x6ac] sm:$0xf0] }
  0xfb   :  { %v1231_v37 = vmul.f32 %v13341_v31, %v13323_v63  ;;  %vm1236_vm5 = vweird.f32 %v13341_v31  ;;  %v1219_v45 = vadd.f32 %v13327_v8, %v1218_v32  ;;  %v8718_v32 = vld [vmem:[#allocation4 + $0xd0] sm:$0xf0]  ;;  %2944 = vmatpush.bf16.msra.mxu3 %v9005_v24 }
  0xfc   :  { %vm13360_vm6 = vmor %vm1235_vm3, %vm1236_vm5  ;;  %2969 = vmatpush.bf16.msrb.mxu1 %v9277_v19  ;;  %v8721_v36 = vor.u32 %v11998_v27, %v8718_v32  ;;  %v8670_v19 = vld [vmem:[#allocation4 + $0x70] sm:$0xf0] }
  0xfd   :  { %v1232_v50 = vsub.f32 1.0, %v1231_v37  ;;  %v1223_v59 = vsel %vm13351_vm4, %v13327_v8, %v1219_v45  ;;  %v9133_v8 = vor.u32 %v12104_v4, %v9132_v0  ;;  %v9628_v37 = vld [vmem:[#allocation4 + $0x7e0] sm:$0xf]  ;;  %v8673_v21 = vor.u32 %v11986_v16, %v8670_v19  ;;  %v8814_v27 = vld [vmem:[#allocation4 + $0x190] sm:$0xf0] }
  0xfe   :  { %v1028_v43 = vpop.f32.mrf.mxu0  ;;  %v1228_v1 = vsel %vm13336_vm2, %v1227_v40, %v1223_v59  ;;  %v9629_v41 = vor.u32 %v12228_v39, %v9628_v37  ;;  %v9452_v0 = vld [vmem:[#allocation4 + $0x680] sm:$0xf]  ;;  %v12212_v39 = vld [vmem:[#allocation4 + $0x76c] sm:$0xf0]  ;;  %v8622_v16 = vld [vmem:[#allocation4 + $0x10] sm:$0xf0] }
  0xff   :  { %v1029_v44 = vadd.f32 %v1028_v43, %v313_v14  ;;  %v1233_v2 = vmul.f32 %v13341_v31, %v1232_v50  ;;  %1335 = vst [vmem:[%s14047_s18] sm:$0xff] %v1228_v1  ;;  %v13373_v7 = vpack.c.bf16 %v1228_v1, %v1228_v1  ;;  %2957 = vmatpush.bf16.msrb.mxu0 %v9133_v8  ;;  %v8862_v43 = vld [vmem:[#allocation4 + $0x1f0] sm:$0xf0]  ;;  %v11990_v1 = vld [vmem:[#allocation4 + $0x84] sm:$0xf]  ;;  %v12220_v8 = vld [vmem:[#allocation4 + $0x7ac] sm:$0xf0] }
 0x100   :  { %v1041_v51 = vpop.f32.mrf.mxu1  ;;  %v8865_v45 = vor.u32 %v12034_v42, %v8862_v43  ;;  %2989 = vmatpush.bf16.msrb.mxu3 %v9629_v41  ;;  %v9469_v50 = vor.u32 %v12188_v47, %v9468_v46  ;;  %v8689_v5 = vor.u32 %v11990_v1, %v8686_v3  ;;  %v9597_v10 = vor.u32 %v12220_v8, %v9596_v6  ;;  %v9564_v37 = vld [vmem:[#allocation4 + $0x760] sm:$0xf]  ;;  %v12018_v42 = vld [vmem:[#allocation4 + $0x164] sm:$0xf]  ;;  %v8798_v43 = vld [vmem:[#allocation4 + $0x170] sm:$0xf0] }
 0x101   :  { %v1042_v63 = vadd.f32 %v1041_v51, %v1029_v44  ;;  %v1234_v14 = vadd.f32 %v13341_v31, %v1233_v2  ;;  %2906 = vmatmul.bf16.vlgmr.msra.gmra.mxu0 %v13373_v7  ;;  %v8702_v44 = vld [vmem:[#allocation4 + $0xb0] sm:$0xf0]  ;;  %v9565_v41 = vor.u32 %v12212_v39, %v9564_v37  ;;  %v8801_v46 = vor.u32 %v12018_v42, %v8798_v43  ;;  %v9404_v47 = vld [vmem:[#allocation4 + $0x620] sm:$0xf] }
 0x102   :  { %v8705_v53 = vor.u32 %v11994_v48, %v8702_v44  ;;  %2978 = vmatpush.bf16.msrb.mxu2 %v9469_v50  ;;  %v12172_v48 = vld [vmem:[#allocation4 + $0x62c] sm:$0xf0]  ;;  %v9516_v43 = vld [vmem:[#allocation4 + $0x700] sm:$0xf]  ;;  %v8750_v50 = vld [vmem:[#allocation4 + $0x110] sm:$0xf0] }
 0x103   :  { %1177 = vst [vmem:[%s14039_s10 + $0x10] sm:$0xff] %v1042_v63  ;;  %v8611_v13 = vmul.f32 -1.442695, %v1042_v63  ;;  %v1238_v23 = vsel %vm13360_vm6, %v13341_v31, %v1234_v14  ;;  %3002 = vmatpush.bf16.msra.mxu0 %v8737_v17  ;;  %v12184_v63 = vld [vmem:[#allocation4 + $0x68c] sm:$0xf0] }
 0x104   :  { %v1054_v22 = vpop.f32.mrf.mxu2  ;;  %v1243_v55 = vsel %vm13379_vm7, %v1242_v54, %v1238_v23  ;;  %v9612_v54 = vld [vmem:[#allocation4 + $0x7c0] sm:$0xf]  ;;  %v9453_v4 = vor.u32 %v12184_v63, %v9452_v0  ;;  %v12180_v14 = vld [vmem:[#allocation4 + $0x66c] sm:$0xf0]  ;;  %v12098_v44 = vld [vmem:[#allocation4 + $0x3e4] sm:$0xf] }
 0x105   :  { %12798 = vpow2.f32 %v8611_v13  ;;  %v1055_v28 = vadd.f32 %v1054_v22, %v314_v15  ;;  %1336 = vst [vmem:[%s14047_s18 + $0x8] sm:$0xff] %v1243_v55  ;;  %v13394_v31 = vpack.c.bf16 %v1243_v55, %v1243_v55  ;;  %v9261_v15 = vor.u32 %v12136_v34, %v9260_v33  ;;  %v9436_v13 = vld [vmem:[#allocation4 + $0x660] sm:$0xf]  ;;  %v12216_v23 = vld [vmem:[#allocation4 + $0x78c] sm:$0xf0] }
 0x106   :  { %v1067_v52 = vpop.f32.mrf.mxu3  ;;  %v1030_v29 = vpop.f32.mrf.mxu0  ;;  %v9613_v59 = vor.u32 %v12224_v56, %v9612_v54  ;;  %2979 = vmatpush.bf16.msrb.mxu2 %v9453_v4  ;;  %v9437_v18 = vor.u32 %v12180_v14, %v9436_v13  ;;  %v9580_v22 = vld [vmem:[#allocation4 + $0x780] sm:$0xf]  ;;  %v12176_v55 = vld [vmem:[#allocation4 + $0x64c] sm:$0xf0]  ;;  %v8817_v33 = vor.u32 %v12022_v26, %v8814_v27  ;;  %v8638_v54 = vld [vmem:[#allocation4 + $0x30] sm:$0xf0] }
 0x107   :  { %v1068_v40 = vadd.f32 %v1067_v52, %v1055_v28  ;;  %2919 = vmatmul.bf16.vlgmr.msra.gmra.mxu1 %v13394_v31  ;;  %3003 = vmatpush.bf16.msra.mxu0 %v8721_v36  ;;  %v9581_v25 = vor.u32 %v12216_v23, %v9580_v22  ;;  %v9420_v52 = vld [vmem:[#allocation4 + $0x640] sm:$0xf]  ;;  %v11982_v29 = vld [vmem:[#allocation4 + $0x44] sm:$0xf]  ;;  %v8990_v22 = vld [vmem:[#allocation4 + $0x2f0] sm:$0xf0] }
 0x108   :  { %v1043_v35 = vpop.f32.mrf.mxu1  ;;  %2970 = vmatpush.bf16.msrb.mxu1 %v9261_v15  ;;  %2990 = vmatpush.bf16.msrb.mxu3 %v9613_v59  ;;  %v9421_v34 = vor.u32 %v12176_v55, %v9420_v52  ;;  %v11974_v14 = vld [vmem:[#allocation4 + $0x4] sm:$0xf]  ;;  %v316_v23 = vperm.slane %v13310_v38, 5  ;;  %v9532_v55 = vld [vmem:[#allocation4 + $0x720] sm:$0xf] }
 0x109   :  { %1178 = vst [vmem:[%s14039_s10 + $0x18] sm:$0xff] %v1068_v40  ;;  %v8612_v49 = vmul.f32 -1.442695, %v1068_v40  ;;  %v8654_v35 = vld [vmem:[#allocation4 + $0x50] sm:$0xf0]  ;;  %v315_v40 = vperm.slane %v13310_v38, 4  ;;  %v8625_v19 = vor.u32 %v11974_v14, %v8622_v16 }
 0x10a   :  { %2980 = vmatpush.bf16.msrb.mxu2 %v9437_v18  ;;  %v8657_v15 = vor.u32 %v11982_v29, %v8654_v35 }
 0x10b   :  { %v12799_v51 = vpop.eup %12798  ;;  %12800 = vpow2.f32 %v8612_v49  ;;  %3004 = vmatpush.bf16.msra.mxu0 %v8705_v53  ;;  %v11978_v49 = vld [vmem:[#allocation4 + $0x24] sm:$0xf]  ;;  %v9405_v53 = vor.u32 %v12172_v48, %v9404_v47 }
 0x10c   :  { %v13400_v58 = vadd.f32 1.0, %v12799_v51  ;;  %3015 = vmatpush.bf16.msra.mxu1 %v8865_v45  ;;  %v1056_v61 = vpop.f32.mrf.mxu2  ;;  %2991 = vmatpush.bf16.msrb.mxu3 %v9597_v10  ;;  %v8641_v59 = vor.u32 %v11978_v49, %v8638_v54  ;;  %v12168_v10 = vld [vmem:[#allocation4 + $0x60c] sm:$0xf0]  ;;  %v12006_v49 = vld [vmem:[#allocation4 + $0x104] sm:$0xf] }
 0x10d   :  { %v12014_v61 = vld [vmem:[#allocation4 + $0x144] sm:$0xf]  ;;  %v9389_v13 = vor.u32 %v12168_v10, %v9388_v9  ;;  %v8753_v54 = vor.u32 %v12006_v49, %v8750_v50  ;;  %v9086_v10 = vld [vmem:[#allocation4 + $0x3b0] sm:$0xf0] }
 0x10e   :  { %12802 = vrcp.f32 %v13400_v58  ;;  %v1069_v2 = vpop.f32.mrf.mxu3  ;;  %v1254_v30 = vand.u32 2147483647, %v13400_v58  ;;  %v1256_v32 = vand.u32 2147483648, %v13400_v58  ;;  %vm1250_vm8 = vweird.f32 %v13400_v58  ;;  %2981 = vmatpush.bf16.msrb.mxu2 %v9421_v34  ;;  %v12090_v9 = vld [vmem:[#allocation4 + $0x3a4] sm:$0xf] }
 0x10f   :  { %3005 = vmatpush.bf16.msra.mxu0 %v8689_v5  ;;  %v8782_v2 = vld [vmem:[#allocation4 + $0x150] sm:$0xf0] }
 0x110   :  { %3016 = vmatpush.bf16.msra.mxu1 %v8849_v62  ;;  %2992 = vmatpush.bf16.msrb.mxu3 %v9581_v25  ;;  %vm13424_vm11 = vcmp.eq.f32.partialorder %v1254_v30, 8.507059e+37  ;;  %v1257_v51 = vor.u32 1.1754944e-38, %v1256_v32  ;;  %v8785_v8 = vor.u32 %v12014_v61, %v8782_v2  ;;  %v12204_v30 = vld [vmem:[#allocation4 + $0x72c] sm:$0xf0]  ;;  %v12010_v32 = vld [vmem:[#allocation4 + $0x124] sm:$0xf] }
 0x111   :  { %v12801_v17 = vpop.eup %12800  ;;  %v9533_v35 = vor.u32 %v12204_v30, %v9532_v55  ;;  %v8910_v25 = vld [vmem:[#allocation4 + $0x250] sm:$0xf0]  ;;  %v12082_v55 = vld [vmem:[#allocation4 + $0x364] sm:$0xf] }
 0x112   :  { %v13403_v20 = vadd.f32 1.0, %v12801_v17  ;;  %2982 = vmatpush.bf16.msrb.mxu2 %v9405_v53 }
 0x113   :  { %3006 = vmatpush.bf16.msra.mxu0 %v8673_v21  ;;  %v12066_v21 = vld [vmem:[#allocation4 + $0x2e4] sm:$0xf] }
 0x114   :  { %v13405_v24 = vpop.eup %12802  ;;  %3017 = vmatpush.bf16.msra.mxu1 %v8833_v12  ;;  %12804 = vrcp.f32 %v13403_v20  ;;  %2993 = vmatpush.bf16.msrb.mxu3 %v9565_v41  ;;  %vm1265_vm12 = vweird.f32 %v13403_v20  ;;  %v1269_v63 = vand.u32 2147483647, %v13403_v20  ;;  %v1271_v6 = vand.u32 2147483648, %v13403_v20 }
 0x115   :  { %v1246_v28 = vmul.f32 %v13405_v24, %v13400_v58  ;;  %vm1251_vm9 = vweird.f32 %v13405_v24  ;;  %v12208_v58 = vld [vmem:[#allocation4 + $0x74c] sm:$0xf0]  ;;  %v8993_v26 = vor.u32 %v12066_v21, %v8990_v22 }
 0x116   :  { %vm13420_vm10 = vmor %vm1250_vm8, %vm1251_vm9  ;;  %v9549_v1 = vor.u32 %v12208_v58, %v9548_v60  ;;  %vm13449_vm14 = vcmp.eq.f32.partialorder %v1269_v63, 8.507059e+37  ;;  %v1272_v52 = vor.u32 1.1754944e-38, %v1271_v6  ;;  %2983 = vmatpush.bf16.msrb.mxu2 %v9389_v13  ;;  %v8958_v60 = vld [vmem:[#allocation4 + $0x2b0] sm:$0xf0] }
 0x117   :  { %v1247_v36 = vsub.f32 1.0, %v1246_v28  ;;  %3007 = vmatpush.bf16.msra.mxu0 %v8657_v15  ;;  %v12062_v15 = vld [vmem:[#allocation4 + $0x2c4] sm:$0xf]  ;;  %v9102_v63 = vld [vmem:[#allocation4 + $0x3d0] sm:$0xf0] }
 0x118   :  { %3018 = vmatpush.bf16.msra.mxu1 %v8817_v33  ;;  %2994 = vmatpush.bf16.msrb.mxu3 %v9549_v1  ;;  %v8766_v33 = vld [vmem:[#allocation4 + $0x130] sm:$0xf0] }
 0x119   :  { %v1248_v45 = vmul.f32 %v13405_v24, %v1247_v36  ;;  %v8769_v36 = vor.u32 %v12010_v32, %v8766_v33  ;;  %v8926_v13 = vld [vmem:[#allocation4 + $0x270] sm:$0xf0]  ;;  %v12130_v33 = vld [vmem:[#allocation4 + $0x4e4] sm:$0xf] }
 0x11a   :  { %v13428_v56 = vpop.eup %12804  ;;  %v9054_v32 = vld [vmem:[#allocation4 + $0x370] sm:$0xf0] }
 0x11b   :  { %v1249_v57 = vadd.f32 %v13405_v24, %v1248_v45  ;;  %v1261_v62 = vmul.f32 %v13428_v56, %v13403_v20  ;;  %vm1266_vm13 = vweird.f32 %v13428_v56  ;;  %3008 = vmatpush.bf16.msra.mxu0 %v8641_v59  ;;  %v8974_v20 = vld [vmem:[#allocation4 + $0x2d0] sm:$0xf0]  ;;  %v12200_v45 = vld [vmem:[#allocation4 + $0x70c] sm:$0xf0]  ;;  %v12058_v59 = vld [vmem:[#allocation4 + $0x2a4] sm:$0xf] }
 0x11c   :  { %3019 = vmatpush.bf16.msra.mxu1 %v8801_v46  ;;  %vm13461_vm15 = vmor %vm1265_vm12, %vm1266_vm13  ;;  %v8977_v42 = vor.u32 %v12062_v15, %v8974_v20  ;;  %2995 = vmatpush.bf16.msrb.mxu3 %v9533_v35  ;;  %v9517_v48 = vor.u32 %v12200_v45, %v9516_v43  ;;  %v8961_v61 = vor.u32 %v12058_v59, %v8958_v60  ;;  %v8894_v20 = vld [vmem:[#allocation4 + $0x230] sm:$0xf0] }
 0x11d   :  { %v1253_v5 = vsel %vm13420_vm10, %v13405_v24, %v1249_v57  ;;  %v1262_v11 = vsub.f32 1.0, %v1261_v62  ;;  %v9057_v35 = vor.u32 %v12082_v55, %v9054_v32 }
 0x11e   :  { %v1080_v0 = vpop.f32.mrf.mxu0  ;;  %v1258_v12 = vsel %vm13424_vm11, %v1257_v51, %v1253_v5  ;;  %v8942_v5 = vld [vmem:[#allocation4 + $0x290] sm:$0xf0] }
 0x11f   :  { %v1081_v3 = vadd.f32 %v1080_v0, %v315_v40  ;;  %1337 = vst [vmem:[%s14047_s18 + $0x10] sm:$0xff] %v1258_v12  ;;  %v13445_v18 = vpack.c.bf16 %v1258_v12, %v1258_v12  ;;  %v1263_v24 = vmul.f32 %v13428_v56, %v1262_v11  ;;  %3009 = vmatpush.bf16.msra.mxu0 %v8625_v19  ;;  %v12094_v0 = vld [vmem:[#allocation4 + $0x3c4] sm:$0xf]  ;;  %v9070_v19 = vld [vmem:[#allocation4 + $0x390] sm:$0xf0] }
 0x120   :  { %v1093_v4 = vpop.f32.mrf.mxu1  ;;  %3020 = vmatpush.bf16.msra.mxu1 %v8785_v8  ;;  %2996 = vmatpush.bf16.msrb.mxu3 %v9517_v48  ;;  %v9105_v2 = vor.u32 %v12094_v0, %v9102_v63  ;;  %v9089_v11 = vor.u32 %v12090_v9, %v9086_v10  ;;  %v12050_v12 = vld [vmem:[#allocation4 + $0x264] sm:$0xf] }
 0x121   :  { %v1094_v17 = vadd.f32 %v1093_v4, %v1081_v3  ;;  %2932 = vmatmul.bf16.vlgmr.msra.gmra.mxu2 %v13445_v18  ;;  %v1264_v29 = vadd.f32 %v13428_v56, %v1263_v24  ;;  %v12054_v4 = vld [vmem:[#allocation4 + $0x284] sm:$0xf]  ;;  %v8929_v16 = vor.u32 %v12050_v12, %v8926_v13 }
 0x122   :  { %3028 = vmatpush.bf16.msra.mxu2 %v8993_v26  ;;  %v8945_v8 = vor.u32 %v12054_v4, %v8942_v5  ;;  %v12046_v24 = vld [vmem:[#allocation4 + $0x244] sm:$0xf] }
 0x123   :  { %1179 = vst [vmem:[%s14039_s10 + $0x20] sm:$0xff] %v1094_v17  ;;  %v8613_v27 = vmul.f32 -1.442695, %v1094_v17  ;;  %v1268_v40 = vsel %vm13461_vm15, %v13428_v56, %v1264_v29  ;;  %v9118_v56 = vld [vmem:[#allocation4 + $0x3f0] sm:$0xf0] }
 0x124   :  { %v1106_v34 = vpop.f32.mrf.mxu2  ;;  %v1273_v46 = vsel %vm13449_vm14, %v1272_v52, %v1268_v40  ;;  %3021 = vmatpush.bf16.msra.mxu1 %v8769_v36  ;;  %v9121_v57 = vor.u32 %v12098_v44, %v9118_v56  ;;  %v12086_v17 = vld [vmem:[#allocation4 + $0x384] sm:$0xf]  ;;  %v8913_v52 = vor.u32 %v12046_v24, %v8910_v25  ;;  %v8878_v56 = vld [vmem:[#allocation4 + $0x210] sm:$0xf0] }
 0x125   :  { %12806 = vpow2.f32 %v8613_v27  ;;  %v1107_v37 = vadd.f32 %v1106_v34, %v316_v23  ;;  %1338 = vst [vmem:[%s14047_s18 + $0x18] sm:$0xff] %v1273_v46  ;;  %v13474_v53 = vpack.c.bf16 %v1273_v46, %v1273_v46  ;;  %v9073_v23 = vor.u32 %v12086_v17, %v9070_v19  ;;  %v9246_v34 = vld [vmem:[#allocation4 + $0x4f0] sm:$0xf0]  ;;  %v12042_v36 = vld [vmem:[#allocation4 + $0x224] sm:$0xf] }
 0x126   :  { %v1119_v39 = vpop.f32.mrf.mxu3  ;;  %v1082_v41 = vpop.f32.mrf.mxu0  ;;  %3029 = vmatpush.bf16.msra.mxu2 %v8977_v42  ;;  %v317_v27 = vperm.slane %v13310_v38, 6  ;;  %v8897_v40 = vor.u32 %v12042_v36, %v8894_v20  ;;  %v9038_v42 = vld [vmem:[#allocation4 + $0x350] sm:$0xf0]  ;;  %v9249_v48 = vor.u32 %v12130_v33, %v9246_v34  ;;  %v12126_v63 = vld [vmem:[#allocation4 + $0x4c4] sm:$0xf] }
 0x127   :  { %v1120_v51 = vadd.f32 %v1119_v39, %v1107_v37  ;;  %2945 = vmatmul.bf16.vlgmr.msra.gmra.mxu3 %v13474_v53  ;;  %v12078_v41 = vld [vmem:[#allocation4 + $0x344] sm:$0xf]  ;;  %v9006_v25 = vld [vmem:[#allocation4 + $0x310] sm:$0xf0] }
 0x128   :  { %v1095_v47 = vpop.f32.mrf.mxu1  ;;  %3022 = vmatpush.bf16.msra.mxu1 %v8753_v54  ;;  %3041 = vmatpush.bf16.msra.mxu3 %v9121_v57  ;;  %v12038_v54 = vld [vmem:[#allocation4 + $0x204] sm:$0xf]  ;;  %v9358_v34 = vld [vmem:[#allocation4 + $0x5d0] sm:$0xf0] }
 0x129   :  { %1180 = vst [vmem:[%s14039_s10 + $0x28] sm:$0xff] %v1120_v51  ;;  %v8614_v58 = vmul.f32 -1.442695, %v1120_v51  ;;  %v9041_v51 = vor.u32 %v12078_v41, %v9038_v42  ;;  %v12074_v4 = vld [vmem:[#allocation4 + $0x324] sm:$0xf] }
 0x12a   :  { %3030 = vmatpush.bf16.msra.mxu2 %v8961_v61  ;;  %v12162_v10 = vld [vmem:[#allocation4 + $0x5e4] sm:$0xf]  ;;  %v9182_v47 = vld [vmem:[#allocation4 + $0x470] sm:$0xf0] }
 0x12b   :  { %v12807_v62 = vpop.eup %12806  ;;  %12808 = vpow2.f32 %v8614_v58  ;;  %v8881_v58 = vor.u32 %v12038_v54, %v8878_v56  ;;  %v12122_v17 = vld [vmem:[#allocation4 + $0x4a4] sm:$0xf]  ;;  %v9166_v56 = vld [vmem:[#allocation4 + $0x450] sm:$0xf0] }
 0x12c   :  { %v1211_v1 = vadd.f32 1.0, %v12807_v62  ;;  %v1108_v3 = vpop.f32.mrf.mxu2  ;;  %3042 = vmatpush.bf16.msra.mxu3 %v9105_v2  ;;  %v12070_v24 = vld [vmem:[#allocation4 + $0x304] sm:$0xf] }
 0x12d   :  { %v9230_v3 = vld [vmem:[#allocation4 + $0x4d0] sm:$0xf0]  ;;  %v12154_v42 = vld [vmem:[#allocation4 + $0x5a4] sm:$0xf] }
 0x12e   :  { %12810 = vrcp.f32 %v1211_v1  ;;  %v1121_v6 = vpop.f32.mrf.mxu3  ;;  %3031 = vmatpush.bf16.msra.mxu2 %v8945_v8  ;;  %v1286_v28 = vand.u32 2147483648, %v1211_v1  ;;  %vm1280_vm0 = vweird.f32 %v1211_v1  ;;  %v1284_v30 = vand.u32 2147483647, %v1211_v1  ;;  %v9022_v8 = vld [vmem:[#allocation4 + $0x330] sm:$0xf0] }
 0x12f   :  { %v9233_v13 = vor.u32 %v12126_v63, %v9230_v3  ;;  %v12110_v54 = vld [vmem:[#allocation4 + $0x444] sm:$0xf] }
 0x130   :  { %3043 = vmatpush.bf16.msra.mxu3 %v9089_v11  ;;  %v1287_v39 = vor.u32 1.1754944e-38, %v1286_v28  ;;  %vm13488_vm3 = vcmp.eq.f32.partialorder %v1284_v30, 8.507059e+37  ;;  %v9025_v11 = vor.u32 %v12074_v4, %v9022_v8  ;;  %v9009_v28 = vor.u32 %v12070_v24, %v9006_v25  ;;  %v12158_v30 = vld [vmem:[#allocation4 + $0x5c4] sm:$0xf] }
 0x131   :  { %v12809_v14 = vpop.eup %12808  ;;  %v12106_v63 = vld [vmem:[#allocation4 + $0x424] sm:$0xf] }
 0x132   :  { %v13480_v21 = vadd.f32 1.0, %v12809_v14  ;;  %3032 = vmatpush.bf16.msra.mxu2 %v8929_v16  ;;  %v9374_v16 = vld [vmem:[#allocation4 + $0x5f0] sm:$0xf0]  ;;  %v12142_v8 = vld [vmem:[#allocation4 + $0x544] sm:$0xf] }
 0x134   :  { %v12811_v22 = vpop.eup %12810  ;;  %12812 = vrcp.f32 %v13480_v21  ;;  %3044 = vmatpush.bf16.msra.mxu3 %v9073_v23  ;;  %vm1295_vm4 = vweird.f32 %v13480_v21  ;;  %v1299_v59 = vand.u32 2147483647, %v13480_v21  ;;  %v1301_v60 = vand.u32 2147483648, %v13480_v21 }
 0x135   :  { %v1276_v26 = vmul.f32 %v12811_v22, %v1211_v1  ;;  %vm1281_vm1 = vweird.f32 %v12811_v22  ;;  %v318_v1 = vperm.slane %v13310_v38, 7  ;;  %v9294_v38 = vld [vmem:[#allocation4 + $0x550] sm:$0xf0] }
 0x136   :  { %3033 = vmatpush.bf16.msra.mxu2 %v8913_v52  ;;  %vm13484_vm2 = vmor %vm1280_vm0, %vm1281_vm1  ;;  %v1302_v9 = vor.u32 1.1754944e-38, %v1301_v60  ;;  %vm1300_vm7 = vcmp.eq.f32.partialorder %v1299_v59, 8.507059e+37 }
 0x137   :  { %v1277_v29 = vsub.f32 1.0, %v1276_v26 }
 0x138   :  { %3045 = vmatpush.bf16.msra.mxu3 %v9057_v35  ;;  %v12118_v35 = vld [vmem:[#allocation4 + $0x484] sm:$0xf] }
 0x139   :  { %v1278_v15 = vmul.f32 %v12811_v22, %v1277_v29  ;;  %v9377_v29 = vor.u32 %v12162_v10, %v9374_v16 }
 0x13a   :  { %v12813_v43 = vpop.eup %12812  ;;  %3034 = vmatpush.bf16.msra.mxu2 %v8897_v40 }
 0x13b   :  { %v1279_v46 = vadd.f32 %v12811_v22, %v1278_v15  ;;  %v1291_v49 = vmul.f32 %v12813_v43, %v13480_v21  ;;  %vm1296_vm5 = vweird.f32 %v12813_v43  ;;  %v9214_v21 = vld [vmem:[#allocation4 + $0x4b0] sm:$0xf0] }
 0x13c   :  { %3046 = vmatpush.bf16.msra.mxu3 %v9041_v51  ;;  %vm13512_vm6 = vmor %vm1295_vm4, %vm1296_vm5  ;;  %v9217_v33 = vor.u32 %v12122_v17, %v9214_v21  ;;  %v9198_v15 = vld [vmem:[#allocation4 + $0x490] sm:$0xf0]  ;;  %v9297_v21 = vor.u32 %v12142_v8, %v9294_v38  ;;  %v12182_v8 = vld [vmem:[#allocation4 + $0x684] sm:$0xf] }
 0x13d   :  { %v1283_v57 = vsel %vm13484_vm2, %v12811_v22, %v1279_v46  ;;  %v1292_v61 = vsub.f32 1.0, %v1291_v49  ;;  %v9201_v41 = vor.u32 %v12118_v35, %v9198_v15  ;;  %v12114_v46 = vld [vmem:[#allocation4 + $0x464] sm:$0xf]  ;;  %v9502_v17 = vld [vmem:[#allocation4 + $0x6f0] sm:$0xf0] }
 0x13e   :  { %v1132_v45 = vpop.f32.mrf.mxu0  ;;  %v1288_v0 = vsel %vm13488_vm3, %v1287_v39, %v1283_v57  ;;  %3035 = vmatpush.bf16.msra.mxu2 %v8881_v58  ;;  %v9361_v39 = vor.u32 %v12158_v30, %v9358_v34  ;;  %v9185_v49 = vor.u32 %v12114_v46, %v9182_v47  ;;  %v9486_v34 = vld [vmem:[#allocation4 + $0x6d0] sm:$0xf0]  ;;  %v12001_v15 = vld [vmem:[#allocation4 + $0xd4] sm:$0xf0]  ;;  %v8868_v46 = vld [vmem:[#allocation4 + $0x1e8] sm:$0xf] }
 0x13f   :  { %v1133_v50 = vadd.f32 %v1132_v45, %v317_v27  ;;  %1339 = vst [vmem:[%s14047_s18 + $0x20] sm:$0xff] %v1288_v0  ;;  %v13504_v2 = vpack.c.bf16 %v1288_v0, %v1288_v0  ;;  %v1293_v6 = vmul.f32 %v12813_v43, %v1292_v61  ;;  %v9169_v61 = vor.u32 %v12110_v54, %v9166_v56  ;;  %v9310_v0 = vld [vmem:[#allocation4 + $0x570] sm:$0xf0]  ;;  %v8708_v56 = vld [vmem:[#allocation4 + $0xa8] sm:$0xf] }
 0x140   :  { %v1145_v44 = vpop.f32.mrf.mxu1  ;;  %3047 = vmatpush.bf16.msra.mxu3 %v9025_v11  ;;  %v12102_v11 = vld [vmem:[#allocation4 + $0x404] sm:$0xf]  ;;  %v9454_v38 = vld [vmem:[#allocation4 + $0x690] sm:$0xf0] }
 0x141   :  { %v1146_v62 = vadd.f32 %v1145_v44, %v1133_v50  ;;  %2958 = vmatmul.bf16.vlgmr.msrb.gmra.mxu0 %v13504_v2  ;;  %v1294_v14 = vadd.f32 %v12813_v43, %v1293_v6  ;;  %v12150_v50 = vld [vmem:[#allocation4 + $0x584] sm:$0xf]  ;;  %v9326_v44 = vld [vmem:[#allocation4 + $0x590] sm:$0xf0] }
 0x142   :  { %3054 = vmatpush.bf16.msrb.mxu0 %v9249_v48  ;;  %v9329_v60 = vor.u32 %v12150_v50, %v9326_v44  ;;  %v12037_v50 = vld [vmem:[#allocation4 + $0x1f4] sm:$0xf0]  ;;  %v12186_v44 = vld [vmem:[#allocation4 + $0x6a4] sm:$0xf] }
 0x143   :  { %1181 = vst [vmem:[%s14039_s10 + $0x30] sm:$0xff] %v1146_v62  ;;  %v8615_v5 = vmul.f32 -1.442695, %v1146_v62  ;;  %v1298_v27 = vsel %vm13512_vm6, %v12813_v43, %v1294_v14  ;;  %v9342_v43 = vld [vmem:[#allocation4 + $0x5b0] sm:$0xf0] }
 0x144   :  { %v1158_v12 = vpop.f32.mrf.mxu2  ;;  %v1303_v55 = vsel %vm1300_vm7, %v1302_v9, %v1298_v27  ;;  %3048 = vmatpush.bf16.msra.mxu3 %v9009_v28  ;;  %v9345_v48 = vor.u32 %v12154_v42, %v9342_v43  ;;  %v12146_v62 = vld [vmem:[#allocation4 + $0x564] sm:$0xf]  ;;  %v9278_v28 = vld [vmem:[#allocation4 + $0x530] sm:$0xf0] }
 0x145   :  { %12814 = vpow2.f32 %v8615_v5  ;;  %v1159_v19 = vadd.f32 %v1158_v12, %v318_v1  ;;  %1340 = vst [vmem:[%s14047_s18 + $0x28] sm:$0xff] %v1303_v55  ;;  %v13521_v32 = vpack.c.bf16 %v1303_v55, %v1303_v55  ;;  %v9150_v1 = vld [vmem:[#allocation4 + $0x430] sm:$0xf0]  ;;  %v9313_v4 = vor.u32 %v12146_v62, %v9310_v0  ;;  %v12138_v27 = vld [vmem:[#allocation4 + $0x524] sm:$0xf] }
 0x146   :  { %v1171_v22 = vpop.f32.mrf.mxu3  ;;  %v1134_v23 = vpop.f32.mrf.mxu0  ;;  %3055 = vmatpush.bf16.msrb.mxu0 %v9233_v13  ;;  %v9153_v6 = vor.u32 %v12106_v63, %v9150_v1  ;;  %v9134_v12 = vld [vmem:[#allocation4 + $0x410] sm:$0xf0]  ;;  %v12194_v13 = vld [vmem:[#allocation4 + $0x6e4] sm:$0xf]  ;;  %v8869_v0 = vor.u32 %v12037_v50, %v8868_v46 }
 0x147   :  { %v1172_v52 = vadd.f32 %v1171_v22, %v1159_v19  ;;  %2971 = vmatmul.bf16.vlgmr.msrb.gmra.mxu1 %v13521_v32  ;;  %v8740_v19 = vld [vmem:[#allocation4 + $0xe8] sm:$0xf]  ;;  %v12005_v22 = vld [vmem:[#allocation4 + $0xf4] sm:$0xf0]  ;;  %v9137_v25 = vor.u32 %v12102_v11, %v9134_v12  ;;  %v12226_v43 = vld [vmem:[#allocation4 + $0x7e4] sm:$0xf] }
 0x148   :  { %v1147_v26 = vpop.f32.mrf.mxu1  ;;  %3067 = vmatpush.bf16.msrb.mxu1 %v9377_v29  ;;  %v9505_v29 = vor.u32 %v12194_v13, %v9502_v17  ;;  %v8741_v30 = vor.u32 %v12005_v22, %v8740_v19  ;;  %v12222_v63 = vld [vmem:[#allocation4 + $0x7c4] sm:$0xf]  ;;  %v9614_v1 = vld [vmem:[#allocation4 + $0x7d0] sm:$0xf0]  ;;  %v8836_v19 = vld [vmem:[#allocation4 + $0x1a8] sm:$0xf] }
 0x149   :  { %1182 = vst [vmem:[%s14039_s10 + $0x38] sm:$0xff] %v1172_v52  ;;  %v8616_v36 = vmul.f32 -1.442695, %v1172_v52  ;;  %v9617_v11 = vor.u32 %v12222_v63, %v9614_v1  ;;  %v12218_v13 = vld [vmem:[#allocation4 + $0x7a4] sm:$0xf] }
 0x14a   :  { %3056 = vmatpush.bf16.msrb.mxu0 %v9217_v33  ;;  %v12190_v33 = vld [vmem:[#allocation4 + $0x6c4] sm:$0xf]  ;;  %v9598_v17 = vld [vmem:[#allocation4 + $0x7b0] sm:$0xf0]  ;;  %v12029_v22 = vld [vmem:[#allocation4 + $0x1b4] sm:$0xf0] }
 0x14b   :  { %v12815_v20 = vpop.eup %12814  ;;  %12816 = vpow2.f32 %v8616_v36  ;;  %v8724_v36 = vld [vmem:[#allocation4 + $0xc8] sm:$0xf]  ;;  %v9489_v47 = vor.u32 %v12190_v33, %v9486_v34  ;;  %v9406_v50 = vld [vmem:[#allocation4 + $0x630] sm:$0xf0]  ;;  %v11977_v63 = vld [vmem:[#allocation4 + $0x14] sm:$0xf0] }
 0x14c   :  { %v13527_v37 = vadd.f32 1.0, %v12815_v20  ;;  %v1160_v40 = vpop.f32.mrf.mxu2  ;;  %3068 = vmatpush.bf16.msrb.mxu1 %v9361_v39  ;;  %v12134_v39 = vld [vmem:[#allocation4 + $0x504] sm:$0xf]  ;;  %v8660_v34 = vld [vmem:[#allocation4 + $0x48] sm:$0xf] }
 0x14d   :  { %v9262_v40 = vld [vmem:[#allocation4 + $0x510] sm:$0xf0] }
 0x14e   :  { %12818 = vrcp.f32 %v13527_v37  ;;  %v1173_v45 = vpop.f32.mrf.mxu3  ;;  %3057 = vmatpush.bf16.msrb.mxu0 %v9201_v41  ;;  %v1316_v5 = vand.u32 2147483648, %v13527_v37  ;;  %v1314_v10 = vand.u32 2147483647, %v13527_v37  ;;  %vm1310_vm9 = vweird.f32 %v13527_v37  ;;  %v9390_v1 = vld [vmem:[#allocation4 + $0x610] sm:$0xf0] }
 0x14f   :  { %v9630_v45 = vld [vmem:[#allocation4 + $0x7f0] sm:$0xf0] }
 0x150   :  { %3069 = vmatpush.bf16.msrb.mxu1 %v9345_v48  ;;  %v1317_v24 = vor.u32 1.1754944e-38, %v1316_v5  ;;  %vm1315_vm11 = vcmp.eq.f32.partialorder %v1314_v10, 8.507059e+37  ;;  %v8725_v48 = vor.u32 %v12001_v15, %v8724_v36  ;;  %v9633_v62 = vor.u32 %v12226_v43, %v9630_v45  ;;  %v11993_v10 = vld [vmem:[#allocation4 + $0x94] sm:$0xf0]  ;;  %v12174_v15 = vld [vmem:[#allocation4 + $0x644] sm:$0xf] }
 0x151   :  { %v12817_v51 = vpop.eup %12816  ;;  %3010 = vmatmul.bf16.vlgmr.msra.gmra.mxu0 %v13373_v7  ;;  %v11985_v36 = vld [vmem:[#allocation4 + $0x54] sm:$0xf0]  ;;  %v8804_v43 = vld [vmem:[#allocation4 + $0x168] sm:$0xf] }
 0x152   :  { %v13530_v57 = vadd.f32 1.0, %v12817_v51  ;;  %3058 = vmatpush.bf16.msrb.mxu0 %v9185_v49  ;;  %v9470_v51 = vld [vmem:[#allocation4 + $0x6b0] sm:$0xf0]  ;;  %v12021_v45 = vld [vmem:[#allocation4 + $0x174] sm:$0xf0] }
 0x154   :  { %v12819_v59 = vpop.eup %12818  ;;  %12820 = vrcp.f32 %v13530_v57  ;;  %3070 = vmatpush.bf16.msrb.mxu1 %v9329_v60  ;;  %v1331_v20 = vand.u32 2147483648, %v13530_v57  ;;  %v1329_v42 = vand.u32 2147483647, %v13530_v57  ;;  %vm1325_vm13 = vweird.f32 %v13530_v57 }
 0x155   :  { %v1306_v58 = vmul.f32 %v12819_v59, %v13527_v37  ;;  %vm1311_vm8 = vweird.f32 %v12819_v59  ;;  %v9281_v37 = vor.u32 %v12138_v27, %v9278_v28  ;;  %v9265_v60 = vor.u32 %v12134_v39, %v9262_v40  ;;  %v12214_v28 = vld [vmem:[#allocation4 + $0x784] sm:$0xf] }
 0x156   :  { %3059 = vmatpush.bf16.msrb.mxu0 %v9169_v61  ;;  %vm1312_vm10 = vmor %vm1310_vm9, %vm1311_vm8  ;;  %v1332_v54 = vor.u32 1.1754944e-38, %v1331_v20  ;;  %vm1330_vm15 = vcmp.eq.f32.partialorder %v1329_v42, 8.507059e+37  ;;  %v8837_v27 = vor.u32 %v12029_v22, %v8836_v19  ;;  %v9422_v20 = vld [vmem:[#allocation4 + $0x650] sm:$0xf0]  ;;  %v12210_v40 = vld [vmem:[#allocation4 + $0x764] sm:$0xf] }
 0x157   :  { %v1307_v3 = vsub.f32 1.0, %v1306_v58  ;;  %3023 = vmatmul.bf16.vlgmr.msra.gmra.mxu1 %v13394_v31  ;;  %v9566_v42 = vld [vmem:[#allocation4 + $0x770] sm:$0xf0]  ;;  %v9425_v46 = vor.u32 %v12174_v15, %v9422_v20  ;;  %v8980_v19 = vld [vmem:[#allocation4 + $0x2c8] sm:$0xf] }
 0x158   :  { %3071 = vmatpush.bf16.msrb.mxu1 %v9313_v4  ;;  %v9473_v4 = vor.u32 %v12186_v44, %v9470_v51  ;;  %v9569_v44 = vor.u32 %v12210_v40, %v9566_v42  ;;  %v8805_v51 = vor.u32 %v12021_v45, %v8804_v43  ;;  %v9236_v22 = vld [vmem:[#allocation4 + $0x4c8] sm:$0xf] }
 0x159   :  { %v1308_v9 = vmul.f32 %v12819_v59, %v1307_v3  ;;  %v8964_v15 = vld [vmem:[#allocation4 + $0x2a8] sm:$0xf] }
 0x15a   :  { %v12821_v14 = vpop.eup %12820  ;;  %3060 = vmatpush.bf16.msrb.mxu0 %v9153_v6  ;;  %v12033_v6 = vld [vmem:[#allocation4 + $0x1d4] sm:$0xf0]  ;;  %v9220_v20 = vld [vmem:[#allocation4 + $0x4a8] sm:$0xf] }
 0x15b   :  { %v1309_v16 = vadd.f32 %v12819_v59, %v1308_v9  ;;  %v1321_v23 = vmul.f32 %v12821_v14, %v13530_v57  ;;  %vm1326_vm12 = vweird.f32 %v12821_v14  ;;  %v8852_v57 = vld [vmem:[#allocation4 + $0x1c8] sm:$0xf] }
 0x15c   :  { %3072 = vmatpush.bf16.msrb.mxu1 %v9297_v21  ;;  %vm1327_vm14 = vmor %vm1325_vm13, %vm1326_vm12  ;;  %v8692_v9 = vld [vmem:[#allocation4 + $0x88] sm:$0xf]  ;;  %v8853_v12 = vor.u32 %v12033_v6, %v8852_v57  ;;  %v11989_v21 = vld [vmem:[#allocation4 + $0x74] sm:$0xf0] }
 0x15d   :  { %v1313_v26 = vsel %vm1312_vm10, %v12819_v59, %v1309_v16  ;;  %v1322_v52 = vsub.f32 1.0, %v1321_v23  ;;  %v11997_v59 = vld [vmem:[#allocation4 + $0xb4] sm:$0xf0]  ;;  %v8693_v16 = vor.u32 %v11993_v10, %v8692_v9  ;;  %v8676_v23 = vld [vmem:[#allocation4 + $0x68] sm:$0xf] }
 0x15e   :  { %v1318_v55 = vsel %vm1315_vm11, %v1317_v24, %v1313_v26  ;;  %3061 = vmatpush.bf16.msrb.mxu0 %v9137_v25  ;;  %v8709_v5 = vor.u32 %v11997_v59, %v8708_v56  ;;  %v12178_v24 = vld [vmem:[#allocation4 + $0x664] sm:$0xf]  ;;  %v9438_v25 = vld [vmem:[#allocation4 + $0x670] sm:$0xf0]  ;;  %v9601_v26 = vor.u32 %v12218_v13, %v9598_v17  ;;  %v9252_v57 = vld [vmem:[#allocation4 + $0x4e8] sm:$0xf] }
 0x15f   :  { %1341 = vst [vmem:[%s14047_s18 + $0x30] sm:$0xff] %v1318_v55  ;;  %v13544_v35 = vpack.c.bf16 %v1318_v55, %v1318_v55  ;;  %v1323_v41 = vmul.f32 %v12821_v14, %v1322_v52  ;;  %v8677_v52 = vor.u32 %v11989_v21, %v8676_v23  ;;  %v9582_v55 = vld [vmem:[#allocation4 + $0x790] sm:$0xf0]  ;;  %v9441_v33 = vor.u32 %v12178_v24, %v9438_v25  ;;  %v12202_v9 = vld [vmem:[#allocation4 + $0x724] sm:$0xf] }
 0x160   :  { %3073 = vmatpush.bf16.msrb.mxu1 %v9281_v37  ;;  %v9585_v37 = vor.u32 %v12214_v28, %v9582_v55  ;;  %v9550_v59 = vld [vmem:[#allocation4 + $0x750] sm:$0xf0]  ;;  %v12013_v13 = vld [vmem:[#allocation4 + $0x134] sm:$0xf0]  ;;  %v8756_v28 = vld [vmem:[#allocation4 + $0x108] sm:$0xf] }
 0x161   :  { %2984 = vmatmul.bf16.vlgmr.msrb.gmra.mxu2 %v13544_v35  ;;  %v1324_v49 = vadd.f32 %v12821_v14, %v1323_v41  ;;  %3062 = vmatmul.bf16.vlgmr.msrb.gmra.mxu0 %v13504_v2  ;;  %v8661_v41 = vor.u32 %v11985_v36, %v8660_v34  ;;  %v12129_v23 = vld [vmem:[#allocation4 + $0x4d4] sm:$0xf0]  ;;  %v9124_v55 = vld [vmem:[#allocation4 + $0x3e8] sm:$0xf] }
 0x162   :  { %3080 = vmatpush.bf16.msrb.mxu2 %v9505_v29  ;;  %3106 = vmatpush.bf16.msra.mxu0 %v8741_v30  ;;  %v8820_v29 = vld [vmem:[#allocation4 + $0x188] sm:$0xf]  ;;  %v12025_v30 = vld [vmem:[#allocation4 + $0x194] sm:$0xf0] }
 0x163   :  { %v1328_v58 = vsel %vm1327_vm14, %v12821_v14, %v1324_v49  ;;  %v9457_v14 = vor.u32 %v12182_v8, %v9454_v38  ;;  %v8821_v39 = vor.u32 %v12025_v30, %v8820_v29  ;;  %v12170_v49 = vld [vmem:[#allocation4 + $0x624] sm:$0xf]  ;;  %v8996_v8 = vld [vmem:[#allocation4 + $0x2e8] sm:$0xf]  ;;  %v12069_v38 = vld [vmem:[#allocation4 + $0x2f4] sm:$0xf0]  ;;  %v9237_v29 = vor.u32 %v12129_v23, %v9236_v22 }
 0x164   :  { %v1333_v61 = vsel %vm1330_vm15, %v1332_v54, %v1328_v58  ;;  %3074 = vmatpush.bf16.msrb.mxu1 %v9265_v60  ;;  %v12206_v54 = vld [vmem:[#allocation4 + $0x744] sm:$0xf]  ;;  %v8788_v60 = vld [vmem:[#allocation4 + $0x148] sm:$0xf]  ;;  %v12017_v58 = vld [vmem:[#allocation4 + $0x154] sm:$0xf0]  ;;  %v8997_v17 = vor.u32 %v12069_v38, %v8996_v8 }
 0x165   :  { %1342 = vst [vmem:[%s14047_s18 + $0x38] sm:$0xff] %v1333_v61  ;;  %v13555_v3 = vpack.c.bf16 %v1333_v61, %v1333_v61  ;;  %v9409_v61 = vor.u32 %v12170_v49, %v9406_v50  ;;  %v8789_v6 = vor.u32 %v12017_v58, %v8788_v60  ;;  %v12065_v25 = vld [vmem:[#allocation4 + $0x2d4] sm:$0xf0]  ;;  %v9364_v49 = vld [vmem:[#allocation4 + $0x5c8] sm:$0xf] }
 0x166   :  { %3081 = vmatpush.bf16.msrb.mxu2 %v9489_v47  ;;  %3107 = vmatpush.bf16.msra.mxu0 %v8725_v48  ;;  %v8644_v47 = vld [vmem:[#allocation4 + $0x28] sm:$0xf]  ;;  %v11981_v48 = vld [vmem:[#allocation4 + $0x34] sm:$0xf0]  ;;  %v8981_v36 = vor.u32 %v12065_v25, %v8980_v19 }
 0x167   :  { %2997 = vmatmul.bf16.vlgmr.msrb.gmra.mxu3 %v13555_v3  ;;  %3075 = vmatmul.bf16.vlgmr.msrb.gmra.mxu1 %v13521_v32  ;;  %v8645_v56 = vor.u32 %v11981_v48, %v8644_v47  ;;  %v12101_v30 = vld [vmem:[#allocation4 + $0x3f4] sm:$0xf0] }
 0x168   :  { %3093 = vmatpush.bf16.msrb.mxu3 %v9633_v62  ;;  %3119 = vmatpush.bf16.msra.mxu1 %v8869_v0  ;;  %v12166_v62 = vld [vmem:[#allocation4 + $0x604] sm:$0xf]  ;;  %v8628_v0 = vld [vmem:[#allocation4 + $0x8] sm:$0xf]  ;;  %v12165_v34 = vld [vmem:[#allocation4 + $0x5f4] sm:$0xf0]  ;;  %v9125_v43 = vor.u32 %v12101_v30, %v9124_v55 }
 0x169   :  { %v8629_v10 = vor.u32 %v11977_v63, %v8628_v0  ;;  %v8617_v42 = vld [vmem:[%s14083_s23 + $0x1] ss:$8 sm:$0xf] }
 0x16a   :  { %3082 = vmatpush.bf16.msrb.mxu2 %v9473_v4  ;;  %3108 = vmatpush.bf16.msra.mxu0 %v8709_v5  ;;  %v12133_v4 = vld [vmem:[#allocation4 + $0x4f4] sm:$0xf0]  ;;  %v9553_v5 = vor.u32 %v12206_v54, %v9550_v59  ;;  %v8948_v59 = vld [vmem:[#allocation4 + $0x288] sm:$0xf] }
 0x16b   :  { %v12097_v48 = vld [vmem:[#allocation4 + $0x3d4] sm:$0xf0]  ;;  %v9060_v55 = vld [vmem:[#allocation4 + $0x368] sm:$0xf] }
 0x16c   :  { %3094 = vmatpush.bf16.msrb.mxu3 %v9617_v11  ;;  %3120 = vmatpush.bf16.msra.mxu1 %v8853_v12  ;;  %v9534_v11 = vld [vmem:[#allocation4 + $0x730] sm:$0xf0]  ;;  %v8772_v12 = vld [vmem:[#allocation4 + $0x128] sm:$0xf]  ;;  %v12161_v50 = vld [vmem:[#allocation4 + $0x5d4] sm:$0xf0] }
 0x16d   :  { %v9537_v21 = vor.u32 %v12202_v9, %v9534_v11  ;;  %v8773_v24 = vor.u32 %v12013_v13, %v8772_v12  ;;  %v12121_v54 = vld [vmem:[#allocation4 + $0x494] sm:$0xf0]  ;;  %v8932_v9 = vld [vmem:[#allocation4 + $0x268] sm:$0xf] }
 0x16e   :  { %3083 = vmatpush.bf16.msrb.mxu2 %v9457_v14  ;;  %3109 = vmatpush.bf16.msra.mxu0 %v8693_v16  ;;  %v9393_v14 = vor.u32 %v12166_v62, %v9390_v1  ;;  %v9253_v16 = vor.u32 %v12133_v4, %v9252_v57  ;;  %v12057_v60 = vld [vmem:[#allocation4 + $0x294] sm:$0xf0]  ;;  %v9092_v62 = vld [vmem:[#allocation4 + $0x3a8] sm:$0xf] }
 0x16f   :  { %v12093_v1 = vld [vmem:[#allocation4 + $0x3b4] sm:$0xf0]  ;;  %v9348_v57 = vld [vmem:[#allocation4 + $0x5a8] sm:$0xf] }
 0x170   :  { %3095 = vmatpush.bf16.msrb.mxu3 %v9601_v26  ;;  %3121 = vmatpush.bf16.msra.mxu1 %v8837_v27  ;;  %v12198_v26 = vld [vmem:[#allocation4 + $0x704] sm:$0xf]  ;;  %v9518_v27 = vld [vmem:[#allocation4 + $0x710] sm:$0xf0]  ;;  %v12157_v4 = vld [vmem:[#allocation4 + $0x5b4] sm:$0xf0]  ;;  %v9093_v11 = vor.u32 %v12093_v1, %v9092_v62 }
 0x171   :  { %3036 = vmatmul.bf16.vlgmr.msra.gmra.mxu2 %v13445_v18  ;;  %v12117_v8 = vld [vmem:[#allocation4 + $0x474] sm:$0xf0]  ;;  %v9349_v12 = vor.u32 %v12157_v4, %v9348_v57  ;;  %v9076_v13 = vld [vmem:[#allocation4 + $0x388] sm:$0xf] }
 0x172   :  { %3110 = vmatpush.bf16.msra.mxu0 %v8677_v52  ;;  %3084 = vmatpush.bf16.msrb.mxu2 %v9441_v33  ;;  %v12009_v52 = vld [vmem:[#allocation4 + $0x114] sm:$0xf0]  ;;  %v9380_v33 = vld [vmem:[#allocation4 + $0x5e8] sm:$0xf] }
 0x173   :  { %v8757_v40 = vor.u32 %v12009_v52, %v8756_v28  ;;  %v9381_v45 = vor.u32 %v12165_v34, %v9380_v33  ;;  %v12153_v19 = vld [vmem:[#allocation4 + $0x594] sm:$0xf0]  ;;  %v9316_v34 = vld [vmem:[#allocation4 + $0x568] sm:$0xf] }
 0x174   :  { %3096 = vmatpush.bf16.msrb.mxu3 %v9585_v37  ;;  %3122 = vmatpush.bf16.msra.mxu1 %v8821_v39  ;;  %v12125_v37 = vld [vmem:[#allocation4 + $0x4b4] sm:$0xf0]  ;;  %v9521_v39 = vor.u32 %v12198_v26, %v9518_v27  ;;  %v8916_v26 = vld [vmem:[#allocation4 + $0x248] sm:$0xf] }
 0x175   :  { %v9221_v47 = vor.u32 %v12125_v37, %v9220_v20  ;;  %v12049_v27 = vld [vmem:[#allocation4 + $0x254] sm:$0xf0]  ;;  %v9156_v20 = vld [vmem:[#allocation4 + $0x428] sm:$0xf] }
 0x176   :  { %3111 = vmatpush.bf16.msra.mxu0 %v8661_v41  ;;  %3085 = vmatpush.bf16.msrb.mxu2 %v9425_v46  ;;  %v12061_v41 = vld [vmem:[#allocation4 + $0x2b4] sm:$0xf0]  ;;  %v9108_v46 = vld [vmem:[#allocation4 + $0x3c8] sm:$0xf] }
 0x177   :  { %3049 = vmatmul.bf16.vlgmr.msra.gmra.mxu3 %v13474_v53  ;;  %v9109_v58 = vor.u32 %v12097_v48, %v9108_v46  ;;  %v12085_v33 = vld [vmem:[#allocation4 + $0x374] sm:$0xf0]  ;;  %v9508_v62 = vld [vmem:[#allocation4 + $0x6e8] sm:$0xf] }
 0x178   :  { %3097 = vmatpush.bf16.msrb.mxu3 %v9569_v44  ;;  %3123 = vmatpush.bf16.msra.mxu1 %v8805_v51  ;;  %v8965_v44 = vor.u32 %v12061_v41, %v8964_v15  ;;  %v9204_v51 = vld [vmem:[#allocation4 + $0x488] sm:$0xf]  ;;  %v8917_v15 = vor.u32 %v12049_v27, %v8916_v26  ;;  %v12109_v37 = vld [vmem:[#allocation4 + $0x434] sm:$0xf0]  ;;  %v9061_v41 = vor.u32 %v12085_v33, %v9060_v55  ;;  %v12035_v26 = vld [vmem:[#allocation4 + $0x1ec] sm:$0xf] }
 0x179   :  { %v9205_v63 = vor.u32 %v12121_v54, %v9204_v51  ;;  %v12081_v46 = vld [vmem:[#allocation4 + $0x354] sm:$0xf0]  ;;  %v9140_v51 = vld [vmem:[#allocation4 + $0x408] sm:$0xf]  ;;  %v8870_v27 = vld [vmem:[#allocation4 + $0x1f8] sm:$0xf0] }
 0x17a   :  { %3112 = vmatpush.bf16.msra.mxu0 %v8645_v56  ;;  %3086 = vmatpush.bf16.msrb.mxu2 %v9409_v61  ;;  %v1610_v56 = vperm.slane %v8617_v42, 0  ;;  %v9365_v61 = vor.u32 %v12161_v50, %v9364_v49  ;;  %v12145_v48 = vld [vmem:[#allocation4 + $0x554] sm:$0xf0]  ;;  %v9284_v4 = vld [vmem:[#allocation4 + $0x528] sm:$0xf] }
 0x17b   :  { %v12105_v54 = vld [vmem:[#allocation4 + $0x414] sm:$0xf0]  ;;  %v8710_v55 = vld [vmem:[#allocation4 + $0xb8] sm:$0xf0] }
 0x17c   :  { %3098 = vmatpush.bf16.msrb.mxu3 %v9553_v5  ;;  %3124 = vmatpush.bf16.msra.mxu1 %v8789_v6  ;;  %v8949_v5 = vor.u32 %v12057_v60, %v8948_v59  ;;  %v9188_v6 = vld [vmem:[#allocation4 + $0x468] sm:$0xf]  ;;  %v12003_v59 = vld [vmem:[#allocation4 + $0xec] sm:$0xf]  ;;  %v8742_v60 = vld [vmem:[#allocation4 + $0xf8] sm:$0xf0]  ;;  %v9141_v1 = vor.u32 %v12105_v54, %v9140_v51 }
 0x17d   :  { %v12077_v57 = vld [vmem:[#allocation4 + $0x334] sm:$0xf0]  ;;  %v12027_v54 = vld [vmem:[#allocation4 + $0x1ac] sm:$0xf] }
 0x17e   :  { %3113 = vmatpush.bf16.msra.mxu0 %v8629_v10  ;;  %3087 = vmatpush.bf16.msrb.mxu2 %v9393_v14  ;;  %v2907_v0 = vpop.f32.mrf.mxu0  ;;  %v12053_v10 = vld [vmem:[#allocation4 + $0x274] sm:$0xf0]  ;;  %v9189_v14 = vor.u32 %v12117_v8, %v9188_v6  ;;  %v8745_v8 = vor.u32 %v12003_v59, %v8742_v60  ;;  %v11987_v59 = vld [vmem:[#allocation4 + $0x6c] sm:$0xf]  ;;  %v8678_v60 = vld [vmem:[#allocation4 + $0x78] sm:$0xf0] }
 0x17f   :  { %v2908_v38 = vadd.f32 %v2907_v0, %v1610_v56  ;;  %v8933_v23 = vor.u32 %v12053_v10, %v8932_v9  ;;  %v12041_v56 = vld [vmem:[#allocation4 + $0x214] sm:$0xf0]  ;;  %v9492_v9 = vld [vmem:[#allocation4 + $0x6c8] sm:$0xf]  ;;  %v11999_v10 = vld [vmem:[#allocation4 + $0xcc] sm:$0xf] }
 0x180   :  { %3099 = vmatpush.bf16.msrb.mxu3 %v9537_v21  ;;  %3125 = vmatpush.bf16.msra.mxu1 %v8773_v24  ;;  %v9172_v21 = vld [vmem:[#allocation4 + $0x448] sm:$0xf]  ;;  %v12113_v24 = vld [vmem:[#allocation4 + $0x454] sm:$0xf0] }
 0x181   :  { %3114 = vmatmul.bf16.vlgmr.msra.gmra.mxu0 %v13373_v7  ;;  %3088 = vmatmul.bf16.vlgmr.msrb.gmra.mxu2 %v13544_v35  ;;  %v9173_v30 = vor.u32 %v12113_v24, %v9172_v21  ;;  %v12197_v0 = vld [vmem:[#allocation4 + $0x6f4] sm:$0xf0] }
 0x182   :  { %3158 = vmatpush.bf16.msrb.mxu0 %v9253_v16  ;;  %3132 = vmatpush.bf16.msra.mxu2 %v8997_v17  ;;  %v12089_v16 = vld [vmem:[#allocation4 + $0x394] sm:$0xf0]  ;;  %v9332_v17 = vld [vmem:[#allocation4 + $0x588] sm:$0xf] }
 0x183   :  { %v9077_v28 = vor.u32 %v12089_v16, %v9076_v13  ;;  %v9333_v52 = vor.u32 %v12153_v19, %v9332_v17  ;;  %v9012_v16 = vld [vmem:[#allocation4 + $0x308] sm:$0xf]  ;;  %v12073_v17 = vld [vmem:[#allocation4 + $0x314] sm:$0xf0] }
 0x184   :  { %3100 = vmatpush.bf16.msrb.mxu3 %v9521_v39  ;;  %3126 = vmatpush.bf16.msra.mxu1 %v8757_v40  ;;  %v2920_v22 = vpop.f32.mrf.mxu1  ;;  %v8900_v39 = vld [vmem:[#allocation4 + $0x228] sm:$0xf]  ;;  %v12045_v40 = vld [vmem:[#allocation4 + $0x234] sm:$0xf0] }
 0x185   :  { %v13568_v25 = vadd.f32 %v2920_v22, %v2908_v38  ;;  %v8901_v50 = vor.u32 %v12045_v40, %v8900_v39  ;;  %v9509_v38 = vor.u32 %v12197_v0, %v9508_v62  ;;  %v9268_v19 = vld [vmem:[#allocation4 + $0x508] sm:$0xf]  ;;  %v12137_v22 = vld [vmem:[#allocation4 + $0x514] sm:$0xf0]  ;;  %v12031_v40 = vld [vmem:[#allocation4 + $0x1cc] sm:$0xf] }
 0x186   :  { %3159 = vmatpush.bf16.msrb.mxu0 %v9237_v29  ;;  %3133 = vmatpush.bf16.msra.mxu2 %v8981_v36  ;;  %v2909_v29 = vpop.f32.mrf.mxu0  ;;  %v12149_v36 = vld [vmem:[#allocation4 + $0x574] sm:$0xf0]  ;;  %v9444_v0 = vld [vmem:[#allocation4 + $0x668] sm:$0xf] }
 0x187   :  { %3127 = vmatmul.bf16.vlgmr.msra.gmra.mxu1 %v13394_v31  ;;  %3101 = vmatmul.bf16.vlgmr.msrb.gmra.mxu3 %v13555_v3  ;;  %v9317_v42 = vor.u32 %v12149_v36, %v9316_v34  ;;  %v12229_v24 = vld [vmem:[#allocation4 + $0x7f4] sm:$0xf0]  ;;  %v9013_v29 = vor.u32 %v12073_v17, %v9012_v16  ;;  %v8873_v34 = vor.u32 %v12035_v26, %v8870_v27  ;;  %v9476_v36 = vld [vmem:[#allocation4 + $0x6a8] sm:$0xf] }
 0x188   :  { %3145 = vmatpush.bf16.msra.mxu3 %v9125_v43  ;;  %3171 = vmatpush.bf16.msrb.mxu1 %v9381_v45  ;;  %v9044_v43 = vld [vmem:[#allocation4 + $0x348] sm:$0xf]  ;;  %v9157_v45 = vor.u32 %v12109_v37, %v9156_v20  ;;  %v12225_v39 = vld [vmem:[#allocation4 + $0x7d4] sm:$0xf0] }
 0x189   :  { %v9620_v20 = vld [vmem:[#allocation4 + $0x7c8] sm:$0xf]  ;;  %v12221_v51 = vld [vmem:[#allocation4 + $0x7b4] sm:$0xf0] }
 0x18a   :  { %3160 = vmatpush.bf16.msrb.mxu0 %v9221_v47  ;;  %3134 = vmatpush.bf16.msra.mxu2 %v8965_v44  ;;  %v9300_v47 = vld [vmem:[#allocation4 + $0x548] sm:$0xf] }
 0x18b   :  { %v8884_v44 = vld [vmem:[#allocation4 + $0x208] sm:$0xf] }
 0x18c   :  { %3146 = vmatpush.bf16.msra.mxu3 %v9109_v58  ;;  %3172 = vmatpush.bf16.msrb.mxu1 %v9365_v61  ;;  %v2922_v49 = vpop.f32.mrf.mxu1  ;;  %v9045_v58 = vor.u32 %v12081_v46, %v9044_v43  ;;  %v9301_v61 = vor.u32 %v12145_v48, %v9300_v47  ;;  %v8885_v6 = vor.u32 %v12041_v56, %v8884_v44  ;;  %v8694_v43 = vld [vmem:[#allocation4 + $0x98] sm:$0xf0]  ;;  %v9460_v48 = vld [vmem:[#allocation4 + $0x688] sm:$0xf] }
 0x18d   :  { %v9621_v46 = vor.u32 %v12225_v39, %v9620_v20  ;;  %v12185_v49 = vld [vmem:[#allocation4 + $0x694] sm:$0xf0]  ;;  %v8838_v56 = vld [vmem:[#allocation4 + $0x1b8] sm:$0xf0]  ;;  %v9572_v16 = vld [vmem:[#allocation4 + $0x768] sm:$0xf] }
 0x18e   :  { %3161 = vmatpush.bf16.msrb.mxu0 %v9205_v63  ;;  %3135 = vmatpush.bf16.msra.mxu2 %v8949_v5  ;;  %v9028_v63 = vld [vmem:[#allocation4 + $0x328] sm:$0xf]  ;;  %v12141_v5 = vld [vmem:[#allocation4 + $0x534] sm:$0xf0]  ;;  %v8841_v62 = vor.u32 %v12027_v54, %v8838_v56  ;;  %v11975_v20 = vld [vmem:[#allocation4 + $0xc] sm:$0xf] }
 0x18f   :  { %v9285_v13 = vor.u32 %v12141_v5, %v9284_v4  ;;  %v12217_v4 = vld [vmem:[#allocation4 + $0x794] sm:$0xf0]  ;;  %v12023_v5 = vld [vmem:[#allocation4 + $0x18c] sm:$0xf] }
 0x190   :  { %3147 = vmatpush.bf16.msra.mxu3 %v9093_v11  ;;  %3173 = vmatpush.bf16.msrb.mxu1 %v9349_v12  ;;  %v8726_v11 = vld [vmem:[#allocation4 + $0xd8] sm:$0xf0]  ;;  %v9029_v12 = vor.u32 %v12077_v57, %v9028_v63  ;;  %v12181_v63 = vld [vmem:[#allocation4 + $0x674] sm:$0xf0]  ;;  %v8681_v57 = vor.u32 %v11987_v59, %v8678_v60  ;;  %v12011_v56 = vld [vmem:[#allocation4 + $0x12c] sm:$0xf] }
 0x191   :  { %v8729_v21 = vor.u32 %v11999_v10, %v8726_v11  ;;  %v9445_v10 = vor.u32 %v12181_v63, %v9444_v0  ;;  %v8774_v59 = vld [vmem:[#allocation4 + $0x138] sm:$0xf0]  ;;  %v12063_v63 = vld [vmem:[#allocation4 + $0x2cc] sm:$0xf] }
 0x192   :  { %3162 = vmatpush.bf16.msrb.mxu0 %v9189_v14  ;;  %3136 = vmatpush.bf16.msra.mxu2 %v8933_v23  ;;  %v12193_v14 = vld [vmem:[#allocation4 + $0x6d4] sm:$0xf0]  ;;  %v9636_v23 = vld [vmem:[#allocation4 + $0x7e8] sm:$0xf] }
 0x193   :  { %v9637_v33 = vor.u32 %v12229_v24, %v9636_v23  ;;  %v8806_v23 = vld [vmem:[#allocation4 + $0x178] sm:$0xf0] }
 0x194   :  { %3148 = vmatpush.bf16.msra.mxu3 %v9077_v28  ;;  %3174 = vmatpush.bf16.msrb.mxu1 %v9333_v52  ;;  %v9493_v28 = vor.u32 %v12193_v14, %v9492_v9  ;;  %v11995_v52 = vld [vmem:[#allocation4 + $0xac] sm:$0xf]  ;;  %v8662_v9 = vld [vmem:[#allocation4 + $0x58] sm:$0xf0]  ;;  %v12177_v14 = vld [vmem:[#allocation4 + $0x654] sm:$0xf0] }
 0x195   :  { %v8713_v37 = vor.u32 %v11995_v52, %v8710_v55  ;;  %v8646_v24 = vld [vmem:[#allocation4 + $0x38] sm:$0xf0]  ;;  %v9412_v52 = vld [vmem:[#allocation4 + $0x628] sm:$0xf]  ;;  %v12173_v55 = vld [vmem:[#allocation4 + $0x634] sm:$0xf0] }
 0x196   :  { %3163 = vmatpush.bf16.msrb.mxu0 %v9173_v30  ;;  %3137 = vmatpush.bf16.msra.mxu2 %v8917_v15  ;;  %v9269_v30 = vor.u32 %v12137_v22, %v9268_v19  ;;  %v12189_v15 = vld [vmem:[#allocation4 + $0x6b4] sm:$0xf0]  ;;  %v12019_v22 = vld [vmem:[#allocation4 + $0x16c] sm:$0xf] }
 0x197   :  { %v12213_v19 = vld [vmem:[#allocation4 + $0x774] sm:$0xf0] }
 0x198   :  { %3149 = vmatpush.bf16.msra.mxu3 %v9061_v41  ;;  %3175 = vmatpush.bf16.msrb.mxu1 %v9317_v42  ;;  %v8854_v41 = vld [vmem:[#allocation4 + $0x1d8] sm:$0xf0]  ;;  %v11991_v42 = vld [vmem:[#allocation4 + $0x8c] sm:$0xf]  ;;  %v9573_v27 = vor.u32 %v12213_v19, %v9572_v16 }
 0x199   :  { %v8857_v47 = vor.u32 %v12031_v40, %v8854_v41  ;;  %v8697_v44 = vor.u32 %v11991_v42, %v8694_v43  ;;  %v9413_v40 = vor.u32 %v12173_v55, %v9412_v52  ;;  %v12131_v41 = vld [vmem:[#allocation4 + $0x4ec] sm:$0xf]  ;;  %v9254_v42 = vld [vmem:[#allocation4 + $0x4f8] sm:$0xf0] }
 0x19a   :  { %3164 = vmatpush.bf16.msrb.mxu0 %v9157_v45  ;;  %3138 = vmatpush.bf16.msra.mxu2 %v8901_v50  ;;  %v9477_v45 = vor.u32 %v12189_v15, %v9476_v36  ;;  %v9604_v50 = vld [vmem:[#allocation4 + $0x7a8] sm:$0xf]  ;;  %v12015_v36 = vld [vmem:[#allocation4 + $0x14c] sm:$0xf]  ;;  %v8790_v15 = vld [vmem:[#allocation4 + $0x158] sm:$0xf0]  ;;  %v9257_v54 = vor.u32 %v12131_v41, %v9254_v42 }
 0x19b   :  { %v12123_v16 = vld [vmem:[#allocation4 + $0x4ac] sm:$0xf]  ;;  %v9110_v55 = vld [vmem:[#allocation4 + $0x3d8] sm:$0xf0] }
 0x19c   :  { %3150 = vmatpush.bf16.msra.mxu3 %v9045_v58  ;;  %3176 = vmatpush.bf16.msrb.mxu1 %v9301_v61  ;;  %v9461_v58 = vor.u32 %v12185_v49, %v9460_v48  ;;  %v9605_v61 = vor.u32 %v12221_v51, %v9604_v50  ;;  %v12067_v48 = vld [vmem:[#allocation4 + $0x2ec] sm:$0xf]  ;;  %v8998_v50 = vld [vmem:[#allocation4 + $0x2f8] sm:$0xf0]  ;;  %v12205_v51 = vld [vmem:[#allocation4 + $0x734] sm:$0xf0] }
 0x19d   :  { %v12095_v52 = vld [vmem:[#allocation4 + $0x3cc] sm:$0xf] }
 0x19e   :  { %3165 = vmatpush.bf16.msrb.mxu0 %v9141_v1  ;;  %3139 = vmatpush.bf16.msra.mxu2 %v8885_v6  ;;  %v9588_v1 = vld [vmem:[#allocation4 + $0x788] sm:$0xf]  ;;  %v8822_v6 = vld [vmem:[#allocation4 + $0x198] sm:$0xf0]  ;;  %v12091_v42 = vld [vmem:[#allocation4 + $0x3ac] sm:$0xf] }
 0x19f   :  { %v9589_v11 = vor.u32 %v12217_v4, %v9588_v1  ;;  %v8982_v1 = vld [vmem:[#allocation4 + $0x2d8] sm:$0xf0]  ;;  %v8777_v4 = vor.u32 %v12011_v56, %v8774_v59  ;;  %v12087_v59 = vld [vmem:[#allocation4 + $0x38c] sm:$0xf] }
 0x1a0   :  { %3151 = vmatpush.bf16.msra.mxu3 %v9029_v12  ;;  %3177 = vmatpush.bf16.msrb.mxu1 %v9285_v13  ;;  %v8825_v12 = vor.u32 %v12023_v5, %v8822_v6  ;;  %v9428_v13 = vld [vmem:[#allocation4 + $0x648] sm:$0xf]  ;;  %v12201_v6 = vld [vmem:[#allocation4 + $0x714] sm:$0xf0]  ;;  %v8985_v19 = vor.u32 %v12063_v63, %v8982_v1 }
 0x1a1   :  { %3140 = vmatmul.bf16.vlgmr.msra.gmra.mxu2 %v13445_v18  ;;  %3166 = vmatmul.bf16.vlgmr.msrb.gmra.mxu0 %v13504_v2  ;;  %v9429_v26 = vor.u32 %v12177_v14, %v9428_v13  ;;  %v12163_v13 = vld [vmem:[#allocation4 + $0x5ec] sm:$0xf]  ;;  %v9382_v14 = vld [vmem:[#allocation4 + $0x5f8] sm:$0xf0] }
 0x1a2   :  { %3210 = vmatpush.bf16.msra.mxu0 %v8745_v8  ;;  %3184 = vmatpush.bf16.msrb.mxu2 %v9509_v38  ;;  %v11983_v38 = vld [vmem:[#allocation4 + $0x4c] sm:$0xf] }
 0x1a3   :  { %v8665_v17 = vor.u32 %v11983_v38, %v8662_v9  ;;  %v12007_v38 = vld [vmem:[#allocation4 + $0x10c] sm:$0xf]  ;;  %v8758_v9 = vld [vmem:[#allocation4 + $0x118] sm:$0xf0] }
 0x1a4   :  { %3152 = vmatpush.bf16.msra.mxu3 %v9013_v29  ;;  %3178 = vmatpush.bf16.msrb.mxu1 %v9269_v30  ;;  %v13574_v8 = vpop.f32.mrf.mxu2  ;;  %v9556_v29 = vld [vmem:[#allocation4 + $0x748] sm:$0xf] }
 0x1a6   :  { %3211 = vmatpush.bf16.msra.mxu0 %v8729_v21  ;;  %3185 = vmatpush.bf16.msrb.mxu2 %v9493_v28  ;;  %v11979_v21 = vld [vmem:[#allocation4 + $0x2c] sm:$0xf]  ;;  %v8809_v28 = vor.u32 %v12019_v22, %v8806_v23  ;;  %v8761_v23 = vor.u32 %v12007_v38, %v8758_v9 }
 0x1a7   :  { %3153 = vmatmul.bf16.vlgmr.msra.gmra.mxu3 %v13474_v53  ;;  %3179 = vmatmul.bf16.vlgmr.msrb.gmra.mxu1 %v13521_v32  ;;  %v12083_v9 = vld [vmem:[#allocation4 + $0x36c] sm:$0xf] }
 0x1a8   :  { %3197 = vmatpush.bf16.msrb.mxu3 %v9637_v33  ;;  %3223 = vmatpush.bf16.msra.mxu1 %v8873_v34  ;;  %v8649_v33 = vor.u32 %v11979_v21, %v8646_v24  ;;  %v12209_v34 = vld [vmem:[#allocation4 + $0x754] sm:$0xf0]  ;;  %v12059_v24 = vld [vmem:[#allocation4 + $0x2ac] sm:$0xf] }
 0x1a9   :  { %v9557_v43 = vor.u32 %v12209_v34, %v9556_v29  ;;  %v12159_v29 = vld [vmem:[#allocation4 + $0x5cc] sm:$0xf] }
 0x1aa   :  { %3212 = vmatpush.bf16.msra.mxu0 %v8713_v37  ;;  %3186 = vmatpush.bf16.msrb.mxu2 %v9477_v45  ;;  %v13576_v30 = vpop.f32.mrf.mxu3  ;;  %v8630_v37 = vld [vmem:[#allocation4 + $0x18] sm:$0xf0]  ;;  %v8793_v45 = vor.u32 %v12015_v36, %v8790_v15  ;;  %v12119_v34 = vld [vmem:[#allocation4 + $0x48c] sm:$0xf] }
 0x1ab   :  { %v8633_v49 = vor.u32 %v11975_v20, %v8630_v37  ;;  %v9206_v36 = vld [vmem:[#allocation4 + $0x498] sm:$0xf0]  ;;  %v12055_v20 = vld [vmem:[#allocation4 + $0x28c] sm:$0xf] }
 0x1ac   :  { %3198 = vmatpush.bf16.msrb.mxu3 %v9621_v46  ;;  %3224 = vmatpush.bf16.msra.mxu1 %v8857_v47  ;;  %v2935_v39 = vpop.f32.mrf.mxu2  ;;  %v9396_v46 = vld [vmem:[#allocation4 + $0x608] sm:$0xf]  ;;  %v12169_v47 = vld [vmem:[#allocation4 + $0x614] sm:$0xf0]  ;;  %v8950_v37 = vld [vmem:[#allocation4 + $0x298] sm:$0xf0]  ;;  %v9209_v41 = vor.u32 %v12119_v34, %v9206_v36 }
 0x1ad   :  { %v9397_v60 = vor.u32 %v12169_v47, %v9396_v46  ;;  %v9350_v46 = vld [vmem:[#allocation4 + $0x5b8] sm:$0xf0]  ;;  %v12115_v47 = vld [vmem:[#allocation4 + $0x46c] sm:$0xf]  ;;  %v12245_v34 = vld [vmem:[#allocation6 + $0x74] sm:$0xf0] }
 0x1ae   :  { %3213 = vmatpush.bf16.msra.mxu0 %v8697_v44  ;;  %3187 = vmatpush.bf16.msrb.mxu2 %v9461_v58  ;;  %v9540_v44 = vld [vmem:[#allocation4 + $0x728] sm:$0xf]  ;;  %v12127_v58 = vld [vmem:[#allocation4 + $0x4cc] sm:$0xf] }
 0x1af   :  { %v9541_v0 = vor.u32 %v12205_v51, %v9540_v44  ;;  %v12051_v44 = vld [vmem:[#allocation4 + $0x26c] sm:$0xf]  ;;  %v8934_v51 = vld [vmem:[#allocation4 + $0x278] sm:$0xf0] }
 0x1b0   :  { %3199 = vmatpush.bf16.msrb.mxu3 %v9605_v61  ;;  %3225 = vmatpush.bf16.msra.mxu1 %v8841_v62  ;;  %v9238_v61 = vld [vmem:[#allocation4 + $0x4d8] sm:$0xf0]  ;;  %v9001_v62 = vor.u32 %v12067_v48, %v8998_v50  ;;  %v8937_v63 = vor.u32 %v12051_v44, %v8934_v51  ;;  %v9697_v44 = vld [vmem:[#allocation6 + $0x60] sm:$0xf]  ;;  %v12243_v51 = vld [vmem:[#allocation6 + $0x64] sm:$0xf0] }
 0x1b1   :  { %v9190_v48 = vld [vmem:[#allocation4 + $0x478] sm:$0xf0] }
 0x1b2   :  { %3214 = vmatpush.bf16.msra.mxu0 %v8681_v57  ;;  %3188 = vmatpush.bf16.msrb.mxu2 %v9445_v10  ;;  %v9524_v57 = vld [vmem:[#allocation4 + $0x708] sm:$0xf]  ;;  %v2948_v5 = vpop.f32.mrf.mxu3  ;;  %v9241_v10 = vor.u32 %v12127_v58, %v9238_v61  ;;  %v9193_v56 = vor.u32 %v12115_v47, %v9190_v48  ;;  %v12151_v58 = vld [vmem:[#allocation4 + $0x58c] sm:$0xf]  ;;  %v9334_v61 = vld [vmem:[#allocation4 + $0x598] sm:$0xf0] }
 0x1b3   :  { %v9525_v22 = vor.u32 %v12201_v6, %v9524_v57  ;;  %v12047_v57 = vld [vmem:[#allocation4 + $0x24c] sm:$0xf]  ;;  %v9337_v6 = vor.u32 %v12151_v58, %v9334_v61  ;;  %v9286_v48 = vld [vmem:[#allocation4 + $0x538] sm:$0xf0] }
 0x1b4   :  { %3200 = vmatpush.bf16.msrb.mxu3 %v9589_v11  ;;  %3226 = vmatpush.bf16.msra.mxu1 %v8825_v12  ;;  %v12099_v11 = vld [vmem:[#allocation4 + $0x3ec] sm:$0xf]  ;;  %v9126_v12 = vld [vmem:[#allocation4 + $0x3f8] sm:$0xf0] }
 0x1b5   :  { %v9129_v21 = vor.u32 %v12099_v11, %v9126_v12  ;;  %v12147_v11 = vld [vmem:[#allocation4 + $0x56c] sm:$0xf]  ;;  %v9318_v12 = vld [vmem:[#allocation4 + $0x578] sm:$0xf0] }
 0x1b6   :  { %3215 = vmatpush.bf16.msra.mxu0 %v8665_v17  ;;  %3189 = vmatpush.bf16.msrb.mxu2 %v9429_v26  ;;  %v9222_v17 = vld [vmem:[#allocation4 + $0x4b8] sm:$0xf0]  ;;  %v12139_v47 = vld [vmem:[#allocation4 + $0x52c] sm:$0xf] }
 0x1b7   :  { %v8966_v26 = vld [vmem:[#allocation4 + $0x2b8] sm:$0xf0]  ;;  %v9289_v58 = vor.u32 %v12139_v47, %v9286_v48  ;;  %v12071_v61 = vld [vmem:[#allocation4 + $0x30c] sm:$0xf]  ;;  %v9665_v47 = vld [vmem:[#allocation6 + $0x20] sm:$0xf] }
 0x1b8   :  { %3201 = vmatpush.bf16.msrb.mxu3 %v9573_v27  ;;  %3227 = vmatpush.bf16.msra.mxu1 %v8809_v28  ;;  %v9385_v27 = vor.u32 %v12163_v13, %v9382_v14  ;;  %v9225_v28 = vor.u32 %v12123_v16, %v9222_v17  ;;  %v8969_v15 = vor.u32 %v12059_v24, %v8966_v26  ;;  %v12107_v13 = vld [vmem:[#allocation4 + $0x42c] sm:$0xf]  ;;  %v9158_v14 = vld [vmem:[#allocation4 + $0x438] sm:$0xf0]  ;;  %v9761_v48 = vld [vmem:[#allocation6 + $0xe0] sm:$0xf] }
 0x1b9   :  { %v12079_v24 = vld [vmem:[#allocation4 + $0x34c] sm:$0xf]  ;;  %v9046_v26 = vld [vmem:[#allocation4 + $0x358] sm:$0xf0] }
 0x1ba   :  { %3216 = vmatpush.bf16.msra.mxu0 %v8649_v33  ;;  %3190 = vmatpush.bf16.msrb.mxu2 %v9413_v40  ;;  %v9366_v33 = vld [vmem:[#allocation4 + $0x5d8] sm:$0xf0] }
 0x1bb   :  { %v9369_v40 = vor.u32 %v12159_v29, %v9366_v33  ;;  %v9705_v33 = vld [vmem:[#allocation6 + $0x70] sm:$0xf] }
 0x1bc   :  { %3202 = vmatpush.bf16.msrb.mxu3 %v9557_v43  ;;  %3228 = vmatpush.bf16.msra.mxu1 %v8793_v45  ;;  %v9094_v43 = vld [vmem:[#allocation4 + $0x3b8] sm:$0xf0]  ;;  %v12155_v45 = vld [vmem:[#allocation4 + $0x5ac] sm:$0xf] }
 0x1bd   :  { %v9097_v50 = vor.u32 %v12091_v42, %v9094_v43  ;;  %v9510_v43 = vld [vmem:[#allocation4 + $0x6f8] sm:$0xf0] }
 0x1be   :  { %3217 = vmatpush.bf16.msra.mxu0 %v8633_v49  ;;  %3191 = vmatpush.bf16.msrb.mxu2 %v9397_v60  ;;  %v13580_v39 = vpop.f32.mrf.mxu0  ;;  %v8953_v49 = vor.u32 %v12055_v20, %v8950_v37  ;;  %v9078_v60 = vld [vmem:[#allocation4 + $0x398] sm:$0xf0]  ;;  %v12195_v37 = vld [vmem:[#allocation4 + $0x6ec] sm:$0xf] }
 0x1bf   :  { %v9081_v1 = vor.u32 %v12087_v59, %v9078_v60  ;;  %v8886_v20 = vld [vmem:[#allocation4 + $0x218] sm:$0xf0]  ;;  %v12191_v59 = vld [vmem:[#allocation4 + $0x6cc] sm:$0xf] }
 0x1c0   :  { %3203 = vmatpush.bf16.msrb.mxu3 %v9541_v0  ;;  %3229 = vmatpush.bf16.msra.mxu1 %v8777_v4  ;;  %v9174_v0 = vld [vmem:[#allocation4 + $0x458] sm:$0xf0] }
 0x1c1   :  { %3218 = vmatmul.bf16.vlgmr.msra.gmra.mxu0 %v13373_v7  ;;  %3192 = vmatmul.bf16.vlgmr.msrb.gmra.mxu2 %v13544_v35  ;;  %v9113_v7 = vor.u32 %v12095_v52, %v9110_v55  ;;  %v8918_v4 = vld [vmem:[#allocation4 + $0x258] sm:$0xf0]  ;;  %v12103_v52 = vld [vmem:[#allocation4 + $0x40c] sm:$0xf] }
 0x1c2   :  { %3262 = vmatpush.bf16.msrb.mxu0 %v9257_v54  ;;  %3236 = vmatpush.bf16.msra.mxu2 %v9001_v62  ;;  %v9353_v54 = vor.u32 %v12155_v45, %v9350_v46  ;;  %v12111_v62 = vld [vmem:[#allocation4 + $0x44c] sm:$0xf]  ;;  %v8921_v16 = vor.u32 %v12047_v57, %v8918_v4  ;;  %v9142_v55 = vld [vmem:[#allocation4 + $0x418] sm:$0xf0]  ;;  %v9698_v4 = vor.u32 %v12243_v51, %v9697_v44 }
 0x1c3   :  { %v9177_v38 = vor.u32 %v12111_v62, %v9174_v0  ;;  %v9145_v42 = vor.u32 %v12103_v52, %v9142_v55  ;;  %v12075_v45 = vld [vmem:[#allocation4 + $0x32c] sm:$0xf]  ;;  %v9030_v46 = vld [vmem:[#allocation4 + $0x338] sm:$0xf0] }
 0x1c4   :  { %3204 = vmatpush.bf16.msrb.mxu3 %v9525_v22  ;;  %3230 = vmatpush.bf16.msra.mxu1 %v8761_v23  ;;  %v8902_v22 = vld [vmem:[#allocation4 + $0x238] sm:$0xf0]  ;;  %v9321_v23 = vor.u32 %v12147_v11, %v9318_v12  ;;  %v12135_v0 = vld [vmem:[#allocation4 + $0x50c] sm:$0xf] }
 0x1c5   :  { %v9494_v60 = vld [vmem:[#allocation4 + $0x6d8] sm:$0xf0] }
 0x1c6   :  { %3263 = vmatpush.bf16.msrb.mxu0 %v9241_v10  ;;  %3237 = vmatpush.bf16.msra.mxu2 %v8985_v19  ;;  %v2961_v5 = vpop.f32.mrf.mxu0  ;;  %v9062_v10 = vld [vmem:[#allocation4 + $0x378] sm:$0xf0]  ;;  %v12043_v19 = vld [vmem:[#allocation4 + $0x22c] sm:$0xf] }
 0x1c7   :  { %3205 = vmatmul.bf16.vlgmr.msrb.gmra.mxu3 %v13555_v3  ;;  %3231 = vmatmul.bf16.vlgmr.msra.gmra.mxu1 %v13394_v31  ;;  %v13584_v31 = vpop.f32.mrf.mxu1  ;;  %v9065_v17 = vor.u32 %v12083_v9, %v9062_v10  ;;  %v8905_v29 = vor.u32 %v12043_v19, %v8902_v22  ;;  %v9014_v62 = vld [vmem:[#allocation4 + $0x318] sm:$0xf0]  ;;  %v9689_v5 = vld [vmem:[#allocation6 + $0x50] sm:$0xf]  ;;  %v9497_v9 = vor.u32 %v12191_v59, %v9494_v60  ;;  %v12175_v59 = vld [vmem:[#allocation4 + $0x64c] sm:$0xf] }
 0x1c8   :  { %3249 = vmatpush.bf16.msra.mxu3 %v9129_v21  ;;  %3275 = vmatpush.bf16.msrb.mxu1 %v9385_v27  ;;  %v9161_v21 = vor.u32 %v12107_v13, %v9158_v14  ;;  %v12143_v27 = vld [vmem:[#allocation4 + $0x54c] sm:$0xf]  ;;  %v9638_v57 = vld [vmem:[#allocation4 + $0x7f8] sm:$0xf0]  ;;  %v9017_v10 = vor.u32 %v12071_v61, %v9014_v62  ;;  %v9657_v62 = vld [vmem:[#allocation6 + $0x10] sm:$0xf] }
 0x1c9   :  { %v12187_v14 = vld [vmem:[#allocation4 + $0x6ac] sm:$0xf]  ;;  %v9622_v19 = vld [vmem:[#allocation4 + $0x7d8] sm:$0xf0] }
 0x1ca   :  { %3264 = vmatpush.bf16.msrb.mxu0 %v9225_v28  ;;  %3238 = vmatpush.bf16.msra.mxu2 %v8969_v15  ;;  %v9302_v28 = vld [vmem:[#allocation4 + $0x558] sm:$0xf0]  ;;  %v9049_v15 = vor.u32 %v12079_v24, %v9046_v26 }
 0x1cb   :  { %v9606_v52 = vld [vmem:[#allocation4 + $0x7b8] sm:$0xf0] }
 0x1cc   :  { %3250 = vmatpush.bf16.msra.mxu3 %v9113_v7  ;;  %3276 = vmatpush.bf16.msrb.mxu1 %v9369_v40  ;;  %v12039_v7 = vld [vmem:[#allocation4 + $0x20c] sm:$0xf]  ;;  %v9430_v60 = vld [vmem:[#allocation4 + $0x658] sm:$0xf0] }
 0x1ce   :  { %3265 = vmatpush.bf16.msrb.mxu0 %v9209_v41  ;;  %3239 = vmatpush.bf16.msra.mxu2 %v8953_v49  ;;  %v13586_v40 = vpop.f32.mrf.mxu0  ;;  %v9305_v41 = vor.u32 %v12143_v27, %v9302_v28  ;;  %v9706_v49 = vor.u32 %v12245_v34, %v9705_v33  ;;  %v9462_v27 = vld [vmem:[#allocation4 + $0x698] sm:$0xf0]  ;;  %v12219_v28 = vld [vmem:[#allocation4 + $0x7ac] sm:$0xf]  ;;  %v9769_v33 = vld [vmem:[#allocation6 + $0xf0] sm:$0xf] }
 0x1cf   :  { %v2974_v36 = vpop.f32.mrf.mxu1  ;;  %v12261_v34 = vld [vmem:[#allocation6 + $0xf4] sm:$0xf0] }
 0x1d0   :  { %3251 = vmatpush.bf16.msra.mxu3 %v9097_v50  ;;  %3277 = vmatpush.bf16.msrb.mxu1 %v9353_v54  ;;  %v8889_v50 = vor.u32 %v12039_v7, %v8886_v20  ;;  %v9513_v54 = vor.u32 %v12195_v37, %v9510_v43  ;;  %v9770_v7 = vor.u32 %v12261_v34, %v9769_v33  ;;  %v9542_v33 = vld [vmem:[#allocation4 + $0x738] sm:$0xf0] }
 0x1d1   :  { %v9609_v37 = vor.u32 %v12219_v28, %v9606_v52  ;;  %v2934_v43 = vadd.f32 %v13574_v8, %v13568_v25  ;;  %v12211_v8 = vld [vmem:[#allocation4 + $0x76c] sm:$0xf] }
 0x1d2   :  { %3266 = vmatpush.bf16.msrb.mxu0 %v9193_v56  ;;  %3240 = vmatpush.bf16.msra.mxu2 %v8937_v63  ;;  %v9033_v56 = vor.u32 %v12075_v45, %v9030_v46  ;;  %v9270_v63 = vld [vmem:[#allocation4 + $0x518] sm:$0xf0]  ;;  %v12215_v45 = vld [vmem:[#allocation4 + $0x78c] sm:$0xf] }
 0x1d3   :  { %v9273_v12 = vor.u32 %v12135_v0, %v9270_v63  ;;  %v12233_v0 = vld [vmem:[#allocation6 + $0x14] sm:$0xf0]  ;;  %v9753_v63 = vld [vmem:[#allocation6 + $0xd0] sm:$0xf]  ;;  %v12167_v52 = vld [vmem:[#allocation4 + $0x60c] sm:$0xf] }
 0x1d4   :  { %3252 = vmatpush.bf16.msra.mxu3 %v9081_v1  ;;  %3278 = vmatpush.bf16.msrb.mxu1 %v9337_v6  ;;  %v12227_v1 = vld [vmem:[#allocation4 + $0x7ec] sm:$0xf]  ;;  %v12241_v6 = vld [vmem:[#allocation6 + $0x54] sm:$0xf0] }
 0x1d5   :  { %v9641_v13 = vor.u32 %v12227_v1, %v9638_v57  ;;  %v9690_v22 = vor.u32 %v12241_v6, %v9689_v5  ;;  %v12257_v1 = vld [vmem:[#allocation6 + $0xd4] sm:$0xf0] }
 0x1d6   :  { %3267 = vmatpush.bf16.msrb.mxu0 %v9177_v38  ;;  %3241 = vmatpush.bf16.msra.mxu2 %v8921_v16  ;;  %v3013_v11 = vpop.f32.mrf.mxu0  ;;  %v9478_v16 = vld [vmem:[#allocation4 + $0x6b8] sm:$0xf0]  ;;  %v9754_v5 = vor.u32 %v12257_v1, %v9753_v63  ;;  %v12238_v63 = vld [vmem:[#allocation6 + $0x44] sm:$0xf]  ;;  %v9683_v1 = vld [vmem:[#allocation6 + $0x48] sm:$0xf0] }
 0x1d7   :  { %v13588_v38 = vpop.f32.mrf.mxu1  ;;  %v9481_v24 = vor.u32 %v12187_v14, %v9478_v16  ;;  %v9658_v14 = vor.u32 %v12233_v0, %v9657_v62  ;;  %v9649_v16 = vld [vmem:[#allocation6] sm:$0xf]  ;;  %v9721_v62 = vld [vmem:[#allocation6 + $0x90] sm:$0xf]  ;;  %v12249_v0 = vld [vmem:[#allocation6 + $0x94] sm:$0xf0] }
 0x1d8   :  { %3253 = vmatpush.bf16.msra.mxu3 %v9065_v17  ;;  %3279 = vmatpush.bf16.msrb.mxu1 %v9321_v23  ;;  %v12223_v17 = vld [vmem:[#allocation4 + $0x7cc] sm:$0xf]  ;;  %v9681_v23 = vld [vmem:[#allocation6 + $0x40] sm:$0xf] }
 0x1d9   :  { %v9625_v26 = vor.u32 %v12223_v17, %v9622_v19  ;;  %v12231_v19 = vld [vmem:[#allocation6 + $0x4] sm:$0xf0] }
 0x1da   :  { %3268 = vmatpush.bf16.msrb.mxu0 %v9161_v21  ;;  %3242 = vmatpush.bf16.msra.mxu2 %v8905_v29  ;;  %v12239_v21 = vld [vmem:[#allocation6 + $0x44] sm:$0xf0]  ;;  %v9673_v29 = vld [vmem:[#allocation6 + $0x30] sm:$0xf]  ;;  %v9650_v34 = vor.u32 %v12231_v19, %v9649_v16 }
 0x1db   :  { %v9682_v55 = vor.u32 %v12239_v21, %v9681_v23 }
 0x1dc   :  { %3254 = vmatpush.bf16.msra.mxu3 %v9049_v15  ;;  %3280 = vmatpush.bf16.msrb.mxu1 %v9305_v41  ;;  %v12179_v41 = vld [vmem:[#allocation4 + $0x66c] sm:$0xf] }
 0x1de   :  { %3269 = vmatpush.bf16.msrb.mxu0 %v9145_v42  ;;  %3243 = vmatpush.bf16.msra.mxu2 %v8889_v50  ;;  %v13594_v20 = vpop.f32.mrf.mxu0  ;;  %v9446_v42 = vld [vmem:[#allocation4 + $0x678] sm:$0xf0]  ;;  %v2947_v50 = vadd.f32 %v13576_v30, %v2934_v43  ;;  %v9699_v43 = vld [vmem:[#allocation6 + $0x68] sm:$0xf0] }
 0x1df   :  { %v3026_v36 = vpop.f32.mrf.mxu1  ;;  %v9449_v51 = vor.u32 %v12179_v41, %v9446_v42  ;;  %v12242_v42 = vld [vmem:[#allocation6 + $0x64] sm:$0xf] }
 0x1e0   :  { %3255 = vmatpush.bf16.msra.mxu3 %v9033_v56  ;;  %3281 = vmatpush.bf16.msrb.mxu1 %v9289_v58  ;;  %v2960_v25 = vadd.f32 %v13580_v39, %v2947_v50  ;;  %v9574_v58 = vld [vmem:[#allocation4 + $0x778] sm:$0xf0]  ;;  %v12171_v39 = vld [vmem:[#allocation4 + $0x62c] sm:$0xf]  ;;  %v12251_v50 = vld [vmem:[#allocation6 + $0xa4] sm:$0xf0] }
 0x1e1   :  { %3270 = vmatmul.bf16.vlgmr.msrb.gmra.mxu0 %v13504_v2  ;;  %3244 = vmatmul.bf16.vlgmr.msra.gmra.mxu2 %v13445_v18  ;;  %v12183_v2 = vld [vmem:[#allocation4 + $0x68c] sm:$0xf]  ;;  %v12237_v18 = vld [vmem:[#allocation6 + $0x34] sm:$0xf0] }
 0x1e2   :  { %3793 = vmatpush.bf16.msra.mxu0 %v9706_v49  ;;  %3288 = vmatpush.bf16.msrb.mxu2 %v9513_v54  ;;  %v9465_v15 = vor.u32 %v12183_v2, %v9462_v27  ;;  %v9674_v46 = vor.u32 %v12237_v18, %v9673_v29  ;;  %v12259_v49 = vld [vmem:[#allocation6 + $0xe4] sm:$0xf0]  ;;  %v2973_v30 = vadd.f32 %v13584_v31, %v2960_v25  ;;  %v9745_v31 = vld [vmem:[#allocation6 + $0xc0] sm:$0xf]  ;;  %v9707_v2 = vld [vmem:[#allocation6 + $0x78] sm:$0xf0] }
 0x1e3   :  { %v9762_v54 = vor.u32 %v12259_v49, %v9761_v48  ;;  %v12203_v18 = vld [vmem:[#allocation4 + $0x72c] sm:$0xf]  ;;  %v9702_v48 = vor.u32 %v12242_v42, %v9699_v43  ;;  %v9729_v49 = vld [vmem:[#allocation6 + $0xa0] sm:$0xf] }
 0x1e4   :  { %3256 = vmatpush.bf16.msra.mxu3 %v9017_v10  ;;  %3282 = vmatpush.bf16.msrb.mxu1 %v9273_v12  ;;  %v2985_v44 = vpop.f32.mrf.mxu2  ;;  %v9414_v10 = vld [vmem:[#allocation4 + $0x638] sm:$0xf0]  ;;  %v12207_v12 = vld [vmem:[#allocation4 + $0x74c] sm:$0xf] }
 0x1e5   :  { %v2986_v11 = vadd.f32 %v2985_v44, %v2973_v30  ;;  %v12240_v44 = vld [vmem:[#allocation6 + $0x54] sm:$0xf]  ;;  %v13609_v25 = vld [vmem:[%s14083_s23 + $0x1] ss:$8 sm:$0xf]  ;;  %v9722_v30 = vor.u32 %v12249_v0, %v9721_v62 }
 0x1e6   :  { %3794 = vmatpush.bf16.msra.mxu0 %v9698_v4  ;;  %3289 = vmatpush.bf16.msrb.mxu2 %v9497_v9  ;;  %v9433_v4 = vor.u32 %v12175_v59, %v9430_v60  ;;  %v3065_v6 = vpop.f32.mrf.mxu0  ;;  %v9577_v9 = vor.u32 %v12211_v8, %v9574_v58  ;;  %v1611_v8 = vperm.slane %v13609_v25, 1 }
 0x1e7   :  { %3257 = vmatmul.bf16.vlgmr.msra.gmra.mxu3 %v13474_v53  ;;  %3283 = vmatmul.bf16.vlgmr.msrb.gmra.mxu1 %v13521_v32  ;;  %v9590_v53 = vld [vmem:[#allocation4 + $0x798] sm:$0xf0]  ;;  %v12235_v32 = vld [vmem:[#allocation6 + $0x24] sm:$0xf0]  ;;  %v13601_v57 = vpop.f32.mrf.mxu1  ;;  %v9686_v6 = vor.u32 %v12238_v63, %v9683_v1  ;;  %v12250_v1 = vld [vmem:[#allocation6 + $0xa4] sm:$0xf] }
 0x1e8   :  { %3301 = vmatpush.bf16.msrb.mxu3 %v9641_v13  ;;  %3806 = vmatpush.bf16.msra.mxu1 %v9770_v7  ;;  %v9593_v56 = vor.u32 %v12215_v45, %v9590_v53  ;;  %v9666_v61 = vor.u32 %v12235_v32, %v9665_v47  ;;  %v9558_v13 = vld [vmem:[#allocation4 + $0x758] sm:$0xf0]  ;;  %v12253_v7 = vld [vmem:[#allocation6 + $0xb4] sm:$0xf0]  ;;  %v9545_v53 = vor.u32 %v12203_v18, %v9542_v33 }
 0x1e9   :  { %v9561_v28 = vor.u32 %v12207_v12, %v9558_v13  ;;  %v9526_v47 = vld [vmem:[#allocation4 + $0x718] sm:$0xf0]  ;;  %v12260_v12 = vld [vmem:[#allocation6 + $0xf4] sm:$0xf] }
 0x1ea   :  { %3795 = vmatpush.bf16.msra.mxu0 %v9690_v22  ;;  %3290 = vmatpush.bf16.msrb.mxu2 %v9481_v24  ;;  %v2998_v17 = vpop.f32.mrf.mxu3  ;;  %v12255_v22 = vld [vmem:[#allocation6 + $0xc4] sm:$0xf0]  ;;  %v9417_v24 = vor.u32 %v12171_v39, %v9414_v10  ;;  %v9713_v39 = vld [vmem:[#allocation6 + $0x80] sm:$0xf]  ;;  %v9771_v13 = vld [vmem:[#allocation6 + $0xf8] sm:$0xf0] }
 0x1eb   :  { %v2999_v23 = vadd.f32 %v2998_v17, %v2986_v11  ;;  %v9746_v27 = vor.u32 %v12255_v22, %v9745_v31  ;;  %v12247_v10 = vld [vmem:[#allocation6 + $0x84] sm:$0xf0]  ;;  %v9774_v17 = vor.u32 %v12260_v12, %v9771_v13  ;;  %v9659_v18 = vld [vmem:[#allocation6 + $0x18] sm:$0xf0]  ;;  %v12277_v12 = vld [vmem:[#allocation6 + $0x174] sm:$0xf0] }
 0x1ec   :  { %3302 = vmatpush.bf16.msrb.mxu3 %v9625_v26  ;;  %3807 = vmatpush.bf16.msra.mxu1 %v9762_v54  ;;  %v2987_v21 = vpop.f32.mrf.mxu2  ;;  %v12244_v26 = vld [vmem:[#allocation6 + $0x74] sm:$0xf]  ;;  %v9730_v54 = vor.u32 %v12251_v50, %v9729_v49  ;;  %v9714_v11 = vor.u32 %v12247_v10, %v9713_v39  ;;  %v12254_v49 = vld [vmem:[#allocation6 + $0xc4] sm:$0xf]  ;;  %v9747_v50 = vld [vmem:[#allocation6 + $0xc8] sm:$0xf0] }
 0x1ed   :  { %3314 = vst [vmem:[%s14040_s11] sm:$0xff] %v2999_v23  ;;  %v9642_v29 = vmul.f32 -1.442695, %v2999_v23  ;;  %v9710_v36 = vor.u32 %v12244_v26, %v9707_v2  ;;  %v12234_v23 = vld [vmem:[#allocation6 + $0x24] sm:$0xf]  ;;  %v9763_v26 = vld [vmem:[#allocation6 + $0xe8] sm:$0xf0] }
 0x1ee   :  { %3796 = vmatpush.bf16.msra.mxu0 %v9682_v55  ;;  %3291 = vmatpush.bf16.msrb.mxu2 %v9465_v15  ;;  %v9398_v55 = vld [vmem:[#allocation4 + $0x618] sm:$0xf0]  ;;  %v9737_v15 = vld [vmem:[#allocation6 + $0xb0] sm:$0xf] }
 0x1ef   :  { %12822 = vpow2.f32 %v9642_v29  ;;  %v9401_v41 = vor.u32 %v12167_v52, %v9398_v55  ;;  %v9738_v45 = vor.u32 %v12253_v7, %v9737_v15  ;;  %v12232_v29 = vld [vmem:[#allocation6 + $0x14] sm:$0xf]  ;;  %v9755_v15 = vld [vmem:[#allocation6 + $0xd8] sm:$0xf0] }
 0x1f0   :  { %3303 = vmatpush.bf16.msrb.mxu3 %v9609_v37  ;;  %3808 = vmatpush.bf16.msra.mxu1 %v9754_v5  ;;  %v3078_v37 = vpop.f32.mrf.mxu1 }
 0x1f2   :  { %3797 = vmatpush.bf16.msra.mxu0 %v9674_v46  ;;  %3292 = vmatpush.bf16.msrb.mxu2 %v9449_v51  ;;  %v12199_v46 = vld [vmem:[#allocation4 + $0x70c] sm:$0xf]  ;;  %v3000_v32 = vpop.f32.mrf.mxu3  ;;  %v9691_v51 = vld [vmem:[#allocation6 + $0x58] sm:$0xf0] }
 0x1f3   :  { %v9529_v59 = vor.u32 %v12199_v46, %v9526_v47  ;;  %v9662_v46 = vor.u32 %v12232_v29, %v9659_v18  ;;  %v12230_v47 = vld [vmem:[#allocation6 + $0x4] sm:$0xf]  ;;  %v9651_v32 = vld [vmem:[#allocation6 + $0x8] sm:$0xf0]  ;;  %v9809_v29 = vld [vmem:[#allocation6 + $0x140] sm:$0xf] }
 0x1f4   :  { %3304 = vmatpush.bf16.msrb.mxu3 %v9593_v56  ;;  %3809 = vmatpush.bf16.msra.mxu1 %v9746_v27  ;;  %v3037_v56 = vpop.f32.mrf.mxu2  ;;  %v12271_v18 = vld [vmem:[#allocation6 + $0x144] sm:$0xf0] }
 0x1f5   :  { %v12823_v60 = vpop.eup %12822 }
 0x1f6   :  { %3798 = vmatpush.bf16.msra.mxu0 %v9666_v61  ;;  %3293 = vmatpush.bf16.msrb.mxu2 %v9433_v4  ;;  %v13612_v58 = vadd.f32 1.0, %v12823_v60  ;;  %v9694_v61 = vor.u32 %v12240_v44, %v9691_v51  ;;  %v3012_v4 = vadd.f32 %v13586_v40, %v1611_v8  ;;  %v9750_v51 = vor.u32 %v12254_v49, %v9747_v50  ;;  %v12252_v8 = vld [vmem:[#allocation6 + $0xb4] sm:$0xf]  ;;  %v9793_v49 = vld [vmem:[#allocation6 + $0x120] sm:$0xf] }
 0x1f7   :  { %v12267_v50 = vld [vmem:[#allocation6 + $0x124] sm:$0xf0] }
 0x1f8   :  { %3305 = vmatpush.bf16.msrb.mxu3 %v9577_v9  ;;  %3810 = vmatpush.bf16.msra.mxu1 %v9738_v45  ;;  %12824 = vrcp.f32 %v13612_v58  ;;  %v12236_v9 = vld [vmem:[#allocation6 + $0x34] sm:$0xf]  ;;  %vm3339_vm1 = vweird.f32 %v13612_v58 }
 0x1fa   :  { %3799 = vmatpush.bf16.msra.mxu0 %v9658_v14  ;;  %3294 = vmatpush.bf16.msrb.mxu2 %v9417_v24  ;;  %v3050_v5 = vpop.f32.mrf.mxu3  ;;  %v3025_v14 = vadd.f32 %v13588_v38, %v3012_v4  ;;  %v12258_v24 = vld [vmem:[#allocation6 + $0xe4] sm:$0xf]  ;;  %v3345_v38 = vand.u32 2147483648, %v13612_v58  ;;  %v12248_v4 = vld [vmem:[#allocation6 + $0x94] sm:$0xf] }
 0x1fb   :  { %v9766_v27 = vor.u32 %v12258_v24, %v9763_v26  ;;  %v12273_v24 = vld [vmem:[#allocation6 + $0x154] sm:$0xf0] }
 0x1fc   :  { %3306 = vmatpush.bf16.msrb.mxu3 %v9561_v28  ;;  %3811 = vmatpush.bf16.msra.mxu1 %v9730_v54  ;;  %v3039_v16 = vpop.f32.mrf.mxu2  ;;  %v3038_v31 = vadd.f32 %v3037_v56, %v3025_v14  ;;  %v12246_v14 = vld [vmem:[#allocation6 + $0x84] sm:$0xf] }
 0x1fd   :  { %v9715_v16 = vld [vmem:[#allocation6 + $0x88] sm:$0xf0] }
 0x1fe   :  { %3800 = vmatpush.bf16.msra.mxu0 %v9650_v34  ;;  %3295 = vmatpush.bf16.msrb.mxu2 %v9401_v41  ;;  %v12825_v19 = vpop.eup %12824  ;;  %v13619_v40 = vpop.f32.mrf.mxu0  ;;  %v3051_v2 = vadd.f32 %v3050_v5, %v3038_v31  ;;  %v3343_v34 = vand.u32 2147483647, %v13612_v58  ;;  %v9825_v31 = vld [vmem:[#allocation6 + $0x160] sm:$0xf] }
 0x1ff   :  { %v3335_v21 = vmul.f32 %v12825_v19, %v13612_v58  ;;  %vm3340_vm0 = vweird.f32 %v12825_v19  ;;  %v9739_v58 = vld [vmem:[#allocation6 + $0xb8] sm:$0xf0] }
 0x200   :  { %3307 = vmatpush.bf16.msrb.mxu3 %v9545_v53  ;;  %3812 = vmatpush.bf16.msra.mxu1 %v9722_v30  ;;  %v3064_v7 = vadd.f32 %v13594_v20, %v3051_v2  ;;  %vm3341_vm2 = vmor %vm3339_vm1, %vm3340_vm0  ;;  %v3346_v53 = vor.u32 1.1754944e-38, %v3345_v38  ;;  %vm3344_vm3 = vcmp.eq.f32.partialorder %v3343_v34, 8.507059e+37  ;;  %v9742_v63 = vor.u32 %v12252_v8, %v9739_v58  ;;  %v9731_v30 = vld [vmem:[#allocation6 + $0xa8] sm:$0xf0]  ;;  %v9777_v8 = vld [vmem:[#allocation6 + $0x100] sm:$0xf] }
 0x201   :  { %3296 = vmatmul.bf16.vlgmr.msrb.gmra.mxu2 %v13544_v35  ;;  %v9675_v35 = vld [vmem:[#allocation6 + $0x38] sm:$0xf0]  ;;  %v3336_v28 = vsub.f32 1.0, %v3335_v21  ;;  %v9734_v5 = vor.u32 %v12250_v1, %v9731_v30  ;;  %v12263_v58 = vld [vmem:[#allocation6 + $0x104] sm:$0xf0] }
 0x202   :  { %3845 = vmatpush.bf16.msrb.mxu0 %v9710_v36  ;;  %v9678_v22 = vor.u32 %v12236_v9, %v9675_v35  ;;  %v3052_v52 = vpop.f32.mrf.mxu3  ;;  %v12256_v36 = vld [vmem:[#allocation6 + $0xd4] sm:$0xf]  ;;  %v3077_v20 = vadd.f32 %v13601_v57, %v3064_v7 }
 0x203   :  { %v3337_v33 = vmul.f32 %v12825_v19, %v3336_v28  ;;  %v9758_v42 = vor.u32 %v12256_v36, %v9755_v15  ;;  %v9810_v36 = vor.u32 %v12271_v18, %v9809_v29  ;;  %v9897_v29 = vld [vmem:[#allocation6 + $0x1f0] sm:$0xf]  ;;  %v12293_v18 = vld [vmem:[#allocation6 + $0x1f4] sm:$0xf0] }
 0x204   :  { %3308 = vmatpush.bf16.msrb.mxu3 %v9529_v59  ;;  %3813 = vmatpush.bf16.msra.mxu1 %v9714_v11  ;;  %v13625_v37 = vpop.f32.mrf.mxu1  ;;  %v3089_v41 = vpop.f32.mrf.mxu2  ;;  %v9654_v59 = vor.u32 %v12230_v47, %v9651_v32  ;;  %v9833_v11 = vld [vmem:[#allocation6 + $0x170] sm:$0xf] }
 0x205   :  { %v3338_v43 = vadd.f32 %v12825_v19, %v3337_v33  ;;  %v3090_v56 = vadd.f32 %v3089_v41, %v3077_v20  ;;  %v9834_v13 = vor.u32 %v12277_v12, %v9833_v11  ;;  %v9794_v20 = vor.u32 %v12267_v50, %v9793_v49  ;;  %v9881_v49 = vld [vmem:[#allocation6 + $0x1d0] sm:$0xf]  ;;  %v12289_v50 = vld [vmem:[#allocation6 + $0x1d4] sm:$0xf0] }
 0x206   :  { %3846 = vmatpush.bf16.msrb.mxu0 %v9702_v48  ;;  %v3117_v45 = vpop.f32.mrf.mxu0 }
 0x207   :  { %3309 = vmatmul.bf16.vlgmr.msrb.gmra.mxu3 %v13555_v3  ;;  %v9667_v3 = vld [vmem:[#allocation6 + $0x28] sm:$0xf0]  ;;  %v3342_v48 = vsel %vm3341_vm2, %v12825_v19, %v3338_v43  ;;  %3819 = vmatpush.bf16.msra.mxu2 %v9834_v13  ;;  %v12269_v43 = vld [vmem:[#allocation6 + $0x134] sm:$0xf0]  ;;  %v12270_v13 = vld [vmem:[#allocation6 + $0x144] sm:$0xf] }
 0x208   :  { %3858 = vmatpush.bf16.msrb.mxu1 %v9774_v17  ;;  %v9670_v55 = vor.u32 %v12234_v23, %v9667_v3  ;;  %v3347_v44 = vsel %vm3344_vm3, %v3346_v53, %v3342_v48  ;;  %v9718_v17 = vor.u32 %v12246_v14, %v9715_v16  ;;  %v9817_v3 = vld [vmem:[#allocation6 + $0x150] sm:$0xf]  ;;  %v9811_v14 = vld [vmem:[#allocation6 + $0x148] sm:$0xf0] }
 0x209   :  { %3394 = vst [vmem:[%s14048_s19] sm:$0xff] %v3347_v44  ;;  %v3462_v54 = vpack.c.bf16 %v3347_v44, %v3347_v44  ;;  %v9818_v2 = vor.u32 %v12273_v24, %v9817_v3  ;;  %v1612_v44 = vperm.slane %v13609_v25, 2 }
 0x20a   :  { %3847 = vmatpush.bf16.msrb.mxu0 %v9694_v61  ;;  %v3102_v60 = vpop.f32.mrf.mxu3 }
 0x20b   :  { %3801 = vmatmul.bf16.vlgmr.msra.gmra.mxu0 %v3462_v54  ;;  %v3103_v61 = vadd.f32 %v3102_v60, %v3090_v56  ;;  %v12265_v56 = vld [vmem:[#allocation6 + $0x114] sm:$0xf0]  ;;  %v3116_v60 = vadd.f32 %v13619_v40, %v1612_v44  ;;  %v12272_v40 = vld [vmem:[#allocation6 + $0x154] sm:$0xf] }
 0x20c   :  { %3859 = vmatpush.bf16.msrb.mxu1 %v9766_v27  ;;  %v3130_v62 = vpop.f32.mrf.mxu1  ;;  %v3091_v0 = vpop.f32.mrf.mxu2 }
 0x20d   :  { %3315 = vst [vmem:[%s14040_s11 + $0x8] sm:$0xff] %v3103_v61  ;;  %v9643_v57 = vmul.f32 -1.442695, %v3103_v61  ;;  %v9778_v61 = vor.u32 %v12263_v58, %v9777_v8  ;;  %v12276_v62 = vld [vmem:[#allocation6 + $0x174] sm:$0xf] }
 0x20e   :  { %3848 = vmatpush.bf16.msrb.mxu0 %v9686_v6  ;;  %v9723_v6 = vld [vmem:[#allocation6 + $0x98] sm:$0xf0]  ;;  %v9873_v58 = vld [vmem:[#allocation6 + $0x1c0] sm:$0xf] }
 0x20f   :  { %12826 = vpow2.f32 %v9643_v57  ;;  %v9726_v9 = vor.u32 %v12248_v4, %v9723_v6  ;;  %v9835_v0 = vld [vmem:[#allocation6 + $0x178] sm:$0xf0]  ;;  %v12274_v4 = vld [vmem:[#allocation6 + $0x164] sm:$0xf] }
 0x210   :  { %3860 = vmatpush.bf16.msrb.mxu1 %v9758_v42  ;;  %v9801_v42 = vld [vmem:[#allocation6 + $0x130] sm:$0xf]  ;;  %v9838_v57 = vor.u32 %v12276_v62, %v9835_v0 }
 0x211   :  { %v9802_v53 = vor.u32 %v12269_v43, %v9801_v42 }
 0x212   :  { %3849 = vmatpush.bf16.msrb.mxu0 %v9678_v22  ;;  %v3104_v39 = vpop.f32.mrf.mxu3  ;;  %v12275_v22 = vld [vmem:[#allocation6 + $0x164] sm:$0xf0] }
 0x213   :  { %v9826_v23 = vor.u32 %v12275_v22, %v9825_v31  ;;  %v9819_v39 = vld [vmem:[#allocation6 + $0x158] sm:$0xf0] }
 0x214   :  { %3861 = vmatpush.bf16.msrb.mxu1 %v9750_v51 }
 0x215   :  { %v12827_v10 = vpop.eup %12826  ;;  %3820 = vmatpush.bf16.msra.mxu2 %v9826_v23  ;;  %v12268_v23 = vld [vmem:[#allocation6 + $0x134] sm:$0xf] }
 0x216   :  { %3850 = vmatpush.bf16.msrb.mxu0 %v9670_v55  ;;  %v3331_v35 = vadd.f32 1.0, %v12827_v10 }
 0x218   :  { %3862 = vmatpush.bf16.msrb.mxu1 %v9742_v63  ;;  %12828 = vrcp.f32 %v3331_v35  ;;  %v3360_v52 = vand.u32 2147483648, %v3331_v35  ;;  %v3358_v34 = vand.u32 2147483647, %v3331_v35  ;;  %vm3354_vm5 = vweird.f32 %v3331_v35 }
 0x219   :  { %3821 = vmatpush.bf16.msra.mxu2 %v9818_v2  ;;  %v3129_v63 = vadd.f32 %v13625_v37, %v3116_v60 }
 0x21a   :  { %3851 = vmatpush.bf16.msrb.mxu0 %v9662_v46  ;;  %v3361_v41 = vor.u32 1.1754944e-38, %v3360_v52  ;;  %vm3359_vm7 = vcmp.eq.f32.partialorder %v3358_v34, 8.507059e+37  ;;  %v12264_v52 = vld [vmem:[#allocation6 + $0x114] sm:$0xf]  ;;  %v9898_v34 = vor.u32 %v12293_v18, %v9897_v29  ;;  %v9883_v29 = vld [vmem:[#allocation6 + $0x1d8] sm:$0xf0] }
 0x21c   :  { %3863 = vmatpush.bf16.msrb.mxu1 %v9734_v5  ;;  %v9827_v5 = vld [vmem:[#allocation6 + $0x168] sm:$0xf0]  ;;  %3832 = vmatpush.bf16.msra.mxu3 %v9898_v34  ;;  %v12286_v34 = vld [vmem:[#allocation6 + $0x1c4] sm:$0xf] }
 0x21d   :  { %3822 = vmatpush.bf16.msra.mxu2 %v9810_v36 }
 0x21e   :  { %3852 = vmatpush.bf16.msrb.mxu0 %v9654_v59  ;;  %v13635_v19 = vpop.f32.mrf.mxu0  ;;  %v12829_v21 = vpop.eup %12828 }
 0x21f   :  { %v3350_v26 = vmul.f32 %v12829_v21, %v3331_v35  ;;  %vm3355_vm4 = vweird.f32 %v12829_v21  ;;  %v9822_v35 = vor.u32 %v12272_v40, %v9819_v39 }
 0x220   :  { %3864 = vmatpush.bf16.msrb.mxu1 %v9726_v9  ;;  %vm3356_vm6 = vmor %vm3354_vm5, %vm3355_vm4  ;;  %v9830_v9 = vor.u32 %v12274_v4, %v9827_v5  ;;  %v9865_v4 = vld [vmem:[#allocation6 + $0x1b0] sm:$0xf]  ;;  %v12285_v5 = vld [vmem:[#allocation6 + $0x1b4] sm:$0xf0] }
 0x221   :  { %3853 = vmatmul.bf16.vlgmr.msrb.gmra.mxu0 %v3462_v54  ;;  %v3351_v38 = vsub.f32 1.0, %v3350_v26  ;;  %3823 = vmatpush.bf16.msra.mxu2 %v9802_v53  ;;  %v9785_v54 = vld [vmem:[#allocation6 + $0x110] sm:$0xf]  ;;  %v9889_v53 = vld [vmem:[#allocation6 + $0x1e0] sm:$0xf] }
 0x222   :  { %v9786_v59 = vor.u32 %v12265_v56, %v9785_v54 }
 0x223   :  { %v3352_v33 = vmul.f32 %v12829_v21, %v3351_v38  ;;  %v9795_v38 = vld [vmem:[#allocation6 + $0x128] sm:$0xf0] }
 0x224   :  { %3865 = vmatpush.bf16.msrb.mxu1 %v9718_v17  ;;  %v3141_v27 = vpop.f32.mrf.mxu2  ;;  %v13637_v28 = vpop.f32.mrf.mxu1  ;;  %v9814_v17 = vor.u32 %v12270_v13, %v9811_v14  ;;  %v1613_v13 = vperm.slane %v13609_v25, 3  ;;  %v9891_v25 = vld [vmem:[#allocation6 + $0x1e8] sm:$0xf0] }
 0x225   :  { %v3353_v15 = vadd.f32 %v12829_v21, %v3352_v33  ;;  %3824 = vmatpush.bf16.msra.mxu2 %v9794_v20  ;;  %v3142_v1 = vadd.f32 %v3141_v27, %v3129_v63  ;;  %v12266_v27 = vld [vmem:[#allocation6 + $0x124] sm:$0xf]  ;;  %v9882_v20 = vor.u32 %v12289_v50, %v9881_v49  ;;  %v12280_v50 = vld [vmem:[#allocation6 + $0x194] sm:$0xf] }
 0x226   :  { %v3169_v55 = vpop.f32.mrf.mxu0 }
 0x227   :  { %v3357_v45 = vsel %vm3356_vm6, %v12829_v21, %v3353_v15  ;;  %v9803_v21 = vld [vmem:[#allocation6 + $0x138] sm:$0xf0]  ;;  %v12262_v15 = vld [vmem:[#allocation6 + $0x104] sm:$0xf] }
 0x228   :  { %v3362_v32 = vsel %vm3359_vm7, %v3361_v41, %v3357_v45  ;;  %v9806_v24 = vor.u32 %v12268_v23, %v9803_v21  ;;  %v9787_v55 = vld [vmem:[#allocation6 + $0x118] sm:$0xf0]  ;;  %v9841_v23 = vld [vmem:[#allocation6 + $0x180] sm:$0xf]  ;;  %v12279_v21 = vld [vmem:[#allocation6 + $0x184] sm:$0xf0] }
 0x229   :  { %3395 = vst [vmem:[%s14048_s19 + $0x8] sm:$0xff] %v3362_v32  ;;  %v3463_v48 = vpack.c.bf16 %v3362_v32, %v3362_v32  ;;  %3825 = vmatpush.bf16.msra.mxu2 %v9786_v59  ;;  %v9790_v33 = vor.u32 %v12264_v52, %v9787_v55  ;;  %v12288_v55 = vld [vmem:[#allocation6 + $0x1d4] sm:$0xf] }
 0x22a   :  { %v3154_v7 = vpop.f32.mrf.mxu3  ;;  %v9886_v18 = vor.u32 %v12288_v55, %v9883_v29  ;;  %v12309_v55 = vld [vmem:[#allocation7 + $0x78] sm:$0xff]  ;;  %v12296_v29 = vld [vmem:[#allocation7 + $0x10] sm:$0xff] }
 0x22b   :  { %3814 = vmatmul.bf16.vlgmr.msra.gmra.mxu1 %v3463_v48  ;;  %v3155_v6 = vadd.f32 %v3154_v7, %v3142_v1  ;;  %v9779_v7 = vld [vmem:[#allocation6 + $0x108] sm:$0xf0] }
 0x22c   :  { %v3143_v46 = vpop.f32.mrf.mxu2  ;;  %v3182_v47 = vpop.f32.mrf.mxu1  ;;  %v9782_v42 = vor.u32 %v12262_v15, %v9779_v7  ;;  %4083 = vmatpush.bf16.msra.mxu1 %v12309_v55 }
 0x22d   :  { %3826 = vmatpush.bf16.msra.mxu2 %v9778_v61  ;;  %v3168_v10 = vadd.f32 %v13635_v19, %v3155_v6  ;;  %v12291_v46 = vld [vmem:[#allocation6 + $0x1e4] sm:$0xf0] }
 0x22e   :  { %v9890_v47 = vor.u32 %v12291_v46, %v9889_v53  ;;  %v12287_v61 = vld [vmem:[#allocation6 + $0x1c4] sm:$0xf0] }
 0x22f   :  { %v3181_v16 = vadd.f32 %v13637_v28, %v3168_v10  ;;  %v9798_v28 = vor.u32 %v12266_v27, %v9795_v38  ;;  %v9874_v62 = vor.u32 %v12287_v61, %v9873_v58  ;;  %v12290_v38 = vld [vmem:[#allocation6 + $0x1e4] sm:$0xf] }
 0x230   :  { %3833 = vmatpush.bf16.msra.mxu3 %v9890_v47  ;;  %v9894_v52 = vor.u32 %v12290_v38, %v9891_v25  ;;  %v12282_v47 = vld [vmem:[#allocation6 + $0x1a4] sm:$0xf]  ;;  %v12300_v38 = vld [vmem:[#allocation7 + $0x30] sm:$0xff]  ;;  %v12299_v25 = vld [vmem:[#allocation7 + $0x28] sm:$0xff] }
 0x231   :  { %3871 = vmatpush.bf16.msrb.mxu2 %v9838_v57 }
 0x232   :  { %v3156_v51 = vpop.f32.mrf.mxu3 }
 0x234   :  { %3834 = vmatpush.bf16.msra.mxu3 %v9882_v20  ;;  %v9851_v20 = vld [vmem:[#allocation6 + $0x198] sm:$0xf0] }
 0x235   :  { %3872 = vmatpush.bf16.msrb.mxu2 %v9830_v9  ;;  %v9866_v9 = vor.u32 %v12285_v5, %v9865_v4 }
 0x238   :  { %3835 = vmatpush.bf16.msra.mxu3 %v9874_v62 }
 0x239   :  { %3873 = vmatpush.bf16.msrb.mxu2 %v9822_v35  ;;  %v9857_v35 = vld [vmem:[#allocation6 + $0x1a0] sm:$0xf] }
 0x23b   :  { %3866 = vmatmul.bf16.vlgmr.msrb.gmra.mxu1 %v3463_v48 }
 0x23c   :  { %3836 = vmatpush.bf16.msra.mxu3 %v9866_v9 }
 0x23d   :  { %3874 = vmatpush.bf16.msrb.mxu2 %v9814_v17  ;;  %v12281_v17 = vld [vmem:[#allocation6 + $0x194] sm:$0xf0] }
 0x23e   :  { %v13645_v30 = vpop.f32.mrf.mxu0 }
 0x241   :  { %3875 = vmatpush.bf16.msrb.mxu2 %v9806_v24  ;;  %v12292_v24 = vld [vmem:[#allocation6 + $0x1f4] sm:$0xf] }
 0x244   :  { %v3193_v11 = vpop.f32.mrf.mxu2  ;;  %v13648_v12 = vpop.f32.mrf.mxu1 }
 0x245   :  { %v3194_v31 = vadd.f32 %v3193_v11, %v3181_v16  ;;  %3876 = vmatpush.bf16.msrb.mxu2 %v9798_v28  ;;  %v12283_v11 = vld [vmem:[#allocation6 + $0x1a4] sm:$0xf0]  ;;  %v9849_v16 = vld [vmem:[#allocation6 + $0x190] sm:$0xf] }
 0x246   :  { %v3221_v37 = vpop.f32.mrf.mxu0 }
 0x247   :  { %v9858_v37 = vor.u32 %v12283_v11, %v9857_v35  ;;  %v9646_v11 = vld [vmem:[%s14083_s23 + $0x2] ss:$8 sm:$0x3] }
 0x249   :  { %3877 = vmatpush.bf16.msrb.mxu2 %v9790_v33  ;;  %3837 = vmatpush.bf16.msra.mxu3 %v9858_v37  ;;  %v3469_v37 = vperm.slane %v9646_v11, 0 }
 0x24a   :  { %v3206_v22 = vpop.f32.mrf.mxu3 }
 0x24b   :  { %v3207_v3 = vadd.f32 %v3206_v22, %v3194_v31  ;;  %v9850_v31 = vor.u32 %v12281_v17, %v9849_v16  ;;  %v3220_v22 = vadd.f32 %v13645_v30, %v1613_v13 }
 0x24c   :  { %v3195_v26 = vpop.f32.mrf.mxu2  ;;  %v3234_v2 = vpop.f32.mrf.mxu1 }
 0x24d   :  { %3316 = vst [vmem:[%s14040_s11 + $0x10] sm:$0xff] %v3207_v3  ;;  %v9644_v19 = vmul.f32 -1.442695, %v3207_v3  ;;  %3878 = vmatpush.bf16.msrb.mxu2 %v9782_v42  ;;  %3838 = vmatpush.bf16.msra.mxu3 %v9850_v31  ;;  %v9842_v3 = vor.u32 %v12279_v21, %v9841_v23  ;;  %v3233_v26 = vadd.f32 %v13648_v12, %v3220_v22  ;;  %v12284_v42 = vld [vmem:[#allocation6 + $0x1b4] sm:$0xf]  ;;  %v3470_v31 = vperm.slane %v9646_v11, 1 }
 0x24f   :  { %12830 = vpow2.f32 %v9644_v19  ;;  %v9899_v19 = vld [vmem:[#allocation6 + $0x1f8] sm:$0xf0] }
 0x250   :  { %v9902_v2 = vor.u32 %v12292_v24, %v9899_v19 }
 0x251   :  { %3839 = vmatpush.bf16.msra.mxu3 %v9842_v3 }
 0x252   :  { %v3208_v36 = vpop.f32.mrf.mxu3 }
 0x253   :  { %v9875_v36 = vld [vmem:[#allocation6 + $0x1c8] sm:$0xf0] }
 0x254   :  { %v9878_v12 = vor.u32 %v12286_v34, %v9875_v36  ;;  %v12294_v34 = vld [vmem:[#allocation7] sm:$0xff] }
 0x255   :  { %v12831_v41 = vpop.eup %12830  ;;  %3884 = vmatpush.bf16.msrb.mxu3 %v9902_v2  ;;  %v12306_v36 = vld [vmem:[#allocation7 + $0x60] sm:$0xff] }
 0x256   :  { %v3332_v43 = vadd.f32 1.0, %v12831_v41 }
 0x258   :  { %12832 = vrcp.f32 %v3332_v43  ;;  %v3375_v51 = vand.u32 2147483648, %v3332_v43  ;;  %v3373_v8 = vand.u32 2147483647, %v3332_v43  ;;  %vm3369_vm9 = vweird.f32 %v3332_v43 }
 0x259   :  { %3885 = vmatpush.bf16.msrb.mxu3 %v9894_v52  ;;  %v12297_v52 = vld [vmem:[#allocation7 + $0x18] sm:$0xff] }
 0x25a   :  { %v3376_v63 = vor.u32 1.1754944e-38, %v3375_v51  ;;  %vm3374_vm11 = vcmp.eq.f32.partialorder %v3373_v8, 8.507059e+37  ;;  %v9843_v8 = vld [vmem:[#allocation6 + $0x188] sm:$0xf0] }
 0x25d   :  { %3886 = vmatpush.bf16.msrb.mxu3 %v9886_v18  ;;  %v12295_v18 = vld [vmem:[#allocation7 + $0x8] sm:$0xff] }
 0x25e   :  { %v13654_v45 = vpop.f32.mrf.mxu0  ;;  %v12833_v32 = vpop.eup %12832 }
 0x25f   :  { %v3365_v48 = vmul.f32 %v12833_v32, %v3332_v43  ;;  %vm3370_vm8 = vweird.f32 %v12833_v32  ;;  %v9867_v43 = vld [vmem:[#allocation6 + $0x1b8] sm:$0xf0] }
 0x260   :  { %vm3371_vm10 = vmor %vm3369_vm9, %vm3370_vm8  ;;  %v9870_v46 = vor.u32 %v12284_v42, %v9867_v43  ;;  %v12304_v43 = vld [vmem:[#allocation7 + $0x50] sm:$0xff] }
 0x261   :  { %v3366_v44 = vsub.f32 1.0, %v3365_v48  ;;  %3887 = vmatpush.bf16.msrb.mxu3 %v9878_v12 }
 0x263   :  { %v3367_v59 = vmul.f32 %v12833_v32, %v3366_v44  ;;  %v9854_v44 = vor.u32 %v12280_v50, %v9851_v20  ;;  %v10028_v20 = vld [vmem:[#allocation9 + $0x70] sm:$0xf] }
 0x264   :  { %v3245_v54 = vpop.f32.mrf.mxu2  ;;  %v13656_v56 = vpop.f32.mrf.mxu1 }
 0x265   :  { %v3368_v0 = vadd.f32 %v12833_v32, %v3367_v59  ;;  %v3246_v27 = vadd.f32 %v3245_v54, %v3233_v26  ;;  %3888 = vmatpush.bf16.msrb.mxu3 %v9870_v46  ;;  %v12303_v46 = vld [vmem:[#allocation7 + $0x48] sm:$0xff] }
 0x266   :  { %v3273_v60 = vpop.f32.mrf.mxu0 }
 0x267   :  { %v3372_v1 = vsel %vm3371_vm10, %v12833_v32, %v3368_v0  ;;  %v9859_v32 = vld [vmem:[#allocation6 + $0x1a8] sm:$0xf0]  ;;  %v12278_v60 = vld [vmem:[#allocation6 + $0x184] sm:$0xf] }
 0x268   :  { %v3377_v6 = vsel %vm3374_vm11, %v3376_v63, %v3372_v1  ;;  %v9862_v49 = vor.u32 %v12282_v47, %v9859_v32  ;;  %v9846_v58 = vor.u32 %v12278_v60, %v9843_v8  ;;  %v12302_v32 = vld [vmem:[#allocation7 + $0x40] sm:$0xff]  ;;  %v12323_v60 = vld [vmem:[#allocation9 + $0x64] sm:$0xf0] }
 0x269   :  { %3396 = vst [vmem:[%s14048_s19 + $0x10] sm:$0xff] %v3377_v6  ;;  %v3464_v40 = vpack.c.bf16 %v3377_v6, %v3377_v6 }
 0x26a   :  { %v3258_v57 = vpop.f32.mrf.mxu3  ;;  %3889 = vmatpush.bf16.msrb.mxu3 %v9862_v49 }
 0x26b   :  { %3827 = vmatmul.bf16.vlgmr.msra.gmra.mxu2 %v3464_v40  ;;  %v3259_v28 = vadd.f32 %v3258_v57, %v3246_v27  ;;  %v12301_v27 = vld [vmem:[#allocation7 + $0x38] sm:$0xff] }
 0x26c   :  { %v3247_v39 = vpop.f32.mrf.mxu2  ;;  %v3286_v10 = vpop.f32.mrf.mxu1  ;;  %4070 = vmatpush.bf16.msra.mxu0 %v12301_v27 }
 0x26d   :  { %v3272_v30 = vadd.f32 %v13654_v45, %v3259_v28  ;;  %v12298_v28 = vld [vmem:[#allocation7 + $0x20] sm:$0xff] }
 0x26e   :  { %3890 = vmatpush.bf16.msrb.mxu3 %v9854_v44  ;;  %v12325_v44 = vld [vmem:[#allocation9 + $0x74] sm:$0xf0] }
 0x26f   :  { %v3285_v15 = vadd.f32 %v13656_v56, %v3272_v30  ;;  %v12308_v30 = vld [vmem:[#allocation7 + $0x70] sm:$0xff] }
 0x270   :  { %4071 = vmatpush.bf16.msra.mxu0 %v12300_v38  ;;  %4084 = vmatpush.bf16.msra.mxu1 %v12308_v30  ;;  %v12319_v30 = vld [vmem:[#allocation9 + $0x44] sm:$0xf0] }
 0x272   :  { %v3260_v14 = vpop.f32.mrf.mxu3  ;;  %3891 = vmatpush.bf16.msrb.mxu3 %v9846_v58 }
 0x274   :  { %4072 = vmatpush.bf16.msra.mxu0 %v12299_v25 }
 0x278   :  { %4073 = vmatpush.bf16.msra.mxu0 %v12298_v28 }
 0x27b   :  { %3879 = vmatmul.bf16.vlgmr.msrb.gmra.mxu2 %v3464_v40 }
 0x27c   :  { %4074 = vmatpush.bf16.msra.mxu0 %v12297_v52 }
 0x280   :  { %4075 = vmatpush.bf16.msra.mxu0 %v12296_v29  ;;  %v10004_v29 = vld [vmem:[#allocation9 + $0x40] sm:$0xf] }
 0x284   :  { %v3297_v33 = vpop.f32.mrf.mxu2  ;;  %4076 = vmatpush.bf16.msra.mxu0 %v12295_v18  ;;  %v12318_v18 = vld [vmem:[#allocation9 + $0x44] sm:$0xf] }
 0x285   :  { %v3298_v7 = vadd.f32 %v3297_v33, %v3285_v15  ;;  %v12307_v33 = vld [vmem:[#allocation7 + $0x68] sm:$0xff] }
 0x286   :  { %4085 = vmatpush.bf16.msra.mxu1 %v12307_v33  ;;  %v10005_v33 = vor.u32 %v12319_v30, %v10004_v29 }
 0x288   :  { %v3802_v54 = vpop.f32.mrf.mxu0  ;;  %4077 = vmatpush.bf16.msra.mxu0 %v12294_v34  ;;  %v10006_v34 = vld [vmem:[#allocation9 + $0x48] sm:$0xf0] }
 0x289   :  { %v3803_v13 = vadd.f32 %v3802_v54, %v3469_v37  ;;  %v10029_v54 = vor.u32 %v12325_v44, %v10028_v20  ;;  %v12312_v20 = vld [vmem:[#allocation9 + $0x14] sm:$0xf]  ;;  %v9982_v44 = vld [vmem:[#allocation9 + $0x18] sm:$0xf0] }
 0x28a   :  { %v3310_v41 = vpop.f32.mrf.mxu3  ;;  %4086 = vmatpush.bf16.msra.mxu1 %v12306_v36  ;;  %v9996_v36 = vld [vmem:[#allocation9 + $0x30] sm:$0xf] }
 0x28b   :  { %v3311_v53 = vadd.f32 %v3310_v41, %v3298_v7  ;;  %v12305_v41 = vld [vmem:[#allocation7 + $0x58] sm:$0xff]  ;;  %4201 = vmatpush.bf16.msra.mxu2 %v10029_v54  ;;  %v9985_v54 = vor.u32 %v12312_v20, %v9982_v44 }
 0x28c   :  { %v3299_v48 = vpop.f32.mrf.mxu2 }
 0x28d   :  { %3317 = vst [vmem:[%s14040_s11 + $0x18] sm:$0xff] %v3311_v53  ;;  %v9645_v45 = vmul.f32 -1.442695, %v3311_v53  ;;  %s14112_s11 = sld [smem:[#allocation33_spill]] }
 0x28e   :  { %4087 = vmatpush.bf16.msra.mxu1 %v12305_v41  ;;  %v9998_v41 = vld [vmem:[#allocation9 + $0x38] sm:$0xf0] }
 0x28f   :  { %12834 = vpow2.f32 %v9645_v45 }
 0x290   :  { %v3804_v61 = vpop.f32.mrf.mxu0 }
 0x291   :  { %v12322_v61 = vld [vmem:[#allocation9 + $0x64] sm:$0xf] }
 0x292   :  { %v3312_v51 = vpop.f32.mrf.mxu3  ;;  %4088 = vmatpush.bf16.msra.mxu1 %v12304_v43 }
 0x293   :  { %v12324_v51 = vld [vmem:[#allocation9 + $0x74] sm:$0xf] }
 0x295   :  { %v12835_v56 = vpop.eup %12834 }
 0x296   :  { %v3333_v59 = vadd.f32 1.0, %v12835_v56  ;;  %4089 = vmatpush.bf16.msra.mxu1 %v12303_v46  ;;  %v10030_v56 = vld [vmem:[#allocation9 + $0x78] sm:$0xf0]  ;;  %v12315_v46 = vld [vmem:[#allocation9 + $0x24] sm:$0xf0] }
 0x297   :  { %v10033_v58 = vor.u32 %v12324_v51, %v10030_v56  ;;  %v9972_v56 = vld [vmem:[#allocation9] sm:$0xf] }
 0x298   :  { %12836 = vrcp.f32 %v3333_v59  ;;  %v3390_v57 = vand.u32 2147483648, %v3333_v59  ;;  %v3388_v4 = vand.u32 2147483647, %v3333_v59  ;;  %vm3384_vm13 = vweird.f32 %v3333_v59 }
 0x29a   :  { %v3391_v9 = vor.u32 1.1754944e-38, %v3390_v57  ;;  %vm3389_vm15 = vcmp.eq.f32.partialorder %v3388_v4, 8.507059e+37  ;;  %4090 = vmatpush.bf16.msra.mxu1 %v12302_v32  ;;  %v10012_v4 = vld [vmem:[#allocation9 + $0x50] sm:$0xf] }
 0x29e   :  { %v12837_v62 = vpop.eup %12836  ;;  %v3854_v5 = vpop.f32.mrf.mxu0 }
 0x29f   :  { %v3380_v0 = vmul.f32 %v12837_v62, %v3333_v59  ;;  %vm3385_vm12 = vweird.f32 %v12837_v62  ;;  %v3855_v22 = vadd.f32 %v3854_v5, %v3470_v31  ;;  %v10020_v59 = vld [vmem:[#allocation9 + $0x60] sm:$0xf]  ;;  %v12321_v5 = vld [vmem:[#allocation9 + $0x54] sm:$0xf0] }
 0x2a0   :  { %vm3386_vm14 = vmor %vm3384_vm13, %vm3385_vm12 }
 0x2a1   :  { %v3381_v63 = vsub.f32 1.0, %v3380_v0  ;;  %v10021_v0 = vor.u32 %v12323_v60, %v10020_v59  ;;  %v12311_v59 = vld [vmem:[#allocation9 + $0x4] sm:$0xf0]  ;;  %v12310_v60 = vld [vmem:[#allocation9 + $0x4] sm:$0xf] }
 0x2a3   :  { %v3382_v1 = vmul.f32 %v12837_v62, %v3381_v63  ;;  %v10022_v63 = vld [vmem:[#allocation9 + $0x68] sm:$0xf0]  ;;  %4202 = vmatpush.bf16.msra.mxu2 %v10021_v0  ;;  %v12356_v0 = vld [vmem:[#allocation10 + $0xec] sm:$0xf0] }
 0x2a5   :  { %v3383_v6 = vadd.f32 %v12837_v62, %v3382_v1  ;;  %v10025_v1 = vor.u32 %v12322_v61, %v10022_v63  ;;  %v10279_v63 = vld [vmem:[#allocation10 + $0x1e0] sm:$0xf] }
 0x2a6   :  { %v3856_v35 = vpop.f32.mrf.mxu0 }
 0x2a7   :  { %v3387_v40 = vsel %vm3386_vm14, %v12837_v62, %v3383_v6  ;;  %v12320_v6 = vld [vmem:[#allocation9 + $0x54] sm:$0xf]  ;;  %v10013_v35 = vor.u32 %v12321_v5, %v10012_v4  ;;  %v12354_v4 = vld [vmem:[#allocation10 + $0xe4] sm:$0xf] }
 0x2a8   :  { %v3392_v39 = vsel %vm3389_vm15, %v3391_v9, %v3387_v40  ;;  %v3815_v14 = vpop.f32.mrf.mxu1  ;;  %v10014_v9 = vld [vmem:[#allocation9 + $0x58] sm:$0xf0]  ;;  %v10153_v5 = vld [vmem:[#allocation10 + $0xf0] sm:$0xf0] }
 0x2a9   :  { %3397 = vst [vmem:[%s14048_s19 + $0x18] sm:$0xff] %v3392_v39  ;;  %v3465_v10 = vpack.c.bf16 %v3392_v39, %v3392_v39  ;;  %v3816_v16 = vadd.f32 %v3815_v14, %v3803_v13  ;;  %v10017_v13 = vor.u32 %v12320_v6, %v10014_v9  ;;  %4203 = vmatpush.bf16.msra.mxu2 %v10013_v35 }
 0x2aa   :  { %v10156_v9 = vor.u32 %v12354_v4, %v10153_v5  ;;  %v12336_v4 = vld [vmem:[#allocation10 + $0x4c] sm:$0xf0]  ;;  %v10199_v5 = vld [vmem:[#allocation10 + $0x140] sm:$0xf] }
 0x2ab   :  { %3840 = vmatmul.bf16.vlgmr.msra.gmra.mxu3 %v3465_v10 }
 0x2ac   :  { %4214 = vmatpush.bf16.msra.mxu3 %v10033_v58  ;;  %v9974_v58 = vld [vmem:[#allocation9 + $0x8] sm:$0xf0] }
 0x2ad   :  { %4204 = vmatpush.bf16.msra.mxu2 %v10005_v33  ;;  %v9977_v61 = vor.u32 %v12310_v60, %v9974_v58  ;;  %v12372_v60 = vld [vmem:[#allocation10 + $0x16c] sm:$0xf0]  ;;  %v10089_v58 = vld [vmem:[#allocation10 + $0x70] sm:$0xf0] }
 0x2b0   :  { %v3817_v17 = vpop.f32.mrf.mxu1  ;;  %4215 = vmatpush.bf16.msra.mxu3 %v10025_v1  ;;  %v12388_v1 = vld [vmem:[#allocation10 + $0x1ec] sm:$0xf0] }
 0x2b1   :  { %v10280_v6 = vor.u32 %v12388_v1, %v10279_v63  ;;  %v10217_v63 = vld [vmem:[#allocation10 + $0x170] sm:$0xf0]  ;;  %v10071_v1 = vld [vmem:[#allocation10 + $0x40] sm:$0xf] }
 0x2b3   :  { %4679 = vmatpush.bf16.msrb.mxu1 %v10280_v6  ;;  %v10072_v6 = vor.u32 %v12336_v4, %v10071_v1  ;;  %v12381_v4 = vld [vmem:[#allocation10 + $0x1b4] sm:$0xf0] }
 0x2b4   :  { %4216 = vmatpush.bf16.msra.mxu3 %v10017_v13  ;;  %v12384_v13 = vld [vmem:[#allocation10 + $0x1cc] sm:$0xf0] }
 0x2b8   :  { %v3867_v23 = vpop.f32.mrf.mxu1 }
 0x2b9   :  { %v3868_v21 = vadd.f32 %v3867_v23, %v3855_v22 }
 0x2bb   :  { %3892 = vmatmul.bf16.vlgmr.msrb.gmra.mxu3 %v3465_v10 }
 0x2c0   :  { %v3869_v3 = vpop.f32.mrf.mxu1 }
 0x2ee   :  { %v3828_v24 = vpop.f32.mrf.mxu2 }
 0x2ef   :  { %v3829_v12 = vadd.f32 %v3828_v24, %v3816_v16 }
 0x2f6   :  { %v3830_v19 = vpop.f32.mrf.mxu2 }
 0x2fe   :  { %v3880_v26 = vpop.f32.mrf.mxu2 }
 0x2ff   :  { %v3881_v48 = vadd.f32 %v3880_v26, %v3868_v21 }
 0x306   :  { %v3882_v2 = vpop.f32.mrf.mxu2 }
 0x32e   :  { %v3841_v15 = vpop.f32.mrf.mxu3 }
 0x32f   :  { %v3842_v7 = vadd.f32 %v3841_v15, %v3829_v12  ;;  %v12317_v12 = vld [vmem:[#allocation9 + $0x34] sm:$0xf0]  ;;  %v10009_v15 = vor.u32 %v12318_v18, %v10006_v34  ;;  %v3973_v34 = vld [vmem:[%s14083_s23 + $0x3] ss:$0 sm:$0xff] }
 0x331   :  { %3897 = vst [vmem:[%s14041_s12] sm:$0xff] %v3842_v7  ;;  %v9903_v42 = vmul.f32 -1.442695, %v3842_v7  ;;  %v12316_v7 = vld [vmem:[#allocation9 + $0x34] sm:$0xf]  ;;  %4217 = vmatpush.bf16.msra.mxu3 %v10009_v15 }
 0x332   :  { %v10001_v43 = vor.u32 %v12316_v7, %v9998_v41 }
 0x333   :  { %12838 = vpow2.f32 %v9903_v42  ;;  %v9997_v42 = vor.u32 %v12317_v12, %v9996_v36 }
 0x335   :  { %4205 = vmatpush.bf16.msra.mxu2 %v9997_v42  ;;  %4218 = vmatpush.bf16.msra.mxu3 %v10001_v43  ;;  %v10103_v42 = vld [vmem:[#allocation10 + $0x80] sm:$0xf]  ;;  %v12344_v43 = vld [vmem:[#allocation10 + $0x8c] sm:$0xf0] }
 0x336   :  { %v3843_v53 = vpop.f32.mrf.mxu3 }
 0x337   :  { %v9988_v53 = vld [vmem:[#allocation9 + $0x20] sm:$0xf] }
 0x338   :  { %v9989_v32 = vor.u32 %v12315_v46, %v9988_v53  ;;  %v10231_v53 = vld [vmem:[#allocation10 + $0x180] sm:$0xf]  ;;  %v10104_v46 = vor.u32 %v12344_v43, %v10103_v42 }
 0x339   :  { %v12839_v47 = vpop.eup %12838 }
 0x33a   :  { %v3905_v45 = vadd.f32 1.0, %v12839_v47  ;;  %v12314_v47 = vld [vmem:[#allocation9 + $0x24] sm:$0xf]  ;;  %4206 = vmatpush.bf16.msra.mxu2 %v9989_v32 }
 0x33b   :  { %v12342_v32 = vld [vmem:[#allocation10 + $0x84] sm:$0xf] }
 0x33c   :  { %12840 = vrcp.f32 %v3905_v45  ;;  %v3918_v39 = vand.u32 2147483648, %v3905_v45  ;;  %v3916_v37 = vand.u32 2147483647, %v3905_v45  ;;  %vm3912_vm1 = vweird.f32 %v3905_v45 }
 0x33e   :  { %v3893_v49 = vpop.f32.mrf.mxu3  ;;  %v3919_v31 = vor.u32 1.1754944e-38, %v3918_v39  ;;  %vm3917_vm3 = vcmp.eq.f32.partialorder %v3916_v37, 8.507059e+37  ;;  %v10281_v39 = vld [vmem:[#allocation10 + $0x1f0] sm:$0xf0]  ;;  %v10263_v37 = vld [vmem:[#allocation10 + $0x1c0] sm:$0xf] }
 0x33f   :  { %v3894_v50 = vadd.f32 %v3893_v49, %v3881_v48  ;;  %v9980_v48 = vld [vmem:[#allocation9 + $0x10] sm:$0xf]  ;;  %v12313_v49 = vld [vmem:[#allocation9 + $0x14] sm:$0xf0] }
 0x340   :  { %v9981_v51 = vor.u32 %v12313_v49, %v9980_v48  ;;  %v10105_v48 = vld [vmem:[#allocation10 + $0x90] sm:$0xf0]  ;;  %v12374_v49 = vld [vmem:[#allocation10 + $0x184] sm:$0xf] }
 0x341   :  { %3898 = vst [vmem:[%s14041_s12 + $0x8] sm:$0xff] %v3894_v50  ;;  %v9904_v8 = vmul.f32 -1.442695, %v3894_v50  ;;  %v10108_v20 = vor.u32 %v12342_v32, %v10105_v48  ;;  %v10143_v48 = vld [vmem:[#allocation10 + $0xc8] sm:$0xf]  ;;  %s14106_s12 = sld [smem:[#allocation31_spill]] }
 0x342   :  { %v12841_v62 = vpop.eup %12840  ;;  %4207 = vmatpush.bf16.msra.mxu2 %v9981_v51  ;;  %v10087_v51 = vld [vmem:[#allocation10 + $0x60] sm:$0xf] }
 0x343   :  { %v3908_v57 = vmul.f32 %v12841_v62, %v3905_v45  ;;  %12842 = vpow2.f32 %v9904_v8  ;;  %vm3913_vm0 = vweird.f32 %v12841_v62  ;;  %v9990_v45 = vld [vmem:[#allocation9 + $0x28] sm:$0xf0]  ;;  %v9973_v8 = vor.u32 %v12311_v59, %v9972_v56  ;;  %v10215_v56 = vld [vmem:[#allocation10 + $0x160] sm:$0xf] }
 0x344   :  { %vm3914_vm2 = vmor %vm3912_vm1, %vm3913_vm0  ;;  %v9993_v50 = vor.u32 %v12314_v47, %v9990_v45  ;;  %v12376_v47 = vld [vmem:[#allocation10 + $0x18c] sm:$0xf0] }
 0x345   :  { %v3909_v40 = vsub.f32 1.0, %v3908_v57  ;;  %v10232_v45 = vor.u32 %v12376_v47, %v10231_v53  ;;  %v12355_v53 = vld [vmem:[#allocation10 + $0xec] sm:$0xf] }
 0x346   :  { %v3895_v10 = vpop.f32.mrf.mxu3  ;;  %4219 = vmatpush.bf16.msra.mxu3 %v9993_v50  ;;  %4208 = vmatpush.bf16.msra.mxu2 %v9973_v8  ;;  %v10233_v50 = vld [vmem:[#allocation10 + $0x190] sm:$0xf0]  ;;  %v12338_v8 = vld [vmem:[#allocation10 + $0x64] sm:$0xf]  ;;  %v12387_v47 = vld [vmem:[#allocation10 + $0x1ec] sm:$0xf] }
 0x347   :  { %v3910_v11 = vmul.f32 %v12841_v62, %v3909_v40  ;;  %v12386_v40 = vld [vmem:[#allocation10 + $0x1e4] sm:$0xf]  ;;  %v10135_v10 = vld [vmem:[#allocation10 + $0xc0] sm:$0xf]  ;;  %v10236_v44 = vor.u32 %v12374_v49, %v10233_v50  ;;  %v12353_v49 = vld [vmem:[#allocation10 + $0xd4] sm:$0xf0] }
 0x348   :  { %v10284_v35 = vor.u32 %v12386_v40, %v10281_v39  ;;  %v12334_v40 = vld [vmem:[#allocation10 + $0x44] sm:$0xf]  ;;  %v10073_v39 = vld [vmem:[#allocation10 + $0x50] sm:$0xf0] }
 0x349   :  { %v12843_v14 = vpop.eup %12842  ;;  %v3911_v16 = vadd.f32 %v12841_v62, %v3910_v11  ;;  %v12352_v11 = vld [vmem:[#allocation10 + $0xcc] sm:$0xf0] }
 0x34a   :  { %v3906_v17 = vadd.f32 1.0, %v12843_v14  ;;  %4220 = vmatpush.bf16.msra.mxu3 %v9985_v54  ;;  %4692 = vmatpush.bf16.msrb.mxu2 %v10156_v9  ;;  %v10136_v14 = vor.u32 %v12352_v11, %v10135_v10  ;;  %v12340_v54 = vld [vmem:[#allocation10 + $0x6c] sm:$0xf0]  ;;  %v12366_v11 = vld [vmem:[#allocation10 + $0x144] sm:$0xf] }
 0x34b   :  { %v3915_v22 = vsel %vm3914_vm2, %v12841_v62, %v3911_v16  ;;  %v10151_v62 = vld [vmem:[#allocation10 + $0xe0] sm:$0xf]  ;;  %v10264_v16 = vor.u32 %v12384_v13, %v10263_v37  ;;  %v10088_v59 = vor.u32 %v12340_v54, %v10087_v51  ;;  %v12368_v9 = vld [vmem:[#allocation10 + $0x14c] sm:$0xf0]  ;;  %v10201_v37 = vld [vmem:[#allocation10 + $0x150] sm:$0xf0] }
 0x34c   :  { %12844 = vrcp.f32 %v3906_v17  ;;  %v3920_v23 = vsel %vm3917_vm3, %v3919_v31, %v3915_v22  ;;  %v3933_v26 = vand.u32 2147483648, %v3906_v17  ;;  %v3931_v27 = vand.u32 2147483647, %v3906_v17  ;;  %v10137_v31 = vld [vmem:[#allocation10 + $0xd0] sm:$0xf0] }
 0x34d   :  { %3937 = vst [vmem:[%s14049_s20] sm:$0xff] %v3920_v23  ;;  %v3971_v21 = vpack.c.bf16 %v3920_v23, %v3920_v23  ;;  %vm3927_vm5 = vweird.f32 %v3906_v17  ;;  %v10152_v57 = vor.u32 %v12356_v0, %v10151_v62  ;;  %v12382_v22 = vld [vmem:[#allocation10 + $0x1c4] sm:$0xf]  ;;  %4680 = vmatpush.bf16.msrb.mxu1 %v10264_v16  ;;  %v10092_v62 = vor.u32 %v12338_v8, %v10089_v58  ;;  %v12332_v16 = vld [vmem:[#allocation10 + $0x2c] sm:$0xf0]  ;;  %v12385_v51 = vld [vmem:[#allocation10 + $0x1d4] sm:$0xf0] }
 0x34e   :  { %v3934_v25 = vor.u32 1.1754944e-38, %v3933_v26  ;;  %vm3932_vm7 = vcmp.eq.f32.partialorder %v3931_v27, 8.507059e+37  ;;  %4221 = vmatpush.bf16.msra.mxu3 %v9977_v61  ;;  %v10247_v26 = vld [vmem:[#allocation10 + $0x1a0] sm:$0xf]  ;;  %v12346_v27 = vld [vmem:[#allocation10 + $0xa4] sm:$0xf]  ;;  %v10216_v61 = vor.u32 %v12372_v60, %v10215_v56  ;;  %v10200_v10 = vor.u32 %v12368_v9, %v10199_v5 }
 0x34f   :  { %4078 = vmatmul.bf16.vlgmr.msra.gmra.mxu0 %v3971_v21  ;;  %v10265_v21 = vld [vmem:[#allocation10 + $0x1d0] sm:$0xf0]  ;;  %v12370_v0 = vld [vmem:[#allocation10 + $0x164] sm:$0xf]  ;;  %v10204_v13 = vor.u32 %v12366_v11, %v10201_v37  ;;  %v12351_v54 = vld [vmem:[#allocation10 + $0xcc] sm:$0xf] }
 0x350   :  { %4666 = vmatpush.bf16.msrb.mxu0 %v10152_v57  ;;  %v10220_v57 = vor.u32 %v12370_v0, %v10217_v63  ;;  %v12383_v60 = vld [vmem:[#allocation10 + $0x1cc] sm:$0xf]  ;;  %v10273_v8 = vld [vmem:[#allocation10 + $0x1d8] sm:$0xf0]  ;;  %v10127_v0 = vld [vmem:[#allocation10 + $0xa8] sm:$0xf] }
 0x351   :  { %v12349_v63 = vld [vmem:[#allocation10 + $0xb4] sm:$0xf0]  ;;  %v12347_v5 = vld [vmem:[#allocation10 + $0xac] sm:$0xf] }
 0x352   :  { %v12845_v3 = vpop.eup %12844  ;;  %4705 = vmatpush.bf16.msrb.mxu3 %v10284_v35  ;;  %v10076_v35 = vor.u32 %v12334_v40, %v10073_v39  ;;  %v10128_v1 = vor.u32 %v12349_v63, %v10127_v0  ;;  %v12379_v39 = vld [vmem:[#allocation10 + $0x1ac] sm:$0xf]  ;;  %v12345_v37 = vld [vmem:[#allocation10 + $0x94] sm:$0xf0]  ;;  %v10193_v63 = vld [vmem:[#allocation10 + $0x138] sm:$0xf0] }
 0x353   :  { %v3923_v24 = vmul.f32 %v12845_v3, %v3906_v17  ;;  %vm3928_vm4 = vweird.f32 %v12845_v3  ;;  %v12350_v17 = vld [vmem:[#allocation10 + $0xc4] sm:$0xf]  ;;  %v12363_v0 = vld [vmem:[#allocation10 + $0x12c] sm:$0xf] }
 0x354   :  { %vm3929_vm6 = vmor %vm3927_vm5, %vm3928_vm4  ;;  %v10140_v23 = vor.u32 %v12350_v17, %v10137_v31  ;;  %4667 = vmatpush.bf16.msrb.mxu0 %v10136_v14  ;;  %v10055_v14 = vld [vmem:[#allocation10 + $0x20] sm:$0xf] }
 0x355   :  { %v3924_v19 = vsub.f32 1.0, %v3923_v24  ;;  %v12348_v24 = vld [vmem:[#allocation10 + $0xac] sm:$0xf0]  ;;  %v10183_v17 = vld [vmem:[#allocation10 + $0x120] sm:$0xf]  ;;  %v10056_v31 = vor.u32 %v12332_v16, %v10055_v14 }
 0x356   :  { %4693 = vmatpush.bf16.msrb.mxu2 %v10140_v23  ;;  %v12330_v23 = vld [vmem:[#allocation10 + $0x24] sm:$0xf]  ;;  %v12377_v14 = vld [vmem:[#allocation10 + $0x194] sm:$0xf0]  ;;  %v12343_v16 = vld [vmem:[#allocation10 + $0x8c] sm:$0xf] }
 0x357   :  { %v3925_v2 = vmul.f32 %v12845_v3, %v3924_v19  ;;  %v10268_v19 = vor.u32 %v12382_v22, %v10265_v21  ;;  %v12364_v22 = vld [vmem:[#allocation10 + $0x12c] sm:$0xf0]  ;;  %v10057_v21 = vld [vmem:[#allocation10 + $0x30] sm:$0xf0] }
 0x359   :  { %v3926_v38 = vadd.f32 %v12845_v3, %v3925_v2  ;;  %v12380_v2 = vld [vmem:[#allocation10 + $0x1ac] sm:$0xf0]  ;;  %4706 = vmatpush.bf16.msrb.mxu3 %v10268_v19  ;;  %v12362_v19 = vld [vmem:[#allocation10 + $0x124] sm:$0xf] }
 0x35a   :  { %v10248_v29 = vor.u32 %v12380_v2, %v10247_v26  ;;  %v10185_v26 = vld [vmem:[#allocation10 + $0x130] sm:$0xf0] }
 0x35b   :  { %v3930_v28 = vsel %vm3929_vm6, %v12845_v3, %v3926_v38  ;;  %v10119_v3 = vld [vmem:[#allocation10 + $0xa0] sm:$0xf]  ;;  %v10188_v2 = vor.u32 %v12362_v19, %v10185_v26 }
 0x35c   :  { %v3935_v52 = vsel %vm3932_vm7, %v3934_v25, %v3930_v28  ;;  %v10120_v38 = vor.u32 %v12348_v24, %v10119_v3  ;;  %v10121_v25 = vld [vmem:[#allocation10 + $0xb0] sm:$0xf0]  ;;  %v12378_v28 = vld [vmem:[#allocation10 + $0x1a4] sm:$0xf]  ;;  %4681 = vmatpush.bf16.msrb.mxu1 %v10248_v29  ;;  %v10184_v3 = vor.u32 %v12364_v22, %v10183_v17  ;;  %v10060_v24 = vor.u32 %v12330_v23, %v10057_v21  ;;  %v10113_v17 = vld [vmem:[#allocation10 + $0x98] sm:$0xf0] }
 0x35d   :  { %3938 = vst [vmem:[%s14049_s20 + $0x8] sm:$0xff] %v3935_v52  ;;  %v3972_v55 = vpack.c.bf16 %v3935_v52, %v3935_v52  ;;  %v10249_v52 = vld [vmem:[#allocation10 + $0x1b0] sm:$0xf0]  ;;  %v10124_v30 = vor.u32 %v12346_v27, %v10121_v25  ;;  %v10039_v27 = vld [vmem:[#allocation10] sm:$0xf]  ;;  %v10116_v19 = vor.u32 %v12343_v16, %v10113_v17 }
 0x35e   :  { %v10252_v18 = vor.u32 %v12378_v28, %v10249_v52  ;;  %4668 = vmatpush.bf16.msrb.mxu0 %v10120_v38  ;;  %v12328_v38 = vld [vmem:[#allocation10 + $0xc] sm:$0xf0]  ;;  %v10167_v25 = vld [vmem:[#allocation10 + $0x100] sm:$0xf]  ;;  %v10041_v29 = vld [vmem:[#allocation10 + $0x10] sm:$0xf0] }
 0x35f   :  { %4091 = vmatmul.bf16.vlgmr.msra.gmra.mxu1 %v3972_v55  ;;  %4694 = vmatpush.bf16.msrb.mxu2 %v10124_v30  ;;  %v10040_v28 = vor.u32 %v12328_v38, %v10039_v27  ;;  %v12360_v52 = vld [vmem:[#allocation10 + $0x10c] sm:$0xf0]  ;;  %v10095_v38 = vld [vmem:[#allocation10 + $0x68] sm:$0xf]  ;;  %v10177_v16 = vld [vmem:[#allocation10 + $0x118] sm:$0xf0] }
 0x360   :  { %4707 = vmatpush.bf16.msrb.mxu3 %v10252_v18  ;;  %4682 = vmatpush.bf16.msrb.mxu1 %v10232_v45  ;;  %v10168_v30 = vor.u32 %v12360_v52, %v10167_v25  ;;  %v10289_v45 = vld [vmem:[#allocation10 + $0x1f8] sm:$0xf0]  ;;  %v12341_v25 = vld [vmem:[#allocation10 + $0x74] sm:$0xf0] }
 0x361   :  { %v10292_v50 = vor.u32 %v12387_v47, %v10289_v45  ;;  %v12369_v47 = vld [vmem:[#allocation10 + $0x154] sm:$0xf0] }
 0x362   :  { %4669 = vmatpush.bf16.msrb.mxu0 %v10104_v46  ;;  %v10161_v46 = vld [vmem:[#allocation10 + $0xf8] sm:$0xf0] }
 0x363   :  { %4695 = vmatpush.bf16.msrb.mxu2 %v10108_v20  ;;  %v10164_v32 = vor.u32 %v12355_v53, %v10161_v46  ;;  %v10144_v20 = vor.u32 %v12353_v49, %v10143_v48  ;;  %v12337_v53 = vld [vmem:[#allocation10 + $0x54] sm:$0xf0]  ;;  %v10207_v46 = vld [vmem:[#allocation10 + $0x148] sm:$0xf]  ;;  %v12335_v48 = vld [vmem:[#allocation10 + $0x4c] sm:$0xf] }
 0x364   :  { %4708 = vmatpush.bf16.msrb.mxu3 %v10236_v44  ;;  %4683 = vmatpush.bf16.msrb.mxu1 %v10216_v61  ;;  %v10271_v44 = vld [vmem:[#allocation10 + $0x1c8] sm:$0xf]  ;;  %v10276_v61 = vor.u32 %v12383_v60, %v10273_v8  ;;  %v10208_v45 = vor.u32 %v12369_v47, %v10207_v46  ;;  %v10081_v49 = vld [vmem:[#allocation10 + $0x58] sm:$0xf0]  ;;  %v12365_v60 = vld [vmem:[#allocation10 + $0x134] sm:$0xf0] }
 0x365   :  { %v10272_v56 = vor.u32 %v12385_v51, %v10271_v44  ;;  %v10209_v44 = vld [vmem:[#allocation10 + $0x158] sm:$0xf0]  ;;  %v10063_v51 = vld [vmem:[#allocation10 + $0x28] sm:$0xf]  ;;  %v12331_v8 = vld [vmem:[#allocation10 + $0x2c] sm:$0xf] }
 0x366   :  { %4670 = vmatpush.bf16.msrb.mxu0 %v10088_v59  ;;  %v10145_v59 = vld [vmem:[#allocation10 + $0xd8] sm:$0xf0]  ;;  %v12642_v46 = vld [vmem:[#allocation12 + $0x7dc] sm:$0xf0] }
 0x367   :  { %4696 = vmatpush.bf16.msrb.mxu2 %v10092_v62  ;;  %v10148_v58 = vor.u32 %v12351_v54, %v10145_v59  ;;  %v9969_v62 = vld [vmem:[%s14083_s23 + $0x4] ss:$8 sm:$0x3]  ;;  %v12333_v54 = vld [vmem:[#allocation10 + $0x34] sm:$0xf0] }
 0x368   :  { %4709 = vmatpush.bf16.msrb.mxu3 %v10220_v57  ;;  %4684 = vmatpush.bf16.msrb.mxu1 %v10200_v10  ;;  %v10255_v57 = vld [vmem:[#allocation10 + $0x1a8] sm:$0xf]  ;;  %v10257_v10 = vld [vmem:[#allocation10 + $0x1b8] sm:$0xf0]  ;;  %v4117_v22 = vperm.slane %v9969_v62, 0  ;;  %v4118_v23 = vperm.slane %v9969_v62, 1 }
 0x369   :  { %v10256_v9 = vor.u32 %v12381_v4, %v10255_v57  ;;  %v10260_v11 = vor.u32 %v12379_v39, %v10257_v10  ;;  %v10191_v59 = vld [vmem:[#allocation10 + $0x128] sm:$0xf]  ;;  %v10065_v62 = vld [vmem:[#allocation10 + $0x38] sm:$0xf0]  ;;  %v10064_v57 = vor.u32 %v12333_v54, %v10063_v51  ;;  %v10196_v10 = vor.u32 %v12363_v0, %v10193_v63  ;;  %v10749_v54 = vld [vmem:[#allocation12 + $0x380] sm:$0xf] }
 0x36a   :  { %4671 = vmatpush.bf16.msrb.mxu0 %v10072_v6  ;;  %v10129_v6 = vld [vmem:[#allocation10 + $0xb8] sm:$0xf0]  ;;  %v10047_v4 = vld [vmem:[#allocation10 + $0x8] sm:$0xf]  ;;  %v12434_v63 = vld [vmem:[#allocation12 + $0x15c] sm:$0xf0] }
 0x36b   :  { %4697 = vmatpush.bf16.msrb.mxu2 %v10076_v35  ;;  %v10132_v40 = vor.u32 %v12347_v5, %v10129_v6  ;;  %v10111_v35 = vld [vmem:[#allocation10 + $0x88] sm:$0xf]  ;;  %v10068_v5 = vor.u32 %v12331_v8, %v10065_v62  ;;  %v12329_v6 = vld [vmem:[#allocation10 + $0x14] sm:$0xf0]  ;;  %v11005_v8 = vld [vmem:[#allocation12 + $0x580] sm:$0xf] }
 0x36c   :  { %4710 = vmatpush.bf16.msrb.mxu3 %v10204_v13  ;;  %4685 = vmatpush.bf16.msrb.mxu1 %v10184_v3  ;;  %v10239_v13 = vld [vmem:[#allocation10 + $0x188] sm:$0xf]  ;;  %v10112_v21 = vor.u32 %v12345_v37, %v10111_v35  ;;  %v12327_v35 = vld [vmem:[#allocation10 + $0xc] sm:$0xf]  ;;  %v10461_v62 = vld [vmem:[#allocation12 + $0x140] sm:$0xf] }
 0x36d   :  { %v10240_v3 = vor.u32 %v12377_v14, %v10239_v13  ;;  %v12359_v14 = vld [vmem:[#allocation10 + $0x10c] sm:$0xf] }
 0x36e   :  { %4672 = vmatpush.bf16.msrb.mxu0 %v10056_v31  ;;  %v12375_v31 = vld [vmem:[#allocation10 + $0x18c] sm:$0xf] }
 0x36f   :  { %4698 = vmatpush.bf16.msrb.mxu2 %v10060_v24  ;;  %v10241_v24 = vld [vmem:[#allocation10 + $0x198] sm:$0xf0] }
 0x370   :  { %4711 = vmatpush.bf16.msrb.mxu3 %v10188_v2  ;;  %4686 = vmatpush.bf16.msrb.mxu1 %v10168_v30  ;;  %v10244_v26 = vor.u32 %v12375_v31, %v10241_v24  ;;  %v12373_v30 = vld [vmem:[#allocation10 + $0x174] sm:$0xf0]  ;;  %v10048_v31 = vor.u32 %v12329_v6, %v10047_v4  ;;  %v10429_v6 = vld [vmem:[#allocation12 + $0x100] sm:$0xf] }
 0x372   :  { %4673 = vmatpush.bf16.msrb.mxu0 %v10040_v28  ;;  %v10223_v28 = vld [vmem:[#allocation10 + $0x168] sm:$0xf] }
 0x3cc   :  { %v4079_v55 = vpop.f32.mrf.mxu0 }
 0x3cd   :  { %v4080_v36 = vadd.f32 %v4079_v55, %v3973_v34  ;;  %v12326_v55 = vld [vmem:[#allocation10 + $0x4] sm:$0xf]  ;;  %v10169_v34 = vld [vmem:[#allocation10 + $0x110] sm:$0xf0] }
 0x3ce   :  { %v10044_v18 = vor.u32 %v12326_v55, %v10041_v29  ;;  %v10096_v29 = vor.u32 %v12341_v25, %v10095_v38 }
 0x3d0   :  { %4699 = vmatpush.bf16.msrb.mxu2 %v10044_v18  ;;  %v12339_v18 = vld [vmem:[#allocation10 + $0x6c] sm:$0xf] }
 0x3d4   :  { %v4081_v33 = vpop.f32.mrf.mxu0 }
 0x3d5   :  { %v12358_v33 = vld [vmem:[#allocation10 + $0x104] sm:$0xf] }
 0x3dc   :  { %v4092_v12 = vpop.f32.mrf.mxu1 }
 0x3dd   :  { %v4093_v15 = vadd.f32 %v4092_v12, %v4080_v36  ;;  %v10159_v36 = vld [vmem:[#allocation10 + $0xe8] sm:$0xf]  ;;  %v10172_v12 = vor.u32 %v12358_v33, %v10169_v34  ;;  %v10097_v33 = vld [vmem:[#allocation10 + $0x78] sm:$0xf0]  ;;  %v10224_v34 = vor.u32 %v12373_v30, %v10223_v28  ;;  %v10525_v30 = vld [vmem:[#allocation12 + $0x1c0] sm:$0xf] }
 0x3df   :  { %4096 = vst [vmem:[%s14042_s13] sm:$0xff] %v4093_v15  ;;  %v4113_v7 = vpack.c.bf16 %v4093_v15, %v4093_v15  ;;  %v12357_v15 = vld [vmem:[#allocation10 + $0xf4] sm:$0xf0]  ;;  %4712 = vmatpush.bf16.msrb.mxu3 %v10172_v12  ;;  %v12371_v12 = vld [vmem:[#allocation10 + $0x16c] sm:$0xf] }
 0x3e0   :  { %v10160_v42 = vor.u32 %v12357_v15, %v10159_v36  ;;  %v10100_v36 = vor.u32 %v12339_v18, %v10097_v33  ;;  %v10225_v15 = vld [vmem:[#allocation10 + $0x178] sm:$0xf0]  ;;  %v12450_v33 = vld [vmem:[#allocation12 + $0x1dc] sm:$0xf0] }
 0x3e1   :  { %4209 = vmatmul.bf16.vlgmr.msra.gmra.mxu2 %v4113_v7  ;;  %4222 = vmatmul.bf16.vlgmr.msra.gmra.mxu3 %v4113_v7  ;;  %v10287_v7 = vld [vmem:[#allocation10 + $0x1e8] sm:$0xf] }
 0x3e2   :  { %4718 = vmatpush.bf16.msra.mxu0 %v10160_v42  ;;  %4744 = vmatpush.bf16.msra.mxu2 %v10164_v32 }
 0x3e3   :  { %4757 = vmatpush.bf16.msra.mxu3 %v10292_v50  ;;  %v12367_v50 = vld [vmem:[#allocation10 + $0x14c] sm:$0xf] }
 0x3e4   :  { %v4094_v41 = vpop.f32.mrf.mxu1 }
 0x3e5   :  { %v12389_v41 = vld [vmem:[#allocation10 + $0x1f4] sm:$0xf0] }
 0x3e6   :  { %v10288_v43 = vor.u32 %v12389_v41, %v10287_v7  ;;  %4719 = vmatpush.bf16.msra.mxu0 %v10144_v20  ;;  %4745 = vmatpush.bf16.msra.mxu2 %v10148_v58  ;;  %v10079_v7 = vld [vmem:[#allocation10 + $0x48] sm:$0xf]  ;;  %v10084_v20 = vor.u32 %v12335_v48, %v10081_v49  ;;  %v10526_v49 = vor.u32 %v12450_v33, %v10525_v30  ;;  %v10301_v30 = vld [vmem:[#allocation12] sm:$0xf] }
 0x3e7   :  { %4758 = vmatpush.bf16.msra.mxu3 %v10276_v61  ;;  %v10080_v32 = vor.u32 %v12337_v53, %v10079_v7  ;;  %v12514_v7 = vld [vmem:[#allocation12 + $0x3dc] sm:$0xf0] }
 0x3e8   :  { %4731 = vmatpush.bf16.msra.mxu1 %v10288_v43  ;;  %v10228_v43 = vor.u32 %v12371_v12, %v10225_v15  ;;  %v11293_v53 = vld [vmem:[#allocation12 + $0x7c0] sm:$0xf] }
 0x3e9   :  { %v10941_v33 = vld [vmem:[#allocation12 + $0x500] sm:$0xf] }
 0x3ea   :  { %4720 = vmatpush.bf16.msra.mxu0 %v10128_v1  ;;  %4746 = vmatpush.bf16.msra.mxu2 %v10132_v40  ;;  %v10192_v1 = vor.u32 %v12365_v60, %v10191_v59  ;;  %v12361_v40 = vld [vmem:[#allocation10 + $0x114] sm:$0xf0]  ;;  %v11294_v60 = vor.u32 %v12642_v46, %v11293_v53  ;;  %v11229_v53 = vld [vmem:[#allocation12 + $0x740] sm:$0xf] }
 0x3eb   :  { %4759 = vmatpush.bf16.msra.mxu3 %v10260_v11  ;;  %v10049_v11 = vld [vmem:[#allocation10 + $0x18] sm:$0xf0] }
 0x3ec   :  { %4732 = vmatpush.bf16.msra.mxu1 %v10272_v56  ;;  %v10212_v56 = vor.u32 %v12367_v50, %v10209_v44  ;;  %v10493_v50 = vld [vmem:[#allocation12 + $0x180] sm:$0xf] }
 0x3ee   :  { %4721 = vmatpush.bf16.msra.mxu0 %v10112_v21  ;;  %4747 = vmatpush.bf16.msra.mxu2 %v10116_v19  ;;  %v10180_v21 = vor.u32 %v12359_v14, %v10177_v16  ;;  %v10653_v14 = vld [vmem:[#allocation12 + $0x2c0] sm:$0xf] }
 0x3ef   :  { %4760 = vmatpush.bf16.msra.mxu3 %v10244_v26  ;;  %v12482_v16 = vld [vmem:[#allocation12 + $0x2dc] sm:$0xf0] }
 0x3f0   :  { %4733 = vmatpush.bf16.msra.mxu1 %v10256_v9  ;;  %v10175_v9 = vld [vmem:[#allocation10 + $0x108] sm:$0xf] }
 0x3f2   :  { %4722 = vmatpush.bf16.msra.mxu0 %v10096_v29  ;;  %4748 = vmatpush.bf16.msra.mxu2 %v10100_v36 }
 0x3f3   :  { %4761 = vmatpush.bf16.msra.mxu3 %v10228_v43  ;;  %v12578_v43 = vld [vmem:[#allocation12 + $0x5dc] sm:$0xf0] }
 0x3f4   :  { %4734 = vmatpush.bf16.msra.mxu1 %v10240_v3 }
 0x3f6   :  { %4723 = vmatpush.bf16.msra.mxu0 %v10080_v32  ;;  %4749 = vmatpush.bf16.msra.mxu2 %v10084_v20  ;;  %v12442_v20 = vld [vmem:[#allocation12 + $0x19c] sm:$0xf0] }
 0x3f7   :  { %4762 = vmatpush.bf16.msra.mxu3 %v10212_v56  ;;  %v12506_v56 = vld [vmem:[#allocation12 + $0x39c] sm:$0xf0] }
 0x3f8   :  { %4735 = vmatpush.bf16.msra.mxu1 %v10224_v34  ;;  %v10781_v34 = vld [vmem:[#allocation12 + $0x3c0] sm:$0xf]  ;;  %v10750_v0 = vor.u32 %v12506_v56, %v10749_v54 }
 0x3f9   :  { %v10782_v44 = vor.u32 %v12514_v7, %v10781_v34  ;;  %v12458_v54 = vld [vmem:[#allocation12 + $0x21c] sm:$0xf0] }
 0x3fa   :  { %4724 = vmatpush.bf16.msra.mxu0 %v10064_v57  ;;  %4750 = vmatpush.bf16.msra.mxu2 %v10068_v5  ;;  %v10717_v57 = vld [vmem:[#allocation12 + $0x340] sm:$0xf]  ;;  %v10462_v5 = vor.u32 %v12434_v63, %v10461_v62 }
 0x3fb   :  { %4763 = vmatpush.bf16.msra.mxu3 %v10196_v10  ;;  %v12490_v10 = vld [vmem:[#allocation12 + $0x31c] sm:$0xf0] }
 0x3fc   :  { %4736 = vmatpush.bf16.msra.mxu1 %v10208_v45  ;;  %v11197_v56 = vld [vmem:[#allocation12 + $0x700] sm:$0xf] }
 0x3fd   :  { %v12538_v63 = vld [vmem:[#allocation12 + $0x49c] sm:$0xf0] }
 0x3fe   :  { %4725 = vmatpush.bf16.msra.mxu0 %v10048_v31  ;;  %v10654_v31 = vor.u32 %v12482_v16, %v10653_v14  ;;  %v12422_v14 = vld [vmem:[#allocation12 + $0x104] sm:$0xf] }
 0x3ff   :  { %4764 = vmatpush.bf16.msra.mxu3 %v10180_v21  ;;  %v10431_v16 = vld [vmem:[#allocation12 + $0x120] sm:$0xf0] }
 0x400   :  { %4737 = vmatpush.bf16.msra.mxu1 %v10192_v1  ;;  %v12498_v1 = vld [vmem:[#allocation12 + $0x35c] sm:$0xf0] }
 0x464   :  { %v4210_v2 = vpop.f32.mrf.mxu2  ;;  %v4223_v27 = vpop.f32.mrf.mxu3 }
 0x465   :  { %v4211_v52 = vadd.f32 %v4210_v2, %v4117_v22  ;;  %v4224_v55 = vadd.f32 %v4223_v27, %v4118_v23  ;;  %v10176_v22 = vor.u32 %v12361_v40, %v10175_v9  ;;  %v10052_v23 = vor.u32 %v12327_v35, %v10049_v11  ;;  %v12426_v40 = vld [vmem:[#allocation12 + $0x11c] sm:$0xf0] }
 0x466   :  { %v10718_v9 = vor.u32 %v12498_v1, %v10717_v57  ;;  %v10430_v35 = vor.u32 %v12426_v40, %v10429_v6  ;;  %v10397_v11 = vld [vmem:[#allocation12 + $0xc0] sm:$0xf]  ;;  %v12430_v1 = vld [vmem:[#allocation12 + $0x144] sm:$0xf] }
 0x467   :  { %4227 = vst [vmem:[%s14043_s14] sm:$0xff] %v4211_v52  ;;  %v10034_v41 = vmul.f32 -1.442695, %v4211_v52  ;;  %v10035_v42 = vmul.f32 -1.442695, %v4224_v55  ;;  %4738 = vmatpush.bf16.msra.mxu1 %v10176_v22  ;;  %4751 = vmatpush.bf16.msra.mxu2 %v10052_v23  ;;  %v10365_v22 = vld [vmem:[#allocation12 + $0x80] sm:$0xf] }
 0x468   :  { %4228 = vst [vmem:[%s14043_s14 + $0x8] sm:$0xff] %v4224_v55  ;;  %v12410_v23 = vld [vmem:[#allocation12 + $0x9c] sm:$0xf0] }
 0x469   :  { %12846 = vpow2.f32 %v10034_v41  ;;  %v11037_v41 = vld [vmem:[#allocation12 + $0x5c0] sm:$0xf]  ;;  %v10366_v21 = vor.u32 %v12410_v23, %v10365_v22 }
 0x46a   :  { %12848 = vpow2.f32 %v10035_v42  ;;  %v11038_v59 = vor.u32 %v12578_v43, %v11037_v41  ;;  %v12466_v43 = vld [vmem:[#allocation12 + $0x25c] sm:$0xf0] }
 0x46b   :  { %v11165_v6 = vld [vmem:[#allocation12 + $0x6c0] sm:$0xf] }
 0x46c   :  { %v4212_v58 = vpop.f32.mrf.mxu2  ;;  %v4225_v61 = vpop.f32.mrf.mxu3  ;;  %v12602_v22 = vld [vmem:[#allocation12 + $0x69c] sm:$0xf0] }
 0x46d   :  { %v12570_v58 = vld [vmem:[#allocation12 + $0x59c] sm:$0xf0]  ;;  %v10494_v61 = vor.u32 %v12442_v20, %v10493_v50  ;;  %v12438_v50 = vld [vmem:[#allocation12 + $0x184] sm:$0xf] }
 0x46e   :  { %v11006_v4 = vor.u32 %v12570_v58, %v11005_v8  ;;  %v10495_v20 = vld [vmem:[#allocation12 + $0x1a0] sm:$0xf0] }
 0x46f   :  { %v12847_v39 = vpop.eup %12846  ;;  %v12510_v8 = vld [vmem:[#allocation12 + $0x3c4] sm:$0xf] }
 0x470   :  { %v12849_v37 = vpop.eup %12848  ;;  %v4235_v13 = vadd.f32 1.0, %v12847_v39  ;;  %v10685_v39 = vld [vmem:[#allocation12 + $0x300] sm:$0xf]  ;;  %v10783_v58 = vld [vmem:[#allocation12 + $0x3e0] sm:$0xf0] }
 0x471   :  { %v4236_v17 = vadd.f32 1.0, %v12849_v37  ;;  %v10686_v37 = vor.u32 %v12490_v10, %v10685_v39  ;;  %v10786_v62 = vor.u32 %v12510_v8, %v10783_v58  ;;  %v12502_v39 = vld [vmem:[#allocation12 + $0x384] sm:$0xf] }
 0x472   :  { %12850 = vrcp.f32 %v4235_v13  ;;  %v4246_v27 = vand.u32 2147483647, %v4235_v13  ;;  %v4248_v38 = vand.u32 2147483648, %v4235_v13  ;;  %vm4242_vm10 = vweird.f32 %v4235_v13  ;;  %v10751_v10 = vld [vmem:[#allocation12 + $0x3a0] sm:$0xf0] }
 0x473   :  { %12852 = vrcp.f32 %v4236_v17  ;;  %v4263_v28 = vand.u32 2147483648, %v4236_v17  ;;  %v4261_v29 = vand.u32 2147483647, %v4236_v17  ;;  %vm4257_vm11 = vweird.f32 %v4236_v17  ;;  %v10975_v8 = vld [vmem:[#allocation12 + $0x560] sm:$0xf0] }
 0x474   :  { %vm4247_vm13 = vcmp.eq.f32.partialorder %v4246_v27, 8.507059e+37  ;;  %v4249_v36 = vor.u32 1.1754944e-38, %v4248_v38  ;;  %v10621_v38 = vld [vmem:[#allocation12 + $0x280] sm:$0xf] }
 0x475   :  { %v4264_v15 = vor.u32 1.1754944e-38, %v4263_v28  ;;  %vm4262_vm15 = vcmp.eq.f32.partialorder %v4261_v29, 8.507059e+37  ;;  %v11261_v28 = vld [vmem:[#allocation12 + $0x780] sm:$0xf] }
 0x478   :  { %v12851_v3 = vpop.eup %12850 }
 0x479   :  { %v12853_v24 = vpop.eup %12852  ;;  %v4238_v19 = vmul.f32 %v12851_v3, %v4235_v13  ;;  %vm4243_vm8 = vweird.f32 %v12851_v3  ;;  %v12418_v13 = vld [vmem:[#allocation12 + $0xdc] sm:$0xf0] }
 0x47a   :  { %v4253_v26 = vmul.f32 %v12853_v24, %v4236_v17  ;;  %vm4258_vm9 = vweird.f32 %v12853_v24  ;;  %vm4244_vm12 = vmor %vm4242_vm10, %vm4243_vm8  ;;  %v10398_v17 = vor.u32 %v12418_v13, %v10397_v11  ;;  %v10845_v11 = vld [vmem:[#allocation12 + $0x440] sm:$0xf] }
 0x47b   :  { %v4239_v2 = vsub.f32 1.0, %v4238_v19  ;;  %vm4259_vm14 = vmor %vm4257_vm11, %vm4258_vm9  ;;  %v10973_v19 = vld [vmem:[#allocation12 + $0x540] sm:$0xf] }
 0x47c   :  { %v4254_v25 = vsub.f32 1.0, %v4253_v26 }
 0x47d   :  { %v4240_v52 = vmul.f32 %v12851_v3, %v4239_v2  ;;  %v12562_v2 = vld [vmem:[#allocation12 + $0x55c] sm:$0xf0] }
 0x47e   :  { %v4255_v55 = vmul.f32 %v12853_v24, %v4254_v25  ;;  %v10974_v27 = vor.u32 %v12562_v2, %v10973_v19  ;;  %v12474_v25 = vld [vmem:[#allocation12 + $0x29c] sm:$0xf0] }
 0x47f   :  { %v4241_v18 = vadd.f32 %v12851_v3, %v4240_v52  ;;  %v10622_v52 = vor.u32 %v12474_v25, %v10621_v38  ;;  %v10813_v19 = vld [vmem:[#allocation12 + $0x400] sm:$0xf]  ;;  %v10399_v38 = vld [vmem:[#allocation12 + $0xe0] sm:$0xf0] }
 0x480   :  { %v4256_v12 = vadd.f32 %v12853_v24, %v4255_v55  ;;  %v12634_v55 = vld [vmem:[#allocation12 + $0x79c] sm:$0xf0]  ;;  %v12574_v25 = vld [vmem:[#allocation12 + $0x5c4] sm:$0xf] }
 0x481   :  { %v4245_v42 = vsel %vm4244_vm12, %v12851_v3, %v4241_v18  ;;  %v10333_v3 = vld [vmem:[#allocation12 + $0x40] sm:$0xf]  ;;  %v11262_v29 = vor.u32 %v12634_v55, %v11261_v28 }
 0x482   :  { %v4250_v47 = vsel %vm4247_vm13, %v4249_v36, %v4245_v42  ;;  %v4260_v32 = vsel %vm4259_vm14, %v12853_v24, %v4256_v12  ;;  %v12402_v24 = vld [vmem:[#allocation12 + $0x5c] sm:$0xf0]  ;;  %v12446_v12 = vld [vmem:[#allocation12 + $0x1c4] sm:$0xf] }
 0x483   :  { %4267 = vst [vmem:[%s14050_s21] sm:$0xff] %v4250_v47  ;;  %v4333_v45 = vpack.c.bf16 %v4250_v47, %v4250_v47  ;;  %v4265_v48 = vsel %vm4262_vm15, %v4264_v15, %v4260_v32  ;;  %v10334_v26 = vor.u32 %v12402_v24, %v10333_v3  ;;  %v12394_v18 = vld [vmem:[#allocation12 + $0x1c] sm:$0xf0]  ;;  %v10527_v15 = vld [vmem:[#allocation12 + $0x1e0] sm:$0xf0] }
 0x484   :  { %4268 = vst [vmem:[%s14050_s21 + $0x8] sm:$0xff] %v4265_v48  ;;  %v4334_v51 = vpack.c.bf16 %v4265_v48, %v4265_v48  ;;  %v10302_v34 = vor.u32 %v12394_v18, %v10301_v30  ;;  %v12554_v36 = vld [vmem:[#allocation12 + $0x51c] sm:$0xf0]  ;;  %v10530_v41 = vor.u32 %v12446_v12, %v10527_v15  ;;  %v10719_v3 = vld [vmem:[#allocation12 + $0x360] sm:$0xf0]  ;;  %s14110_s21 = sld [smem:[#allocation32_spill]] }
 0x485   :  { %4674 = vmatmul.bf16.vlgmr.msrb.gmra.mxu0 %v4333_v45  ;;  %4700 = vmatmul.bf16.vlgmr.msrb.gmra.mxu2 %v4333_v45  ;;  %v10942_v7 = vor.u32 %v12554_v36, %v10941_v33  ;;  %v10589_v42 = vld [vmem:[#allocation12 + $0x240] sm:$0xf]  ;;  %v12486_v33 = vld [vmem:[#allocation12 + $0x304] sm:$0xf] }
 0x486   :  { %4687 = vmatmul.bf16.vlgmr.msrb.gmra.mxu1 %v4334_v51  ;;  %4713 = vmatmul.bf16.vlgmr.msrb.gmra.mxu3 %v4334_v51  ;;  %v10590_v46 = vor.u32 %v12466_v43, %v10589_v42  ;;  %v12626_v47 = vld [vmem:[#allocation12 + $0x75c] sm:$0xf0]  ;;  %v13711_v12 = vld [vmem:[%s14083_s23 + $0x5] ss:$8 sm:$0xf] }
 0x487   :  { %6415 = vmatpush.bf16.msrb.mxu0 %v10526_v49  ;;  %6428 = vmatpush.bf16.msrb.mxu1 %v10782_v44  ;;  %v11230_v32 = vor.u32 %v12626_v47, %v11229_v53  ;;  %v12546_v48 = vld [vmem:[#allocation12 + $0x4dc] sm:$0xf0]  ;;  %v10498_v44 = vor.u32 %v12438_v50, %v10495_v20  ;;  %v12406_v15 = vld [vmem:[#allocation12 + $0x84] sm:$0xf] }
 0x488   :  { %6441 = vmatpush.bf16.msrb.mxu2 %v11038_v59  ;;  %6454 = vmatpush.bf16.msrb.mxu3 %v11294_v60  ;;  %v12618_v60 = vld [vmem:[#allocation12 + $0x71c] sm:$0xf0]  ;;  %v11007_v43 = vld [vmem:[#allocation12 + $0x5a0] sm:$0xf0] }
 0x489   :  { %v11101_v55 = vld [vmem:[#allocation12 + $0x640] sm:$0xf]  ;;  %v11295_v20 = vld [vmem:[#allocation12 + $0x7e0] sm:$0xf0] }
 0x48a   :  { %v11069_v53 = vld [vmem:[#allocation12 + $0x600] sm:$0xf] }
 0x48b   :  { %6416 = vmatpush.bf16.msrb.mxu0 %v10494_v61  ;;  %6429 = vmatpush.bf16.msrb.mxu1 %v10750_v0  ;;  %v11198_v61 = vor.u32 %v12618_v60, %v11197_v56  ;;  %v10877_v0 = vld [vmem:[#allocation12 + $0x480] sm:$0xf]  ;;  %v12558_v56 = vld [vmem:[#allocation12 + $0x544] sm:$0xf] }
 0x48c   :  { %6442 = vmatpush.bf16.msrb.mxu2 %v11006_v4  ;;  %6455 = vmatpush.bf16.msrb.mxu3 %v11262_v29  ;;  %v10878_v57 = vor.u32 %v12538_v63, %v10877_v0  ;;  %v10463_v4 = vld [vmem:[#allocation12 + $0x160] sm:$0xf0]  ;;  %v12594_v29 = vld [vmem:[#allocation12 + $0x65c] sm:$0xf0]  ;;  %v10978_v58 = vor.u32 %v12558_v56, %v10975_v8 }
 0x48d   :  { %v11102_v18 = vor.u32 %v12594_v29, %v11101_v55  ;;  %v12630_v0 = vld [vmem:[#allocation12 + $0x784] sm:$0xf] }
 0x48e   :  { %v11199_v55 = vld [vmem:[#allocation12 + $0x720] sm:$0xf0] }
 0x48f   :  { %6417 = vmatpush.bf16.msrb.mxu0 %v10462_v5  ;;  %6430 = vmatpush.bf16.msrb.mxu1 %v10718_v9  ;;  %v10466_v5 = vor.u32 %v12430_v1, %v10463_v4  ;;  %v12610_v9 = vld [vmem:[#allocation12 + $0x6dc] sm:$0xf0]  ;;  %v12518_v56 = vld [vmem:[#allocation12 + $0x404] sm:$0xf] }
 0x490   :  { %6443 = vmatpush.bf16.msrb.mxu2 %v10974_v27  ;;  %6456 = vmatpush.bf16.msrb.mxu3 %v11230_v32  ;;  %v11166_v40 = vor.u32 %v12610_v9, %v11165_v6  ;;  %v12414_v27 = vld [vmem:[#allocation12 + $0xc4] sm:$0xf] }
 0x491   :  { %v10402_v28 = vor.u32 %v12414_v27, %v10399_v38  ;;  %v10303_v6 = vld [vmem:[#allocation12 + $0x20] sm:$0xf0] }
 0x492   :  { %v12550_v9 = vld [vmem:[#allocation12 + $0x504] sm:$0xf] }
 0x493   :  { %6418 = vmatpush.bf16.msrb.mxu0 %v10430_v35  ;;  %6431 = vmatpush.bf16.msrb.mxu1 %v10686_v37  ;;  %v10754_v35 = vor.u32 %v12502_v39, %v10751_v10  ;;  %v12530_v37 = vld [vmem:[#allocation12 + $0x45c] sm:$0xf0]  ;;  %v10559_v27 = vld [vmem:[#allocation12 + $0x220] sm:$0xf0] }
 0x494   :  { %6444 = vmatpush.bf16.msrb.mxu2 %v10942_v7  ;;  %6457 = vmatpush.bf16.msrb.mxu3 %v11198_v61  ;;  %v10846_v13 = vor.u32 %v12530_v37, %v10845_v11  ;;  %v10367_v7 = vld [vmem:[#allocation12 + $0xa0] sm:$0xf0] }
 0x495   :  { %4726 = vmatmul.bf16.vlgmr.msra.gmra.mxu0 %v4333_v45  ;;  %4752 = vmatmul.bf16.vlgmr.msra.gmra.mxu2 %v4333_v45  ;;  %v10909_v45 = vld [vmem:[#allocation12 + $0x4c0] sm:$0xf]  ;;  %v10370_v42 = vor.u32 %v12406_v15, %v10367_v7  ;;  %v12470_v61 = vld [vmem:[#allocation12 + $0x284] sm:$0xf] }
 0x496   :  { %4739 = vmatmul.bf16.vlgmr.msra.gmra.mxu1 %v4334_v51  ;;  %4765 = vmatmul.bf16.vlgmr.msra.gmra.mxu3 %v4334_v51  ;;  %v10910_v49 = vor.u32 %v12546_v48, %v10909_v45  ;;  %v10557_v51 = vld [vmem:[#allocation12 + $0x200] sm:$0xf]  ;;  %v12478_v45 = vld [vmem:[#allocation12 + $0x2c4] sm:$0xf] }
 0x497   :  { %6419 = vmatpush.bf16.msrb.mxu0 %v10398_v17  ;;  %6432 = vmatpush.bf16.msrb.mxu1 %v10654_v31  ;;  %v10558_v59 = vor.u32 %v12458_v54, %v10557_v51  ;;  %v10434_v17 = vor.u32 %v12422_v14, %v10431_v16  ;;  %v11133_v31 = vld [vmem:[#allocation12 + $0x680] sm:$0xf]  ;;  %v10655_v48 = vld [vmem:[#allocation12 + $0x2e0] sm:$0xf0] }
 0x498   :  { %6445 = vmatpush.bf16.msrb.mxu2 %v10910_v49  ;;  %6458 = vmatpush.bf16.msrb.mxu3 %v11166_v40  ;;  %v11134_v23 = vor.u32 %v12602_v22, %v11133_v31  ;;  %v12638_v49 = vld [vmem:[#allocation12 + $0x7c4] sm:$0xf]  ;;  %v10658_v50 = vor.u32 %v12478_v45, %v10655_v48 }
 0x499   :  { %v12398_v51 = vld [vmem:[#allocation12 + $0x44] sm:$0xf] }
 0x49a   :  { %v10335_v54 = vld [vmem:[#allocation12 + $0x60] sm:$0xf0] }
 0x49b   :  { %6420 = vmatpush.bf16.msrb.mxu0 %v10366_v21  ;;  %6433 = vmatpush.bf16.msrb.mxu1 %v10622_v52  ;;  %v12494_v21 = vld [vmem:[#allocation12 + $0x344] sm:$0xf]  ;;  %v10338_v60 = vor.u32 %v12398_v51, %v10335_v54 }
 0x49c   :  { %6446 = vmatpush.bf16.msrb.mxu2 %v10878_v57  ;;  %v10722_v24 = vor.u32 %v12494_v21, %v10719_v3  ;;  %6459 = vmatpush.bf16.msrb.mxu3 %v11134_v23  ;;  %v11039_v52 = vld [vmem:[#allocation12 + $0x5e0] sm:$0xf0] }
 0x49d   :  { %v11042_v30 = vor.u32 %v12574_v25, %v11039_v52  ;;  %v11263_v57 = vld [vmem:[#allocation12 + $0x7a0] sm:$0xf0] }
 0x49e   :  { %v11266_v4 = vor.u32 %v12630_v0, %v11263_v57  ;;  %v12462_v37 = vld [vmem:[#allocation12 + $0x244] sm:$0xf]  ;;  %v4341_v0 = vperm.slane %v13711_v12, 3 }
 0x49f   :  { %6421 = vmatpush.bf16.msrb.mxu0 %v10334_v26  ;;  %6434 = vmatpush.bf16.msrb.mxu1 %v10590_v46  ;;  %v12522_v26 = vld [vmem:[#allocation12 + $0x41c] sm:$0xf0]  ;;  %v12622_v14 = vld [vmem:[#allocation12 + $0x744] sm:$0xf] }
 0x4a0   :  { %6447 = vmatpush.bf16.msrb.mxu2 %v10846_v13  ;;  %v10814_v2 = vor.u32 %v12522_v26, %v10813_v19  ;;  %6460 = vmatpush.bf16.msrb.mxu3 %v11102_v18  ;;  %v12586_v46 = vld [vmem:[#allocation12 + $0x61c] sm:$0xf0]  ;;  %v10591_v13 = vld [vmem:[#allocation12 + $0x260] sm:$0xf0] }
 0x4a1   :  { %v11070_v32 = vor.u32 %v12586_v46, %v11069_v53  ;;  %v10594_v31 = vor.u32 %v12462_v37, %v10591_v13  ;;  %v11231_v22 = vld [vmem:[#allocation12 + $0x760] sm:$0xf0] }
 0x4a2   :  { %v11234_v23 = vor.u32 %v12622_v14, %v11231_v22  ;;  %v12542_v21 = vld [vmem:[#allocation12 + $0x4c4] sm:$0xf] }
 0x4a3   :  { %6422 = vmatpush.bf16.msrb.mxu0 %v10302_v34  ;;  %6435 = vmatpush.bf16.msrb.mxu1 %v10558_v59  ;;  %v10687_v34 = vld [vmem:[#allocation12 + $0x320] sm:$0xf0]  ;;  %v4338_v59 = vperm.slane %v13711_v12, 0 }
 0x4a4   :  { %6448 = vmatpush.bf16.msrb.mxu2 %v10814_v2  ;;  %v10690_v36 = vor.u32 %v12486_v33, %v10687_v34  ;;  %6461 = vmatpush.bf16.msrb.mxu3 %v11070_v32  ;;  %v10911_v3 = vld [vmem:[#allocation12 + $0x4e0] sm:$0xf0]  ;;  %v4340_v32 = vperm.slane %v13711_v12, 2 }
 0x4a5   :  { %v10914_v19 = vor.u32 %v12542_v21, %v10911_v3  ;;  %v12454_v2 = vld [vmem:[#allocation12 + $0x204] sm:$0xf] }
 0x4a6   :  { %v12614_v38 = vld [vmem:[#allocation12 + $0x704] sm:$0xf]  ;;  %v10562_v52 = vor.u32 %v12454_v2, %v10559_v27  ;;  %v12451_v2 = vld [vmem:[#allocation12 + $0x1e4] sm:$0xf0] }
 0x4a7   :  { %6467 = vmatpush.bf16.msra.mxu0 %v10530_v41  ;;  %6480 = vmatpush.bf16.msra.mxu1 %v10786_v62  ;;  %v12566_v41 = vld [vmem:[#allocation12 + $0x584] sm:$0xf] }
 0x4a8   :  { %6493 = vmatpush.bf16.msra.mxu2 %v11042_v30  ;;  %v11010_v47 = vor.u32 %v12566_v41, %v11007_v43  ;;  %v10623_v62 = vld [vmem:[#allocation12 + $0x2a0] sm:$0xf0]  ;;  %v11202_v30 = vor.u32 %v12614_v38, %v11199_v55 }
 0x4a9   :  { %v10626_v63 = vor.u32 %v12470_v61, %v10623_v62  ;;  %v12534_v18 = vld [vmem:[#allocation12 + $0x484] sm:$0xf] }
 0x4aa   :  { %v10879_v33 = vld [vmem:[#allocation12 + $0x4a0] sm:$0xf0] }
 0x4ab   :  { %6468 = vmatpush.bf16.msra.mxu0 %v10498_v44  ;;  %6481 = vmatpush.bf16.msra.mxu1 %v10754_v35  ;;  %v11298_v44 = vor.u32 %v12638_v49, %v11295_v20  ;;  %v10943_v35 = vld [vmem:[#allocation12 + $0x520] sm:$0xf0]  ;;  %v10882_v15 = vor.u32 %v12534_v18, %v10879_v33 }
 0x4ac   :  { %6494 = vmatpush.bf16.msra.mxu2 %v11010_v47  ;;  %v10946_v11 = vor.u32 %v12550_v9, %v10943_v35  ;;  %v12606_v7 = vld [vmem:[#allocation12 + $0x6c4] sm:$0xf] }
 0x4ad   :  { %6506 = vmatpush.bf16.msra.mxu3 %v11298_v44  ;;  %v11167_v41 = vld [vmem:[#allocation12 + $0x6e0] sm:$0xf0] }
 0x4ae   :  { %v11170_v43 = vor.u32 %v12606_v7, %v11167_v41  ;;  %v12526_v53 = vld [vmem:[#allocation12 + $0x444] sm:$0xf]  ;;  %v12443_v7 = vld [vmem:[#allocation12 + $0x1a4] sm:$0xf0] }
 0x4af   :  { %6469 = vmatpush.bf16.msra.mxu0 %v10466_v5  ;;  %6482 = vmatpush.bf16.msra.mxu1 %v10722_v24  ;;  %v12390_v5 = vld [vmem:[#allocation12 + $0x4] sm:$0xf] }
 0x4b0   :  { %6495 = vmatpush.bf16.msra.mxu2 %v10978_v58  ;;  %v10306_v10 = vor.u32 %v12390_v5, %v10303_v6  ;;  %v10847_v46 = vld [vmem:[#allocation12 + $0x460] sm:$0xf0] }
 0x4b1   :  { %6507 = vmatpush.bf16.msra.mxu3 %v11266_v4  ;;  %v10850_v45 = vor.u32 %v12526_v53, %v10847_v46  ;;  %v11135_v20 = vld [vmem:[#allocation12 + $0x6a0] sm:$0xf0]  ;;  %v12515_v53 = vld [vmem:[#allocation12 + $0x3e4] sm:$0xf0] }
 0x4b2   :  { %v10815_v8 = vld [vmem:[#allocation12 + $0x420] sm:$0xf0] }
 0x4b3   :  { %6470 = vmatpush.bf16.msra.mxu0 %v10434_v17  ;;  %6483 = vmatpush.bf16.msra.mxu1 %v10690_v36  ;;  %v4339_v17 = vperm.slane %v13711_v12, 1  ;;  %v10818_v58 = vor.u32 %v12518_v56, %v10815_v8  ;;  %v11103_v57 = vld [vmem:[#allocation12 + $0x660] sm:$0xf0]  ;;  %v10757_v56 = vld [vmem:[#allocation12 + $0x388] sm:$0xf] }
 0x4b4   :  { %6496 = vmatpush.bf16.msra.mxu2 %v10946_v11  ;;  %v11071_v11 = vld [vmem:[#allocation12 + $0x620] sm:$0xf0] }
 0x4b5   :  { %6508 = vmatpush.bf16.msra.mxu3 %v11234_v23 }
 0x4b7   :  { %6471 = vmatpush.bf16.msra.mxu0 %v10402_v28  ;;  %6484 = vmatpush.bf16.msra.mxu1 %v10658_v50  ;;  %v12598_v50 = vld [vmem:[#allocation12 + $0x684] sm:$0xf] }
 0x4b8   :  { %6497 = vmatpush.bf16.msra.mxu2 %v10914_v19  ;;  %v11138_v51 = vor.u32 %v12598_v50, %v11135_v20 }
 0x4b9   :  { %6509 = vmatpush.bf16.msra.mxu3 %v11202_v30 }
 0x4bb   :  { %6472 = vmatpush.bf16.msra.mxu0 %v10370_v42  ;;  %6485 = vmatpush.bf16.msra.mxu1 %v10626_v63  ;;  %v12590_v63 = vld [vmem:[#allocation12 + $0x644] sm:$0xf] }
 0x4bc   :  { %6498 = vmatpush.bf16.msra.mxu2 %v10882_v15  ;;  %v11106_v4 = vor.u32 %v12590_v63, %v11103_v57  ;;  %v10501_v15 = vld [vmem:[#allocation12 + $0x188] sm:$0xf] }
 0x4bd   :  { %6510 = vmatpush.bf16.msra.mxu3 %v11170_v43  ;;  %v10789_v43 = vld [vmem:[#allocation12 + $0x3c8] sm:$0xf] }
 0x4bf   :  { %6473 = vmatpush.bf16.msra.mxu0 %v10338_v60  ;;  %6486 = vmatpush.bf16.msra.mxu1 %v10594_v31 }
 0x4c0   :  { %6499 = vmatpush.bf16.msra.mxu2 %v10850_v45 }
 0x4c1   :  { %6511 = vmatpush.bf16.msra.mxu3 %v11138_v51 }
 0x4c3   :  { %6474 = vmatpush.bf16.msra.mxu0 %v10306_v10  ;;  %6487 = vmatpush.bf16.msra.mxu1 %v10562_v52  ;;  %v12582_v10 = vld [vmem:[#allocation12 + $0x604] sm:$0xf] }
 0x4c4   :  { %6500 = vmatpush.bf16.msra.mxu2 %v10818_v58  ;;  %v10437_v58 = vld [vmem:[#allocation12 + $0x108] sm:$0xf] }
 0x4c5   :  { %6512 = vmatpush.bf16.msra.mxu3 %v11106_v4  ;;  %v12499_v4 = vld [vmem:[#allocation12 + $0x364] sm:$0xf0] }
 0x502   :  { %v4675_v1 = vpop.f32.mrf.mxu0 }
 0x503   :  { %v4676_v40 = vadd.f32 %v4675_v1, %v4338_v59  ;;  %v4688_v39 = vpop.f32.mrf.mxu1 }
 0x505   :  { %v4689_v16 = vadd.f32 %v4688_v39, %v4676_v40 }
 0x507   :  { %4770 = vst [vmem:[%s14044_s15] sm:$0xff] %v4689_v16  ;;  %v10293_v24 = vmul.f32 -1.442695, %v4689_v16  ;;  %v11074_v16 = vor.u32 %v12582_v10, %v11071_v11  ;;  %v11045_v10 = vld [vmem:[#allocation12 + $0x5c8] sm:$0xf] }
 0x508   :  { %v4701_v26 = vpop.f32.mrf.mxu2 }
 0x509   :  { %12854 = vpow2.f32 %v10293_v24  ;;  %v4702_v25 = vadd.f32 %v4701_v26, %v4339_v17  ;;  %v4714_v28 = vpop.f32.mrf.mxu3  ;;  %6513 = vmatpush.bf16.msra.mxu3 %v11074_v16  ;;  %v10533_v26 = vld [vmem:[#allocation12 + $0x1c8] sm:$0xf] }
 0x50a   :  { %v4677_v29 = vpop.f32.mrf.mxu0  ;;  %v10534_v18 = vor.u32 %v12451_v2, %v10533_v26 }
 0x50b   :  { %v4715_v34 = vadd.f32 %v4714_v28, %v4702_v25  ;;  %v4690_v36 = vpop.f32.mrf.mxu1 }
 0x50d   :  { %4771 = vst [vmem:[%s14044_s15 + $0x8] sm:$0xff] %v4715_v34  ;;  %v10294_v42 = vmul.f32 -1.442695, %v4715_v34 }
 0x50f   :  { %v12855_v47 = vpop.eup %12854  ;;  %12856 = vpow2.f32 %v10294_v42 }
 0x510   :  { %v4786_v48 = vadd.f32 1.0, %v12855_v47  ;;  %v4703_v49 = vpop.f32.mrf.mxu2 }
 0x511   :  { %v4716_v44 = vpop.f32.mrf.mxu3  ;;  %v12435_v49 = vld [vmem:[#allocation12 + $0x164] sm:$0xf0] }
 0x512   :  { %12858 = vrcp.f32 %v4786_v48  ;;  %v4727_v54 = vpop.f32.mrf.mxu0  ;;  %v4801_v17 = vand.u32 2147483648, %v4786_v48  ;;  %v4799_v22 = vand.u32 2147483647, %v4786_v48  ;;  %vm4795_vm1 = vweird.f32 %v4786_v48 }
 0x513   :  { %v4728_v59 = vadd.f32 %v4727_v54, %v4340_v32  ;;  %v4740_v60 = vpop.f32.mrf.mxu1  ;;  %v10502_v32 = vor.u32 %v12443_v7, %v10501_v15  ;;  %v10790_v44 = vor.u32 %v12515_v53, %v10789_v43  ;;  %v10341_v15 = vld [vmem:[#allocation12 + $0x48] sm:$0xf] }
 0x514   :  { %v4802_v27 = vor.u32 1.1754944e-38, %v4801_v17  ;;  %vm4800_vm3 = vcmp.eq.f32.partialorder %v4799_v22, 8.507059e+37  ;;  %v12491_v17 = vld [vmem:[#allocation12 + $0x324] sm:$0xf0] }
 0x515   :  { %v12857_v61 = vpop.eup %12856  ;;  %v4741_v62 = vadd.f32 %v4740_v60, %v4728_v59  ;;  %v12507_v59 = vld [vmem:[#allocation12 + $0x3a4] sm:$0xf0] }
 0x516   :  { %v13723_v1 = vadd.f32 1.0, %v12857_v61  ;;  %v12427_v61 = vld [vmem:[#allocation12 + $0x124] sm:$0xf0] }
 0x517   :  { %4772 = vst [vmem:[%s14044_s15 + $0x10] sm:$0xff] %v4741_v62  ;;  %v10295_v5 = vmul.f32 -1.442695, %v4741_v62  ;;  %v12403_v7 = vld [vmem:[#allocation12 + $0x64] sm:$0xf0] }
 0x518   :  { %v12859_v6 = vpop.eup %12858  ;;  %12860 = vrcp.f32 %v13723_v1  ;;  %v4753_v9 = vpop.f32.mrf.mxu2  ;;  %v4816_v30 = vand.u32 2147483648, %v13723_v1  ;;  %v4814_v36 = vand.u32 2147483647, %v13723_v1  ;;  %vm4810_vm5 = vweird.f32 %v13723_v1  ;;  %v12563_v43 = vld [vmem:[#allocation12 + $0x564] sm:$0xf0] }
 0x519   :  { %v4791_v40 = vmul.f32 %v12859_v6, %v4786_v48  ;;  %12862 = vpow2.f32 %v10295_v5  ;;  %v4754_v39 = vadd.f32 %v4753_v9, %v4341_v0  ;;  %v4766_v12 = vpop.f32.mrf.mxu3  ;;  %vm4796_vm0 = vweird.f32 %v12859_v6  ;;  %v10469_v48 = vld [vmem:[#allocation12 + $0x148] sm:$0xf] }
 0x51a   :  { %v4729_v35 = vpop.f32.mrf.mxu0  ;;  %vm4797_vm2 = vmor %vm4795_vm1, %vm4796_vm0  ;;  %v4817_v46 = vor.u32 1.1754944e-38, %v4816_v30  ;;  %vm4815_vm7 = vcmp.eq.f32.partialorder %v4814_v36, 8.507059e+37  ;;  %v10470_v60 = vor.u32 %v12435_v49, %v10469_v48  ;;  %v10758_v0 = vor.u32 %v12507_v59, %v10757_v56  ;;  %v10405_v9 = vld [vmem:[#allocation12 + $0xc8] sm:$0xf] }
 0x51b   :  { %v4792_v37 = vsub.f32 1.0, %v4791_v40  ;;  %v4767_v13 = vadd.f32 %v4766_v12, %v4754_v39  ;;  %v4742_v14 = vpop.f32.mrf.mxu1  ;;  %v12419_v12 = vld [vmem:[#allocation12 + $0xe4] sm:$0xf0] }
 0x51c   :  { %v12579_v35 = vld [vmem:[#allocation12 + $0x5e4] sm:$0xf0] }
 0x51d   :  { %v4793_v31 = vmul.f32 %v12859_v6, %v4792_v37  ;;  %4773 = vst [vmem:[%s14044_s15 + $0x18] sm:$0xff] %v4767_v13  ;;  %v10296_v23 = vmul.f32 -1.442695, %v4767_v13  ;;  %v10693_v13 = vld [vmem:[#allocation12 + $0x308] sm:$0xf] }
 0x51e   :  { %v12861_v21 = vpop.eup %12860  ;;  %v12643_v30 = vld [vmem:[#allocation12 + $0x7e4] sm:$0xf0] }
 0x51f   :  { %v12863_v3 = vpop.eup %12862  ;;  %v4794_v24 = vadd.f32 %v12859_v6, %v4793_v31  ;;  %v4806_v19 = vmul.f32 %v12861_v21, %v13723_v1  ;;  %12864 = vpow2.f32 %v10296_v23  ;;  %vm4811_vm4 = vweird.f32 %v12861_v21  ;;  %v10725_v1 = vld [vmem:[#allocation12 + $0x348] sm:$0xf] }
 0x520   :  { %v13733_v38 = vadd.f32 1.0, %v12863_v3  ;;  %v4755_v25 = vpop.f32.mrf.mxu2  ;;  %vm4812_vm6 = vmor %vm4810_vm5, %vm4811_vm4  ;;  %v10726_v37 = vor.u32 %v12499_v4, %v10725_v1  ;;  %v10373_v31 = vld [vmem:[#allocation12 + $0x88] sm:$0xf]  ;;  %v11046_v3 = vor.u32 %v12579_v35, %v11045_v10  ;;  %v12439_v10 = vld [vmem:[#allocation12 + $0x18c] sm:$0xf] }
 0x521   :  { %v4798_v28 = vsel %vm4797_vm2, %v12859_v6, %v4794_v24  ;;  %v4807_v52 = vsub.f32 1.0, %v4806_v19  ;;  %v4768_v55 = vpop.f32.mrf.mxu3  ;;  %v10438_v6 = vor.u32 %v12427_v61, %v10437_v58  ;;  %v12411_v24 = vld [vmem:[#allocation12 + $0xa4] sm:$0xf0]  ;;  %v10694_v25 = vor.u32 %v12491_v17, %v10693_v13  ;;  %v12447_v61 = vld [vmem:[#allocation12 + $0x1cc] sm:$0xf] }
 0x522   :  { %v4803_v29 = vsel %vm4800_vm3, %v4802_v27, %v4798_v28  ;;  %12866 = vrcp.f32 %v13733_v38  ;;  %v4831_v62 = vand.u32 2147483648, %v13733_v38  ;;  %v4829_v57 = vand.u32 2147483647, %v13733_v38  ;;  %v11013_v19 = vld [vmem:[#allocation12 + $0x588] sm:$0xf] }
 0x523   :  { %4850 = vst [vmem:[%s14106_s12] sm:$0xff] %v4803_v29  ;;  %v13740_v33 = vpack.c.bf16 %v4803_v29, %v4803_v29  ;;  %v4808_v34 = vmul.f32 %v12861_v21, %v4807_v52  ;;  %vm4825_vm9 = vweird.f32 %v13733_v38  ;;  %v10661_v28 = vld [vmem:[#allocation12 + $0x2c8] sm:$0xf]  ;;  %v10503_v35 = vld [vmem:[#allocation12 + $0x1a8] sm:$0xf0] }
 0x524   :  { %v4832_v11 = vor.u32 1.1754944e-38, %v4831_v62  ;;  %vm4830_vm11 = vcmp.eq.f32.partialorder %v4829_v57, 8.507059e+37  ;;  %v12483_v55 = vld [vmem:[#allocation12 + $0x2e4] sm:$0xf0]  ;;  %v10535_v62 = vld [vmem:[#allocation12 + $0x1e8] sm:$0xf0] }
 0x525   :  { %v12865_v41 = vpop.eup %12864  ;;  %v4809_v42 = vadd.f32 %v12861_v21, %v4808_v34  ;;  %6423 = vmatmul.bf16.vlgmr.msrb.gmra.mxu0 %v13740_v33  ;;  %v11301_v29 = vld [vmem:[#allocation12 + $0x7c8] sm:$0xf]  ;;  %v10374_v34 = vor.u32 %v12411_v24, %v10373_v31  ;;  %v12511_v17 = vld [vmem:[#allocation12 + $0x3cc] sm:$0xf] }
 0x526   :  { %v13745_v47 = vadd.f32 1.0, %v12865_v41  ;;  %6519 = vmatpush.bf16.msrb.mxu0 %v10534_v18  ;;  %v11269_v49 = vld [vmem:[#allocation12 + $0x788] sm:$0xf]  ;;  %v10791_v31 = vld [vmem:[#allocation12 + $0x3e8] sm:$0xf0] }
 0x527   :  { %v4813_v45 = vsel %vm4812_vm6, %v12861_v21, %v4809_v42  ;;  %v10406_v21 = vor.u32 %v12419_v12, %v10405_v9  ;;  %v10981_v42 = vld [vmem:[#allocation12 + $0x548] sm:$0xf] }
 0x528   :  { %v12867_v50 = vpop.eup %12866  ;;  %v4818_v20 = vsel %vm4815_vm7, %v4817_v46, %v4813_v45  ;;  %12868 = vrcp.f32 %v13745_v47  ;;  %v4846_v23 = vand.u32 2147483648, %v13745_v47  ;;  %v4844_v27 = vand.u32 2147483647, %v13745_v47  ;;  %v12475_v45 = vld [vmem:[#allocation12 + $0x2a4] sm:$0xf0] }
 0x529   :  { %4851 = vst [vmem:[%s14106_s12 + $0x8] sm:$0xff] %v4818_v20  ;;  %v13751_v51 = vpack.c.bf16 %v4818_v20, %v4818_v20  ;;  %v4821_v54 = vmul.f32 %v12867_v50, %v13733_v38  ;;  %vm4826_vm8 = vweird.f32 %v12867_v50  ;;  %v12571_v38 = vld [vmem:[#allocation12 + $0x5a4] sm:$0xf0]  ;;  %vm4840_vm13 = vweird.f32 %v13745_v47 }
 0x52a   :  { %6520 = vmatpush.bf16.msrb.mxu0 %v10502_v32  ;;  %vm4827_vm10 = vmor %vm4825_vm9, %vm4826_vm8  ;;  %v4847_v18 = vor.u32 1.1754944e-38, %v4846_v23  ;;  %v11014_v36 = vor.u32 %v12571_v38, %v11013_v19  ;;  %vm4845_vm15 = vcmp.eq.f32.partialorder %v4844_v27, 8.507059e+37  ;;  %v10662_v46 = vor.u32 %v12483_v55, %v10661_v28  ;;  %v10629_v32 = vld [vmem:[#allocation12 + $0x288] sm:$0xf]  ;;  %v12431_v19 = vld [vmem:[#allocation12 + $0x14c] sm:$0xf] }
 0x52b   :  { %v4822_v8 = vsub.f32 1.0, %v4821_v54  ;;  %6436 = vmatmul.bf16.vlgmr.msrb.gmra.mxu1 %v13751_v51  ;;  %v10342_v20 = vor.u32 %v12403_v7, %v10341_v15  ;;  %v10309_v54 = vld [vmem:[#allocation12 + $0x8] sm:$0xf]  ;;  %v10794_v27 = vor.u32 %v12511_v17, %v10791_v31  ;;  %v10759_v55 = vld [vmem:[#allocation12 + $0x3a8] sm:$0xf0] }
 0x52c   :  { %6532 = vmatpush.bf16.msrb.mxu1 %v10790_v44  ;;  %v10982_v44 = vor.u32 %v12563_v43, %v10981_v42  ;;  %v12395_v56 = vld [vmem:[#allocation12 + $0x24] sm:$0xf0]  ;;  %v10439_v15 = vld [vmem:[#allocation12 + $0x128] sm:$0xf0] }
 0x52d   :  { %v4823_v63 = vmul.f32 %v12867_v50, %v4822_v8  ;;  %v10949_v59 = vld [vmem:[#allocation12 + $0x508] sm:$0xf]  ;;  %v10630_v8 = vor.u32 %v12475_v45, %v10629_v32  ;;  %v10310_v4 = vor.u32 %v12395_v56, %v10309_v54  ;;  %v11047_v54 = vld [vmem:[#allocation12 + $0x5e8] sm:$0xf0] }
 0x52e   :  { %v12869_v5 = vpop.eup %12868  ;;  %6521 = vmatpush.bf16.msrb.mxu0 %v10470_v60  ;;  %v12555_v60 = vld [vmem:[#allocation12 + $0x524] sm:$0xf0]  ;;  %v12559_v17 = vld [vmem:[#allocation12 + $0x54c] sm:$0xf] }
 0x52f   :  { %v4824_v40 = vadd.f32 %v12867_v50, %v4823_v63  ;;  %v4836_v39 = vmul.f32 %v12869_v5, %v13745_v47  ;;  %vm4841_vm12 = vweird.f32 %v12869_v5  ;;  %v11302_v47 = vor.u32 %v12643_v30, %v11301_v29  ;;  %v12467_v63 = vld [vmem:[#allocation12 + $0x264] sm:$0xf0]  ;;  %v10983_v31 = vld [vmem:[#allocation12 + $0x568] sm:$0xf0] }
 0x530   :  { %6533 = vmatpush.bf16.msrb.mxu1 %v10758_v0  ;;  %vm4842_vm14 = vmor %vm4840_vm13, %vm4841_vm12  ;;  %v10597_v0 = vld [vmem:[#allocation12 + $0x248] sm:$0xf] }
 0x531   :  { %v4828_v14 = vsel %vm4827_vm10, %v12867_v50, %v4824_v40  ;;  %v4837_v16 = vsub.f32 1.0, %v4836_v39  ;;  %v12635_v50 = vld [vmem:[#allocation12 + $0x7a4] sm:$0xf0]  ;;  %v10598_v39 = vor.u32 %v12467_v63, %v10597_v0  ;;  %v12407_v63 = vld [vmem:[#allocation12 + $0x8c] sm:$0xf] }
 0x532   :  { %v4833_v22 = vsel %vm4830_vm11, %v4832_v11, %v4828_v14  ;;  %6522 = vmatpush.bf16.msrb.mxu0 %v10438_v6  ;;  %v11270_v58 = vor.u32 %v12635_v50, %v11269_v49  ;;  %v11237_v57 = vld [vmem:[#allocation12 + $0x748] sm:$0xf]  ;;  %v10538_v6 = vor.u32 %v12447_v61, %v10535_v62  ;;  %v12415_v49 = vld [vmem:[#allocation12 + $0xcc] sm:$0xf] }
 0x533   :  { %4852 = vst [vmem:[%s14106_s12 + $0x10] sm:$0xff] %v4833_v22  ;;  %v13763_v26 = vpack.c.bf16 %v4833_v22, %v4833_v22  ;;  %v4838_v2 = vmul.f32 %v12869_v5, %v4837_v16  ;;  %v12627_v1 = vld [vmem:[#allocation12 + $0x764] sm:$0xf0]  ;;  %v10506_v22 = vor.u32 %v12439_v10, %v10503_v35  ;;  %v10695_v61 = vld [vmem:[#allocation12 + $0x328] sm:$0xf0] }
 0x534   :  { %6534 = vmatpush.bf16.msrb.mxu1 %v10726_v37  ;;  %v10917_v9 = vld [vmem:[#allocation12 + $0x4c8] sm:$0xf]  ;;  %v11238_v12 = vor.u32 %v12627_v1, %v11237_v57  ;;  %v10375_v1 = vld [vmem:[#allocation12 + $0xa8] sm:$0xf0] }
 0x535   :  { %v4839_v52 = vadd.f32 %v12869_v5, %v4838_v2  ;;  %6449 = vmatmul.bf16.vlgmr.msrb.gmra.mxu2 %v13763_v26  ;;  %6475 = vmatmul.bf16.vlgmr.msra.gmra.mxu0 %v13740_v33  ;;  %v12547_v40 = vld [vmem:[#allocation12 + $0x4e4] sm:$0xf0]  ;;  %v10471_v2 = vld [vmem:[#allocation12 + $0x168] sm:$0xf0] }
 0x536   :  { %6523 = vmatpush.bf16.msrb.mxu0 %v10406_v21  ;;  %6545 = vmatpush.bf16.msrb.mxu2 %v11046_v3  ;;  %v10565_v11 = vld [vmem:[#allocation12 + $0x208] sm:$0xf]  ;;  %v10918_v16 = vor.u32 %v12547_v40, %v10917_v9  ;;  %v10474_v29 = vor.u32 %v12431_v19, %v10471_v2  ;;  %v12639_v10 = vld [vmem:[#allocation12 + $0x7cc] sm:$0xf] }
 0x537   :  { %v4843_v41 = vsel %vm4842_vm14, %v12869_v5, %v4839_v52  ;;  %v10950_v5 = vor.u32 %v12555_v60, %v10949_v59  ;;  %v12459_v37 = vld [vmem:[#allocation12 + $0x224] sm:$0xf0]  ;;  %v12503_v52 = vld [vmem:[#allocation12 + $0x38c] sm:$0xf] }
 0x538   :  { %v4848_v53 = vsel %vm4845_vm15, %v4847_v18, %v4843_v41  ;;  %6535 = vmatpush.bf16.msrb.mxu1 %v10694_v25  ;;  %v11205_v13 = vld [vmem:[#allocation12 + $0x708] sm:$0xf]  ;;  %v10566_v3 = vor.u32 %v12459_v37, %v10565_v11  ;;  %v10762_v7 = vor.u32 %v12503_v52, %v10759_v55  ;;  %v11303_v35 = vld [vmem:[#allocation12 + $0x7e8] sm:$0xf0]  ;;  %v10378_v11 = vor.u32 %v12407_v63, %v10375_v1  ;;  %v10477_v63 = vld [vmem:[#allocation12 + $0x150] sm:$0xf] }
 0x539   :  { %4853 = vst [vmem:[%s14106_s12 + $0x18] sm:$0xff] %v4848_v53  ;;  %v13772_v48 = vpack.c.bf16 %v4848_v53, %v4848_v53  ;;  %v12619_v14 = vld [vmem:[#allocation12 + $0x724] sm:$0xf0]  ;;  %v12495_v53 = vld [vmem:[#allocation12 + $0x34c] sm:$0xf] }
 0x53a   :  { %6524 = vmatpush.bf16.msrb.mxu0 %v10374_v34  ;;  %6546 = vmatpush.bf16.msrb.mxu2 %v11014_v36  ;;  %v10885_v23 = vld [vmem:[#allocation12 + $0x488] sm:$0xf]  ;;  %v11206_v24 = vor.u32 %v12619_v14, %v11205_v13  ;;  %v12423_v36 = vld [vmem:[#allocation12 + $0x10c] sm:$0xf] }
 0x53b   :  { %6462 = vmatmul.bf16.vlgmr.msrb.gmra.mxu3 %v13772_v48  ;;  %6488 = vmatmul.bf16.vlgmr.msra.gmra.mxu1 %v13751_v51  ;;  %v12539_v21 = vld [vmem:[#allocation12 + $0x4a4] sm:$0xf0]  ;;  %v12399_v13 = vld [vmem:[#allocation12 + $0x4c] sm:$0xf] }
 0x53c   :  { %6536 = vmatpush.bf16.msrb.mxu1 %v10662_v46  ;;  %6558 = vmatpush.bf16.msrb.mxu3 %v11302_v47  ;;  %v11173_v38 = vld [vmem:[#allocation12 + $0x6c8] sm:$0xf]  ;;  %v10886_v28 = vor.u32 %v12539_v21, %v10885_v23  ;;  %v10727_v46 = vld [vmem:[#allocation12 + $0x368] sm:$0xf0]  ;;  %v10442_v47 = vor.u32 %v12423_v36, %v10439_v15  ;;  %v11306_v23 = vor.u32 %v12639_v10, %v11303_v35 }
 0x53d   :  { %v12611_v25 = vld [vmem:[#allocation12 + $0x6e4] sm:$0xf0]  ;;  %v10730_v56 = vor.u32 %v12495_v53, %v10727_v46  ;;  %v12471_v21 = vld [vmem:[#allocation12 + $0x28c] sm:$0xf] }
 0x53e   :  { %6525 = vmatpush.bf16.msrb.mxu0 %v10342_v20  ;;  %6547 = vmatpush.bf16.msrb.mxu2 %v10982_v44  ;;  %v10853_v30 = vld [vmem:[#allocation12 + $0x448] sm:$0xf]  ;;  %v11174_v34 = vor.u32 %v12611_v25, %v11173_v38  ;;  %v10407_v20 = vld [vmem:[#allocation12 + $0xe8] sm:$0xf0] }
 0x53f   :  { %v12531_v18 = vld [vmem:[#allocation12 + $0x464] sm:$0xf0]  ;;  %v12575_v44 = vld [vmem:[#allocation12 + $0x5cc] sm:$0xf]  ;;  %v10410_v62 = vor.u32 %v12415_v49, %v10407_v20  ;;  %v12444_v49 = vld [vmem:[#allocation12 + $0x1ac] sm:$0xf0] }
 0x540   :  { %6537 = vmatpush.bf16.msrb.mxu1 %v10630_v8  ;;  %6559 = vmatpush.bf16.msrb.mxu3 %v11270_v58  ;;  %v11141_v41 = vld [vmem:[#allocation12 + $0x688] sm:$0xf]  ;;  %v10854_v43 = vor.u32 %v12531_v18, %v10853_v30  ;;  %v12487_v58 = vld [vmem:[#allocation12 + $0x30c] sm:$0xf]  ;;  %v11050_v0 = vor.u32 %v12575_v44, %v11047_v54  ;;  %v10541_v30 = vld [vmem:[#allocation12 + $0x1d0] sm:$0xf] }
 0x541   :  { %v12603_v42 = vld [vmem:[#allocation12 + $0x6a4] sm:$0xf0]  ;;  %v11271_v19 = vld [vmem:[#allocation12 + $0x7a8] sm:$0xf0]  ;;  %v12452_v18 = vld [vmem:[#allocation12 + $0x1ec] sm:$0xf0] }
 0x542   :  { %6526 = vmatpush.bf16.msrb.mxu0 %v10310_v4  ;;  %6548 = vmatpush.bf16.msrb.mxu2 %v10950_v5  ;;  %v10821_v32 = vld [vmem:[#allocation12 + $0x408] sm:$0xf]  ;;  %v11142_v50 = vor.u32 %v12603_v42, %v11141_v41  ;;  %v12567_v4 = vld [vmem:[#allocation12 + $0x58c] sm:$0xf] }
 0x543   :  { %v12523_v45 = vld [vmem:[#allocation12 + $0x424] sm:$0xf0]  ;;  %v11015_v5 = vld [vmem:[#allocation12 + $0x5a8] sm:$0xf0] }
 0x544   :  { %6538 = vmatpush.bf16.msrb.mxu1 %v10598_v39  ;;  %6560 = vmatpush.bf16.msrb.mxu3 %v11238_v12  ;;  %v11109_v59 = vld [vmem:[#allocation12 + $0x648] sm:$0xf]  ;;  %v10822_v8 = vor.u32 %v12523_v45, %v10821_v32  ;;  %v12479_v39 = vld [vmem:[#allocation12 + $0x2cc] sm:$0xf]  ;;  %v11018_v37 = vor.u32 %v12567_v4, %v11015_v5  ;;  %v10509_v45 = vld [vmem:[#allocation12 + $0x190] sm:$0xf] }
 0x545   :  { %6501 = vmatmul.bf16.vlgmr.msra.gmra.mxu2 %v13763_v26  ;;  %6527 = vmatmul.bf16.vlgmr.msrb.gmra.mxu0 %v13740_v33  ;;  %v12595_v60 = vld [vmem:[#allocation12 + $0x664] sm:$0xf0]  ;;  %v10663_v12 = vld [vmem:[#allocation12 + $0x2e8] sm:$0xf0] }
 0x546   :  { %6571 = vmatpush.bf16.msra.mxu0 %v10538_v6  ;;  %6549 = vmatpush.bf16.msrb.mxu2 %v10918_v16  ;;  %v11110_v57 = vor.u32 %v12595_v60, %v11109_v59  ;;  %v10698_v6 = vor.u32 %v12487_v58, %v10695_v61  ;;  %v11077_v9 = vld [vmem:[#allocation12 + $0x608] sm:$0xf]  ;;  %v10343_v16 = vld [vmem:[#allocation12 + $0x68] sm:$0xf0]  ;;  %v10797_v59 = vld [vmem:[#allocation12 + $0x3d0] sm:$0xf] }
 0x547   :  { %v12587_v40 = vld [vmem:[#allocation12 + $0x624] sm:$0xf0]  ;;  %v10346_v2 = vor.u32 %v12399_v13, %v10343_v16  ;;  %v12391_v38 = vld [vmem:[#allocation12 + $0xc] sm:$0xf]  ;;  %v12516_v60 = vld [vmem:[#allocation12 + $0x3ec] sm:$0xf0] }
 0x548   :  { %6539 = vmatpush.bf16.msrb.mxu1 %v10566_v3  ;;  %6561 = vmatpush.bf16.msrb.mxu3 %v11206_v24  ;;  %v11078_v14 = vor.u32 %v12587_v40, %v11077_v9  ;;  %v10631_v3 = vld [vmem:[#allocation12 + $0x2a8] sm:$0xf0]  ;;  %v10798_v1 = vor.u32 %v12516_v60, %v10797_v59  ;;  %v10765_v9 = vld [vmem:[#allocation12 + $0x390] sm:$0xf] }
 0x549   :  { %v12631_v24 = vld [vmem:[#allocation12 + $0x78c] sm:$0xf]  ;;  %v10634_v55 = vor.u32 %v12471_v21, %v10631_v3  ;;  %v12508_v40 = vld [vmem:[#allocation12 + $0x3ac] sm:$0xf0] }
 0x54a   :  { %6572 = vmatpush.bf16.msra.mxu0 %v10506_v22  ;;  %6550 = vmatpush.bf16.msrb.mxu2 %v10886_v28  ;;  %v10666_v22 = vor.u32 %v12479_v39, %v10663_v12  ;;  %v10311_v25 = vld [vmem:[#allocation12 + $0x28] sm:$0xf0]  ;;  %v10766_v13 = vor.u32 %v12508_v40, %v10765_v9  ;;  %v12556_v9 = vld [vmem:[#allocation12 + $0x52c] sm:$0xf0] }
 0x54b   :  { %6514 = vmatmul.bf16.vlgmr.msra.gmra.mxu3 %v13772_v48  ;;  %6540 = vmatmul.bf16.vlgmr.msrb.gmra.mxu1 %v13751_v51  ;;  %v12551_v28 = vld [vmem:[#allocation12 + $0x50c] sm:$0xf]  ;;  %v10314_v41 = vor.u32 %v12391_v38, %v10311_v25  ;;  %v12580_v38 = vld [vmem:[#allocation12 + $0x5ec] sm:$0xf0] }
 0x54c   :  { %6584 = vmatpush.bf16.msra.mxu1 %v10794_v27  ;;  %6562 = vmatpush.bf16.msrb.mxu3 %v11174_v34  ;;  %v10986_v27 = vor.u32 %v12559_v17, %v10983_v31  ;;  %v10951_v52 = vld [vmem:[#allocation12 + $0x528] sm:$0xf0]  ;;  %v10733_v31 = vld [vmem:[#allocation12 + $0x350] sm:$0xf] }
 0x54d   :  { %v12463_v34 = vld [vmem:[#allocation12 + $0x24c] sm:$0xf]  ;;  %v10954_v42 = vor.u32 %v12551_v28, %v10951_v52 }
 0x54e   :  { %6573 = vmatpush.bf16.msra.mxu0 %v10474_v29  ;;  %6551 = vmatpush.bf16.msrb.mxu2 %v10854_v43  ;;  %v11274_v29 = vor.u32 %v12631_v24, %v11271_v19  ;;  %v10599_v36 = vld [vmem:[#allocation12 + $0x268] sm:$0xf0]  ;;  %v10542_v43 = vor.u32 %v12452_v18, %v10541_v30  ;;  %v10413_v24 = vld [vmem:[#allocation12 + $0xd0] sm:$0xf] }
 0x54f   :  { %v12623_v15 = vld [vmem:[#allocation12 + $0x74c] sm:$0xf]  ;;  %v12492_v30 = vld [vmem:[#allocation12 + $0x32c] sm:$0xf0] }
 0x550   :  { %6585 = vmatpush.bf16.msra.mxu1 %v10762_v7  ;;  %6563 = vmatpush.bf16.msrb.mxu3 %v11142_v50  ;;  %v11239_v7 = vld [vmem:[#allocation12 + $0x768] sm:$0xf0] }
 0x551   :  { %v12543_v53 = vld [vmem:[#allocation12 + $0x4cc] sm:$0xf]  ;;  %v11242_v32 = vor.u32 %v12623_v15, %v11239_v7  ;;  %v12412_v7 = vld [vmem:[#allocation12 + $0xac] sm:$0xf0] }
 0x552   :  { %6574 = vmatpush.bf16.msra.mxu0 %v10442_v47  ;;  %6552 = vmatpush.bf16.msrb.mxu2 %v10822_v8  ;;  %v10919_v46 = vld [vmem:[#allocation12 + $0x4e8] sm:$0xf0]  ;;  %v10602_v47 = vor.u32 %v12463_v34, %v10599_v36  ;;  %v10510_v8 = vor.u32 %v12444_v49, %v10509_v45  ;;  %v10381_v36 = vld [vmem:[#allocation12 + $0x90] sm:$0xf] }
 0x553   :  { %v12455_v50 = vld [vmem:[#allocation12 + $0x20c] sm:$0xf]  ;;  %v11309_v45 = vld [vmem:[#allocation12 + $0x7d0] sm:$0xf] }
 0x554   :  { %6586 = vmatpush.bf16.msra.mxu1 %v10730_v56  ;;  %6564 = vmatpush.bf16.msrb.mxu3 %v11110_v57  ;;  %v10567_v20 = vld [vmem:[#allocation12 + $0x228] sm:$0xf0]  ;;  %v10922_v56 = vor.u32 %v12543_v53, %v10919_v46  ;;  %v12436_v57 = vld [vmem:[#allocation12 + $0x16c] sm:$0xf0] }
 0x555   :  { %6553 = vmatmul.bf16.vlgmr.msrb.gmra.mxu2 %v13763_v26  ;;  %v12615_v44 = vld [vmem:[#allocation12 + $0x70c] sm:$0xf]  ;;  %v10478_v39 = vor.u32 %v12436_v57, %v10477_v63  ;;  %v12644_v49 = vld [vmem:[#allocation12 + $0x7ec] sm:$0xf0] }
 0x556   :  { %6575 = vmatpush.bf16.msra.mxu0 %v10410_v62  ;;  %6597 = vmatpush.bf16.msra.mxu2 %v11050_v0  ;;  %v11207_v54 = vld [vmem:[#allocation12 + $0x728] sm:$0xf0]  ;;  %v10570_v62 = vor.u32 %v12455_v50, %v10567_v20  ;;  %v10382_v50 = vor.u32 %v12412_v7, %v10381_v36  ;;  %v11310_v60 = vor.u32 %v12644_v49, %v11309_v45  ;;  %v12636_v63 = vld [vmem:[#allocation12 + $0x7ac] sm:$0xf0]  ;;  %v12432_v36 = vld [vmem:[#allocation12 + $0x154] sm:$0xf] }
 0x557   :  { %v12535_v58 = vld [vmem:[#allocation12 + $0x48c] sm:$0xf]  ;;  %v11210_v0 = vor.u32 %v12615_v44, %v11207_v54  ;;  %v10349_v54 = vld [vmem:[#allocation12 + $0x50] sm:$0xf]  ;;  %v10479_v7 = vld [vmem:[#allocation12 + $0x170] sm:$0xf0] }
 0x558   :  { %6587 = vmatpush.bf16.msra.mxu1 %v10698_v6  ;;  %6565 = vmatpush.bf16.msrb.mxu3 %v11078_v14  ;;  %v10887_v61 = vld [vmem:[#allocation12 + $0x4a8] sm:$0xf0]  ;;  %v10861_v45 = vld [vmem:[#allocation12 + $0x450] sm:$0xf] }
 0x559   :  { %v12607_v4 = vld [vmem:[#allocation12 + $0x6cc] sm:$0xf]  ;;  %v10890_v6 = vor.u32 %v12535_v58, %v10887_v61  ;;  %v12564_v58 = vld [vmem:[#allocation12 + $0x56c] sm:$0xf0] }
 0x55a   :  { %6576 = vmatpush.bf16.msra.mxu0 %v10378_v11  ;;  %6598 = vmatpush.bf16.msra.mxu2 %v11018_v37  ;;  %v11175_v5 = vld [vmem:[#allocation12 + $0x6e8] sm:$0xf0]  ;;  %v10445_v11 = vld [vmem:[#allocation12 + $0x110] sm:$0xf] }
 0x55b   :  { %6566 = vmatmul.bf16.vlgmr.msrb.gmra.mxu3 %v13772_v48  ;;  %v12527_v12 = vld [vmem:[#allocation12 + $0x44c] sm:$0xf]  ;;  %v11178_v35 = vor.u32 %v12607_v4, %v11175_v5  ;;  %v12428_v37 = vld [vmem:[#allocation12 + $0x12c] sm:$0xf0] }
 0x55c   :  { %6588 = vmatpush.bf16.msra.mxu1 %v10666_v22  ;;  %6610 = vmatpush.bf16.msra.mxu3 %v11306_v23  ;;  %v10855_v10 = vld [vmem:[#allocation12 + $0x468] sm:$0xf0]  ;;  %v12500_v22 = vld [vmem:[#allocation12 + $0x36c] sm:$0xf0]  ;;  %v10446_v23 = vor.u32 %v12428_v37, %v10445_v11 }
 0x55d   :  { %v12599_v14 = vld [vmem:[#allocation12 + $0x68c] sm:$0xf]  ;;  %v10858_v17 = vor.u32 %v12527_v12, %v10855_v10  ;;  %v10734_v25 = vor.u32 %v12500_v22, %v10733_v31  ;;  %v10637_v61 = vld [vmem:[#allocation12 + $0x290] sm:$0xf]  ;;  %v12448_v12 = vld [vmem:[#allocation12 + $0x1d4] sm:$0xf] }
 0x55e   :  { %6577 = vmatpush.bf16.msra.mxu0 %v10346_v2  ;;  %6599 = vmatpush.bf16.msra.mxu2 %v10986_v27  ;;  %v11143_v16 = vld [vmem:[#allocation12 + $0x6a8] sm:$0xf0]  ;;  %v12420_v2 = vld [vmem:[#allocation12 + $0xec] sm:$0xf0]  ;;  %v10543_v10 = vld [vmem:[#allocation12 + $0x1f0] sm:$0xf0] }
 0x55f   :  { %v12519_v21 = vld [vmem:[#allocation12 + $0x40c] sm:$0xf]  ;;  %v11146_v19 = vor.u32 %v12599_v14, %v11143_v16  ;;  %v11053_v27 = vld [vmem:[#allocation12 + $0x5d0] sm:$0xf]  ;;  %v10414_v18 = vor.u32 %v12420_v2, %v10413_v24  ;;  %v10511_v24 = vld [vmem:[#allocation12 + $0x1b0] sm:$0xf0] }
 0x560   :  { %6589 = vmatpush.bf16.msra.mxu1 %v10634_v55  ;;  %6611 = vmatpush.bf16.msra.mxu3 %v11274_v29  ;;  %v10823_v3 = vld [vmem:[#allocation12 + $0x428] sm:$0xf0]  ;;  %v10701_v29 = vld [vmem:[#allocation12 + $0x310] sm:$0xf]  ;;  %v11054_v34 = vor.u32 %v12580_v38, %v11053_v27 }
 0x561   :  { %v12591_v28 = vld [vmem:[#allocation12 + $0x64c] sm:$0xf]  ;;  %v10826_v55 = vor.u32 %v12519_v21, %v10823_v3  ;;  %v12396_v5 = vld [vmem:[#allocation12 + $0x2c] sm:$0xf0]  ;;  %v12440_v3 = vld [vmem:[#allocation12 + $0x194] sm:$0xf] }
 0x562   :  { %6578 = vmatpush.bf16.msra.mxu0 %v10314_v41  ;;  %6600 = vmatpush.bf16.msra.mxu2 %v10954_v42  ;;  %v11111_v52 = vld [vmem:[#allocation12 + $0x668] sm:$0xf0]  ;;  %v11021_v41 = vld [vmem:[#allocation12 + $0x590] sm:$0xf] }
 0x563   :  { %v11114_v15 = vor.u32 %v12591_v28, %v11111_v52  ;;  %v12572_v42 = vld [vmem:[#allocation12 + $0x5ac] sm:$0xf0]  ;;  %v12583_v53 = vld [vmem:[#allocation12 + $0x60c] sm:$0xf]  ;;  %v10799_v28 = vld [vmem:[#allocation12 + $0x3f0] sm:$0xf0] }
 0x564   :  { %6590 = vmatpush.bf16.msra.mxu1 %v10602_v47  ;;  %6612 = vmatpush.bf16.msra.mxu3 %v11242_v32  ;;  %v11079_v46 = vld [vmem:[#allocation12 + $0x628] sm:$0xf0]  ;;  %v10669_v47 = vld [vmem:[#allocation12 + $0x2d0] sm:$0xf]  ;;  %v11022_v20 = vor.u32 %v12572_v42, %v11021_v41 }
 0x565   :  { %6579 = vmatmul.bf16.vlgmr.msra.gmra.mxu0 %v13740_v33  ;;  %v12484_v32 = vld [vmem:[#allocation12 + $0x2ec] sm:$0xf0]  ;;  %v11082_v44 = vor.u32 %v12583_v53, %v11079_v46  ;;  %v10767_v53 = vld [vmem:[#allocation12 + $0x3b0] sm:$0xf0] }
 0x566   :  { %6623 = vmatpush.bf16.msrb.mxu0 %v10542_v43  ;;  %6601 = vmatpush.bf16.msra.mxu2 %v10922_v56  ;;  %v10702_v43 = vor.u32 %v12492_v30, %v10701_v29  ;;  %v12404_v56 = vld [vmem:[#allocation12 + $0x6c] sm:$0xf0]  ;;  %v10670_v59 = vor.u32 %v12484_v32, %v10669_v47  ;;  %v10482_v47 = vor.u32 %v12432_v36, %v10479_v7  ;;  %v11279_v36 = vld [vmem:[#allocation12 + $0x7b0] sm:$0xf0] }
 0x567   :  { %v10350_v57 = vor.u32 %v12404_v56, %v10349_v54  ;;  %v12468_v11 = vld [vmem:[#allocation12 + $0x26c] sm:$0xf0]  ;;  %v12392_v7 = vld [vmem:[#allocation12 + $0x14] sm:$0xf] }
 0x568   :  { %6591 = vmatpush.bf16.msra.mxu1 %v10570_v62  ;;  %6613 = vmatpush.bf16.msra.mxu3 %v11210_v0  ;;  %v12476_v62 = vld [vmem:[#allocation12 + $0x2ac] sm:$0xf0] }
 0x569   :  { %v11277_v0 = vld [vmem:[#allocation12 + $0x790] sm:$0xf]  ;;  %v10638_v40 = vor.u32 %v12476_v62, %v10637_v61 }
 0x56a   :  { %6624 = vmatpush.bf16.msrb.mxu0 %v10510_v8  ;;  %6602 = vmatpush.bf16.msra.mxu2 %v10890_v6  ;;  %v10989_v8 = vld [vmem:[#allocation12 + $0x550] sm:$0xf] }
 0x56b   :  { %6592 = vmatmul.bf16.vlgmr.msra.gmra.mxu1 %v13751_v51  ;;  %v10990_v4 = vor.u32 %v12564_v58, %v10989_v8  ;;  %v10957_v6 = vld [vmem:[#allocation12 + $0x510] sm:$0xf] }
 0x56c   :  { %6636 = vmatpush.bf16.msrb.mxu1 %v10798_v1  ;;  %6614 = vmatpush.bf16.msra.mxu3 %v11178_v35  ;;  %v10317_v1 = vld [vmem:[#allocation12 + $0x10] sm:$0xf]  ;;  %v10958_v16 = vor.u32 %v12556_v9, %v10957_v6 }
 0x56d   :  { %v10605_v35 = vld [vmem:[#allocation12 + $0x250] sm:$0xf]  ;;  %v10318_v14 = vor.u32 %v12396_v5, %v10317_v1  ;;  %v11055_v5 = vld [vmem:[#allocation12 + $0x5f0] sm:$0xf0] }
 0x56e   :  { %6625 = vmatpush.bf16.msrb.mxu0 %v10478_v39  ;;  %6603 = vmatpush.bf16.msra.mxu2 %v10858_v17  ;;  %v11278_v39 = vor.u32 %v12636_v63, %v11277_v0  ;;  %v11245_v37 = vld [vmem:[#allocation12 + $0x750] sm:$0xf]  ;;  %v10546_v17 = vor.u32 %v12448_v12, %v10543_v10  ;;  %v12416_v63 = vld [vmem:[#allocation12 + $0xd4] sm:$0xf] }
 0x56f   :  { %v10925_v31 = vld [vmem:[#allocation12 + $0x4d0] sm:$0xf] }
 0x570   :  { %6637 = vmatpush.bf16.msrb.mxu1 %v10766_v13  ;;  %6615 = vmatpush.bf16.msra.mxu3 %v11146_v19  ;;  %v12628_v13 = vld [vmem:[#allocation12 + $0x76c] sm:$0xf0] }
 0x571   :  { %v12548_v22 = vld [vmem:[#allocation12 + $0x4ec] sm:$0xf0]  ;;  %v11246_v21 = vor.u32 %v12628_v13, %v11245_v37  ;;  %v10383_v37 = vld [vmem:[#allocation12 + $0xb0] sm:$0xf0] }
 0x572   :  { %6626 = vmatpush.bf16.msrb.mxu0 %v10446_v23  ;;  %6604 = vmatpush.bf16.msra.mxu2 %v10826_v55  ;;  %v10606_v23 = vor.u32 %v12468_v11, %v10605_v35  ;;  %v10573_v19 = vld [vmem:[#allocation12 + $0x210] sm:$0xf]  ;;  %v10926_v52 = vor.u32 %v12548_v22, %v10925_v31  ;;  %v10514_v55 = vor.u32 %v12440_v3, %v10511_v24  ;;  %v12408_v11 = vld [vmem:[#allocation12 + $0x94] sm:$0xf] }
 0x573   :  { %v12460_v2 = vld [vmem:[#allocation12 + $0x22c] sm:$0xf0]  ;;  %v12640_v3 = vld [vmem:[#allocation12 + $0x7d4] sm:$0xf] }
 0x574   :  { %6638 = vmatpush.bf16.msrb.mxu1 %v10734_v25  ;;  %6616 = vmatpush.bf16.msra.mxu3 %v11114_v15  ;;  %v11213_v27 = vld [vmem:[#allocation12 + $0x710] sm:$0xf]  ;;  %v12512_v25 = vld [vmem:[#allocation12 + $0x3d4] sm:$0xf]  ;;  %v10574_v29 = vor.u32 %v12460_v2, %v10573_v19  ;;  %v10386_v19 = vor.u32 %v12408_v11, %v10383_v37  ;;  %v10485_v11 = vld [vmem:[#allocation12 + $0x158] sm:$0xf] }
 0x575   :  { %6605 = vmatmul.bf16.vlgmr.msra.gmra.mxu2 %v13763_v26  ;;  %v12620_v38 = vld [vmem:[#allocation12 + $0x72c] sm:$0xf0]  ;;  %v10802_v15 = vor.u32 %v12512_v25, %v10799_v28  ;;  %v11311_v24 = vld [vmem:[#allocation12 + $0x7f0] sm:$0xf0] }
 0x576   :  { %6627 = vmatpush.bf16.msrb.mxu0 %v10414_v18  ;;  %6649 = vmatpush.bf16.msrb.mxu2 %v11054_v34  ;;  %v11214_v30 = vor.u32 %v12620_v38, %v11213_v27  ;;  %v10893_v18 = vld [vmem:[#allocation12 + $0x490] sm:$0xf]  ;;  %v12400_v25 = vld [vmem:[#allocation12 + $0x54] sm:$0xf] }
 0x577   :  { %v12540_v34 = vld [vmem:[#allocation12 + $0x4ac] sm:$0xf0]  ;;  %v10351_v28 = vld [vmem:[#allocation12 + $0x70] sm:$0xf0] }
 0x578   :  { %6639 = vmatpush.bf16.msrb.mxu1 %v10702_v43  ;;  %6617 = vmatpush.bf16.msra.mxu3 %v11082_v44  ;;  %v11181_v41 = vld [vmem:[#allocation12 + $0x6d0] sm:$0xf]  ;;  %v12504_v43 = vld [vmem:[#allocation12 + $0x394] sm:$0xf]  ;;  %v10894_v46 = vor.u32 %v12540_v34, %v10893_v18 }
 0x579   :  { %v12612_v42 = vld [vmem:[#allocation12 + $0x6ec] sm:$0xf0]  ;;  %v10447_v44 = vld [vmem:[#allocation12 + $0x130] sm:$0xf0] }
 0x57a   :  { %6628 = vmatpush.bf16.msrb.mxu0 %v10382_v50  ;;  %6650 = vmatpush.bf16.msrb.mxu2 %v11022_v20  ;;  %v11182_v32 = vor.u32 %v12612_v42, %v11181_v41  ;;  %v12532_v49 = vld [vmem:[#allocation12 + $0x46c] sm:$0xf0]  ;;  %v12424_v50 = vld [vmem:[#allocation12 + $0x114] sm:$0xf]  ;;  %v10770_v20 = vor.u32 %v12504_v43, %v10767_v53 }
 0x57b   :  { %6618 = vmatmul.bf16.vlgmr.msra.gmra.mxu3 %v13772_v48  ;;  %v11149_v54 = vld [vmem:[#allocation12 + $0x690] sm:$0xf]  ;;  %v10862_v8 = vor.u32 %v12532_v49, %v10861_v45  ;;  %v10450_v61 = vor.u32 %v12424_v50, %v10447_v44  ;;  %v10639_v18 = vld [vmem:[#allocation12 + $0x2b0] sm:$0xf0]  ;;  %v12453_v45 = vld [vmem:[#allocation12 + $0x1f4] sm:$0xf0] }
 0x57c   :  { %6640 = vmatpush.bf16.msrb.mxu1 %v10670_v59  ;;  %6662 = vmatpush.bf16.msrb.mxu3 %v11310_v60  ;;  %v12604_v56 = vld [vmem:[#allocation12 + $0x6ac] sm:$0xf0]  ;;  %v12496_v59 = vld [vmem:[#allocation12 + $0x354] sm:$0xf] }
 0x57d   :  { %v10735_v60 = vld [vmem:[#allocation12 + $0x370] sm:$0xf0]  ;;  %v10829_v58 = vld [vmem:[#allocation12 + $0x410] sm:$0xf]  ;;  %v11150_v62 = vor.u32 %v12604_v56, %v11149_v54 }
 0x57e   :  { %6629 = vmatpush.bf16.msrb.mxu0 %v10350_v57  ;;  %6651 = vmatpush.bf16.msrb.mxu2 %v10990_v4  ;;  %v12524_v0 = vld [vmem:[#allocation12 + $0x42c] sm:$0xf0]  ;;  %v10415_v57 = vld [vmem:[#allocation12 + $0xf0] sm:$0xf0]  ;;  %v10738_v1 = vor.u32 %v12496_v59, %v10735_v60 }
 0x57f   :  { %v12576_v4 = vld [vmem:[#allocation12 + $0x5d4] sm:$0xf]  ;;  %v11117_v6 = vld [vmem:[#allocation12 + $0x650] sm:$0xf]  ;;  %v10830_v12 = vor.u32 %v12524_v0, %v10829_v58  ;;  %v10418_v10 = vor.u32 %v12416_v63, %v10415_v57  ;;  %v12445_v0 = vld [vmem:[#allocation12 + $0x1b4] sm:$0xf0] }
 0x580   :  { %6641 = vmatpush.bf16.msrb.mxu1 %v10638_v40  ;;  %6663 = vmatpush.bf16.msrb.mxu3 %v11278_v39  ;;  %v12596_v9 = vld [vmem:[#allocation12 + $0x66c] sm:$0xf0]  ;;  %v12488_v40 = vld [vmem:[#allocation12 + $0x314] sm:$0xf]  ;;  %v11058_v35 = vor.u32 %v12576_v4, %v11055_v5  ;;  %v10805_v5 = vld [vmem:[#allocation12 + $0x3d8] sm:$0xf] }
 0x581   :  { %v10703_v39 = vld [vmem:[#allocation12 + $0x330] sm:$0xf0]  ;;  %v11118_v13 = vor.u32 %v12596_v9, %v11117_v6  ;;  %v11085_v31 = vld [vmem:[#allocation12 + $0x610] sm:$0xf]  ;;  %v12517_v6 = vld [vmem:[#allocation12 + $0x3f4] sm:$0xf0] }
 0x582   :  { %6630 = vmatpush.bf16.msrb.mxu0 %v10318_v14  ;;  %6652 = vmatpush.bf16.msrb.mxu2 %v10958_v16  ;;  %v10706_v14 = vor.u32 %v12488_v40, %v10703_v39  ;;  %v12568_v16 = vld [vmem:[#allocation12 + $0x594] sm:$0xf]  ;;  %v12588_v22 = vld [vmem:[#allocation12 + $0x62c] sm:$0xf0]  ;;  %v10806_v37 = vor.u32 %v12517_v6, %v10805_v5 }
 0x583   :  { %v11086_v27 = vor.u32 %v12588_v22, %v11085_v31  ;;  %v12632_v34 = vld [vmem:[#allocation12 + $0x794] sm:$0xf]  ;;  %v12509_v31 = vld [vmem:[#allocation12 + $0x3b4] sm:$0xf0] }
 0x584   :  { %6642 = vmatpush.bf16.msrb.mxu1 %v10606_v23  ;;  %6664 = vmatpush.bf16.msrb.mxu3 %v11246_v21  ;;  %v12480_v23 = vld [vmem:[#allocation12 + $0x2d4] sm:$0xf] }
 0x585   :  { %6631 = vmatmul.bf16.vlgmr.msrb.gmra.mxu0 %v13740_v33  ;;  %v10671_v21 = vld [vmem:[#allocation12 + $0x2f0] sm:$0xf0] }
 0x586   :  { %6675 = vmatpush.bf16.msra.mxu0 %v10546_v17  ;;  %6653 = vmatpush.bf16.msrb.mxu2 %v10926_v52  ;;  %v11023_v17 = vld [vmem:[#allocation12 + $0x5b0] sm:$0xf0]  ;;  %v10674_v38 = vor.u32 %v12480_v23, %v10671_v21 }
 0x587   :  { %v11026_v2 = vor.u32 %v12568_v16, %v11023_v17  ;;  %v12560_v52 = vld [vmem:[#allocation12 + $0x554] sm:$0xf]  ;;  %v10773_v17 = vld [vmem:[#allocation12 + $0x398] sm:$0xf] }
 0x588   :  { %6643 = vmatpush.bf16.msrb.mxu1 %v10574_v29  ;;  %6665 = vmatpush.bf16.msrb.mxu3 %v11214_v30  ;;  %v10991_v29 = vld [vmem:[#allocation12 + $0x570] sm:$0xf0] }
 0x589   :  { %v12472_v30 = vld [vmem:[#allocation12 + $0x294] sm:$0xf]  ;;  %v10994_v41 = vor.u32 %v12560_v52, %v10991_v29  ;;  %v10741_v52 = vld [vmem:[#allocation12 + $0x358] sm:$0xf] }
 0x58a   :  { %6676 = vmatpush.bf16.msra.mxu0 %v10514_v55  ;;  %6654 = vmatpush.bf16.msrb.mxu2 %v10894_v46  ;;  %v11314_v55 = vor.u32 %v12640_v3, %v11311_v24  ;;  %v10642_v42 = vor.u32 %v12472_v30, %v10639_v18  ;;  %v10319_v43 = vld [vmem:[#allocation12 + $0x30] sm:$0xf0] }
 0x58b   :  { %6644 = vmatmul.bf16.vlgmr.msrb.gmra.mxu1 %v13751_v51  ;;  %v12552_v53 = vld [vmem:[#allocation12 + $0x514] sm:$0xf]  ;;  %v10322_v54 = vor.u32 %v12392_v7, %v10319_v43  ;;  %v12421_v7 = vld [vmem:[#allocation12 + $0xf4] sm:$0xf0] }
 0x58c   :  { %6688 = vmatpush.bf16.msra.mxu1 %v10802_v15  ;;  %6666 = vmatpush.bf16.msrb.mxu3 %v11182_v32  ;;  %v10354_v15 = vor.u32 %v12400_v25, %v10351_v28  ;;  %v10959_v46 = vld [vmem:[#allocation12 + $0x530] sm:$0xf0]  ;;  %v10549_v32 = vld [vmem:[#allocation12 + $0x1d8] sm:$0xf] }
 0x58d   :  { %v12464_v49 = vld [vmem:[#allocation12 + $0x254] sm:$0xf]  ;;  %v10962_v56 = vor.u32 %v12552_v53, %v10959_v46  ;;  %v10550_v59 = vor.u32 %v12453_v45, %v10549_v32  ;;  %v12581_v43 = vld [vmem:[#allocation12 + $0x5f4] sm:$0xf0] }
 0x58e   :  { %6677 = vmatpush.bf16.msra.mxu0 %v10482_v47  ;;  %6655 = vmatpush.bf16.msrb.mxu2 %v10862_v8  ;;  %v11282_v47 = vor.u32 %v12632_v34, %v11279_v36  ;;  %v10607_v50 = vld [vmem:[#allocation12 + $0x270] sm:$0xf0]  ;;  %v12493_v32 = vld [vmem:[#allocation12 + $0x334] sm:$0xf0] }
 0x58f   :  { %v11247_v44 = vld [vmem:[#allocation12 + $0x770] sm:$0xf0]  ;;  %v10610_v58 = vor.u32 %v12464_v49, %v10607_v50 }
 0x590   :  { %6689 = vmatpush.bf16.msra.mxu1 %v10770_v20  ;;  %6667 = vmatpush.bf16.msrb.mxu3 %v11150_v62  ;;  %v12624_v20 = vld [vmem:[#allocation12 + $0x754] sm:$0xf]  ;;  %v10517_v62 = vld [vmem:[#allocation12 + $0x198] sm:$0xf] }
 0x591   :  { %v12544_v60 = vld [vmem:[#allocation12 + $0x4d4] sm:$0xf]  ;;  %v10518_v40 = vor.u32 %v12445_v0, %v10517_v62  ;;  %v10677_v0 = vld [vmem:[#allocation12 + $0x2d8] sm:$0xf] }
 0x592   :  { %6678 = vmatpush.bf16.msra.mxu0 %v10450_v61  ;;  %6656 = vmatpush.bf16.msrb.mxu2 %v10830_v12  ;;  %v10927_v8 = vld [vmem:[#allocation12 + $0x4f0] sm:$0xf0]  ;;  %v11250_v61 = vor.u32 %v12624_v20, %v11247_v44  ;;  %v10389_v44 = vld [vmem:[#allocation12 + $0x98] sm:$0xf] }
 0x593   :  { %v12456_v63 = vld [vmem:[#allocation12 + $0x214] sm:$0xf]  ;;  %v10930_v9 = vor.u32 %v12544_v60, %v10927_v8  ;;  %v11029_v60 = vld [vmem:[#allocation12 + $0x598] sm:$0xf] }
 0x594   :  { %6690 = vmatpush.bf16.msra.mxu1 %v10738_v1  ;;  %6668 = vmatpush.bf16.msrb.mxu3 %v11118_v13  ;;  %v10575_v57 = vld [vmem:[#allocation12 + $0x230] sm:$0xf0]  ;;  %v12437_v13 = vld [vmem:[#allocation12 + $0x174] sm:$0xf0] }
 0x595   :  { %6657 = vmatmul.bf16.vlgmr.msrb.gmra.mxu2 %v13763_v26  ;;  %v12616_v1 = vld [vmem:[#allocation12 + $0x714] sm:$0xf]  ;;  %v10578_v39 = vor.u32 %v12456_v63, %v10575_v57  ;;  %v10486_v23 = vor.u32 %v12437_v13, %v10485_v11  ;;  %v12573_v8 = vld [vmem:[#allocation12 + $0x5b4] sm:$0xf0] }
 0x596   :  { %6679 = vmatpush.bf16.msra.mxu0 %v10418_v10  ;;  %6701 = vmatpush.bf16.msra.mxu2 %v11058_v35  ;;  %v11215_v4 = vld [vmem:[#allocation12 + $0x730] sm:$0xf0]  ;;  %v12485_v63 = vld [vmem:[#allocation12 + $0x2f4] sm:$0xf0] }
 0x597   :  { %v11218_v12 = vor.u32 %v12616_v1, %v11215_v4  ;;  %v12536_v10 = vld [vmem:[#allocation12 + $0x494] sm:$0xf]  ;;  %v11317_v57 = vld [vmem:[#allocation12 + $0x7d8] sm:$0xf] }
 0x598   :  { %6691 = vmatpush.bf16.msra.mxu1 %v10706_v14  ;;  %6669 = vmatpush.bf16.msrb.mxu3 %v11086_v27  ;;  %v10895_v35 = vld [vmem:[#allocation12 + $0x4b0] sm:$0xf0]  ;;  %v12429_v27 = vld [vmem:[#allocation12 + $0x134] sm:$0xf0] }
 0x599   :  { %v12608_v14 = vld [vmem:[#allocation12 + $0x6d4] sm:$0xf]  ;;  %v10898_v22 = vor.u32 %v12536_v10, %v10895_v35  ;;  %v12645_v1 = vld [vmem:[#allocation12 + $0x7f4] sm:$0xf0] }
 0x59a   :  { %6680 = vmatpush.bf16.msra.mxu0 %v10386_v19  ;;  %6702 = vmatpush.bf16.msra.mxu2 %v11026_v2  ;;  %v11183_v16 = vld [vmem:[#allocation12 + $0x6f0] sm:$0xf0]  ;;  %v10453_v19 = vld [vmem:[#allocation12 + $0x118] sm:$0xf]  ;;  %v10774_v2 = vor.u32 %v12509_v31, %v10773_v17  ;;  %v11318_v11 = vor.u32 %v12645_v1, %v11317_v57 }
 0x59b   :  { %6670 = vmatmul.bf16.vlgmr.msrb.gmra.mxu3 %v13772_v48  ;;  %v11186_v21 = vor.u32 %v12608_v14, %v11183_v16  ;;  %v12528_v3 = vld [vmem:[#allocation12 + $0x454] sm:$0xf]  ;;  %v10454_v18 = vor.u32 %v12429_v27, %v10453_v19  ;;  %v12405_v10 = vld [vmem:[#allocation12 + $0x74] sm:$0xf0] }
 0x59c   :  { %6692 = vmatpush.bf16.msra.mxu1 %v10674_v38  ;;  %6714 = vmatpush.bf16.msra.mxu3 %v11314_v55  ;;  %v10863_v24 = vld [vmem:[#allocation12 + $0x470] sm:$0xf0]  ;;  %v12501_v55 = vld [vmem:[#allocation12 + $0x374] sm:$0xf0] }
 0x59d   :  { %v12600_v38 = vld [vmem:[#allocation12 + $0x694] sm:$0xf]  ;;  %v10866_v29 = vor.u32 %v12528_v3, %v10863_v24  ;;  %v10997_v35 = vld [vmem:[#allocation12 + $0x558] sm:$0xf] }
 0x59e   :  { %6681 = vmatpush.bf16.msra.mxu0 %v10354_v15  ;;  %6703 = vmatpush.bf16.msra.mxu2 %v10994_v41  ;;  %v11151_v25 = vld [vmem:[#allocation12 + $0x6b0] sm:$0xf0]  ;;  %v10421_v15 = vld [vmem:[#allocation12 + $0xd8] sm:$0xf]  ;;  %v10742_v41 = vor.u32 %v12501_v55, %v10741_v52  ;;  %v12449_v52 = vld [vmem:[#allocation12 + $0x1dc] sm:$0xf] }
 0x59f   :  { %v12520_v30 = vld [vmem:[#allocation12 + $0x414] sm:$0xf]  ;;  %v11154_v34 = vor.u32 %v12600_v38, %v11151_v25  ;;  %v10422_v50 = vor.u32 %v12421_v7, %v10421_v15  ;;  %v10645_v13 = vld [vmem:[#allocation12 + $0x298] sm:$0xf]  ;;  %v10551_v55 = vld [vmem:[#allocation12 + $0x1f8] sm:$0xf0] }
 0x5a0   :  { %6693 = vmatpush.bf16.msra.mxu1 %v10642_v42  ;;  %6715 = vmatpush.bf16.msra.mxu3 %v11282_v47  ;;  %v10831_v36 = vld [vmem:[#allocation12 + $0x430] sm:$0xf0]  ;;  %v11061_v42 = vld [vmem:[#allocation12 + $0x5d8] sm:$0xf] }
 0x5a1   :  { %v12592_v53 = vld [vmem:[#allocation12 + $0x654] sm:$0xf]  ;;  %v10709_v47 = vld [vmem:[#allocation12 + $0x318] sm:$0xf]  ;;  %v10834_v45 = vor.u32 %v12520_v30, %v10831_v36  ;;  %v11062_v20 = vor.u32 %v12581_v43, %v11061_v42 }
 0x5a2   :  { %6682 = vmatpush.bf16.msra.mxu0 %v10322_v54  ;;  %6704 = vmatpush.bf16.msra.mxu2 %v10962_v56  ;;  %v13791_v28 = vpop.f32.mrf.mxu0  ;;  %v11119_v46 = vld [vmem:[#allocation12 + $0x670] sm:$0xf0]  ;;  %v12413_v54 = vld [vmem:[#allocation12 + $0xb4] sm:$0xf0] }
 0x5a3   :  { %v11122_v56 = vor.u32 %v12592_v53, %v11119_v46  ;;  %v11087_v62 = vld [vmem:[#allocation12 + $0x630] sm:$0xf0]  ;;  %v10390_v6 = vor.u32 %v12413_v54, %v10389_v44  ;;  %v12477_v14 = vld [vmem:[#allocation12 + $0x2b4] sm:$0xf0] }
 0x5a4   :  { %6694 = vmatpush.bf16.msra.mxu1 %v10610_v58  ;;  %6716 = vmatpush.bf16.msra.mxu3 %v11250_v61  ;;  %v12584_v58 = vld [vmem:[#allocation12 + $0x614] sm:$0xf]  ;;  %v11285_v16 = vld [vmem:[#allocation12 + $0x798] sm:$0xf]  ;;  %v10646_v24 = vor.u32 %v12477_v14, %v10645_v13 }
 0x5a5   :  { %6683 = vmatmul.bf16.vlgmr.msra.gmra.mxu0 %v13740_v33  ;;  %v10297_v4 = vld [vmem:[%s14083_s23 + $0x6] ss:$8 sm:$0xf]  ;;  %v12637_v17 = vld [vmem:[#allocation12 + $0x7b4] sm:$0xf0] }
 0x5a6   :  { %6727 = vmatpush.bf16.msrb.mxu0 %v10550_v59  ;;  %6705 = vmatpush.bf16.msra.mxu2 %v10930_v9  ;;  %v10710_v59 = vor.u32 %v12493_v32, %v10709_v47  ;;  %v10298_v5 = vld [vmem:[%s14083_s23 + $0x6] ss:$8 sm:$0xf0]  ;;  %v11030_v9 = vor.u32 %v12573_v8, %v11029_v60  ;;  %v12397_v19 = vld [vmem:[#allocation12 + $0x34] sm:$0xf0]  ;;  %v11286_v25 = vor.u32 %v12637_v17, %v11285_v16 }
 0x5a7   :  { %v12557_v27 = vld [vmem:[#allocation12 + $0x534] sm:$0xf0]  ;;  %v12441_v47 = vld [vmem:[#allocation12 + $0x19c] sm:$0xf] }
 0x5a8   :  { %6695 = vmatpush.bf16.msra.mxu1 %v10578_v39  ;;  %6717 = vmatpush.bf16.msra.mxu3 %v11218_v12  ;;  %v13794_v49 = vpop.f32.mrf.mxu1  ;;  %v10678_v39 = vor.u32 %v12485_v63, %v10677_v0  ;;  %v10357_v12 = vld [vmem:[#allocation12 + $0x58] sm:$0xf]  ;;  %v10519_v32 = vld [vmem:[#allocation12 + $0x1b8] sm:$0xf0] }
 0x5a9   :  { %v12469_v30 = vld [vmem:[#allocation12 + $0x274] sm:$0xf0]  ;;  %v10807_v60 = vld [vmem:[#allocation12 + $0x3f8] sm:$0xf0] }
 0x5aa   :  { %6728 = vmatpush.bf16.msrb.mxu0 %v10518_v40  ;;  %6706 = vmatpush.bf16.msra.mxu2 %v10898_v22  ;;  %v6426_v61 = vpop.f32.mrf.mxu0  ;;  %v11090_v40 = vor.u32 %v12584_v58, %v11087_v62  ;;  %v10358_v22 = vor.u32 %v12405_v10, %v10357_v12  ;;  %v10933_v42 = vld [vmem:[#allocation12 + $0x4d8] sm:$0xf]  ;;  %v10775_v12 = vld [vmem:[#allocation12 + $0x3b8] sm:$0xf0] }
 0x5ab   :  { %6696 = vmatmul.bf16.vlgmr.msra.gmra.mxu1 %v13751_v51  ;;  %v12549_v43 = vld [vmem:[#allocation12 + $0x4f4] sm:$0xf0]  ;;  %v10522_v61 = vor.u32 %v12441_v47, %v10519_v32  ;;  %v10711_v47 = vld [vmem:[#allocation12 + $0x338] sm:$0xf0] }
 0x5ac   :  { %6740 = vmatpush.bf16.msrb.mxu1 %v10806_v37  ;;  %6718 = vmatpush.bf16.msra.mxu3 %v11186_v21  ;;  %v12565_v37 = vld [vmem:[#allocation12 + $0x574] sm:$0xf0]  ;;  %v13803_v21 = vor.u32 %v10298_v5, %v10297_v4  ;;  %v10934_v58 = vor.u32 %v12549_v43, %v10933_v42  ;;  %v12433_v4 = vld [vmem:[#allocation12 + $0x15c] sm:$0xf] }
 0x5ad   :  { %v10998_v3 = vor.u32 %v12565_v37, %v10997_v35  ;;  %v12621_v44 = vld [vmem:[#allocation12 + $0x734] sm:$0xf0]  ;;  %v11063_v42 = vld [vmem:[#allocation12 + $0x5f8] sm:$0xf0] }
 0x5ae   :  { %6729 = vmatpush.bf16.msrb.mxu0 %v10486_v23  ;;  %6707 = vmatpush.bf16.msra.mxu2 %v10866_v29  ;;  %v10325_v23 = vld [vmem:[#allocation12 + $0x18] sm:$0xf]  ;;  %v5119_v15 = vperm.slane %v13803_v21, 0  ;;  %v5120_v32 = vperm.slane %v13803_v21, 1 }
 0x5af   :  { %v10613_v29 = vld [vmem:[#allocation12 + $0x258] sm:$0xf]  ;;  %v10326_v36 = vor.u32 %v12397_v19, %v10325_v23 }
 0x5b0   :  { %6741 = vmatpush.bf16.msrb.mxu1 %v10774_v2  ;;  %6719 = vmatpush.bf16.msra.mxu3 %v11154_v34  ;;  %v6439_v31 = vpop.f32.mrf.mxu1  ;;  %v10965_v2 = vld [vmem:[#allocation12 + $0x518] sm:$0xf]  ;;  %v10614_v53 = vor.u32 %v12469_v30, %v10613_v29  ;;  %v6425_v8 = vadd.f32 %v13791_v28, %v5119_v15  ;;  %v10423_v15 = vld [vmem:[#allocation12 + $0xf8] sm:$0xf0] }
 0x5b1   :  { %v12629_v34 = vld [vmem:[#allocation12 + $0x774] sm:$0xf0]  ;;  %v10966_v7 = vor.u32 %v12557_v27, %v10965_v2  ;;  %v12497_v2 = vld [vmem:[#allocation12 + $0x35c] sm:$0xf] }
 0x5b2   :  { %6730 = vmatpush.bf16.msrb.mxu0 %v10454_v18  ;;  %6708 = vmatpush.bf16.msra.mxu2 %v10834_v45  ;;  %v13805_v38 = vpop.f32.mrf.mxu0  ;;  %v11253_v18 = vld [vmem:[#allocation12 + $0x758] sm:$0xf]  ;;  %v6438_v5 = vadd.f32 %v13794_v49, %v6425_v8  ;;  %v12425_v49 = vld [vmem:[#allocation12 + $0x11c] sm:$0xf] }
 0x5b3   :  { %v11254_v46 = vor.u32 %v12629_v34, %v11253_v18  ;;  %v10581_v45 = vld [vmem:[#allocation12 + $0x218] sm:$0xf]  ;;  %v10743_v27 = vld [vmem:[#allocation12 + $0x378] sm:$0xf0] }
 0x5b4   :  { %6742 = vmatpush.bf16.msrb.mxu1 %v10742_v41  ;;  %6720 = vmatpush.bf16.msra.mxu3 %v11122_v56  ;;  %v10554_v41 = vor.u32 %v12449_v52, %v10551_v55  ;;  %v10901_v57 = vld [vmem:[#allocation12 + $0x498] sm:$0xf] }
 0x5b5   :  { %6709 = vmatmul.bf16.vlgmr.msra.gmra.mxu2 %v13763_v26  ;;  %v12541_v1 = vld [vmem:[#allocation12 + $0x4b4] sm:$0xf0] }
 0x5b6   :  { %6731 = vmatpush.bf16.msrb.mxu0 %v10422_v50  ;;  %6753 = vmatpush.bf16.msrb.mxu2 %v11062_v20  ;;  %v12461_v50 = vld [vmem:[#allocation12 + $0x234] sm:$0xf0]  ;;  %v10902_v35 = vor.u32 %v12541_v1, %v10901_v57  ;;  %v12481_v57 = vld [vmem:[#allocation12 + $0x2dc] sm:$0xf] }
 0x5b7   :  { %v11221_v20 = vld [vmem:[#allocation12 + $0x718] sm:$0xf]  ;;  %v10582_v0 = vor.u32 %v12461_v50, %v10581_v45  ;;  %v10679_v1 = vld [vmem:[#allocation12 + $0x2f8] sm:$0xf0] }
 0x5b8   :  { %6743 = vmatpush.bf16.msrb.mxu1 %v10710_v59  ;;  %6721 = vmatpush.bf16.msra.mxu3 %v11090_v40  ;;  %v6450_v54 = vpop.f32.mrf.mxu2  ;;  %v13809_v56 = vpop.f32.mrf.mxu1  ;;  %v12513_v59 = vld [vmem:[#allocation12 + $0x3dc] sm:$0xf]  ;;  %v11222_v63 = vor.u32 %v12621_v44, %v11221_v20  ;;  %v11189_v40 = vld [vmem:[#allocation12 + $0x6d8] sm:$0xf] }
 0x5b9   :  { %v12613_v28 = vld [vmem:[#allocation12 + $0x6f4] sm:$0xf0]  ;;  %v6451_v10 = vadd.f32 %v6450_v54, %v6438_v5  ;;  %v12409_v54 = vld [vmem:[#allocation12 + $0x9c] sm:$0xf]  ;;  %v6477_v5 = vadd.f32 %v13805_v38, %v5120_v32 }
 0x5ba   :  { %6732 = vmatpush.bf16.msrb.mxu0 %v10390_v6  ;;  %6754 = vmatpush.bf16.msrb.mxu2 %v11030_v9  ;;  %v6478_v62 = vpop.f32.mrf.mxu0  ;;  %v10810_v6 = vor.u32 %v12513_v59, %v10807_v60  ;;  %v10487_v9 = vld [vmem:[#allocation12 + $0x178] sm:$0xf0]  ;;  %v11190_v13 = vor.u32 %v12613_v28, %v11189_v40  ;;  %v10869_v14 = vld [vmem:[#allocation12 + $0x458] sm:$0xf] }
 0x5bb   :  { %6722 = vmatmul.bf16.vlgmr.msra.gmra.mxu3 %v13772_v48  ;;  %v10490_v37 = vor.u32 %v12433_v4, %v10487_v9  ;;  %v12533_v16 = vld [vmem:[#allocation12 + $0x474] sm:$0xf0]  ;;  %v10391_v59 = vld [vmem:[#allocation12 + $0xb8] sm:$0xf0] }
 0x5bc   :  { %6744 = vmatpush.bf16.msrb.mxu1 %v10678_v39  ;;  %6766 = vmatpush.bf16.msrb.mxu3 %v11318_v11  ;;  %v12505_v39 = vld [vmem:[#allocation12 + $0x39c] sm:$0xf]  ;;  %v11157_v23 = vld [vmem:[#allocation12 + $0x698] sm:$0xf]  ;;  %v10870_v52 = vor.u32 %v12533_v16, %v10869_v14 }
 0x5bd   :  { %v10778_v31 = vor.u32 %v12505_v39, %v10775_v12  ;;  %v10837_v55 = vld [vmem:[#allocation12 + $0x418] sm:$0xf]  ;;  %v12641_v9 = vld [vmem:[#allocation12 + $0x7dc] sm:$0xf]  ;;  %v10394_v12 = vor.u32 %v12409_v54, %v10391_v59  ;;  %v11382_v59 = vld [vmem:[#allocation13 + $0x60] sm:$0xf] }
 0x5be   :  { %6733 = vmatpush.bf16.msrb.mxu0 %v10358_v22  ;;  %6755 = vmatpush.bf16.msrb.mxu2 %v10998_v3  ;;  %v6463_v11 = vpop.f32.mrf.mxu3  ;;  %v10455_v22 = vld [vmem:[#allocation12 + $0x138] sm:$0xf0]  ;;  %v12605_v3 = vld [vmem:[#allocation12 + $0x6b4] sm:$0xf0] }
 0x5bf   :  { %v6464_v17 = vadd.f32 %v6463_v11, %v6451_v10  ;;  %v10458_v30 = vor.u32 %v12425_v49, %v10455_v22  ;;  %v11158_v18 = vor.u32 %v12605_v3, %v11157_v23  ;;  %v12525_v34 = vld [vmem:[#allocation12 + $0x434] sm:$0xf0]  ;;  %v11319_v40 = vld [vmem:[#allocation12 + $0x7f8] sm:$0xf0] }
 0x5c0   :  { %6745 = vmatpush.bf16.msrb.mxu1 %v10646_v24  ;;  %6767 = vmatpush.bf16.msrb.mxu3 %v11286_v25  ;;  %v6452_v24 = vpop.f32.mrf.mxu2  ;;  %v6491_v19 = vpop.f32.mrf.mxu1  ;;  %v11125_v43 = vld [vmem:[#allocation12 + $0x658] sm:$0xf]  ;;  %v10838_v45 = vor.u32 %v12525_v34, %v10837_v55  ;;  %v10359_v38 = vld [vmem:[#allocation12 + $0x78] sm:$0xf0]  ;;  %v11322_v16 = vor.u32 %v12641_v9, %v11319_v40  ;;  %v11454_v40 = vld [vmem:[#allocation13 + $0xf0] sm:$0xf] }
 0x5c1   :  { %6831 = vst [vmem:[%s14107_s28] sm:$0xff] %v6464_v17  ;;  %v11323_v25 = vmul.f32 -1.442695, %v6464_v17  ;;  %v11093_v62 = vld [vmem:[#allocation12 + $0x618] sm:$0xf]  ;;  %v12561_v14 = vld [vmem:[#allocation12 + $0x55c] sm:$0xf] }
 0x5c2   :  { %6734 = vmatpush.bf16.msrb.mxu0 %v10326_v36  ;;  %6756 = vmatpush.bf16.msrb.mxu2 %v10966_v7  ;;  %v13818_v29 = vpop.f32.mrf.mxu0  ;;  %v12417_v36 = vld [vmem:[#allocation12 + $0xdc] sm:$0xf]  ;;  %v10746_v7 = vor.u32 %v12497_v2, %v10743_v27  ;;  %v12661_v34 = vld [vmem:[#allocation13 + $0x74] sm:$0xf0] }
 0x5c3   :  { %12870 = vpow2.f32 %v11323_v25  ;;  %v10426_v20 = vor.u32 %v12417_v36, %v10423_v15  ;;  %v10999_v49 = vld [vmem:[#allocation12 + $0x578] sm:$0xf0] }
 0x5c4   :  { %6746 = vmatpush.bf16.msrb.mxu1 %v10614_v53  ;;  %6768 = vmatpush.bf16.msrb.mxu3 %v11254_v46  ;;  %v12597_v53 = vld [vmem:[#allocation12 + $0x674] sm:$0xf0]  ;;  %v12489_v46 = vld [vmem:[#allocation12 + $0x31c] sm:$0xf] }
 0x5c5   :  { %6735 = vmatmul.bf16.vlgmr.msrb.gmra.mxu0 %v13740_v33  ;;  %v11126_v60 = vor.u32 %v12597_v53, %v11125_v43  ;;  %v10714_v8 = vor.u32 %v12489_v46, %v10711_v47  ;;  %v12473_v17 = vld [vmem:[#allocation12 + $0x29c] sm:$0xf] }
 0x5c6   :  { %6779 = vmatpush.bf16.msra.mxu0 %v10554_v41  ;;  %6757 = vmatpush.bf16.msrb.mxu2 %v10934_v58  ;;  %v12577_v41 = vld [vmem:[#allocation12 + $0x5dc] sm:$0xf]  ;;  %v6465_v50 = vpop.f32.mrf.mxu3 }
 0x5c7   :  { %v11066_v44 = vor.u32 %v12577_v41, %v11063_v42  ;;  %v12569_v58 = vld [vmem:[#allocation12 + $0x59c] sm:$0xf] }
 0x5c8   :  { %6747 = vmatpush.bf16.msrb.mxu1 %v10582_v0  ;;  %6769 = vmatpush.bf16.msrb.mxu3 %v11222_v63  ;;  %v6502_v0 = vpop.f32.mrf.mxu2  ;;  %v12589_v63 = vld [vmem:[#allocation12 + $0x634] sm:$0xf0]  ;;  %v12633_v23 = vld [vmem:[#allocation12 + $0x79c] sm:$0xf] }
 0x5c9   :  { %v12871_v4 = vpop.eup %12870  ;;  %v11094_v11 = vor.u32 %v12589_v63, %v11093_v62  ;;  %v11287_v3 = vld [vmem:[#allocation12 + $0x7b8] sm:$0xf0] }
 0x5ca   :  { %6780 = vmatpush.bf16.msra.mxu0 %v10522_v61  ;;  %6758 = vmatpush.bf16.msrb.mxu2 %v10902_v35  ;;  %v11031_v61 = vld [vmem:[#allocation12 + $0x5b8] sm:$0xf0]  ;;  %v13824_v28 = vadd.f32 1.0, %v12871_v4  ;;  %v6530_v39 = vpop.f32.mrf.mxu0  ;;  %v6490_v35 = vadd.f32 %v13809_v56, %v6477_v5  ;;  %v11290_v15 = vor.u32 %v12633_v23, %v11287_v3  ;;  %v5121_v4 = vperm.slane %v13803_v21, 2 }
 0x5cb   :  { %6748 = vmatmul.bf16.vlgmr.msrb.gmra.mxu1 %v13751_v51  ;;  %v11034_v10 = vor.u32 %v12569_v58, %v11031_v61  ;;  %v12393_v19 = vld [vmem:[#allocation12 + $0x1c] sm:$0xf]  ;;  %v12659_v58 = vld [vmem:[#allocation13 + $0x64] sm:$0xf0]  ;;  %v12677_v39 = vld [vmem:[#allocation13 + $0xf4] sm:$0xf0] }
 0x5cc   :  { %6792 = vmatpush.bf16.msra.mxu1 %v10810_v6  ;;  %6770 = vmatpush.bf16.msrb.mxu3 %v11190_v13  ;;  %v13822_v6 = vpop.f32.mrf.mxu1  ;;  %v12401_v13 = vld [vmem:[#allocation12 + $0x5c] sm:$0xf]  ;;  %12872 = vrcp.f32 %v13824_v28  ;;  %v6503_v22 = vadd.f32 %v6502_v0, %v6490_v35  ;;  %vm6876_vm1 = vweird.f32 %v13824_v28 }
 0x5cd   :  { %v10362_v24 = vor.u32 %v12401_v13, %v10359_v38  ;;  %v10327_v2 = vld [vmem:[#allocation12 + $0x38] sm:$0xf0] }
 0x5ce   :  { %6781 = vmatpush.bf16.msra.mxu0 %v10490_v37  ;;  %6759 = vmatpush.bf16.msrb.mxu2 %v10870_v52  ;;  %v10682_v37 = vor.u32 %v12481_v57, %v10679_v1  ;;  %v6515_v56 = vpop.f32.mrf.mxu3  ;;  %v12553_v27 = vld [vmem:[#allocation12 + $0x51c] sm:$0xf]  ;;  %v11002_v52 = vor.u32 %v12561_v14, %v10999_v49  ;;  %v10330_v32 = vor.u32 %v12393_v19, %v10327_v2  ;;  %v6882_v1 = vand.u32 2147483648, %v13824_v28  ;;  %v12657_v49 = vld [vmem:[#allocation13 + $0x54] sm:$0xf0] }
 0x5cf   :  { %v6516_v25 = vadd.f32 %v6515_v56, %v6503_v22  ;;  %v10615_v41 = vld [vmem:[#allocation12 + $0x278] sm:$0xf0]  ;;  %v6529_v56 = vadd.f32 %v13818_v29, %v5121_v4  ;;  %v11446_v19 = vld [vmem:[#allocation13 + $0xe0] sm:$0xf]  ;;  %v12675_v2 = vld [vmem:[#allocation13 + $0xe4] sm:$0xf0] }
 0x5d0   :  { %6793 = vmatpush.bf16.msra.mxu1 %v10778_v31  ;;  %6771 = vmatpush.bf16.msrb.mxu3 %v11158_v18  ;;  %v10647_v31 = vld [vmem:[#allocation12 + $0x2b8] sm:$0xf0]  ;;  %v11390_v18 = vld [vmem:[#allocation13 + $0x70] sm:$0xf]  ;;  %v6504_v36 = vpop.f32.mrf.mxu2  ;;  %v12671_v4 = vld [vmem:[#allocation13 + $0xc4] sm:$0xf0] }
 0x5d1   :  { %v10650_v55 = vor.u32 %v12473_v17, %v10647_v31  ;;  %v12625_v42 = vld [vmem:[#allocation12 + $0x75c] sm:$0xf]  ;;  %6832 = vst [vmem:[%s14107_s28 + $0x8] sm:$0xff] %v6516_v25  ;;  %v11324_v43 = vmul.f32 -1.442695, %v6516_v25  ;;  %v11455_v31 = vor.u32 %v12677_v39, %v11454_v40  ;;  %v6542_v29 = vadd.f32 %v13822_v6, %v6529_v56 }
 0x5d2   :  { %6782 = vmatpush.bf16.msra.mxu0 %v10458_v30  ;;  %6760 = vmatpush.bf16.msrb.mxu2 %v10838_v45  ;;  %v10967_v30 = vld [vmem:[#allocation12 + $0x538] sm:$0xf0]  ;;  %v13832_v47 = vpop.eup %12872  ;;  %v11350_v40 = vld [vmem:[#allocation13 + $0x20] sm:$0xf] }
 0x5d3   :  { %v11255_v46 = vld [vmem:[#allocation12 + $0x778] sm:$0xf0]  ;;  %v6872_v45 = vmul.f32 %v13832_v47, %v13824_v28  ;;  %12874 = vpow2.f32 %v11324_v43  ;;  %v10970_v50 = vor.u32 %v12553_v27, %v10967_v30  ;;  %vm6877_vm0 = vweird.f32 %v13832_v47  ;;  %v11438_v43 = vld [vmem:[#allocation13 + $0xd0] sm:$0xf]  ;;  %v12709_v27 = vld [vmem:[#allocation13 + $0x1f4] sm:$0xf0] }
 0x5d4   :  { %6794 = vmatpush.bf16.msra.mxu1 %v10746_v7  ;;  %6772 = vmatpush.bf16.msrb.mxu3 %v11126_v60  ;;  %v12465_v7 = vld [vmem:[#allocation12 + $0x25c] sm:$0xf]  ;;  %v6543_v53 = vpop.f32.mrf.mxu1  ;;  %vm13850_vm2 = vmor %vm6876_vm1, %vm6877_vm0 }
 0x5d5   :  { %6761 = vmatmul.bf16.vlgmr.msrb.gmra.mxu2 %v13763_v26  ;;  %v10935_v54 = vld [vmem:[#allocation12 + $0x4f8] sm:$0xf0]  ;;  %v10618_v60 = vor.u32 %v12465_v7, %v10615_v41  ;;  %v6873_v0 = vsub.f32 1.0, %v6872_v45  ;;  %v12655_v7 = vld [vmem:[#allocation13 + $0x44] sm:$0xf0] }
 0x5d6   :  { %6783 = vmatpush.bf16.msra.mxu0 %v10426_v20  ;;  %6805 = vmatpush.bf16.msra.mxu2 %v11066_v44  ;;  %v11391_v20 = vor.u32 %v12661_v34, %v11390_v18  ;;  %v12545_v44 = vld [vmem:[#allocation12 + $0x4dc] sm:$0xf]  ;;  %v6517_v5 = vpop.f32.mrf.mxu3  ;;  %v11366_v34 = vld [vmem:[#allocation13 + $0x40] sm:$0xf]  ;;  %v12673_v53 = vld [vmem:[#allocation13 + $0xd4] sm:$0xf0] }
 0x5d7   :  { %v12457_v61 = vld [vmem:[#allocation12 + $0x21c] sm:$0xf]  ;;  %v10938_v9 = vor.u32 %v12545_v44, %v10935_v54  ;;  %v11367_v54 = vor.u32 %v12655_v7, %v11366_v34  ;;  %v11414_v7 = vld [vmem:[#allocation13 + $0xa0] sm:$0xf] }
 0x5d8   :  { %6795 = vmatpush.bf16.msra.mxu1 %v10714_v8  ;;  %6773 = vmatpush.bf16.msrb.mxu3 %v11094_v11  ;;  %v11258_v8 = vor.u32 %v12625_v42, %v11255_v46  ;;  %v10583_v62 = vld [vmem:[#allocation12 + $0x238] sm:$0xf0]  ;;  %v6880_v11 = vand.u32 2147483647, %v13824_v28  ;;  %v6883_v28 = vor.u32 1.1754944e-38, %v6882_v1 }
 0x5d9   :  { %v12617_v63 = vld [vmem:[#allocation12 + $0x71c] sm:$0xf]  ;;  %v10586_v13 = vor.u32 %v12457_v61, %v10583_v62  ;;  %v12875_v17 = vpop.eup %12874  ;;  %v12693_v61 = vld [vmem:[#allocation13 + $0x174] sm:$0xf0]  ;;  %v11439_v62 = vor.u32 %v12673_v53, %v11438_v43  ;;  %v11574_v53 = vld [vmem:[#allocation13 + $0x1e0] sm:$0xf] }
 0x5da   :  { %6784 = vmatpush.bf16.msra.mxu0 %v10394_v12  ;;  %6806 = vmatpush.bf16.msra.mxu2 %v11034_v10  ;;  %v11223_v57 = vld [vmem:[#allocation12 + $0x738] sm:$0xf0]  ;;  %v6874_v12 = vmul.f32 %v13832_v47, %v6873_v0  ;;  %v11383_v10 = vor.u32 %v12659_v58, %v11382_v59  ;;  %vm6881_vm3 = vcmp.eq.f32.partialorder %v6880_v11, 8.507059e+37  ;;  %v11518_v58 = vld [vmem:[#allocation13 + $0x170] sm:$0xf] }
 0x5db   :  { %6774 = vmatmul.bf16.vlgmr.msrb.gmra.mxu3 %v13772_v48  ;;  %v12537_v35 = vld [vmem:[#allocation12 + $0x49c] sm:$0xf]  ;;  %v11226_v38 = vor.u32 %v12617_v63, %v11223_v57  ;;  %v11430_v63 = vld [vmem:[#allocation13 + $0xc0] sm:$0xf]  ;;  %v12691_v11 = vld [vmem:[#allocation13 + $0x164] sm:$0xf0] }
 0x5dc   :  { %6796 = vmatpush.bf16.msra.mxu1 %v10682_v37  ;;  %6818 = vmatpush.bf16.msra.mxu3 %v11322_v16  ;;  %v6554_v37 = vpop.f32.mrf.mxu2  ;;  %v10903_v14 = vld [vmem:[#allocation12 + $0x4b8] sm:$0xf0]  ;;  %v11374_v16 = vld [vmem:[#allocation13 + $0x50] sm:$0xf]  ;;  %v6875_v3 = vadd.f32 %v13832_v47, %v6874_v12  ;;  %v11519_v12 = vor.u32 %v12693_v61, %v11518_v58  ;;  %v12665_v58 = vld [vmem:[#allocation13 + $0x94] sm:$0xf0] }
 0x5dd   :  { %v12609_v22 = vld [vmem:[#allocation12 + $0x6dc] sm:$0xf]  ;;  %v11375_v25 = vor.u32 %v12657_v49, %v11374_v16  ;;  %v6555_v6 = vadd.f32 %v6554_v37, %v6542_v29  ;;  %v11646_v61 = vld [vmem:[#allocation13 + $0x270] sm:$0xf] }
 0x5de   :  { %6785 = vmatpush.bf16.msra.mxu0 %v10362_v24  ;;  %6807 = vmatpush.bf16.msra.mxu2 %v11002_v52  ;;  %v11191_v23 = vld [vmem:[#allocation12 + $0x6f8] sm:$0xf0]  ;;  %v13846_v24 = vadd.f32 1.0, %v12875_v17  ;;  %v6879_v52 = vsel %vm13850_vm2, %v13832_v47, %v6875_v3  ;;  %v6567_v46 = vpop.f32.mrf.mxu3 }
 0x5df   :  { %v12529_v30 = vld [vmem:[#allocation12 + $0x45c] sm:$0xf]  ;;  %v13859_v36 = vsel %vm6881_vm3, %v6883_v28, %v6879_v52  ;;  %v6568_v44 = vadd.f32 %v6567_v46, %v6555_v6  ;;  %v12707_v46 = vld [vmem:[#allocation13 + $0x1e4] sm:$0xf0] }
 0x5e0   :  { %6797 = vmatpush.bf16.msra.mxu1 %v10650_v55  ;;  %6819 = vmatpush.bf16.msra.mxu3 %v11290_v15  ;;  %12876 = vrcp.f32 %v13846_v24  ;;  %v11194_v55 = vor.u32 %v12609_v22, %v11191_v23  ;;  %v10871_v18 = vld [vmem:[#allocation12 + $0x478] sm:$0xf0]  ;;  %v11447_v15 = vor.u32 %v12675_v2, %v11446_v19  ;;  %6991 = vst [vmem:[%s14110_s21] sm:$0xff] %v13859_v36  ;;  %v6897_v17 = vand.u32 2147483648, %v13846_v24  ;;  %v12669_v22 = vld [vmem:[#allocation13 + $0xb4] sm:$0xf0] }
 0x5e1   :  { %v12601_v41 = vld [vmem:[#allocation12 + $0x69c] sm:$0xf]  ;;  %6833 = vst [vmem:[%s14107_s28 + $0x10] sm:$0xff] %v6568_v44  ;;  %v11325_v1 = vmul.f32 -1.442695, %v6568_v44  ;;  %vm6891_vm5 = vweird.f32 %v13846_v24 }
 0x5e2   :  { %6786 = vmatpush.bf16.msra.mxu0 %v10330_v32  ;;  %6808 = vmatpush.bf16.msra.mxu2 %v10970_v50  ;;  %v11159_v42 = vld [vmem:[#allocation12 + $0x6b8] sm:$0xf0]  ;;  %v13866_v47 = vpop.f32.mrf.mxu0  ;;  %v10874_v32 = vor.u32 %v12529_v30, %v10871_v18  ;;  %v6895_v19 = vand.u32 2147483647, %v13846_v24  ;;  %v11582_v2 = vld [vmem:[#allocation13 + $0x1f0] sm:$0xf] }
 0x5e3   :  { %v12521_v45 = vld [vmem:[#allocation12 + $0x41c] sm:$0xf]  ;;  %12878 = vpow2.f32 %v11325_v1  ;;  %v11502_v30 = vld [vmem:[#allocation13 + $0x150] sm:$0xf]  ;;  %v12689_v18 = vld [vmem:[#allocation13 + $0x154] sm:$0xf0]  ;;  %v11583_v6 = vor.u32 %v12709_v27, %v11582_v2 }
 0x5e4   :  { %6798 = vmatpush.bf16.msra.mxu1 %v10618_v60  ;;  %6820 = vmatpush.bf16.msra.mxu3 %v11258_v8  ;;  %v10839_v50 = vld [vmem:[#allocation12 + $0x438] sm:$0xf0]  ;;  %v6556_v59 = vpop.f32.mrf.mxu2  ;;  %v11162_v60 = vor.u32 %v12601_v41, %v11159_v42  ;;  %v12653_v8 = vld [vmem:[#allocation13 + $0x34] sm:$0xf0]  ;;  %v12667_v41 = vld [vmem:[#allocation13 + $0xa4] sm:$0xf0] }
 0x5e5   :  { %6787 = vmatmul.bf16.vlgmr.msra.gmra.mxu0 %v13740_v33  ;;  %v10906_v33 = vor.u32 %v12537_v35, %v10903_v14  ;;  %v12593_v0 = vld [vmem:[#allocation12 + $0x65c] sm:$0xf]  ;;  %v11510_v35 = vld [vmem:[#allocation13 + $0x160] sm:$0xf]  ;;  %v11431_v14 = vor.u32 %v12671_v4, %v11430_v63  ;;  %v6898_v42 = vor.u32 1.1754944e-38, %v6897_v17  ;;  %vm6896_vm7 = vcmp.eq.f32.partialorder %v6895_v19, 8.507059e+37 }
 0x5e6   :  { %7782 = vmatpush.bf16.msrb.mxu0 %v11391_v20  ;;  %6809 = vmatpush.bf16.msra.mxu2 %v10938_v9  ;;  %v11358_v20 = vld [vmem:[#allocation13 + $0x30] sm:$0xf]  ;;  %v13868_v57 = vpop.eup %12876  ;;  %v10842_v9 = vor.u32 %v12521_v45, %v10839_v50  ;;  %v12585_v16 = vld [vmem:[#allocation12 + $0x61c] sm:$0xf]  ;;  %v6569_v3 = vpop.f32.mrf.mxu3  ;;  %v11334_v45 = vld [vmem:[#allocation13] sm:$0xf] }
 0x5e7   :  { %v6887_v5 = vmul.f32 %v13868_v57, %v13846_v24  ;;  %v11359_v39 = vor.u32 %v12653_v8, %v11358_v20  ;;  %v11095_v49 = vld [vmem:[#allocation12 + $0x638] sm:$0xf0]  ;;  %vm6892_vm4 = vweird.f32 %v13868_v57  ;;  %v12647_v50 = vld [vmem:[#allocation13 + $0x4] sm:$0xf0]  ;;  %v11503_v20 = vor.u32 %v12689_v18, %v11502_v30  ;;  %v11494_v59 = vld [vmem:[#allocation13 + $0x140] sm:$0xf] }
 0x5e8   :  { %6799 = vmatpush.bf16.msra.mxu1 %v10586_v13  ;;  %6821 = vmatpush.bf16.msra.mxu3 %v11226_v38  ;;  %v13875_v13 = vpop.f32.mrf.mxu1  ;;  %v11098_v52 = vor.u32 %v12585_v16, %v11095_v49  ;;  %vm6893_vm6 = vmor %vm6891_vm5, %vm6892_vm4  ;;  %v11406_v8 = vld [vmem:[#allocation13 + $0x90] sm:$0xf]  ;;  %v12705_v63 = vld [vmem:[#allocation13 + $0x1d4] sm:$0xf0]  ;;  %v5122_v1 = vperm.slane %v13803_v21, 3  ;;  %v13901_v49 = vpack.c.bf16 %v13859_v36, %v13859_v36 }
 0x5e9   :  { %v6888_v37 = vsub.f32 1.0, %v6887_v5  ;;  %v11407_v5 = vor.u32 %v12665_v58, %v11406_v8  ;;  %v12683_v3 = vld [vmem:[#allocation13 + $0x124] sm:$0xf0]  ;;  %v11630_v27 = vld [vmem:[#allocation13 + $0x250] sm:$0xf] }
 0x5ea   :  { %7783 = vmatpush.bf16.msrb.mxu0 %v11383_v10  ;;  %6810 = vmatpush.bf16.msra.mxu2 %v10906_v33  ;;  %v12651_v10 = vld [vmem:[#allocation13 + $0x24] sm:$0xf0]  ;;  %v6582_v56 = vpop.f32.mrf.mxu0  ;;  %v11511_v33 = vor.u32 %v12691_v11, %v11510_v35  ;;  %v11638_v35 = vld [vmem:[#allocation13 + $0x260] sm:$0xf]  ;;  %v6581_v19 = vadd.f32 %v13866_v47, %v5122_v1  ;;  %v11550_v36 = vld [vmem:[#allocation13 + $0x1b0] sm:$0xf] }
 0x5eb   :  { %6800 = vmatmul.bf16.vlgmr.msra.gmra.mxu1 %v13751_v51  ;;  %v11127_v51 = vld [vmem:[#allocation12 + $0x678] sm:$0xf0]  ;;  %v6889_v23 = vmul.f32 %v13868_v57, %v6888_v37  ;;  %v11351_v28 = vor.u32 %v12651_v10, %v11350_v40  ;;  %v12685_v40 = vld [vmem:[#allocation13 + $0x134] sm:$0xf0]  ;;  %v11614_v8 = vld [vmem:[#allocation13 + $0x230] sm:$0xf] }
 0x5ec   :  { %7795 = vmatpush.bf16.msrb.mxu1 %v11455_v31  ;;  %6822 = vmatpush.bf16.msra.mxu3 %v11194_v55  ;;  %v11130_v38 = vor.u32 %v12593_v0, %v11127_v51  ;;  %v11422_v31 = vld [vmem:[#allocation13 + $0xb0] sm:$0xf]  ;;  %v12649_v55 = vld [vmem:[#allocation13 + $0x14] sm:$0xf0] }
 0x5ed   :  { %v11423_v29 = vor.u32 %v12669_v22, %v11422_v31  ;;  %v6890_v34 = vadd.f32 %v13868_v57, %v6889_v23  ;;  %v12725_v0 = vld [vmem:[#allocation13 + $0x274] sm:$0xf0]  ;;  %v11566_v51 = vld [vmem:[#allocation13 + $0x1d0] sm:$0xf]  ;;  %v11478_v23 = vld [vmem:[#allocation13 + $0x120] sm:$0xf] }
 0x5ee   :  { %7784 = vmatpush.bf16.msrb.mxu0 %v11375_v25  ;;  %6811 = vmatpush.bf16.msra.mxu2 %v10874_v32  ;;  %v11342_v25 = vld [vmem:[#allocation13 + $0x10] sm:$0xf]  ;;  %v11647_v10 = vor.u32 %v12725_v0, %v11646_v61  ;;  %v11567_v11 = vor.u32 %v12705_v63, %v11566_v51  ;;  %v11479_v47 = vor.u32 %v12683_v3, %v11478_v23  ;;  %v12717_v58 = vld [vmem:[#allocation13 + $0x234] sm:$0xf0] }
 0x5ef   :  { %v6894_v43 = vsel %vm6893_vm6, %v13868_v57, %v6890_v34  ;;  %v11343_v32 = vor.u32 %v12649_v55, %v11342_v25  ;;  %v11335_v57 = vor.u32 %v12647_v50, %v11334_v45  ;;  %v6594_v55 = vadd.f32 %v13875_v13, %v6581_v19  ;;  %v11470_v34 = vld [vmem:[#allocation13 + $0x110] sm:$0xf]  ;;  %v11622_v13 = vld [vmem:[#allocation13 + $0x240] sm:$0xf]  ;;  %v12699_v45 = vld [vmem:[#allocation13 + $0x1a4] sm:$0xf0] }
 0x5f0   :  { %7796 = vmatpush.bf16.msrb.mxu1 %v11447_v15  ;;  %6823 = vmatpush.bf16.msra.mxu3 %v11162_v60  ;;  %v12879_v15 = vpop.eup %12878  ;;  %v6595_v44 = vpop.f32.mrf.mxu1  ;;  %v12687_v60 = vld [vmem:[#allocation13 + $0x144] sm:$0xf0]  ;;  %v11534_v51 = vld [vmem:[#allocation13 + $0x190] sm:$0xf]  ;;  %v12697_v63 = vld [vmem:[#allocation13 + $0x194] sm:$0xf0] }
 0x5f1   :  { %v13886_v24 = vadd.f32 1.0, %v12879_v15  ;;  %v11495_v4 = vor.u32 %v12687_v60, %v11494_v59  ;;  %v12679_v59 = vld [vmem:[#allocation13 + $0x104] sm:$0xf0]  ;;  %v12741_v1 = vld [vmem:[#allocation13 + $0x2f4] sm:$0xf0] }
 0x5f2   :  { %7785 = vmatpush.bf16.msrb.mxu0 %v11367_v54  ;;  %6812 = vmatpush.bf16.msra.mxu2 %v10842_v9  ;;  %v11415_v54 = vor.u32 %v12667_v41, %v11414_v7  ;;  %v11486_v9 = vld [vmem:[#allocation13 + $0x130] sm:$0xf]  ;;  %v12681_v41 = vld [vmem:[#allocation13 + $0x114] sm:$0xf0] }
 0x5f3   :  { %12880 = vrcp.f32 %v13886_v24  ;;  %v11487_v17 = vor.u32 %v12685_v40, %v11486_v9  ;;  %v6912_v25 = vand.u32 2147483648, %v13886_v24  ;;  %v6910_v30 = vand.u32 2147483647, %v13886_v24  ;;  %v11598_v23 = vld [vmem:[#allocation13 + $0x210] sm:$0xf] }
 0x5f4   :  { %7797 = vmatpush.bf16.msrb.mxu1 %v11439_v62  ;;  %6824 = vmatpush.bf16.msra.mxu3 %v11130_v38  ;;  %v11575_v62 = vor.u32 %v12707_v46, %v11574_v53  ;;  %v12723_v38 = vld [vmem:[#allocation13 + $0x264] sm:$0xf0]  ;;  %vm6906_vm9 = vweird.f32 %v13886_v24  ;;  %v11471_v44 = vor.u32 %v12681_v41, %v11470_v34  ;;  %v11615_v40 = vor.u32 %v12717_v58, %v11614_v8  ;;  %v12713_v3 = vld [vmem:[#allocation13 + $0x214] sm:$0xf0] }
 0x5f5   :  { %6813 = vmatmul.bf16.vlgmr.msra.gmra.mxu2 %v13763_v26  ;;  %v13889_v26 = vsel %vm6896_vm7, %v6898_v42, %v6894_v43  ;;  %v11639_v2 = vor.u32 %v12723_v38, %v11638_v35  ;;  %v6913_v46 = vor.u32 1.1754944e-38, %v6912_v25  ;;  %vm6911_vm11 = vcmp.eq.f32.partialorder %v6910_v30, 8.507059e+37  ;;  %v11526_v35 = vld [vmem:[#allocation13 + $0x180] sm:$0xf]  ;;  %v12660_v30 = vld [vmem:[#allocation13 + $0x74] sm:$0xf] }
 0x5f6   :  { %7786 = vmatpush.bf16.msrb.mxu0 %v11359_v39  ;;  %7808 = vmatpush.bf16.msrb.mxu2 %v11519_v12  ;;  %6992 = vst [vmem:[%s14110_s21 + $0x8] sm:$0xff] %v13889_v26  ;;  %v11398_v39 = vld [vmem:[#allocation13 + $0x80] sm:$0xf]  ;;  %v12663_v12 = vld [vmem:[#allocation13 + $0x84] sm:$0xf0]  ;;  %v13910_v18 = vpack.c.bf16 %v13889_v26, %v13889_v26  ;;  %v11599_v25 = vor.u32 %v12713_v3, %v11598_v23 }
 0x5f7   :  { %v11399_v22 = vor.u32 %v12663_v12, %v11398_v39  ;;  %v11606_v39 = vld [vmem:[#allocation13 + $0x220] sm:$0xf]  ;;  %v12715_v12 = vld [vmem:[#allocation13 + $0x224] sm:$0xf0]  ;;  %v11360_v23 = vld [vmem:[#allocation13 + $0x38] sm:$0xf0] }
 0x5f8   :  { %7798 = vmatpush.bf16.msrb.mxu1 %v11431_v14  ;;  %6825 = vmatpush.bf16.msra.mxu3 %v11098_v52  ;;  %v11558_v14 = vld [vmem:[#allocation13 + $0x1c0] sm:$0xf]  ;;  %v6606_v31 = vpop.f32.mrf.mxu2  ;;  %v12701_v52 = vld [vmem:[#allocation13 + $0x1b4] sm:$0xf0] }
 0x5f9   :  { %v12881_v37 = vpop.eup %12880  ;;  %v6607_v7 = vadd.f32 %v6606_v31, %v6594_v55  ;;  %v11551_v43 = vor.u32 %v12701_v52, %v11550_v36  ;;  %v11702_v38 = vld [vmem:[#allocation13 + $0x2e0] sm:$0xf]  ;;  %v12711_v52 = vld [vmem:[#allocation13 + $0x204] sm:$0xf0] }
 0x5fa   :  { %7787 = vmatpush.bf16.msrb.mxu0 %v11351_v28  ;;  %7809 = vmatpush.bf16.msrb.mxu2 %v11511_v33  ;;  %v6902_v16 = vmul.f32 %v12881_v37, %v13886_v24  ;;  %v12721_v28 = vld [vmem:[#allocation13 + $0x254] sm:$0xf0]  ;;  %vm6907_vm8 = vweird.f32 %v12881_v37  ;;  %v11462_v24 = vld [vmem:[#allocation13 + $0x100] sm:$0xf]  ;;  %v12735_v55 = vld [vmem:[#allocation13 + $0x2c4] sm:$0xf0] }
 0x5fb   :  { %6826 = vmatmul.bf16.vlgmr.msra.gmra.mxu3 %v13772_v48  ;;  %v12703_v48 = vld [vmem:[#allocation13 + $0x1c4] sm:$0xf0]  ;;  %v11631_v15 = vor.u32 %v12721_v28, %v11630_v27  ;;  %vm6908_vm10 = vmor %vm6906_vm9, %vm6907_vm8  ;;  %v12737_v27 = vld [vmem:[#allocation13 + $0x2d4] sm:$0xf0] }
 0x5fc   :  { %7799 = vmatpush.bf16.msrb.mxu1 %v11423_v29  ;;  %7821 = vmatpush.bf16.msrb.mxu3 %v11583_v6  ;;  %v6903_v56 = vsub.f32 1.0, %v6902_v16  ;;  %v11559_v33 = vor.u32 %v12703_v48, %v11558_v14  ;;  %v12719_v6 = vld [vmem:[#allocation13 + $0x244] sm:$0xf0]  ;;  %v11590_v36 = vld [vmem:[#allocation13 + $0x200] sm:$0xf] }
 0x5fd   :  { %v12739_v14 = vld [vmem:[#allocation13 + $0x2e4] sm:$0xf0] }
 0x5fe   :  { %7788 = vmatpush.bf16.msrb.mxu0 %v11343_v32  ;;  %7810 = vmatpush.bf16.msrb.mxu2 %v11503_v20  ;;  %v6904_v29 = vmul.f32 %v12881_v37, %v6903_v56  ;;  %v6619_v53 = vpop.f32.mrf.mxu3  ;;  %v11542_v32 = vld [vmem:[#allocation13 + $0x1a0] sm:$0xf]  ;;  %v11703_v16 = vor.u32 %v12739_v14, %v11702_v38 }
 0x5ff   :  { %v6620_v50 = vadd.f32 %v6619_v53, %v6607_v7  ;;  %v11543_v0 = vor.u32 %v12699_v45, %v11542_v32  ;;  %v12658_v53 = vld [vmem:[#allocation13 + $0x64] sm:$0xf] }
 0x600   :  { %7800 = vmatpush.bf16.msrb.mxu1 %v11415_v54  ;;  %7822 = vmatpush.bf16.msrb.mxu3 %v11575_v62  ;;  %v6905_v42 = vadd.f32 %v12881_v37, %v6904_v29  ;;  %v6608_v54 = vpop.f32.mrf.mxu2  ;;  %v11623_v62 = vor.u32 %v12719_v6, %v11622_v13  ;;  %v11686_v29 = vld [vmem:[#allocation13 + $0x2c0] sm:$0xf]  ;;  %v12733_v13 = vld [vmem:[#allocation13 + $0x2b4] sm:$0xf0] }
 0x601   :  { %6834 = vst [vmem:[%s14107_s28 + $0x18] sm:$0xff] %v6620_v50  ;;  %v11326_v61 = vmul.f32 -1.442695, %v6620_v50  ;;  %v11687_v34 = vor.u32 %v12735_v55, %v11686_v29  ;;  %v11670_v50 = vld [vmem:[#allocation13 + $0x2a0] sm:$0xf] }
 0x602   :  { %7789 = vmatpush.bf16.msrb.mxu0 %v11335_v57  ;;  %7811 = vmatpush.bf16.msrb.mxu2 %v11495_v4  ;;  %v13915_v26 = vpop.f32.mrf.mxu0  ;;  %v6909_v20 = vsel %vm6908_vm10, %v12881_v37, %v6905_v42  ;;  %v11710_v57 = vld [vmem:[#allocation13 + $0x2f0] sm:$0xf]  ;;  %v11463_v4 = vor.u32 %v12679_v59, %v11462_v24  ;;  %v12695_v37 = vld [vmem:[#allocation13 + $0x184] sm:$0xf0]  ;;  %v11766_v55 = vld [vmem:[#allocation13 + $0x360] sm:$0xf] }
 0x603   :  { %v6914_v60 = vsel %vm6911_vm11, %v6913_v46, %v6909_v20  ;;  %12882 = vpow2.f32 %v11326_v61  ;;  %v11527_v56 = vor.u32 %v12695_v37, %v11526_v35  ;;  %v11678_v42 = vld [vmem:[#allocation13 + $0x2b0] sm:$0xf]  ;;  %v11384_v46 = vld [vmem:[#allocation13 + $0x68] sm:$0xf0]  ;;  %v12731_v24 = vld [vmem:[#allocation13 + $0x2a4] sm:$0xf0] }
 0x604   :  { %7801 = vmatpush.bf16.msrb.mxu1 %v11407_v5  ;;  %7823 = vmatpush.bf16.msrb.mxu3 %v11567_v11  ;;  %6993 = vst [vmem:[%s14110_s21 + $0x10] sm:$0xff] %v6914_v60  ;;  %v11711_v5 = vor.u32 %v12741_v1, %v11710_v57  ;;  %v13925_v31 = vpack.c.bf16 %v6914_v60, %v6914_v60  ;;  %v12656_v61 = vld [vmem:[#allocation13 + $0x54] sm:$0xf]  ;;  %v11662_v1 = vld [vmem:[#allocation13 + $0x290] sm:$0xf] }
 0x605   :  { %7790 = vmatmul.bf16.vlgmr.msrb.gmra.mxu0 %v13901_v49  ;;  %v11679_v32 = vor.u32 %v12733_v13, %v11678_v42  ;;  %v11387_v54 = vor.u32 %v12658_v53, %v11384_v46  ;;  %v11671_v59 = vor.u32 %v12731_v24, %v11670_v50  ;;  %v11758_v46 = vld [vmem:[#allocation13 + $0x350] sm:$0xf] }
 0x606   :  { %7834 = vmatpush.bf16.msra.mxu0 %v11647_v10  ;;  %7812 = vmatpush.bf16.msrb.mxu2 %v11487_v17  ;;  %v11535_v10 = vor.u32 %v12697_v63, %v11534_v51  ;;  %v6621_v11 = vpop.f32.mrf.mxu3 }
 0x608   :  { %7802 = vmatpush.bf16.msrb.mxu1 %v11399_v22  ;;  %7824 = vmatpush.bf16.msrb.mxu3 %v11559_v33  ;;  %v13923_v9 = vpop.f32.mrf.mxu1  ;;  %v11607_v22 = vor.u32 %v12715_v12, %v11606_v39  ;;  %v12654_v39 = vld [vmem:[#allocation13 + $0x44] sm:$0xf] }
 0x609   :  { %v12883_v17 = vpop.eup %12882 }
 0x60a   :  { %7835 = vmatpush.bf16.msra.mxu0 %v11639_v2  ;;  %7813 = vmatpush.bf16.msrb.mxu2 %v11479_v47  ;;  %v6634_v48 = vpop.f32.mrf.mxu0  ;;  %v6866_v19 = vadd.f32 1.0, %v12883_v17  ;;  %v11694_v2 = vld [vmem:[#allocation13 + $0x2d0] sm:$0xf]  ;;  %v11392_v47 = vld [vmem:[#allocation13 + $0x78] sm:$0xf0] }
 0x60b   :  { %7803 = vmatmul.bf16.vlgmr.msrb.gmra.mxu1 %v13910_v18  ;;  %v11695_v28 = vor.u32 %v12737_v27, %v11694_v2  ;;  %v11395_v41 = vor.u32 %v12660_v30, %v11392_v47  ;;  %v12652_v48 = vld [vmem:[#allocation13 + $0x34] sm:$0xf]  ;;  %v12727_v17 = vld [vmem:[#allocation13 + $0x284] sm:$0xf0]  ;;  %v12674_v47 = vld [vmem:[#allocation13 + $0xe4] sm:$0xf] }
 0x60c   :  { %7825 = vmatpush.bf16.msrb.mxu3 %v11551_v43  ;;  %7847 = vmatpush.bf16.msra.mxu1 %v11711_v5  ;;  %12884 = vrcp.f32 %v6866_v19  ;;  %v5123_v43 = vperm.slane %v13803_v21, 4  ;;  %v6927_v20 = vand.u32 2147483648, %v6866_v19  ;;  %v6925_v58 = vand.u32 2147483647, %v6866_v19  ;;  %v12676_v2 = vld [vmem:[#allocation13 + $0xf4] sm:$0xf] }
 0x60d   :  { %vm6921_vm13 = vweird.f32 %v6866_v19  ;;  %v12755_v30 = vld [vmem:[#allocation13 + $0x364] sm:$0xf0] }
 0x60e   :  { %7836 = vmatpush.bf16.msra.mxu0 %v11631_v15  ;;  %7814 = vmatpush.bf16.msrb.mxu2 %v11471_v44  ;;  %v11591_v15 = vor.u32 %v12711_v52, %v11590_v36  ;;  %v6633_v8 = vadd.f32 %v13915_v26, %v5123_v43  ;;  %v6928_v63 = vor.u32 1.1754944e-38, %v6927_v20  ;;  %vm6926_vm15 = vcmp.eq.f32.partialorder %v6925_v58, 8.507059e+37  ;;  %v11368_v26 = vld [vmem:[#allocation13 + $0x48] sm:$0xf0]  ;;  %v11344_v43 = vld [vmem:[#allocation13 + $0x18] sm:$0xf0] }
 0x60f   :  { %v11371_v14 = vor.u32 %v12654_v39, %v11368_v26  ;;  %v11352_v36 = vld [vmem:[#allocation13 + $0x28] sm:$0xf0]  ;;  %v11440_v20 = vld [vmem:[#allocation13 + $0xd8] sm:$0xf0]  ;;  %v11750_v58 = vld [vmem:[#allocation13 + $0x340] sm:$0xf] }
 0x610   :  { %7826 = vmatpush.bf16.msrb.mxu3 %v11543_v0  ;;  %7848 = vmatpush.bf16.msra.mxu1 %v11703_v16  ;;  %v6647_v33 = vpop.f32.mrf.mxu1  ;;  %v6646_v0 = vadd.f32 %v13923_v9, %v6633_v8  ;;  %v11654_v16 = vld [vmem:[#allocation13 + $0x280] sm:$0xf]  ;;  %v5124_v39 = vperm.slane %v13803_v21, 5 }
 0x611   :  { %v11655_v3 = vor.u32 %v12727_v17, %v11654_v16  ;;  %v11363_v33 = vor.u32 %v12652_v48, %v11360_v23  ;;  %v12666_v23 = vld [vmem:[#allocation13 + $0xa4] sm:$0xf] }
 0x612   :  { %7837 = vmatpush.bf16.msra.mxu0 %v11623_v62  ;;  %7815 = vmatpush.bf16.msrb.mxu2 %v11463_v4  ;;  %v12885_v7 = vpop.eup %12884  ;;  %v11376_v62 = vld [vmem:[#allocation13 + $0x58] sm:$0xf0]  ;;  %v12729_v4 = vld [vmem:[#allocation13 + $0x294] sm:$0xf0] }
 0x613   :  { %v6917_v6 = vmul.f32 %v12885_v7, %v6866_v19  ;;  %vm6922_vm12 = vweird.f32 %v12885_v7  ;;  %v11379_v57 = vor.u32 %v12656_v61, %v11376_v62  ;;  %v11663_v12 = vor.u32 %v12729_v4, %v11662_v1  ;;  %v12757_v19 = vld [vmem:[#allocation13 + $0x374] sm:$0xf0]  ;;  %v12751_v61 = vld [vmem:[#allocation13 + $0x344] sm:$0xf0]  ;;  %v12670_v62 = vld [vmem:[#allocation13 + $0xc4] sm:$0xf] }
 0x614   :  { %7827 = vmatpush.bf16.msrb.mxu3 %v11535_v10  ;;  %7849 = vmatpush.bf16.msra.mxu1 %v11695_v28  ;;  %vm6923_vm14 = vmor %vm6921_vm13, %vm6922_vm12  ;;  %v11456_v28 = vld [vmem:[#allocation13 + $0xf8] sm:$0xf0]  ;;  %v11742_v1 = vld [vmem:[#allocation13 + $0x330] sm:$0xf] }
 0x615   :  { %7816 = vmatmul.bf16.vlgmr.msrb.gmra.mxu2 %v13925_v31  ;;  %v6918_v45 = vsub.f32 1.0, %v6917_v6  ;;  %v11459_v52 = vor.u32 %v12676_v2, %v11456_v28  ;;  %v12648_v6 = vld [vmem:[#allocation13 + $0x14] sm:$0xf]  ;;  %v12749_v4 = vld [vmem:[#allocation13 + $0x334] sm:$0xf0] }
 0x616   :  { %7838 = vmatpush.bf16.msra.mxu0 %v11615_v40  ;;  %v11743_v26 = vor.u32 %v12749_v4, %v11742_v1  ;;  %v11648_v28 = vld [vmem:[#allocation13 + $0x278] sm:$0xf0]  ;;  %v11830_v1 = vld [vmem:[#allocation13 + $0x3e0] sm:$0xf]  ;;  %v12771_v4 = vld [vmem:[#allocation13 + $0x3e4] sm:$0xf0] }
 0x617   :  { %v6919_v60 = vmul.f32 %v12885_v7, %v6918_v45  ;;  %v12672_v45 = vld [vmem:[#allocation13 + $0xd4] sm:$0xf] }
 0x618   :  { %7828 = vmatpush.bf16.msrb.mxu3 %v11527_v56  ;;  %7850 = vmatpush.bf16.msra.mxu1 %v11687_v34  ;;  %v6658_v44 = vpop.f32.mrf.mxu2  ;;  %v11774_v56 = vld [vmem:[#allocation13 + $0x370] sm:$0xf] }
 0x619   :  { %v6920_v51 = vadd.f32 %v12885_v7, %v6919_v60  ;;  %v6659_v5 = vadd.f32 %v6658_v44, %v6646_v0  ;;  %v11775_v27 = vor.u32 %v12757_v19, %v11774_v56  ;;  %v11443_v44 = vor.u32 %v12672_v45, %v11440_v20  ;;  %v11336_v60 = vld [vmem:[#allocation13 + $0x8] sm:$0xf0]  ;;  %v12743_v45 = vld [vmem:[#allocation13 + $0x304] sm:$0xf0]  ;;  %v12662_v20 = vld [vmem:[#allocation13 + $0x84] sm:$0xf] }
 0x61a   :  { %7839 = vmatpush.bf16.msra.mxu0 %v11607_v22  ;;  %v11751_v0 = vor.u32 %v12751_v61, %v11750_v58  ;;  %v12773_v58 = vld [vmem:[#allocation13 + $0x3f4] sm:$0xf0]  ;;  %v12692_v61 = vld [vmem:[#allocation13 + $0x174] sm:$0xf] }
 0x61b   :  { %v6924_v40 = vsel %vm6923_vm14, %v12885_v7, %v6920_v51  ;;  %7860 = vmatpush.bf16.msra.mxu2 %v11775_v27  ;;  %v11448_v7 = vld [vmem:[#allocation13 + $0xe8] sm:$0xf0]  ;;  %v12724_v27 = vld [vmem:[#allocation13 + $0x274] sm:$0xf] }
 0x61c   :  { %7851 = vmatpush.bf16.msra.mxu1 %v11679_v32  ;;  %v6929_v35 = vsel %vm6926_vm15, %v6928_v63, %v6924_v40  ;;  %v11451_v42 = vor.u32 %v12674_v47, %v11448_v7  ;;  %v12753_v32 = vld [vmem:[#allocation13 + $0x354] sm:$0xf0]  ;;  %v11432_v51 = vld [vmem:[#allocation13 + $0xc8] sm:$0xf0]  ;;  %v11408_v47 = vld [vmem:[#allocation13 + $0x98] sm:$0xf0] }
 0x61d   :  { %6994 = vst [vmem:[%s14110_s21 + $0x18] sm:$0xff] %v6929_v35  ;;  %v13936_v9 = vpack.c.bf16 %v6929_v35, %v6929_v35  ;;  %v11759_v24 = vor.u32 %v12753_v32, %v11758_v46  ;;  %v11435_v63 = vor.u32 %v12670_v62, %v11432_v51  ;;  %v11718_v32 = vld [vmem:[#allocation13 + $0x300] sm:$0xf]  ;;  %v12720_v62 = vld [vmem:[#allocation13 + $0x254] sm:$0xf] }
 0x61e   :  { %7840 = vmatpush.bf16.msra.mxu0 %v11599_v25  ;;  %v6671_v10 = vpop.f32.mrf.mxu3  ;;  %v12650_v25 = vld [vmem:[#allocation13 + $0x24] sm:$0xf] }
 0x61f   :  { %v6672_v11 = vadd.f32 %v6671_v10, %v6659_v5  ;;  %7829 = vmatmul.bf16.vlgmr.msrb.gmra.mxu3 %v13936_v9  ;;  %v11355_v13 = vor.u32 %v12650_v25, %v11352_v36  ;;  %v12668_v5 = vld [vmem:[#allocation13 + $0xb4] sm:$0xf]  ;;  %v11726_v36 = vld [vmem:[#allocation13 + $0x310] sm:$0xf] }
 0x620   :  { %7852 = vmatpush.bf16.msra.mxu1 %v11671_v59  ;;  %v6660_v38 = vpop.f32.mrf.mxu2  ;;  %v12646_v59 = vld [vmem:[#allocation13 + $0x4] sm:$0xf] }
 0x621   :  { %6835 = vst [vmem:[%s14107_s28 + $0x20] sm:$0xff] %v6672_v11  ;;  %v11327_v22 = vmul.f32 -1.442695, %v6672_v11  ;;  %v11734_v38 = vld [vmem:[#allocation13 + $0x320] sm:$0xf] }
 0x622   :  { %7841 = vmatpush.bf16.msra.mxu0 %v11591_v15  ;;  %v13931_v37 = vpop.f32.mrf.mxu0  ;;  %v11767_v15 = vor.u32 %v12755_v30, %v11766_v55 }
 0x623   :  { %12886 = vpow2.f32 %v11327_v22  ;;  %v6685_v16 = vadd.f32 %v13931_v37, %v5124_v39  ;;  %v12745_v37 = vld [vmem:[#allocation13 + $0x314] sm:$0xf0]  ;;  %v11831_v39 = vor.u32 %v12771_v4, %v11830_v1  ;;  %v12710_v1 = vld [vmem:[#allocation13 + $0x204] sm:$0xf]  ;;  %v11592_v4 = vld [vmem:[#allocation13 + $0x208] sm:$0xf0] }
 0x624   :  { %7853 = vmatpush.bf16.msra.mxu1 %v11663_v12  ;;  %7861 = vmatpush.bf16.msra.mxu2 %v11767_v15  ;;  %v11424_v12 = vld [vmem:[#allocation13 + $0xb8] sm:$0xf0]  ;;  %v11727_v30 = vor.u32 %v12745_v37, %v11726_v36  ;;  %v12767_v36 = vld [vmem:[#allocation13 + $0x3c4] sm:$0xf0]  ;;  %v12686_v37 = vld [vmem:[#allocation13 + $0x144] sm:$0xf] }
 0x625   :  { %v11427_v35 = vor.u32 %v12668_v5, %v11424_v12  ;;  %v12690_v5 = vld [vmem:[#allocation13 + $0x164] sm:$0xf] }
 0x626   :  { %7886 = vmatpush.bf16.msrb.mxu0 %v11395_v41  ;;  %v6673_v34 = vpop.f32.mrf.mxu3 }
 0x628   :  { %7854 = vmatpush.bf16.msra.mxu1 %v11655_v3  ;;  %v13942_v29 = vpop.f32.mrf.mxu1  ;;  %7862 = vmatpush.bf16.msra.mxu2 %v11759_v24  ;;  %v11416_v3 = vld [vmem:[#allocation13 + $0xa8] sm:$0xf0]  ;;  %v11719_v24 = vor.u32 %v12743_v45, %v11718_v32 }
 0x629   :  { %v12887_v53 = vpop.eup %12886  ;;  %v11419_v2 = vor.u32 %v12666_v23, %v11416_v3  ;;  %v11504_v3 = vld [vmem:[#allocation13 + $0x158] sm:$0xf0] }
 0x62a   :  { %7887 = vmatpush.bf16.msrb.mxu0 %v11387_v54  ;;  %v6686_v41 = vpop.f32.mrf.mxu0  ;;  %v13944_v50 = vadd.f32 1.0, %v12887_v53  ;;  %v11347_v54 = vor.u32 %v12648_v6, %v11344_v43  ;;  %v12722_v6 = vld [vmem:[#allocation13 + $0x264] sm:$0xf]  ;;  %v11640_v43 = vld [vmem:[#allocation13 + $0x268] sm:$0xf0] }
 0x62c   :  { %7899 = vmatpush.bf16.msrb.mxu1 %v11459_v52  ;;  %12888 = vrcp.f32 %v13944_v50  ;;  %7863 = vmatpush.bf16.msra.mxu2 %v11751_v0  ;;  %v6942_v48 = vand.u32 2147483648, %v13944_v50  ;;  %v6940_v19 = vand.u32 2147483647, %v13944_v50  ;;  %vm6936_vm1 = vweird.f32 %v13944_v50  ;;  %v12664_v52 = vld [vmem:[#allocation13 + $0x94] sm:$0xf] }
 0x62d   :  { %v11411_v7 = vor.u32 %v12664_v52, %v11408_v47  ;;  %v11632_v0 = vld [vmem:[#allocation13 + $0x258] sm:$0xf0]  ;;  %v11496_v52 = vld [vmem:[#allocation13 + $0x148] sm:$0xf0] }
 0x62e   :  { %7888 = vmatpush.bf16.msrb.mxu0 %v11379_v57  ;;  %v11339_v57 = vor.u32 %v12646_v59, %v11336_v60  ;;  %v6943_v55 = vor.u32 1.1754944e-38, %v6942_v48  ;;  %vm6941_vm3 = vcmp.eq.f32.partialorder %v6940_v19, 8.507059e+37  ;;  %v11643_v60 = vor.u32 %v12722_v6, %v11640_v43  ;;  %v11822_v48 = vld [vmem:[#allocation13 + $0x3d0] sm:$0xf]  ;;  %v11488_v6 = vld [vmem:[#allocation13 + $0x138] sm:$0xf0] }
 0x62f   :  { %v11499_v47 = vor.u32 %v12686_v37, %v11496_v52  ;;  %v11464_v52 = vld [vmem:[#allocation13 + $0x108] sm:$0xf0] }
 0x630   :  { %7900 = vmatpush.bf16.msrb.mxu1 %v11451_v42  ;;  %v6699_v8 = vpop.f32.mrf.mxu1  ;;  %7864 = vmatpush.bf16.msra.mxu2 %v11743_v26  ;;  %v11512_v26 = vld [vmem:[#allocation13 + $0x168] sm:$0xf0] }
 0x631   :  { %v11838_v8 = vld [vmem:[#allocation13 + $0x3f0] sm:$0xf] }
 0x632   :  { %7889 = vmatpush.bf16.msrb.mxu0 %v11371_v14  ;;  %v12889_v40 = vpop.eup %12888  ;;  %v12747_v14 = vld [vmem:[#allocation13 + $0x324] sm:$0xf0]  ;;  %v11839_v51 = vor.u32 %v12773_v58, %v11838_v8  ;;  %v11480_v8 = vld [vmem:[#allocation13 + $0x128] sm:$0xf0] }
 0x633   :  { %v6932_v10 = vmul.f32 %v12889_v40, %v13944_v50  ;;  %v11735_v22 = vor.u32 %v12747_v14, %v11734_v38  ;;  %vm6937_vm0 = vweird.f32 %v12889_v40  ;;  %v12718_v38 = vld [vmem:[#allocation13 + $0x244] sm:$0xf]  ;;  %v11624_v14 = vld [vmem:[#allocation13 + $0x248] sm:$0xf0] }
 0x634   :  { %7901 = vmatpush.bf16.msrb.mxu1 %v11443_v44  ;;  %vm6938_vm2 = vmor %vm6936_vm1, %vm6937_vm0  ;;  %v11400_v44 = vld [vmem:[#allocation13 + $0x88] sm:$0xf0]  ;;  %7873 = vmatpush.bf16.msra.mxu3 %v11839_v51  ;;  %v11627_v19 = vor.u32 %v12718_v38, %v11624_v14  ;;  %v11472_v14 = vld [vmem:[#allocation13 + $0x118] sm:$0xf0] }
 0x635   :  { %v6933_v11 = vsub.f32 1.0, %v6932_v10  ;;  %7865 = vmatpush.bf16.msra.mxu2 %v11735_v22  ;;  %v11403_v59 = vor.u32 %v12662_v20, %v11400_v44  ;;  %v11635_v10 = vor.u32 %v12720_v62, %v11632_v0  ;;  %v11600_v20 = vld [vmem:[#allocation13 + $0x218] sm:$0xf0]  ;;  %v11798_v44 = vld [vmem:[#allocation13 + $0x3a0] sm:$0xf] }
 0x636   :  { %7890 = vmatpush.bf16.msrb.mxu0 %v11363_v33  ;;  %v6698_v33 = vadd.f32 %v13942_v29, %v6685_v16  ;;  %v12769_v16 = vld [vmem:[#allocation13 + $0x3d4] sm:$0xf0] }
 0x637   :  { %v6934_v56 = vmul.f32 %v12889_v40, %v6933_v11  ;;  %v11823_v23 = vor.u32 %v12769_v16, %v11822_v48  ;;  %v11595_v48 = vor.u32 %v12710_v1, %v11592_v4  ;;  %v12730_v1 = vld [vmem:[#allocation13 + $0x2a4] sm:$0xf]  ;;  %v11672_v4 = vld [vmem:[#allocation13 + $0x2a8] sm:$0xf0] }
 0x638   :  { %7902 = vmatpush.bf16.msrb.mxu1 %v11435_v63  ;;  %v6710_v17 = vpop.f32.mrf.mxu2  ;;  %v11520_v63 = vld [vmem:[#allocation13 + $0x178] sm:$0xf0]  ;;  %7874 = vmatpush.bf16.msra.mxu3 %v11831_v39  ;;  %v12761_v39 = vld [vmem:[#allocation13 + $0x394] sm:$0xf0] }
 0x639   :  { %v6935_v25 = vadd.f32 %v12889_v40, %v6934_v56  ;;  %v6711_v34 = vadd.f32 %v6710_v17, %v6698_v33  ;;  %7866 = vmatpush.bf16.msra.mxu2 %v11727_v30  ;;  %v12688_v17 = vld [vmem:[#allocation13 + $0x154] sm:$0xf]  ;;  %v11814_v33 = vld [vmem:[#allocation13 + $0x3c0] sm:$0xf] }
 0x63a   :  { %7891 = vmatpush.bf16.msrb.mxu0 %v11355_v13  ;;  %v11651_v13 = vor.u32 %v12724_v27, %v11648_v28  ;;  %v12716_v27 = vld [vmem:[#allocation13 + $0x234] sm:$0xf]  ;;  %v11616_v28 = vld [vmem:[#allocation13 + $0x238] sm:$0xf0]  ;;  %v11815_v30 = vor.u32 %v12767_v36, %v11814_v33  ;;  %v11704_v36 = vld [vmem:[#allocation13 + $0x2e8] sm:$0xf0] }
 0x63b   :  { %v6939_v15 = vsel %vm6938_vm2, %v12889_v40, %v6935_v25 }
 0x63c   :  { %7903 = vmatpush.bf16.msrb.mxu1 %v11427_v35  ;;  %v6944_v42 = vsel %vm6941_vm3, %v6943_v55, %v6939_v15  ;;  %v11515_v35 = vor.u32 %v12690_v5, %v11512_v26  ;;  %7875 = vmatpush.bf16.msra.mxu3 %v11823_v23  ;;  %v11619_v55 = vor.u32 %v12716_v27, %v11616_v28  ;;  %v11608_v15 = vld [vmem:[#allocation13 + $0x228] sm:$0xf0]  ;;  %v11790_v5 = vld [vmem:[#allocation13 + $0x390] sm:$0xf]  ;;  %v12680_v26 = vld [vmem:[#allocation13 + $0x114] sm:$0xf] }
 0x63d   :  { %6995 = vst [vmem:[%s14110_s21 + $0x20] sm:$0xff] %v6944_v42  ;;  %v13959_v46 = vpack.c.bf16 %v6944_v42, %v6944_v42  ;;  %7867 = vmatpush.bf16.msra.mxu2 %v11719_v24  ;;  %v12684_v42 = vld [vmem:[#allocation13 + $0x134] sm:$0xf]  ;;  %v11791_v38 = vor.u32 %v12761_v39, %v11790_v5  ;;  %v11475_v16 = vor.u32 %v12680_v26, %v11472_v14  ;;  %v12738_v23 = vld [vmem:[#allocation13 + $0x2e4] sm:$0xf] }
 0x63e   :  { %7892 = vmatpush.bf16.msrb.mxu0 %v11347_v54  ;;  %v6723_v41 = vpop.f32.mrf.mxu3  ;;  %v11491_v32 = vor.u32 %v12684_v42, %v11488_v6  ;;  %v12712_v24 = vld [vmem:[#allocation13 + $0x214] sm:$0xf]  ;;  %v12678_v27 = vld [vmem:[#allocation13 + $0x104] sm:$0xf]  ;;  %v11552_v39 = vld [vmem:[#allocation13 + $0x1b8] sm:$0xf0] }
 0x63f   :  { %v6724_v29 = vadd.f32 %v6723_v41, %v6711_v34  ;;  %7842 = vmatmul.bf16.vlgmr.msra.gmra.mxu0 %v13959_v46  ;;  %v12714_v34 = vld [vmem:[#allocation13 + $0x224] sm:$0xf]  ;;  %v12765_v41 = vld [vmem:[#allocation13 + $0x3b4] sm:$0xf0]  ;;  %v11603_v62 = vor.u32 %v12712_v24, %v11600_v20  ;;  %v12736_v42 = vld [vmem:[#allocation13 + $0x2d4] sm:$0xf] }
 0x640   :  { %7904 = vmatpush.bf16.msrb.mxu1 %v11419_v2  ;;  %v6712_v50 = vpop.f32.mrf.mxu2  ;;  %v11507_v2 = vor.u32 %v12688_v17, %v11504_v3  ;;  %7876 = vmatpush.bf16.msra.mxu3 %v11815_v30  ;;  %v11467_v30 = vor.u32 %v12678_v27, %v11464_v52  ;;  %v12706_v6 = vld [vmem:[#allocation13 + $0x1e4] sm:$0xf]  ;;  %v12700_v5 = vld [vmem:[#allocation13 + $0x1b4] sm:$0xf]  ;;  %v11664_v14 = vld [vmem:[#allocation13 + $0x298] sm:$0xf0] }
 0x641   :  { %6836 = vst [vmem:[%s14107_s28 + $0x28] sm:$0xff] %v6724_v29  ;;  %v11328_v54 = vmul.f32 -1.442695, %v6724_v29  ;;  %v11611_v29 = vor.u32 %v12714_v34, %v11608_v15  ;;  %v5125_v50 = vperm.slane %v13803_v21, 6  ;;  %v11584_v34 = vld [vmem:[#allocation13 + $0x1f8] sm:$0xf0]  ;;  %v11555_v26 = vor.u32 %v12700_v5, %v11552_v39 }
 0x642   :  { %7893 = vmatpush.bf16.msrb.mxu0 %v11339_v57  ;;  %v13954_v53 = vpop.f32.mrf.mxu0  ;;  %v11523_v57 = vor.u32 %v12692_v61, %v11520_v63  ;;  %v12734_v24 = vld [vmem:[#allocation13 + $0x2c4] sm:$0xf]  ;;  %v11656_v27 = vld [vmem:[#allocation13 + $0x288] sm:$0xf0]  ;;  %v12756_v52 = vld [vmem:[#allocation13 + $0x374] sm:$0xf] }
 0x643   :  { %12890 = vpow2.f32 %v11328_v54  ;;  %v12763_v54 = vld [vmem:[#allocation13 + $0x3a4] sm:$0xf0]  ;;  %v6737_v63 = vadd.f32 %v13954_v53, %v5125_v50  ;;  %v12748_v5 = vld [vmem:[#allocation13 + $0x334] sm:$0xf]  ;;  %v11744_v39 = vld [vmem:[#allocation13 + $0x338] sm:$0xf0] }
 0x644   :  { %7905 = vmatpush.bf16.msrb.mxu1 %v11411_v7  ;;  %7912 = vmatpush.bf16.msrb.mxu2 %v11523_v57  ;;  %v11806_v7 = vld [vmem:[#allocation13 + $0x3b0] sm:$0xf] }
 0x646   :  { %7938 = vmatpush.bf16.msra.mxu0 %v11651_v13  ;;  %v6725_v12 = vpop.f32.mrf.mxu3  ;;  %v11807_v13 = vor.u32 %v12765_v41, %v11806_v7  ;;  %v11707_v41 = vor.u32 %v12738_v23, %v11704_v36  ;;  %v11536_v23 = vld [vmem:[#allocation13 + $0x198] sm:$0xf0] }
 0x648   :  { %7906 = vmatpush.bf16.msrb.mxu1 %v11403_v59  ;;  %v13965_v40 = vpop.f32.mrf.mxu1  ;;  %7913 = vmatpush.bf16.msrb.mxu2 %v11515_v35  ;;  %v12740_v35 = vld [vmem:[#allocation13 + $0x2f4] sm:$0xf] }
 0x649   :  { %v12891_v22 = vpop.eup %12890  ;;  %7877 = vmatpush.bf16.msra.mxu3 %v11807_v13  ;;  %v6750_v12 = vadd.f32 %v13965_v40, %v6737_v63  ;;  %v11696_v13 = vld [vmem:[#allocation13 + $0x2d8] sm:$0xf0] }
 0x64a   :  { %7939 = vmatpush.bf16.msra.mxu0 %v11643_v60  ;;  %v6738_v11 = vpop.f32.mrf.mxu0  ;;  %v13967_v56 = vadd.f32 1.0, %v12891_v22  ;;  %v11799_v60 = vor.u32 %v12763_v54, %v11798_v44  ;;  %v11699_v50 = vor.u32 %v12736_v42, %v11696_v13  ;;  %v11688_v44 = vld [vmem:[#allocation13 + $0x2c8] sm:$0xf0]  ;;  %v12704_v54 = vld [vmem:[#allocation13 + $0x1d4] sm:$0xf] }
 0x64b   :  { %v11712_v11 = vld [vmem:[#allocation13 + $0x2f8] sm:$0xf0] }
 0x64c   :  { %12892 = vrcp.f32 %v13967_v56  ;;  %7914 = vmatpush.bf16.msrb.mxu2 %v11507_v2  ;;  %v6957_v58 = vand.u32 2147483648, %v13967_v56  ;;  %v6955_v57 = vand.u32 2147483647, %v13967_v56  ;;  %vm6951_vm5 = vweird.f32 %v13967_v56  ;;  %v12759_v2 = vld [vmem:[#allocation13 + $0x384] sm:$0xf0] }
 0x64d   :  { %7878 = vmatpush.bf16.msra.mxu3 %v11799_v60  ;;  %v11715_v40 = vor.u32 %v12740_v35, %v11712_v11  ;;  %v11675_v35 = vor.u32 %v12730_v1, %v11672_v4  ;;  %v12728_v11 = vld [vmem:[#allocation13 + $0x294] sm:$0xf] }
 0x64e   :  { %7940 = vmatpush.bf16.msra.mxu0 %v11635_v10  ;;  %v6958_v53 = vor.u32 1.1754944e-38, %v6957_v58  ;;  %vm6956_vm7 = vcmp.eq.f32.partialorder %v6955_v57, 8.507059e+37  ;;  %v12732_v58 = vld [vmem:[#allocation13 + $0x2b4] sm:$0xf] }
 0x64f   :  { %7894 = vmatmul.bf16.vlgmr.msrb.gmra.mxu0 %v13901_v49  ;;  %v12682_v49 = vld [vmem:[#allocation13 + $0x124] sm:$0xf] }
 0x650   :  { %v6751_v25 = vpop.f32.mrf.mxu1  ;;  %7915 = vmatpush.bf16.msrb.mxu2 %v11499_v47  ;;  %v11483_v0 = vor.u32 %v12682_v49, %v11480_v8  ;;  %v12708_v47 = vld [vmem:[#allocation13 + $0x1f4] sm:$0xf]  ;;  %v11691_v8 = vor.u32 %v12734_v24, %v11688_v44  ;;  %v12754_v24 = vld [vmem:[#allocation13 + $0x364] sm:$0xf] }
 0x651   :  { %7879 = vmatpush.bf16.msra.mxu3 %v11791_v38  ;;  %v11587_v7 = vor.u32 %v12708_v47, %v11584_v34 }
 0x652   :  { %7941 = vmatpush.bf16.msra.mxu0 %v11627_v19  ;;  %v12893_v43 = vpop.eup %12892  ;;  %v11782_v19 = vld [vmem:[#allocation13 + $0x380] sm:$0xf] }
 0x653   :  { %v6947_v45 = vmul.f32 %v12893_v43, %v13967_v56  ;;  %vm6952_vm4 = vweird.f32 %v12893_v43  ;;  %v11783_v37 = vor.u32 %v12759_v2, %v11782_v19  ;;  %v12726_v2 = vld [vmem:[#allocation13 + $0x284] sm:$0xf] }
 0x654   :  { %7916 = vmatpush.bf16.msrb.mxu2 %v11491_v32  ;;  %vm6953_vm6 = vmor %vm6951_vm5, %vm6952_vm4 }
 0x655   :  { %v6948_v59 = vsub.f32 1.0, %v6947_v45  ;;  %7880 = vmatpush.bf16.msra.mxu3 %v11783_v37 }
 0x656   :  { %7942 = vmatpush.bf16.msra.mxu0 %v11619_v55 }
 0x657   :  { %v6949_v51 = vmul.f32 %v12893_v43, %v6948_v59  ;;  %v11568_v59 = vld [vmem:[#allocation13 + $0x1d8] sm:$0xf0] }
 0x658   :  { %v6762_v61 = vpop.f32.mrf.mxu2  ;;  %7917 = vmatpush.bf16.msrb.mxu2 %v11483_v0  ;;  %v11571_v60 = vor.u32 %v12704_v54, %v11568_v59  ;;  %v11560_v0 = vld [vmem:[#allocation13 + $0x1c8] sm:$0xf0] }
 0x659   :  { %v6950_v10 = vadd.f32 %v12893_v43, %v6949_v51  ;;  %v6763_v17 = vadd.f32 %v6762_v61, %v6750_v12  ;;  %7925 = vmatpush.bf16.msrb.mxu3 %v11587_v7  ;;  %v11680_v61 = vld [vmem:[#allocation13 + $0x2b8] sm:$0xf0]  ;;  %v12694_v7 = vld [vmem:[#allocation13 + $0x184] sm:$0xf] }
 0x65a   :  { %7943 = vmatpush.bf16.msra.mxu0 %v11611_v29  ;;  %v11683_v57 = vor.u32 %v12732_v58, %v11680_v61 }
 0x65b   :  { %v6954_v22 = vsel %vm6953_vm6, %v12893_v43, %v6950_v10  ;;  %v11576_v43 = vld [vmem:[#allocation13 + $0x1e8] sm:$0xf0]  ;;  %v5126_v10 = vperm.slane %v13803_v21, 7 }
 0x65c   :  { %v6959_v56 = vsel %vm6956_vm7, %v6958_v53, %v6954_v22  ;;  %7918 = vmatpush.bf16.msrb.mxu2 %v11475_v16  ;;  %v11579_v29 = vor.u32 %v12706_v6, %v11576_v43  ;;  %v12698_v53 = vld [vmem:[#allocation13 + $0x1a4] sm:$0xf]  ;;  %v12696_v22 = vld [vmem:[#allocation13 + $0x194] sm:$0xf] }
 0x65d   :  { %6996 = vst [vmem:[%s14110_s21 + $0x28] sm:$0xff] %v6959_v56  ;;  %v13984_v25 = vpack.c.bf16 %v6959_v56, %v6959_v56 }
 0x65e   :  { %7944 = vmatpush.bf16.msra.mxu0 %v11603_v62  ;;  %v6775_v3 = vpop.f32.mrf.mxu3  ;;  %7926 = vmatpush.bf16.msrb.mxu3 %v11579_v29  ;;  %v12702_v62 = vld [vmem:[#allocation13 + $0x1c4] sm:$0xf] }
 0x65f   :  { %v6776_v28 = vadd.f32 %v6775_v3, %v6763_v17  ;;  %7855 = vmatmul.bf16.vlgmr.msra.gmra.mxu1 %v13984_v25  ;;  %v11563_v63 = vor.u32 %v12702_v62, %v11560_v0 }
 0x660   :  { %v6764_v55 = vpop.f32.mrf.mxu2  ;;  %7951 = vmatpush.bf16.msra.mxu1 %v11715_v40  ;;  %7919 = vmatpush.bf16.msrb.mxu2 %v11467_v30  ;;  %v11667_v40 = vor.u32 %v12728_v11, %v11664_v14  ;;  %v13997_v30 = vld [vmem:[%s14083_s23 + $0x7] ss:$8 sm:$0x3]  ;;  %v12744_v14 = vld [vmem:[#allocation13 + $0x314] sm:$0xf] }
 0x661   :  { %6837 = vst [vmem:[%s14107_s28 + $0x30] sm:$0xff] %v6776_v28  ;;  %v11329_v15 = vmul.f32 -1.442695, %v6776_v28  ;;  %v11539_v28 = vor.u32 %v12696_v22, %v11536_v23  ;;  %v11776_v55 = vld [vmem:[#allocation13 + $0x378] sm:$0xf0] }
 0x662   :  { %v13979_v33 = vpop.f32.mrf.mxu0  ;;  %7945 = vmatpush.bf16.msra.mxu0 %v11595_v48  ;;  %7927 = vmatpush.bf16.msrb.mxu3 %v11571_v60  ;;  %v11544_v48 = vld [vmem:[#allocation13 + $0x1a8] sm:$0xf0]  ;;  %v11779_v6 = vor.u32 %v12756_v52, %v11776_v55  ;;  %v12770_v55 = vld [vmem:[#allocation13 + $0x3e4] sm:$0xf] }
 0x663   :  { %12894 = vpow2.f32 %v11329_v15  ;;  %v11547_v16 = vor.u32 %v12698_v53, %v11544_v48  ;;  %v6789_v19 = vadd.f32 %v13979_v33, %v5126_v10  ;;  %v11659_v33 = vor.u32 %v12726_v2, %v11656_v27  ;;  %v11736_v10 = vld [vmem:[#allocation13 + $0x328] sm:$0xf0]  ;;  %v11728_v53 = vld [vmem:[#allocation13 + $0x318] sm:$0xf0] }
 0x664   :  { %7952 = vmatpush.bf16.msra.mxu1 %v11707_v41  ;;  %v11528_v41 = vld [vmem:[#allocation13 + $0x188] sm:$0xf0]  ;;  %v11731_v22 = vor.u32 %v12744_v14, %v11728_v53 }
 0x665   :  { %7946 = vmatmul.bf16.vlgmr.msra.gmra.mxu0 %v13959_v46  ;;  %v11531_v43 = vor.u32 %v12694_v7, %v11528_v41  ;;  %v11824_v7 = vld [vmem:[#allocation13 + $0x3d8] sm:$0xf0] }
 0x666   :  { %v6777_v45 = vpop.f32.mrf.mxu3  ;;  %7928 = vmatpush.bf16.msrb.mxu3 %v11563_v63  ;;  %v11752_v63 = vld [vmem:[#allocation13 + $0x348] sm:$0xf0] }
 0x668   :  { %v6801_v32 = vpop.f32.mrf.mxu1  ;;  %7953 = vmatpush.bf16.msra.mxu1 %v11699_v50 }
 0x669   :  { %v12895_v49 = vpop.eup %12894  ;;  %v6802_v36 = vadd.f32 %v6801_v32, %v6789_v19  ;;  %v7138_v32 = vperm.slane %v13997_v30, 0 }
 0x66a   :  { %v6790_v20 = vpop.f32.mrf.mxu0  ;;  %v6869_v46 = vadd.f32 1.0, %v12895_v49  ;;  %7929 = vmatpush.bf16.msrb.mxu3 %v11555_v26  ;;  %v12752_v49 = vld [vmem:[#allocation13 + $0x354] sm:$0xf] }
 0x66b   :  { %v11768_v20 = vld [vmem:[#allocation13 + $0x368] sm:$0xf0] }
 0x66c   :  { %12896 = vrcp.f32 %v6869_v46  ;;  %7954 = vmatpush.bf16.msra.mxu1 %v11691_v8  ;;  %v6972_v3 = vand.u32 2147483648, %v6869_v46  ;;  %v6970_v21 = vand.u32 2147483647, %v6869_v46  ;;  %vm6966_vm9 = vweird.f32 %v6869_v46 }
 0x66d   :  { %v11771_v59 = vor.u32 %v12754_v24, %v11768_v20  ;;  %v12762_v20 = vld [vmem:[#allocation13 + $0x3a4] sm:$0xf] }
 0x66e   :  { %7930 = vmatpush.bf16.msrb.mxu3 %v11547_v16  ;;  %v6973_v47 = vor.u32 1.1754944e-38, %v6972_v3  ;;  %vm6971_vm11 = vcmp.eq.f32.partialorder %v6970_v21, 8.507059e+37  ;;  %v11840_v21 = vld [vmem:[#allocation13 + $0x3f8] sm:$0xf0] }
 0x66f   :  { %7907 = vmatmul.bf16.vlgmr.msrb.gmra.mxu1 %v13910_v18 }
 0x670   :  { %v6803_v51 = vpop.f32.mrf.mxu1  ;;  %7955 = vmatpush.bf16.msra.mxu1 %v11683_v57 }
 0x671   :  { %v12750_v51 = vld [vmem:[#allocation13 + $0x344] sm:$0xf] }
 0x672   :  { %v12897_v12 = vpop.eup %12896  ;;  %7931 = vmatpush.bf16.msrb.mxu3 %v11539_v28  ;;  %v11755_v4 = vor.u32 %v12750_v51, %v11752_v63 }
 0x673   :  { %v6962_v38 = vmul.f32 %v12897_v12, %v6869_v46  ;;  %vm6967_vm8 = vweird.f32 %v12897_v12  ;;  %v11760_v46 = vld [vmem:[#allocation13 + $0x358] sm:$0xf0] }
 0x674   :  { %7956 = vmatpush.bf16.msra.mxu1 %v11675_v35  ;;  %vm6968_vm10 = vmor %vm6966_vm9, %vm6967_vm8  ;;  %v11763_v62 = vor.u32 %v12752_v49, %v11760_v46  ;;  %v12758_v46 = vld [vmem:[#allocation13 + $0x384] sm:$0xf] }
 0x675   :  { %v6963_v17 = vsub.f32 1.0, %v6962_v38 }
 0x676   :  { %7932 = vmatpush.bf16.msrb.mxu3 %v11531_v43  ;;  %v12764_v43 = vld [vmem:[#allocation13 + $0x3b4] sm:$0xf] }
 0x677   :  { %v6964_v18 = vmul.f32 %v12897_v12, %v6963_v17 }
 0x678   :  { %v6814_v56 = vpop.f32.mrf.mxu2  ;;  %7957 = vmatpush.bf16.msra.mxu1 %v11667_v40  ;;  %v12742_v40 = vld [vmem:[#allocation13 + $0x304] sm:$0xf] }
 0x679   :  { %v6965_v37 = vadd.f32 %v12897_v12, %v6964_v18  ;;  %v6815_v34 = vadd.f32 %v6814_v56, %v6802_v36  ;;  %v11720_v18 = vld [vmem:[#allocation13 + $0x308] sm:$0xf0] }
 0x67a   :  { %v11723_v27 = vor.u32 %v12742_v40, %v11720_v18 }
 0x67b   :  { %v6969_v15 = vsel %vm6968_vm10, %v12897_v12, %v6965_v37  ;;  %v12746_v12 = vld [vmem:[#allocation13 + $0x324] sm:$0xf] }
 0x67c   :  { %v6974_v13 = vsel %vm6971_vm11, %v6973_v47, %v6969_v15  ;;  %7958 = vmatpush.bf16.msra.mxu1 %v11659_v33  ;;  %v11739_v11 = vor.u32 %v12746_v12, %v11736_v10  ;;  %v11832_v47 = vld [vmem:[#allocation13 + $0x3e8] sm:$0xf0]  ;;  %v12768_v15 = vld [vmem:[#allocation13 + $0x3d4] sm:$0xf] }
 0x67d   :  { %6997 = vst [vmem:[%s14110_s21 + $0x30] sm:$0xff] %v6974_v13  ;;  %v14003_v50 = vpack.c.bf16 %v6974_v13, %v6974_v13  ;;  %v11827_v41 = vor.u32 %v12768_v15, %v11824_v7  ;;  %v11816_v13 = vld [vmem:[#allocation13 + $0x3c8] sm:$0xf0] }
 0x67e   :  { %v6827_v42 = vpop.f32.mrf.mxu3 }
 0x67f   :  { %v6828_v29 = vadd.f32 %v6827_v42, %v6815_v34  ;;  %7868 = vmatmul.bf16.vlgmr.msra.gmra.mxu2 %v14003_v50  ;;  %7959 = vmatmul.bf16.vlgmr.msra.gmra.mxu1 %v13984_v25  ;;  %v11747_v25 = vor.u32 %v12748_v5, %v11744_v39  ;;  %v11835_v34 = vor.u32 %v12770_v55, %v11832_v47  ;;  %v12766_v42 = vld [vmem:[#allocation13 + $0x3c4] sm:$0xf]  ;;  %v7139_v5 = vperm.slane %v13997_v30, 1 }
 0x680   :  { %v6816_v44 = vpop.f32.mrf.mxu2  ;;  %7964 = vmatpush.bf16.msra.mxu2 %v11779_v6  ;;  %v11819_v6 = vor.u32 %v12766_v42, %v11816_v13 }
 0x681   :  { %6838 = vst [vmem:[%s14107_s28 + $0x38] sm:$0xff] %v6828_v29  ;;  %v11330_v54 = vmul.f32 -1.442695, %v6828_v29  ;;  %v11808_v29 = vld [vmem:[#allocation13 + $0x3b8] sm:$0xf0] }
 0x682   :  { %v7791_v45 = vpop.f32.mrf.mxu0  ;;  %v11811_v24 = vor.u32 %v12764_v43, %v11808_v29  ;;  %v11800_v44 = vld [vmem:[#allocation13 + $0x3a8] sm:$0xf0] }
 0x683   :  { %12898 = vpow2.f32 %v11330_v54  ;;  %v7792_v60 = vadd.f32 %v7791_v45, %v7138_v32  ;;  %v12760_v54 = vld [vmem:[#allocation13 + $0x394] sm:$0xf] }
 0x684   :  { %7965 = vmatpush.bf16.msra.mxu2 %v11771_v59  ;;  %v11792_v59 = vld [vmem:[#allocation13 + $0x398] sm:$0xf0] }
 0x685   :  { %v11795_v49 = vor.u32 %v12760_v54, %v11792_v59 }
 0x686   :  { %v6829_v61 = vpop.f32.mrf.mxu3 }
 0x688   :  { %v7804_v8 = vpop.f32.mrf.mxu1  ;;  %7966 = vmatpush.bf16.msra.mxu2 %v11763_v62 }
 0x689   :  { %v7805_v58 = vadd.f32 %v7804_v8, %v7792_v60  ;;  %v12899_v57 = vpop.eup %12898  ;;  %v11784_v8 = vld [vmem:[#allocation13 + $0x388] sm:$0xf0] }
 0x68a   :  { %v7793_v0 = vpop.f32.mrf.mxu0  ;;  %v6870_v1 = vadd.f32 1.0, %v12899_v57 }
 0x68c   :  { %12900 = vrcp.f32 %v6870_v1  ;;  %7967 = vmatpush.bf16.msra.mxu2 %v11755_v4  ;;  %v6987_v16 = vand.u32 2147483648, %v6870_v1  ;;  %v6985_v56 = vand.u32 2147483647, %v6870_v1  ;;  %vm6981_vm13 = vweird.f32 %v6870_v1 }
 0x68e   :  { %v6988_v2 = vor.u32 1.1754944e-38, %v6987_v16  ;;  %vm6986_vm15 = vcmp.eq.f32.partialorder %v6985_v56, 8.507059e+37 }
 0x68f   :  { %7920 = vmatmul.bf16.vlgmr.msrb.gmra.mxu2 %v13925_v31  ;;  %v12772_v31 = vld [vmem:[#allocation13 + $0x3f4] sm:$0xf] }
 0x690   :  { %v7806_v26 = vpop.f32.mrf.mxu1  ;;  %7968 = vmatpush.bf16.msra.mxu2 %v11747_v25  ;;  %v11843_v37 = vor.u32 %v12772_v31, %v11840_v21 }
 0x692   :  { %v12901_v35 = vpop.eup %12900 }
 0x693   :  { %v6977_v38 = vmul.f32 %v12901_v35, %v6870_v1  ;;  %vm6982_vm12 = vweird.f32 %v12901_v35 }
 0x694   :  { %7969 = vmatpush.bf16.msra.mxu2 %v11739_v11  ;;  %vm6983_vm14 = vmor %vm6981_vm13, %vm6982_vm12 }
 0x695   :  { %v6978_v48 = vsub.f32 1.0, %v6977_v38 }
 0x697   :  { %v6979_v23 = vmul.f32 %v12901_v35, %v6978_v48 }
 0x698   :  { %v7817_v17 = vpop.f32.mrf.mxu2  ;;  %7970 = vmatpush.bf16.msra.mxu2 %v11731_v22 }
 0x699   :  { %v7818_v3 = vadd.f32 %v7817_v17, %v7805_v58  ;;  %v6980_v19 = vadd.f32 %v12901_v35, %v6979_v23  ;;  %v11787_v58 = vor.u32 %v12758_v46, %v11784_v8 }
 0x69b   :  { %v6984_v28 = vsel %vm6983_vm14, %v12901_v35, %v6980_v19 }
 0x69c   :  { %v6989_v36 = vsel %vm6986_vm15, %v6988_v2, %v6984_v28  ;;  %7971 = vmatpush.bf16.msra.mxu2 %v11723_v27 }
 0x69d   :  { %6998 = vst [vmem:[%s14110_s21 + $0x38] sm:$0xff] %v6989_v36  ;;  %v7134_v52 = vpack.c.bf16 %v6989_v36, %v6989_v36  ;;  %s14111_s21 = sld [smem:[#allocation30_spill]] }
 0x69f   :  { %7881 = vmatmul.bf16.vlgmr.msra.gmra.mxu3 %v7134_v52  ;;  %7972 = vmatmul.bf16.vlgmr.msra.gmra.mxu2 %v14003_v50  ;;  %v11803_v50 = vor.u32 %v12762_v20, %v11800_v44 }
 0x6a0   :  { %v7819_v33 = vpop.f32.mrf.mxu2  ;;  %7977 = vmatpush.bf16.msra.mxu3 %v11843_v37 }
 0x6a2   :  { %v7830_v32 = vpop.f32.mrf.mxu3 }
 0x6a3   :  { %v7831_v45 = vadd.f32 %v7830_v32, %v7818_v3 }
 0x6a4   :  { %7978 = vmatpush.bf16.msra.mxu3 %v11835_v34 }
 0x6a8   :  { %7979 = vmatpush.bf16.msra.mxu3 %v11827_v41 }
 0x6aa   :  { %v7832_v60 = vpop.f32.mrf.mxu3 }
 0x6ac   :  { %7980 = vmatpush.bf16.msra.mxu3 %v11819_v6 }
 0x6af   :  { %7933 = vmatmul.bf16.vlgmr.msrb.gmra.mxu3 %v13936_v9 }
 0x6b0   :  { %7981 = vmatpush.bf16.msra.mxu3 %v11811_v24 }
 0x6b4   :  { %7982 = vmatpush.bf16.msra.mxu3 %v11803_v50 }
 0x6b8   :  { %7983 = vmatpush.bf16.msra.mxu3 %v11795_v49 }
 0x6bc   :  { %7984 = vmatpush.bf16.msra.mxu3 %v11787_v58  ;;  %v7843_v61 = vpop.f32.mrf.mxu0 }
 0x6bd   :  { %v7844_v62 = vadd.f32 %v7843_v61, %v7831_v45 }
 0x6bf   :  { %7985 = vmatmul.bf16.vlgmr.msra.gmra.mxu3 %v7134_v52 }
 0x6c4   :  { %v7845_v0 = vpop.f32.mrf.mxu0 }
 0x6cc   :  { %v7895_v51 = vpop.f32.mrf.mxu0 }
 0x6cd   :  { %v7896_v39 = vadd.f32 %v7895_v51, %v7139_v5 }
 0x6d4   :  { %v7897_v63 = vpop.f32.mrf.mxu0 }
 0x6dc   :  { %v7856_v57 = vpop.f32.mrf.mxu1 }
 0x6dd   :  { %v7857_v48 = vadd.f32 %v7856_v57, %v7844_v62 }
 0x6e2   :  { %v7947_v9 = vpop.f32.mrf.mxu0 }
 0x6e4   :  { %v7858_v1 = vpop.f32.mrf.mxu1 }
 0x6ea   :  { %v7949_v4 = vpop.f32.mrf.mxu0 }
 0x6ec   :  { %v7908_v26 = vpop.f32.mrf.mxu1 }
 0x6ed   :  { %v7909_v25 = vadd.f32 %v7908_v26, %v7896_v39 }
 0x6f4   :  { %v7910_v12 = vpop.f32.mrf.mxu1 }
 0x6fc   :  { %v7960_v10 = vpop.f32.mrf.mxu1 }
 0x702   :  { %v7869_v35 = vpop.f32.mrf.mxu2 }
 0x703   :  { %v7870_v16 = vadd.f32 %v7869_v35, %v7857_v48 }
 0x704   :  { %v7962_v11 = vpop.f32.mrf.mxu1 }
 0x70a   :  { %v7871_v38 = vpop.f32.mrf.mxu2 }
 0x712   :  { %v7921_v14 = vpop.f32.mrf.mxu2 }
 0x713   :  { %v7922_v31 = vadd.f32 %v7921_v14, %v7909_v25 }
 0x71a   :  { %v7923_v53 = vpop.f32.mrf.mxu2 }
 0x722   :  { %v7882_v17 = vpop.f32.mrf.mxu3  ;;  %v7973_v23 = vpop.f32.mrf.mxu2 }
 0x723   :  { %v7883_v22 = vadd.f32 %v7882_v17, %v7870_v16 }
 0x725   :  { %7990 = vst [vmem:[%s14111_s21] sm:$0xff] %v7883_v22  ;;  %v11844_v30 = vmul.f32 -1.442695, %v7883_v22 }
 0x727   :  { %12902 = vpow2.f32 %v11844_v30 }
 0x72a   :  { %v7884_v3 = vpop.f32.mrf.mxu3  ;;  %v7975_v56 = vpop.f32.mrf.mxu2 }
 0x72d   :  { %v12903_v40 = vpop.eup %12902 }
 0x72e   :  { %v7998_v18 = vadd.f32 1.0, %v12903_v40 }
 0x730   :  { %12904 = vrcp.f32 %v7998_v18  ;;  %v8011_v37 = vand.u32 2147483648, %v7998_v18  ;;  %v8009_v47 = vand.u32 2147483647, %v7998_v18  ;;  %vm8005_vm1 = vweird.f32 %v7998_v18 }
 0x732   :  { %v7934_v19 = vpop.f32.mrf.mxu3  ;;  %v8012_v15 = vor.u32 1.1754944e-38, %v8011_v37  ;;  %vm8010_vm3 = vcmp.eq.f32.partialorder %v8009_v47, 8.507059e+37 }
 0x733   :  { %v7935_v21 = vadd.f32 %v7934_v19, %v7922_v31 }
 0x735   :  { %v7948_v36 = vadd.f32 %v7947_v9, %v7935_v21 }
 0x736   :  { %v12905_v2 = vpop.eup %12904 }
 0x737   :  { %v8001_v27 = vmul.f32 %v12905_v2, %v7998_v18  ;;  %vm8006_vm0 = vweird.f32 %v12905_v2  ;;  %v7961_v34 = vadd.f32 %v7960_v10, %v7948_v36 }
 0x738   :  { %vm8007_vm2 = vmor %vm8005_vm1, %vm8006_vm0 }
 0x739   :  { %v8002_v28 = vsub.f32 1.0, %v8001_v27  ;;  %v7974_v42 = vadd.f32 %v7973_v23, %v7961_v34 }
 0x73a   :  { %v7936_v52 = vpop.f32.mrf.mxu3 }
 0x73b   :  { %v8003_v55 = vmul.f32 %v12905_v2, %v8002_v28 }
 0x73d   :  { %v8004_v33 = vadd.f32 %v12905_v2, %v8003_v55 }
 0x73f   :  { %v8008_v7 = vsel %vm8007_vm2, %v12905_v2, %v8004_v33 }
 0x740   :  { %v8013_v41 = vsel %vm8010_vm3, %v8012_v15, %v8008_v7 }
 0x741   :  { %8030 = vst [vmem:[%s14112_s11] sm:$0xff] %v8013_v41 }
 0x742   :  { %v7986_v13 = vpop.f32.mrf.mxu3 }
 0x743   :  { %v7987_v6 = vadd.f32 %v7986_v13, %v7974_v42 }
 0x745   :  { %7991 = vst [vmem:[%s14111_s21 + $0x8] sm:$0xff] %v7987_v6  ;;  %v11845_v43 = vmul.f32 -1.442695, %v7987_v6 }
 0x747   :  { %12906 = vpow2.f32 %v11845_v43 }
 0x74a   :  { %v7988_v29 = vpop.f32.mrf.mxu3 }
 0x74d   :  { %v12907_v32 = vpop.eup %12906 }
 0x74e   :  { %v7999_v45 = vadd.f32 1.0, %v12907_v32 }
 0x750   :  { %12908 = vrcp.f32 %v7999_v45  ;;  %v8026_v50 = vand.u32 2147483648, %v7999_v45  ;;  %v8024_v59 = vand.u32 2147483647, %v7999_v45  ;;  %vm8020_vm5 = vweird.f32 %v7999_v45 }
 0x752   :  { %v8027_v49 = vor.u32 1.1754944e-38, %v8026_v50  ;;  %vm8025_vm7 = vcmp.eq.f32.partialorder %v8024_v59, 8.507059e+37 }
 0x756   :  { %v12909_v24 = vpop.eup %12908 }
 0x757   :  { %v8016_v20 = vmul.f32 %v12909_v24, %v7999_v45  ;;  %vm8021_vm4 = vweird.f32 %v12909_v24 }
 0x758   :  { %vm8022_vm6 = vmor %vm8020_vm5, %vm8021_vm4 }
 0x759   :  { %v8017_v44 = vsub.f32 1.0, %v8016_v20 }
 0x75b   :  { %v8018_v54 = vmul.f32 %v12909_v24, %v8017_v44 }
 0x75d   :  { %v8019_v60 = vadd.f32 %v12909_v24, %v8018_v54 }
 0x75f   :  { %v8023_v46 = vsel %vm8022_vm6, %v12909_v24, %v8019_v60 }
 0x760   :  { %v8028_v8 = vsel %vm8025_vm7, %v8027_v49, %v8023_v46 }
 0x761   :  { %8031 = vst [vmem:[%s14112_s11 + $0x8] sm:$0xff] %v8028_v8 }
 0x762   :  { %8092 = vsyncpa [#allocation3], 1 }
 0x763   :  { %8093 = vsyncpa [#allocation5], 1 }
 0x764   :  { %8094 = vsyncpa [#allocation8], 1 }
 0x765   :  { %8095 = vsyncpa [#allocation11], 1 }
 0x766   :  { %8096 = vsyncpa [#allocation14], 1 }

</bundles_post_ra>
